<compile_context>
chip_gen: v5e
topology: v5e:2x2
jax: 0.10.0
libtpu: 0.0.40
codegen_flags: <defaults>
</compile_context>

<pallas_src>
import functools
import math

import jax
import jax.numpy as jnp
from jax.experimental import pallas as pl
from jax.experimental.pallas import tpu as pltpu


def _round_up(x, m):
    return (x + m - 1) // m * m


def _pad2d(a, rows, cols):
    r, c = a.shape
    if r == rows and c == cols:
        return a
    return jnp.pad(a, ((0, rows - r), (0, cols - c)))


# --------------------------------------------------------------------------
# Tiled matmul with fused BatchNorm(+ReLU) epilogue
# --------------------------------------------------------------------------
def _conv_mm_kernel(a_ref, b_ref, s_ref, o_ref, acc_ref, *, relu):
    @pl.when(pl.program_id(2) == 0)
    def _init():
        acc_ref[...] = jnp.zeros_like(acc_ref)

    acc_ref[...] += jnp.dot(a_ref[...], b_ref[...],
                            preferred_element_type=jnp.float32)

    @pl.when(pl.program_id(2) == pl.num_programs(2) - 1)
    def _finalize():
        y = acc_ref[...] + s_ref[...]
        if relu:
            y = jnp.maximum(y, 0.0)
        o_ref[...] = y


def pallas_matmul_bn(a_bf16, b_bf16, shift_f32, relu,
                     tm_want=256, tn_want=256, tk_want=512):
    """(M,K)bf16 @ (K,N)bf16 -> f32, + per-column shift, optional ReLU."""
    M, K = a_bf16.shape
    K2, N = b_bf16.shape
    assert K == K2

    # M tiles (bf16 sublane packing -> align to 16)
    Mp = _round_up(M, 16)
    tm = Mp if Mp <= tm_want else tm_want
    Mp = _round_up(Mp, tm)
    # N tiles (lane dim, multiples of 128)
    Np = _round_up(N, 128)
    tn = Np if Np <= tn_want else tn_want
    Np = _round_up(Np, tn)
    # K tiles: single tile if small, else prefer an exact 128-multiple divisor
    Kp = _round_up(K, 128)
    if Kp <= 1024:
        tk = Kp
    else:
        tk = None
        for t in range(tk_want, 127, -128):
            if Kp % t == 0:
                tk = t
                break
        if tk is None:
            Kp = _round_up(Kp, tk_want)
            tk = tk_want

    grid = (Mp // tm, Np // tn, Kp // tk)
    out = pl.pallas_call(
        functools.partial(_conv_mm_kernel, relu=relu),
        out_shape=jax.ShapeDtypeStruct((Mp, Np), jnp.float32),
        grid=grid,
        in_specs=[
            pl.BlockSpec((tm, tk), lambda i, j, k: (i, k)),
            pl.BlockSpec((tk, tn), lambda i, j, k: (k, j)),
            pl.BlockSpec((1, tn), lambda i, j, k: (0, j)),
        ],
        out_specs=pl.BlockSpec((tm, tn), lambda i, j, k: (i, j)),
        scratch_shapes=[pltpu.VMEM((tm, tn), jnp.float32)],
        compiler_params=pltpu.CompilerParams(
            dimension_semantics=("parallel", "parallel", "arbitrary")),
    )(_pad2d(a_bf16, Mp, Kp), _pad2d(b_bf16, Kp, Np),
      _pad2d(shift_f32.reshape(1, N), 1, Np))
    return out[:M, :N]


# --------------------------------------------------------------------------
# Conv + BN(+ReLU) fused: im2col (JAX slicing glue) + fused Pallas matmul
# --------------------------------------------------------------------------
def conv2d_bn_act(x, w, bn, stride, pad, relu):
    """x: (N,H,W,Cin) f32 NHWC; w: (KH,KW,Cin,Cout); bn folded into epilogue."""
    gamma, beta, mean, var = bn
    scale = gamma / jnp.sqrt(var + 1e-5)
    shift = beta - mean * scale

    N, H, W, Cin = x.shape
    KH, KW, _, Cout = w.shape
    Hout = (H + 2 * pad - KH) // stride + 1
    Wout = (W + 2 * pad - KW) // stride + 1

    xb = x.astype(jnp.bfloat16)
    if pad > 0:
        xb = jnp.pad(xb, ((0, 0), (pad, pad), (pad, pad), (0, 0)))
    cols = []
    for i in range(KH):
        for j in range(KW):
            cols.append(xb[:, i:i + stride * (Hout - 1) + 1:stride,
                           j:j + stride * (Wout - 1) + 1:stride, :])
    patches = jnp.concatenate(cols, axis=-1).reshape(
        N * Hout * Wout, KH * KW * Cin)

    w_folded = (w.reshape(KH * KW * Cin, Cout) * scale).astype(jnp.bfloat16)
    out = pallas_matmul_bn(patches, w_folded, shift, relu)
    return out.reshape(N, Hout, Wout, Cout)


# --------------------------------------------------------------------------
# Lane-dense tiled elementwise kernels (residual add+ReLU, 3x3 maxpool)
# --------------------------------------------------------------------------
def _lane_dense(arrs, rb_want=512):
    """Flatten same-shaped arrays to (rows, 128) lane-dense 2D views."""
    shape = arrs[0].shape
    T = math.prod(shape)
    cols = 128
    rows = (T + cols - 1) // cols
    rows_p = _round_up(max(rows, 8), 8)
    rb = rb_want if rows_p > rb_want else rows_p
    rows_p = _round_up(rows_p, rb)
    Tp = rows_p * cols
    flat = []
    for a in arrs:
        f = a.reshape(-1)
        if Tp != T:
            f = jnp.pad(f, (0, Tp - T))
        flat.append(f.reshape(rows_p, cols))
    return flat, rows_p, cols, rb, T, shape


def _add_relu_kernel(a_ref, b_ref, o_ref):
    o_ref[...] = jnp.maximum(a_ref[...] + b_ref[...], 0.0)


def pallas_add_relu(a, b):
    (af, bf), rows_p, cols, rb, T, shape = _lane_dense([a, b])
    out = pl.pallas_call(
        _add_relu_kernel,
        out_shape=jax.ShapeDtypeStruct((rows_p, cols), jnp.float32),
        grid=(rows_p // rb,),
        in_specs=[pl.BlockSpec((rb, cols), lambda i: (i, 0)),
                  pl.BlockSpec((rb, cols), lambda i: (i, 0))],
        out_specs=pl.BlockSpec((rb, cols), lambda i: (i, 0)),
        compiler_params=pltpu.CompilerParams(
            dimension_semantics=("parallel",)),
    )(af, bf)
    return out.reshape(-1)[:T].reshape(shape)


def _max9_kernel(*refs):
    o_ref = refs[-1]
    m = refs[0][...]
    for r in refs[1:9]:
        m = jnp.maximum(m, r[...])
    o_ref[...] = m


def pallas_maxpool_3x3_s2(x):
    """3x3 max pool, stride 2, padding 1 (ResNet stem pool)."""
    N, H, W, C = x.shape
    Hout = (H + 2 - 3) // 2 + 1
    Wout = (W + 2 - 3) // 2 + 1
    xp = jnp.pad(x, ((0, 0), (1, 1), (1, 1), (0, 0)),
                 constant_values=-jnp.inf)
    wins = [xp[:, i:i + 2 * (Hout - 1) + 1:2,
               j:j + 2 * (Wout - 1) + 1:2, :]
            for i in range(3) for j in range(3)]
    flat, rows_p, cols, rb, T, _ = _lane_dense(wins)
    out = pl.pallas_call(
        _max9_kernel,
        out_shape=jax.ShapeDtypeStruct((rows_p, cols), jnp.float32),
        grid=(rows_p // rb,),
        in_specs=[pl.BlockSpec((rb, cols), lambda i: (i, 0))] * 9,
        out_specs=pl.BlockSpec((rb, cols), lambda i: (i, 0)),
        compiler_params=pltpu.CompilerParams(
            dimension_semantics=("parallel",)),
    )(*flat)
    return out.reshape(-1)[:T].reshape(N, Hout, Wout, C)


# --------------------------------------------------------------------------
# Global average pool and final FC + Sigmoid
# --------------------------------------------------------------------------
def _avgpool_kernel(x_ref, o_ref, *, inv):
    o_ref[...] = jnp.sum(x_ref[...], axis=1) * inv


def pallas_global_avgpool(x):
    """Adaptive average pool to 1x1: (N,H,W,C) -> (N,C). Tiny -> one block."""
    N, H, W, C = x.shape
    HW = H * W
    Np, Cp = _round_up(N, 8), _round_up(C, 128)
    x3 = x.reshape(N, HW, C)
    if (Np, Cp) != (N, C):
        x3 = jnp.pad(x3, ((0, Np - N), (0, 0), (0, Cp - C)))
    out = pl.pallas_call(
        functools.partial(_avgpool_kernel, inv=1.0 / HW),
        out_shape=jax.ShapeDtypeStruct((Np, Cp), jnp.float32),
    )(x3)
    return out[:N, :C]


def _fc_sigmoid_kernel(x_ref, w_ref, b_ref, logit_ref, prob_ref):
    logits = jnp.dot(x_ref[...], w_ref[...],
                     preferred_element_type=jnp.float32) + b_ref[...]
    logit_ref[...] = logits
    prob_ref[...] = jax.nn.sigmoid(logits)


def pallas_fc_sigmoid(x, w, b):
    """Final Linear + Sigmoid; returns (logits, probs). Tiny -> one block."""
    N, K = x.shape
    K2, C = w.shape
    assert K == K2
    Np, Kp, Cp = _round_up(N, 8), _round_up(K, 128), _round_up(C, 128)
    logits, probs = pl.pallas_call(
        _fc_sigmoid_kernel,
        out_shape=(jax.ShapeDtypeStruct((Np, Cp), jnp.float32),
                   jax.ShapeDtypeStruct((Np, Cp), jnp.float32)),
    )(_pad2d(x, Np, Kp), _pad2d(w, Kp, Cp), _pad2d(b.reshape(1, C), 1, Cp))
    return logits[:N, :C], probs[:N, :C]


# --------------------------------------------------------------------------
# ResNet-18 parameters (deterministic synthetic init) and forward pass
# --------------------------------------------------------------------------
def _conv_w(key, kh, kw, cin, cout):
    fan_in = kh * kw * cin
    return jax.random.normal(key, (kh, kw, cin, cout), jnp.float32) * \
        jnp.sqrt(2.0 / fan_in)


def _bn_p(key, c):
    k1, k2 = jax.random.split(key)
    gamma = 1.0 + 0.1 * jax.random.normal(k1, (c,), jnp.float32)
    beta = 0.1 * jax.random.normal(k2, (c,), jnp.float32)
    mean = jnp.zeros((c,), jnp.float32)
    var = jnp.ones((c,), jnp.float32)
    return (gamma, beta, mean, var)


def init_resnet18_params(key, num_classes):
    params = {}
    key, k = jax.random.split(key)
    params["conv1"] = _conv_w(k, 7, 7, 3, 64)
    key, k = jax.random.split(key)
    params["bn1"] = _bn_p(k, 64)
    in_c = 64
    stage_cfg = [(64, 1), (128, 2), (256, 2), (512, 2)]  # resnet18: 2 blocks/stage
    strides = {}
    for li, (out_c, stride) in enumerate(stage_cfg):
        blocks = []
        blk_strides = []
        for b in range(2):
            s = stride if b == 0 else 1
            blk = {}
            key, k = jax.random.split(key)
            blk["conv1"] = _conv_w(k, 3, 3, in_c, out_c)
            key, k = jax.random.split(key)
            blk["bn1"] = _bn_p(k, out_c)
            key, k = jax.random.split(key)
            blk["conv2"] = _conv_w(k, 3, 3, out_c, out_c)
            key, k = jax.random.split(key)
            blk["bn2"] = _bn_p(k, out_c)
            if s != 1 or in_c != out_c:
                key, k = jax.random.split(key)
                blk["down_conv"] = _conv_w(k, 1, 1, in_c, out_c)
                key, k = jax.random.split(key)
                blk["down_bn"] = _bn_p(k, out_c)
            blocks.append(blk)
            blk_strides.append(s)
            in_c = out_c
        params[f"layer{li + 1}"] = blocks
        strides[f"layer{li + 1}"] = blk_strides
    key, k = jax.random.split(key)
    params["fc_w"] = jax.random.normal(k, (512, num_classes), jnp.float32) / \
        jnp.sqrt(512.0)
    key, k = jax.random.split(key)
    params["fc_b"] = 0.01 * jax.random.normal(k, (num_classes,), jnp.float32)
    return params, strides


def basic_block(x, blk, stride):
    identity = x
    out = conv2d_bn_act(x, blk["conv1"], blk["bn1"],
                        stride=stride, pad=1, relu=True)
    out = conv2d_bn_act(out, blk["conv2"], blk["bn2"],
                        stride=1, pad=1, relu=False)
    if "down_conv" in blk:
        identity = conv2d_bn_act(x, blk["down_conv"], blk["down_bn"],
                                 stride=stride, pad=0, relu=False)
    return pallas_add_relu(out, identity)


def classification_model_forward(params, strides, x_nchw):
    """Mirrors ClassificationModel.forward: returns (logits, probs)."""
    x = jnp.transpose(x_nchw.astype(jnp.float32), (0, 2, 3, 1))  # NCHW -> NHWC
    x = conv2d_bn_act(x, params["conv1"], params["bn1"],
                      stride=2, pad=3, relu=True)
    x = pallas_maxpool_3x3_s2(x)
    for li in range(4):
        for blk, s in zip(params[f"layer{li + 1}"], strides[f"layer{li + 1}"]):
            x = basic_block(x, blk, s)
    pooled = pallas_global_avgpool(x)                 # (N, 512)
    logits, probs = pallas_fc_sigmoid(pooled, params["fc_w"], params["fc_b"])
    return logits, probs


# --------------------------------------------------------------------------
if __name__ == "__main__":
    key = jax.random.PRNGKey(0)
    k_param, k_input = jax.random.split(key)

    num_classes = 10
    params, strides = init_resnet18_params(k_param, num_classes)

    # small deterministic input: batch=2, 3 channels, 32x32 (NCHW)
    x = jax.random.normal(k_input, (2, 3, 32, 32), jnp.float32)

    fwd = jax.jit(lambda p, xx: classification_model_forward(p, strides, xx))
    logits, probs = fwd(params, x)
    logits = jax.block_until_ready(logits)
    probs = jax.block_until_ready(probs)

    assert logits.shape == (2, num_classes)
    assert probs.shape == (2, num_classes)
    assert bool(jnp.all(jnp.isfinite(logits)))
    assert bool(jnp.all((probs >= 0.0) & (probs <= 1.0)))

    print("KERNEL_OK")
</pallas_src>

<mosaic_0001>
module attributes {stable_mosaic.version = 11 : i64} {
  func.func @_conv_mm_kernel(%arg0: i32, %arg1: i32, %arg2: i32, %arg3: memref<256x256xbf16, #tpu.memory_space<vmem>>, %arg4: memref<256x128xbf16, #tpu.memory_space<vmem>>, %arg5: memref<1x128xf32, #tpu.memory_space<vmem>>, %arg6: memref<256x128xf32, #tpu.memory_space<vmem>>, %arg7: memref<256x128xf32, #tpu.memory_space<vmem>>) attributes {dimension_semantics = [#tpu.dimension_semantics<parallel>, #tpu.dimension_semantics<parallel>, #tpu.dimension_semantics<arbitrary>], iteration_bounds = array<i64: 2, 1, 1>, scalar_prefetch = 0 : i64, scratch_operands = 1 : i64, tpu.core_type = #tpu.core_type<tc>, window_params = [{transform_indices = @transform_0, window_bounds = array<i64: 256, 256>}, {transform_indices = @transform_1, window_bounds = array<i64: 256, 128>}, {transform_indices = @transform_2, window_bounds = array<i64: 1, 128>}, {transform_indices = @transform_3, window_bounds = array<i64: 256, 128>}]} {
    %c0_i32 = arith.constant 0 : i32
    %0 = arith.cmpi eq, %arg2, %c0_i32 : i32
    %1 = arith.extui %0 : i1 to i32
    %c0_i32_0 = arith.constant 0 : i32
    %2 = arith.cmpi ne, %1, %c0_i32_0 : i32
    scf.if %2 {
      %cst_10 = arith.constant 0.000000e+00 : f32
      %12 = vector.broadcast %cst_10 : f32 to vector<256x128xf32>
      %c0_11 = arith.constant 0 : index
      %c0_12 = arith.constant 0 : index
      %13 = vector.load %arg7[%c0_11, %c0_12] : memref<256x128xf32, #tpu.memory_space<vmem>>, vector<256x128xf32>
      tpu.vector_store %arg7[%c0_11, %c0_12], %12 {strides = array<i32>} : memref<256x128xf32, #tpu.memory_space<vmem>>, vector<256x128xf32>,
    } else {
    }
    %c0 = arith.constant 0 : index
    %c0_1 = arith.constant 0 : index
    %3 = vector.load %arg7[%c0, %c0_1] : memref<256x128xf32, #tpu.memory_space<vmem>>, vector<256x128xf32>
    %c0_2 = arith.constant 0 : index
    %c0_3 = arith.constant 0 : index
    %4 = vector.load %arg3[%c0_2, %c0_3] : memref<256x256xbf16, #tpu.memory_space<vmem>>, vector<256x256xbf16>
    %c0_4 = arith.constant 0 : index
    %c0_5 = arith.constant 0 : index
    %5 = vector.load %arg4[%c0_4, %c0_5] : memref<256x128xbf16, #tpu.memory_space<vmem>>, vector<256x128xbf16>
    %cst = arith.constant dense<0.000000e+00> : vector<256x128xf32>
    %6 = tpu.matmul %4, %5, %cst {dimension_numbers = #tpu.dot_dimension_numbers<[1], [0], [0], [1], [0, 0, 1, 1], [], []>} : vector<256x256xbf16>, vector<256x128xbf16>, vector<256x128xf32> -> vector<256x128xf32>
    %7 = arith.addf %3, %6 : vector<256x128xf32>
    %c0_6 = arith.constant 0 : index
    %c0_7 = arith.constant 0 : index
    %8 = vector.load %arg7[%c0_6, %c0_7] : memref<256x128xf32, #tpu.memory_space<vmem>>, vector<256x128xf32>
    tpu.vector_store %arg7[%c0_6, %c0_7], %7 {strides = array<i32>} : memref<256x128xf32, #tpu.memory_space<vmem>>, vector<256x128xf32>,
    %c0_i32_8 = arith.constant 0 : i32
    %9 = arith.cmpi eq, %arg2, %c0_i32_8 : i32
    %10 = arith.extui %9 : i1 to i32
    %c0_i32_9 = arith.constant 0 : i32
    %11 = arith.cmpi ne, %10, %c0_i32_9 : i32
    scf.if %11 {
      %c0_10 = arith.constant 0 : index
      %c0_11 = arith.constant 0 : index
      %12 = vector.load %arg7[%c0_10, %c0_11] : memref<256x128xf32, #tpu.memory_space<vmem>>, vector<256x128xf32>
      %c0_12 = arith.constant 0 : index
      %c0_13 = arith.constant 0 : index
      %13 = vector.load %arg5[%c0_12, %c0_13] : memref<1x128xf32, #tpu.memory_space<vmem>>, vector<1x128xf32>
      %14 = vector.broadcast %13 : vector<1x128xf32> to vector<256x128xf32>
      %15 = arith.addf %12, %14 : vector<256x128xf32>
      %cst_14 = arith.constant 0.000000e+00 : f32
      %16 = vector.broadcast %cst_14 : f32 to vector<256x128xf32>
      %17 = arith.maximumf %15, %16 : vector<256x128xf32>
      %c0_15 = arith.constant 0 : index
      %c0_16 = arith.constant 0 : index
      %18 = vector.load %arg6[%c0_15, %c0_16] : memref<256x128xf32, #tpu.memory_space<vmem>>, vector<256x128xf32>
      tpu.vector_store %arg6[%c0_15, %c0_16], %17 {strides = array<i32>} : memref<256x128xf32, #tpu.memory_space<vmem>>, vector<256x128xf32>,
    } else {
    }
    return
  }
  func.func @transform_0(%arg0: i32, %arg1: i32, %arg2: i32) -> (i32, i32) {
    %c0_i32 = arith.constant 0 : i32
    return %arg0, %arg2 : i32, i32
  }
  func.func @transform_1(%arg0: i32, %arg1: i32, %arg2: i32) -> (i32, i32) {
    %c0_i32 = arith.constant 0 : i32
    return %arg2, %arg1 : i32, i32
  }
  func.func @transform_2(%arg0: i32, %arg1: i32, %arg2: i32) -> (i32, i32) {
    %c0_i32 = arith.constant 0 : i32
    %c0_i32_0 = arith.constant 0 : i32
    return %c0_i32, %arg1 : i32, i32
  }
  func.func @transform_3(%arg0: i32, %arg1: i32, %arg2: i32) -> (i32, i32) {
    %c0_i32 = arith.constant 0 : i32
    return %arg0, %arg1 : i32, i32
  }
}

module attributes {stable_mosaic.version = 11 : i64} {
  func.func @_max9_kernel(%arg0: i32, %arg1: memref<64x128xf32, #tpu.memory_space<vmem>>, %arg2: memref<64x128xf32, #tpu.memory_space<vmem>>, %arg3: memref<64x128xf32, #tpu.memory_space<vmem>>, %arg4: memref<64x128xf32, #tpu.memory_space<vmem>>, %arg5: memref<64x128xf32, #tpu.memory_space<vmem>>, %arg6: memref<64x128xf32, #tpu.memory_space<vmem>>, %arg7: memref<64x128xf32, #tpu.memory_space<vmem>>, %arg8: memref<64x128xf32, #tpu.memory_space<vmem>>, %arg9: memref<64x128xf32, #tpu.memory_space<vmem>>, %arg10: memref<64x128xf32, #tpu.memory_space<vmem>>) attributes {dimension_semantics = [#tpu.dimension_semantics<parallel>], iteration_bounds = array<i64: 1>, scalar_prefetch = 0 : i64, scratch_operands = 0 : i64, tpu.core_type = #tpu.core_type<tc>, window_params = [{transform_indices = @transform_0, window_bounds = array<i64: 64, 128>}, {transform_indices = @transform_1, window_bounds = array<i64: 64, 128>}, {transform_indices = @transform_2, window_bounds = array<i64: 64, 128>}, {transform_indices = @transform_3, window_bounds = array<i64: 64, 128>}, {transform_indices = @transform_4, window_bounds = array<i64: 64, 128>}, {transform_indices = @transform_5, window_bounds = array<i64: 64, 128>}, {transform_indices = @transform_6, window_bounds = array<i64: 64, 128>}, {transform_indices = @transform_7, window_bounds = array<i64: 64, 128>}, {transform_indices = @transform_8, window_bounds = array<i64: 64, 128>}, {transform_indices = @transform_9, window_bounds = array<i64: 64, 128>}]} {
    %c0 = arith.constant 0 : index
    %c0_0 = arith.constant 0 : index
    %0 = vector.load %arg1[%c0, %c0_0] : memref<64x128xf32, #tpu.memory_space<vmem>>, vector<64x128xf32>
    %c0_1 = arith.constant 0 : index
    %c0_2 = arith.constant 0 : index
    %1 = vector.load %arg2[%c0_1, %c0_2] : memref<64x128xf32, #tpu.memory_space<vmem>>, vector<64x128xf32>
    %2 = arith.maximumf %0, %1 : vector<64x128xf32>
    %c0_3 = arith.constant 0 : index
    %c0_4 = arith.constant 0 : index
    %3 = vector.load %arg3[%c0_3, %c0_4] : memref<64x128xf32, #tpu.memory_space<vmem>>, vector<64x128xf32>
    %4 = arith.maximumf %2, %3 : vector<64x128xf32>
    %c0_5 = arith.constant 0 : index
    %c0_6 = arith.constant 0 : index
    %5 = vector.load %arg4[%c0_5, %c0_6] : memref<64x128xf32, #tpu.memory_space<vmem>>, vector<64x128xf32>
    %6 = arith.maximumf %4, %5 : vector<64x128xf32>
    %c0_7 = arith.constant 0 : index
    %c0_8 = arith.constant 0 : index
    %7 = vector.load %arg5[%c0_7, %c0_8] : memref<64x128xf32, #tpu.memory_space<vmem>>, vector<64x128xf32>
    %8 = arith.maximumf %6, %7 : vector<64x128xf32>
    %c0_9 = arith.constant 0 : index
    %c0_10 = arith.constant 0 : index
    %9 = vector.load %arg6[%c0_9, %c0_10] : memref<64x128xf32, #tpu.memory_space<vmem>>, vector<64x128xf32>
    %10 = arith.maximumf %8, %9 : vector<64x128xf32>
    %c0_11 = arith.constant 0 : index
    %c0_12 = arith.constant 0 : index
    %11 = vector.load %arg7[%c0_11, %c0_12] : memref<64x128xf32, #tpu.memory_space<vmem>>, vector<64x128xf32>
    %12 = arith.maximumf %10, %11 : vector<64x128xf32>
    %c0_13 = arith.constant 0 : index
    %c0_14 = arith.constant 0 : index
    %13 = vector.load %arg8[%c0_13, %c0_14] : memref<64x128xf32, #tpu.memory_space<vmem>>, vector<64x128xf32>
    %14 = arith.maximumf %12, %13 : vector<64x128xf32>
    %c0_15 = arith.constant 0 : index
    %c0_16 = arith.constant 0 : index
    %15 = vector.load %arg9[%c0_15, %c0_16] : memref<64x128xf32, #tpu.memory_space<vmem>>, vector<64x128xf32>
    %16 = arith.maximumf %14, %15 : vector<64x128xf32>
    %c0_17 = arith.constant 0 : index
    %c0_18 = arith.constant 0 : index
    %17 = vector.load %arg10[%c0_17, %c0_18] : memref<64x128xf32, #tpu.memory_space<vmem>>, vector<64x128xf32>
    tpu.vector_store %arg10[%c0_17, %c0_18], %16 {strides = array<i32>} : memref<64x128xf32, #tpu.memory_space<vmem>>, vector<64x128xf32>,
    return
  }
  func.func @transform_0(%arg0: i32) -> (i32, i32) {
    %c0_i32 = arith.constant 0 : i32
    %c0_i32_0 = arith.constant 0 : i32
    return %arg0, %c0_i32 : i32, i32
  }
  func.func @transform_1(%arg0: i32) -> (i32, i32) {
    %c0_i32 = arith.constant 0 : i32
    %c0_i32_0 = arith.constant 0 : i32
    return %arg0, %c0_i32 : i32, i32
  }
  func.func @transform_2(%arg0: i32) -> (i32, i32) {
    %c0_i32 = arith.constant 0 : i32
    %c0_i32_0 = arith.constant 0 : i32
    return %arg0, %c0_i32 : i32, i32
  }
  func.func @transform_3(%arg0: i32) -> (i32, i32) {
    %c0_i32 = arith.constant 0 : i32
    %c0_i32_0 = arith.constant 0 : i32
    return %arg0, %c0_i32 : i32, i32
  }
  func.func @transform_4(%arg0: i32) -> (i32, i32) {
    %c0_i32 = arith.constant 0 : i32
    %c0_i32_0 = arith.constant 0 : i32
    return %arg0, %c0_i32 : i32, i32
  }
  func.func @transform_5(%arg0: i32) -> (i32, i32) {
    %c0_i32 = arith.constant 0 : i32
    %c0_i32_0 = arith.constant 0 : i32
    return %arg0, %c0_i32 : i32, i32
  }
  func.func @transform_6(%arg0: i32) -> (i32, i32) {
    %c0_i32 = arith.constant 0 : i32
    %c0_i32_0 = arith.constant 0 : i32
    return %arg0, %c0_i32 : i32, i32
  }
  func.func @transform_7(%arg0: i32) -> (i32, i32) {
    %c0_i32 = arith.constant 0 : i32
    %c0_i32_0 = arith.constant 0 : i32
    return %arg0, %c0_i32 : i32, i32
  }
  func.func @transform_8(%arg0: i32) -> (i32, i32) {
    %c0_i32 = arith.constant 0 : i32
    %c0_i32_0 = arith.constant 0 : i32
    return %arg0, %c0_i32 : i32, i32
  }
  func.func @transform_9(%arg0: i32) -> (i32, i32) {
    %c0_i32 = arith.constant 0 : i32
    %c0_i32_0 = arith.constant 0 : i32
    return %arg0, %c0_i32 : i32, i32
  }
}

module attributes {stable_mosaic.version = 11 : i64} {
  func.func @_conv_mm_kernel(%arg0: i32, %arg1: i32, %arg2: i32, %arg3: memref<128x640xbf16, #tpu.memory_space<vmem>>, %arg4: memref<640x128xbf16, #tpu.memory_space<vmem>>, %arg5: memref<1x128xf32, #tpu.memory_space<vmem>>, %arg6: memref<128x128xf32, #tpu.memory_space<vmem>>, %arg7: memref<128x128xf32, #tpu.memory_space<vmem>>) attributes {dimension_semantics = [#tpu.dimension_semantics<parallel>, #tpu.dimension_semantics<parallel>, #tpu.dimension_semantics<arbitrary>], iteration_bounds = array<i64: 1, 1, 1>, scalar_prefetch = 0 : i64, scratch_operands = 1 : i64, tpu.core_type = #tpu.core_type<tc>, window_params = [{transform_indices = @transform_0, window_bounds = array<i64: 128, 640>}, {transform_indices = @transform_1, window_bounds = array<i64: 640, 128>}, {transform_indices = @transform_2, window_bounds = array<i64: 1, 128>}, {transform_indices = @transform_3, window_bounds = array<i64: 128, 128>}]} {
    %c0_i32 = arith.constant 0 : i32
    %0 = arith.cmpi eq, %arg2, %c0_i32 : i32
    %1 = arith.extui %0 : i1 to i32
    %c0_i32_0 = arith.constant 0 : i32
    %2 = arith.cmpi ne, %1, %c0_i32_0 : i32
    scf.if %2 {
      %cst_10 = arith.constant 0.000000e+00 : f32
      %12 = vector.broadcast %cst_10 : f32 to vector<128x128xf32>
      %c0_11 = arith.constant 0 : index
      %c0_12 = arith.constant 0 : index
      %13 = vector.load %arg7[%c0_11, %c0_12] : memref<128x128xf32, #tpu.memory_space<vmem>>, vector<128x128xf32>
      tpu.vector_store %arg7[%c0_11, %c0_12], %12 {strides = array<i32>} : memref<128x128xf32, #tpu.memory_space<vmem>>, vector<128x128xf32>,
    } else {
    }
    %c0 = arith.constant 0 : index
    %c0_1 = arith.constant 0 : index
    %3 = vector.load %arg7[%c0, %c0_1] : memref<128x128xf32, #tpu.memory_space<vmem>>, vector<128x128xf32>
    %c0_2 = arith.constant 0 : index
    %c0_3 = arith.constant 0 : index
    %4 = vector.load %arg3[%c0_2, %c0_3] : memref<128x640xbf16, #tpu.memory_space<vmem>>, vector<128x640xbf16>
    %c0_4 = arith.constant 0 : index
    %c0_5 = arith.constant 0 : index
    %5 = vector.load %arg4[%c0_4, %c0_5] : memref<640x128xbf16, #tpu.memory_space<vmem>>, vector<640x128xbf16>
    %cst = arith.constant dense<0.000000e+00> : vector<128x128xf32>
    %6 = tpu.matmul %4, %5, %cst {dimension_numbers = #tpu.dot_dimension_numbers<[1], [0], [0], [1], [0, 0, 1, 1], [], []>} : vector<128x640xbf16>, vector<640x128xbf16>, vector<128x128xf32> -> vector<128x128xf32>
    %7 = arith.addf %3, %6 : vector<128x128xf32>
    %c0_6 = arith.constant 0 : index
    %c0_7 = arith.constant 0 : index
    %8 = vector.load %arg7[%c0_6, %c0_7] : memref<128x128xf32, #tpu.memory_space<vmem>>, vector<128x128xf32>
    tpu.vector_store %arg7[%c0_6, %c0_7], %7 {strides = array<i32>} : memref<128x128xf32, #tpu.memory_space<vmem>>, vector<128x128xf32>,
    %c0_i32_8 = arith.constant 0 : i32
    %9 = arith.cmpi eq, %arg2, %c0_i32_8 : i32
    %10 = arith.extui %9 : i1 to i32
    %c0_i32_9 = arith.constant 0 : i32
    %11 = arith.cmpi ne, %10, %c0_i32_9 : i32
    scf.if %11 {
      %c0_10 = arith.constant 0 : index
      %c0_11 = arith.constant 0 : index
      %12 = vector.load %arg7[%c0_10, %c0_11] : memref<128x128xf32, #tpu.memory_space<vmem>>, vector<128x128xf32>
      %c0_12 = arith.constant 0 : index
      %c0_13 = arith.constant 0 : index
      %13 = vector.load %arg5[%c0_12, %c0_13] : memref<1x128xf32, #tpu.memory_space<vmem>>, vector<1x128xf32>
      %14 = vector.broadcast %13 : vector<1x128xf32> to vector<128x128xf32>
      %15 = arith.addf %12, %14 : vector<128x128xf32>
      %cst_14 = arith.constant 0.000000e+00 : f32
      %16 = vector.broadcast %cst_14 : f32 to vector<128x128xf32>
      %17 = arith.maximumf %15, %16 : vector<128x128xf32>
      %c0_15 = arith.constant 0 : index
      %c0_16 = arith.constant 0 : index
      %18 = vector.load %arg6[%c0_15, %c0_16] : memref<128x128xf32, #tpu.memory_space<vmem>>, vector<128x128xf32>
      tpu.vector_store %arg6[%c0_15, %c0_16], %17 {strides = array<i32>} : memref<128x128xf32, #tpu.memory_space<vmem>>, vector<128x128xf32>,
    } else {
    }
    return
  }
  func.func @transform_0(%arg0: i32, %arg1: i32, %arg2: i32) -> (i32, i32) {
    %c0_i32 = arith.constant 0 : i32
    return %arg0, %arg2 : i32, i32
  }
  func.func @transform_1(%arg0: i32, %arg1: i32, %arg2: i32) -> (i32, i32) {
    %c0_i32 = arith.constant 0 : i32
    return %arg2, %arg1 : i32, i32
  }
  func.func @transform_2(%arg0: i32, %arg1: i32, %arg2: i32) -> (i32, i32) {
    %c0_i32 = arith.constant 0 : i32
    %c0_i32_0 = arith.constant 0 : i32
    return %c0_i32, %arg1 : i32, i32
  }
  func.func @transform_3(%arg0: i32, %arg1: i32, %arg2: i32) -> (i32, i32) {
    %c0_i32 = arith.constant 0 : i32
    return %arg0, %arg1 : i32, i32
  }
}

module attributes {stable_mosaic.version = 11 : i64} {
  func.func @_conv_mm_kernel(%arg0: i32, %arg1: i32, %arg2: i32, %arg3: memref<128x640xbf16, #tpu.memory_space<vmem>>, %arg4: memref<640x128xbf16, #tpu.memory_space<vmem>>, %arg5: memref<1x128xf32, #tpu.memory_space<vmem>>, %arg6: memref<128x128xf32, #tpu.memory_space<vmem>>, %arg7: memref<128x128xf32, #tpu.memory_space<vmem>>) attributes {dimension_semantics = [#tpu.dimension_semantics<parallel>, #tpu.dimension_semantics<parallel>, #tpu.dimension_semantics<arbitrary>], iteration_bounds = array<i64: 1, 1, 1>, scalar_prefetch = 0 : i64, scratch_operands = 1 : i64, tpu.core_type = #tpu.core_type<tc>, window_params = [{transform_indices = @transform_0, window_bounds = array<i64: 128, 640>}, {transform_indices = @transform_1, window_bounds = array<i64: 640, 128>}, {transform_indices = @transform_2, window_bounds = array<i64: 1, 128>}, {transform_indices = @transform_3, window_bounds = array<i64: 128, 128>}]} {
    %c0_i32 = arith.constant 0 : i32
    %0 = arith.cmpi eq, %arg2, %c0_i32 : i32
    %1 = arith.extui %0 : i1 to i32
    %c0_i32_0 = arith.constant 0 : i32
    %2 = arith.cmpi ne, %1, %c0_i32_0 : i32
    scf.if %2 {
      %cst_10 = arith.constant 0.000000e+00 : f32
      %12 = vector.broadcast %cst_10 : f32 to vector<128x128xf32>
      %c0_11 = arith.constant 0 : index
      %c0_12 = arith.constant 0 : index
      %13 = vector.load %arg7[%c0_11, %c0_12] : memref<128x128xf32, #tpu.memory_space<vmem>>, vector<128x128xf32>
      tpu.vector_store %arg7[%c0_11, %c0_12], %12 {strides = array<i32>} : memref<128x128xf32, #tpu.memory_space<vmem>>, vector<128x128xf32>,
    } else {
    }
    %c0 = arith.constant 0 : index
    %c0_1 = arith.constant 0 : index
    %3 = vector.load %arg7[%c0, %c0_1] : memref<128x128xf32, #tpu.memory_space<vmem>>, vector<128x128xf32>
    %c0_2 = arith.constant 0 : index
    %c0_3 = arith.constant 0 : index
    %4 = vector.load %arg3[%c0_2, %c0_3] : memref<128x640xbf16, #tpu.memory_space<vmem>>, vector<128x640xbf16>
    %c0_4 = arith.constant 0 : index
    %c0_5 = arith.constant 0 : index
    %5 = vector.load %arg4[%c0_4, %c0_5] : memref<640x128xbf16, #tpu.memory_space<vmem>>, vector<640x128xbf16>
    %cst = arith.constant dense<0.000000e+00> : vector<128x128xf32>
    %6 = tpu.matmul %4, %5, %cst {dimension_numbers = #tpu.dot_dimension_numbers<[1], [0], [0], [1], [0, 0, 1, 1], [], []>} : vector<128x640xbf16>, vector<640x128xbf16>, vector<128x128xf32> -> vector<128x128xf32>
    %7 = arith.addf %3, %6 : vector<128x128xf32>
    %c0_6 = arith.constant 0 : index
    %c0_7 = arith.constant 0 : index
    %8 = vector.load %arg7[%c0_6, %c0_7] : memref<128x128xf32, #tpu.memory_space<vmem>>, vector<128x128xf32>
    tpu.vector_store %arg7[%c0_6, %c0_7], %7 {strides = array<i32>} : memref<128x128xf32, #tpu.memory_space<vmem>>, vector<128x128xf32>,
    %c0_i32_8 = arith.constant 0 : i32
    %9 = arith.cmpi eq, %arg2, %c0_i32_8 : i32
    %10 = arith.extui %9 : i1 to i32
    %c0_i32_9 = arith.constant 0 : i32
    %11 = arith.cmpi ne, %10, %c0_i32_9 : i32
    scf.if %11 {
      %c0_10 = arith.constant 0 : index
      %c0_11 = arith.constant 0 : index
      %12 = vector.load %arg7[%c0_10, %c0_11] : memref<128x128xf32, #tpu.memory_space<vmem>>, vector<128x128xf32>
      %c0_12 = arith.constant 0 : index
      %c0_13 = arith.constant 0 : index
      %13 = vector.load %arg5[%c0_12, %c0_13] : memref<1x128xf32, #tpu.memory_space<vmem>>, vector<1x128xf32>
      %14 = vector.broadcast %13 : vector<1x128xf32> to vector<128x128xf32>
      %15 = arith.addf %12, %14 : vector<128x128xf32>
      %c0_14 = arith.constant 0 : index
      %c0_15 = arith.constant 0 : index
      %16 = vector.load %arg6[%c0_14, %c0_15] : memref<128x128xf32, #tpu.memory_space<vmem>>, vector<128x128xf32>
      tpu.vector_store %arg6[%c0_14, %c0_15], %15 {strides = array<i32>} : memref<128x128xf32, #tpu.memory_space<vmem>>, vector<128x128xf32>,
    } else {
    }
    return
  }
  func.func @transform_0(%arg0: i32, %arg1: i32, %arg2: i32) -> (i32, i32) {
    %c0_i32 = arith.constant 0 : i32
    return %arg0, %arg2 : i32, i32
  }
  func.func @transform_1(%arg0: i32, %arg1: i32, %arg2: i32) -> (i32, i32) {
    %c0_i32 = arith.constant 0 : i32
    return %arg2, %arg1 : i32, i32
  }
  func.func @transform_2(%arg0: i32, %arg1: i32, %arg2: i32) -> (i32, i32) {
    %c0_i32 = arith.constant 0 : i32
    %c0_i32_0 = arith.constant 0 : i32
    return %c0_i32, %arg1 : i32, i32
  }
  func.func @transform_3(%arg0: i32, %arg1: i32, %arg2: i32) -> (i32, i32) {
    %c0_i32 = arith.constant 0 : i32
    return %arg0, %arg1 : i32, i32
  }
}

module attributes {stable_mosaic.version = 11 : i64} {
  func.func @_add_relu_kernel(%arg0: i32, %arg1: memref<64x128xf32, #tpu.memory_space<vmem>>, %arg2: memref<64x128xf32, #tpu.memory_space<vmem>>, %arg3: memref<64x128xf32, #tpu.memory_space<vmem>>) attributes {dimension_semantics = [#tpu.dimension_semantics<parallel>], iteration_bounds = array<i64: 1>, scalar_prefetch = 0 : i64, scratch_operands = 0 : i64, tpu.core_type = #tpu.core_type<tc>, window_params = [{transform_indices = @transform_0, window_bounds = array<i64: 64, 128>}, {transform_indices = @transform_1, window_bounds = array<i64: 64, 128>}, {transform_indices = @transform_2, window_bounds = array<i64: 64, 128>}]} {
    %c0 = arith.constant 0 : index
    %c0_0 = arith.constant 0 : index
    %0 = vector.load %arg1[%c0, %c0_0] : memref<64x128xf32, #tpu.memory_space<vmem>>, vector<64x128xf32>
    %c0_1 = arith.constant 0 : index
    %c0_2 = arith.constant 0 : index
    %1 = vector.load %arg2[%c0_1, %c0_2] : memref<64x128xf32, #tpu.memory_space<vmem>>, vector<64x128xf32>
    %2 = arith.addf %0, %1 : vector<64x128xf32>
    %cst = arith.constant 0.000000e+00 : f32
    %3 = vector.broadcast %cst : f32 to vector<64x128xf32>
    %4 = arith.maximumf %2, %3 : vector<64x128xf32>
    %c0_3 = arith.constant 0 : index
    %c0_4 = arith.constant 0 : index
    %5 = vector.load %arg3[%c0_3, %c0_4] : memref<64x128xf32, #tpu.memory_space<vmem>>, vector<64x128xf32>
    tpu.vector_store %arg3[%c0_3, %c0_4], %4 {strides = array<i32>} : memref<64x128xf32, #tpu.memory_space<vmem>>, vector<64x128xf32>,
    return
  }
  func.func @transform_0(%arg0: i32) -> (i32, i32) {
    %c0_i32 = arith.constant 0 : i32
    %c0_i32_0 = arith.constant 0 : i32
    return %arg0, %c0_i32 : i32, i32
  }
  func.func @transform_1(%arg0: i32) -> (i32, i32) {
    %c0_i32 = arith.constant 0 : i32
    %c0_i32_0 = arith.constant 0 : i32
    return %arg0, %c0_i32 : i32, i32
  }
  func.func @transform_2(%arg0: i32) -> (i32, i32) {
    %c0_i32 = arith.constant 0 : i32
    %c0_i32_0 = arith.constant 0 : i32
    return %arg0, %c0_i32 : i32, i32
  }
}

module attributes {stable_mosaic.version = 11 : i64} {
  func.func @_conv_mm_kernel(%arg0: i32, %arg1: i32, %arg2: i32, %arg3: memref<32x640xbf16, #tpu.memory_space<vmem>>, %arg4: memref<640x128xbf16, #tpu.memory_space<vmem>>, %arg5: memref<1x128xf32, #tpu.memory_space<vmem>>, %arg6: memref<32x128xf32, #tpu.memory_space<vmem>>, %arg7: memref<32x128xf32, #tpu.memory_space<vmem>>) attributes {dimension_semantics = [#tpu.dimension_semantics<parallel>, #tpu.dimension_semantics<parallel>, #tpu.dimension_semantics<arbitrary>], iteration_bounds = array<i64: 1, 1, 1>, scalar_prefetch = 0 : i64, scratch_operands = 1 : i64, tpu.core_type = #tpu.core_type<tc>, window_params = [{transform_indices = @transform_0, window_bounds = array<i64: 32, 640>}, {transform_indices = @transform_1, window_bounds = array<i64: 640, 128>}, {transform_indices = @transform_2, window_bounds = array<i64: 1, 128>}, {transform_indices = @transform_3, window_bounds = array<i64: 32, 128>}]} {
    %c0_i32 = arith.constant 0 : i32
    %0 = arith.cmpi eq, %arg2, %c0_i32 : i32
    %1 = arith.extui %0 : i1 to i32
    %c0_i32_0 = arith.constant 0 : i32
    %2 = arith.cmpi ne, %1, %c0_i32_0 : i32
    scf.if %2 {
      %cst_10 = arith.constant 0.000000e+00 : f32
      %12 = vector.broadcast %cst_10 : f32 to vector<32x128xf32>
      %c0_11 = arith.constant 0 : index
      %c0_12 = arith.constant 0 : index
      %13 = vector.load %arg7[%c0_11, %c0_12] : memref<32x128xf32, #tpu.memory_space<vmem>>, vector<32x128xf32>
      tpu.vector_store %arg7[%c0_11, %c0_12], %12 {strides = array<i32>} : memref<32x128xf32, #tpu.memory_space<vmem>>, vector<32x128xf32>,
    } else {
    }
    %c0 = arith.constant 0 : index
    %c0_1 = arith.constant 0 : index
    %3 = vector.load %arg7[%c0, %c0_1] : memref<32x128xf32, #tpu.memory_space<vmem>>, vector<32x128xf32>
    %c0_2 = arith.constant 0 : index
    %c0_3 = arith.constant 0 : index
    %4 = vector.load %arg3[%c0_2, %c0_3] : memref<32x640xbf16, #tpu.memory_space<vmem>>, vector<32x640xbf16>
    %c0_4 = arith.constant 0 : index
    %c0_5 = arith.constant 0 : index
    %5 = vector.load %arg4[%c0_4, %c0_5] : memref<640x128xbf16, #tpu.memory_space<vmem>>, vector<640x128xbf16>
    %cst = arith.constant dense<0.000000e+00> : vector<32x128xf32>
    %6 = tpu.matmul %4, %5, %cst {dimension_numbers = #tpu.dot_dimension_numbers<[1], [0], [0], [1], [0, 0, 1, 1], [], []>} : vector<32x640xbf16>, vector<640x128xbf16>, vector<32x128xf32> -> vector<32x128xf32>
    %7 = arith.addf %3, %6 : vector<32x128xf32>
    %c0_6 = arith.constant 0 : index
    %c0_7 = arith.constant 0 : index
    %8 = vector.load %arg7[%c0_6, %c0_7] : memref<32x128xf32, #tpu.memory_space<vmem>>, vector<32x128xf32>
    tpu.vector_store %arg7[%c0_6, %c0_7], %7 {strides = array<i32>} : memref<32x128xf32, #tpu.memory_space<vmem>>, vector<32x128xf32>,
    %c0_i32_8 = arith.constant 0 : i32
    %9 = arith.cmpi eq, %arg2, %c0_i32_8 : i32
    %10 = arith.extui %9 : i1 to i32
    %c0_i32_9 = arith.constant 0 : i32
    %11 = arith.cmpi ne, %10, %c0_i32_9 : i32
    scf.if %11 {
      %c0_10 = arith.constant 0 : index
      %c0_11 = arith.constant 0 : index
      %12 = vector.load %arg7[%c0_10, %c0_11] : memref<32x128xf32, #tpu.memory_space<vmem>>, vector<32x128xf32>
      %c0_12 = arith.constant 0 : index
      %c0_13 = arith.constant 0 : index
      %13 = vector.load %arg5[%c0_12, %c0_13] : memref<1x128xf32, #tpu.memory_space<vmem>>, vector<1x128xf32>
      %14 = vector.broadcast %13 : vector<1x128xf32> to vector<32x128xf32>
      %15 = arith.addf %12, %14 : vector<32x128xf32>
      %cst_14 = arith.constant 0.000000e+00 : f32
      %16 = vector.broadcast %cst_14 : f32 to vector<32x128xf32>
      %17 = arith.maximumf %15, %16 : vector<32x128xf32>
      %c0_15 = arith.constant 0 : index
      %c0_16 = arith.constant 0 : index
      %18 = vector.load %arg6[%c0_15, %c0_16] : memref<32x128xf32, #tpu.memory_space<vmem>>, vector<32x128xf32>
      tpu.vector_store %arg6[%c0_15, %c0_16], %17 {strides = array<i32>} : memref<32x128xf32, #tpu.memory_space<vmem>>, vector<32x128xf32>,
    } else {
    }
    return
  }
  func.func @transform_0(%arg0: i32, %arg1: i32, %arg2: i32) -> (i32, i32) {
    %c0_i32 = arith.constant 0 : i32
    return %arg0, %arg2 : i32, i32
  }
  func.func @transform_1(%arg0: i32, %arg1: i32, %arg2: i32) -> (i32, i32) {
    %c0_i32 = arith.constant 0 : i32
    return %arg2, %arg1 : i32, i32
  }
  func.func @transform_2(%arg0: i32, %arg1: i32, %arg2: i32) -> (i32, i32) {
    %c0_i32 = arith.constant 0 : i32
    %c0_i32_0 = arith.constant 0 : i32
    return %c0_i32, %arg1 : i32, i32
  }
  func.func @transform_3(%arg0: i32, %arg1: i32, %arg2: i32) -> (i32, i32) {
    %c0_i32 = arith.constant 0 : i32
    return %arg0, %arg1 : i32, i32
  }
}

module attributes {stable_mosaic.version = 11 : i64} {
  func.func @_conv_mm_kernel(%arg0: i32, %arg1: i32, %arg2: i32, %arg3: memref<32x384xbf16, #tpu.memory_space<vmem>>, %arg4: memref<384x128xbf16, #tpu.memory_space<vmem>>, %arg5: memref<1x128xf32, #tpu.memory_space<vmem>>, %arg6: memref<32x128xf32, #tpu.memory_space<vmem>>, %arg7: memref<32x128xf32, #tpu.memory_space<vmem>>) attributes {dimension_semantics = [#tpu.dimension_semantics<parallel>, #tpu.dimension_semantics<parallel>, #tpu.dimension_semantics<arbitrary>], iteration_bounds = array<i64: 1, 1, 3>, scalar_prefetch = 0 : i64, scratch_operands = 1 : i64, tpu.core_type = #tpu.core_type<tc>, window_params = [{transform_indices = @transform_0, window_bounds = array<i64: 32, 384>}, {transform_indices = @transform_1, window_bounds = array<i64: 384, 128>}, {transform_indices = @transform_2, window_bounds = array<i64: 1, 128>}, {transform_indices = @transform_3, window_bounds = array<i64: 32, 128>}]} {
    %c0_i32 = arith.constant 0 : i32
    %0 = arith.cmpi eq, %arg2, %c0_i32 : i32
    %1 = arith.extui %0 : i1 to i32
    %c0_i32_0 = arith.constant 0 : i32
    %2 = arith.cmpi ne, %1, %c0_i32_0 : i32
    scf.if %2 {
      %cst_9 = arith.constant 0.000000e+00 : f32
      %12 = vector.broadcast %cst_9 : f32 to vector<32x128xf32>
      %c0_10 = arith.constant 0 : index
      %c0_11 = arith.constant 0 : index
      %13 = vector.load %arg7[%c0_10, %c0_11] : memref<32x128xf32, #tpu.memory_space<vmem>>, vector<32x128xf32>
      tpu.vector_store %arg7[%c0_10, %c0_11], %12 {strides = array<i32>} : memref<32x128xf32, #tpu.memory_space<vmem>>, vector<32x128xf32>,
    } else {
    }
    %c0 = arith.constant 0 : index
    %c0_1 = arith.constant 0 : index
    %3 = vector.load %arg7[%c0, %c0_1] : memref<32x128xf32, #tpu.memory_space<vmem>>, vector<32x128xf32>
    %c0_2 = arith.constant 0 : index
    %c0_3 = arith.constant 0 : index
    %4 = vector.load %arg3[%c0_2, %c0_3] : memref<32x384xbf16, #tpu.memory_space<vmem>>, vector<32x384xbf16>
    %c0_4 = arith.constant 0 : index
    %c0_5 = arith.constant 0 : index
    %5 = vector.load %arg4[%c0_4, %c0_5] : memref<384x128xbf16, #tpu.memory_space<vmem>>, vector<384x128xbf16>
    %cst = arith.constant dense<0.000000e+00> : vector<32x128xf32>
    %6 = tpu.matmul %4, %5, %cst {dimension_numbers = #tpu.dot_dimension_numbers<[1], [0], [0], [1], [0, 0, 1, 1], [], []>} : vector<32x384xbf16>, vector<384x128xbf16>, vector<32x128xf32> -> vector<32x128xf32>
    %7 = arith.addf %3, %6 : vector<32x128xf32>
    %c0_6 = arith.constant 0 : index
    %c0_7 = arith.constant 0 : index
    %8 = vector.load %arg7[%c0_6, %c0_7] : memref<32x128xf32, #tpu.memory_space<vmem>>, vector<32x128xf32>
    tpu.vector_store %arg7[%c0_6, %c0_7], %7 {strides = array<i32>} : memref<32x128xf32, #tpu.memory_space<vmem>>, vector<32x128xf32>,
    %c2_i32 = arith.constant 2 : i32
    %9 = arith.cmpi eq, %arg2, %c2_i32 : i32
    %10 = arith.extui %9 : i1 to i32
    %c0_i32_8 = arith.constant 0 : i32
    %11 = arith.cmpi ne, %10, %c0_i32_8 : i32
    scf.if %11 {
      %c0_9 = arith.constant 0 : index
      %c0_10 = arith.constant 0 : index
      %12 = vector.load %arg7[%c0_9, %c0_10] : memref<32x128xf32, #tpu.memory_space<vmem>>, vector<32x128xf32>
      %c0_11 = arith.constant 0 : index
      %c0_12 = arith.constant 0 : index
      %13 = vector.load %arg5[%c0_11, %c0_12] : memref<1x128xf32, #tpu.memory_space<vmem>>, vector<1x128xf32>
      %14 = vector.broadcast %13 : vector<1x128xf32> to vector<32x128xf32>
      %15 = arith.addf %12, %14 : vector<32x128xf32>
      %c0_13 = arith.constant 0 : index
      %c0_14 = arith.constant 0 : index
      %16 = vector.load %arg6[%c0_13, %c0_14] : memref<32x128xf32, #tpu.memory_space<vmem>>, vector<32x128xf32>
      tpu.vector_store %arg6[%c0_13, %c0_14], %15 {strides = array<i32>} : memref<32x128xf32, #tpu.memory_space<vmem>>, vector<32x128xf32>,
    } else {
    }
    return
  }
  func.func @transform_0(%arg0: i32, %arg1: i32, %arg2: i32) -> (i32, i32) {
    %c0_i32 = arith.constant 0 : i32
    return %arg0, %arg2 : i32, i32
  }
  func.func @transform_1(%arg0: i32, %arg1: i32, %arg2: i32) -> (i32, i32) {
    %c0_i32 = arith.constant 0 : i32
    return %arg2, %arg1 : i32, i32
  }
  func.func @transform_2(%arg0: i32, %arg1: i32, %arg2: i32) -> (i32, i32) {
    %c0_i32 = arith.constant 0 : i32
    %c0_i32_0 = arith.constant 0 : i32
    return %c0_i32, %arg1 : i32, i32
  }
  func.func @transform_3(%arg0: i32, %arg1: i32, %arg2: i32) -> (i32, i32) {
    %c0_i32 = arith.constant 0 : i32
    return %arg0, %arg1 : i32, i32
  }
}

module attributes {stable_mosaic.version = 11 : i64} {
  func.func @_add_relu_kernel(%arg0: i32, %arg1: memref<32x128xf32, #tpu.memory_space<vmem>>, %arg2: memref<32x128xf32, #tpu.memory_space<vmem>>, %arg3: memref<32x128xf32, #tpu.memory_space<vmem>>) attributes {dimension_semantics = [#tpu.dimension_semantics<parallel>], iteration_bounds = array<i64: 1>, scalar_prefetch = 0 : i64, scratch_operands = 0 : i64, tpu.core_type = #tpu.core_type<tc>, window_params = [{transform_indices = @transform_0, window_bounds = array<i64: 32, 128>}, {transform_indices = @transform_1, window_bounds = array<i64: 32, 128>}, {transform_indices = @transform_2, window_bounds = array<i64: 32, 128>}]} {
    %c0 = arith.constant 0 : index
    %c0_0 = arith.constant 0 : index
    %0 = vector.load %arg1[%c0, %c0_0] : memref<32x128xf32, #tpu.memory_space<vmem>>, vector<32x128xf32>
    %c0_1 = arith.constant 0 : index
    %c0_2 = arith.constant 0 : index
    %1 = vector.load %arg2[%c0_1, %c0_2] : memref<32x128xf32, #tpu.memory_space<vmem>>, vector<32x128xf32>
    %2 = arith.addf %0, %1 : vector<32x128xf32>
    %cst = arith.constant 0.000000e+00 : f32
    %3 = vector.broadcast %cst : f32 to vector<32x128xf32>
    %4 = arith.maximumf %2, %3 : vector<32x128xf32>
    %c0_3 = arith.constant 0 : index
    %c0_4 = arith.constant 0 : index
    %5 = vector.load %arg3[%c0_3, %c0_4] : memref<32x128xf32, #tpu.memory_space<vmem>>, vector<32x128xf32>
    tpu.vector_store %arg3[%c0_3, %c0_4], %4 {strides = array<i32>} : memref<32x128xf32, #tpu.memory_space<vmem>>, vector<32x128xf32>,
    return
  }
  func.func @transform_0(%arg0: i32) -> (i32, i32) {
    %c0_i32 = arith.constant 0 : i32
    %c0_i32_0 = arith.constant 0 : i32
    return %arg0, %c0_i32 : i32, i32
  }
  func.func @transform_1(%arg0: i32) -> (i32, i32) {
    %c0_i32 = arith.constant 0 : i32
    %c0_i32_0 = arith.constant 0 : i32
    return %arg0, %c0_i32 : i32, i32
  }
  func.func @transform_2(%arg0: i32) -> (i32, i32) {
    %c0_i32 = arith.constant 0 : i32
    %c0_i32_0 = arith.constant 0 : i32
    return %arg0, %c0_i32 : i32, i32
  }
}

module attributes {stable_mosaic.version = 11 : i64} {
  func.func @_conv_mm_kernel(%arg0: i32, %arg1: i32, %arg2: i32, %arg3: memref<32x128xbf16, #tpu.memory_space<vmem>>, %arg4: memref<128x128xbf16, #tpu.memory_space<vmem>>, %arg5: memref<1x128xf32, #tpu.memory_space<vmem>>, %arg6: memref<32x128xf32, #tpu.memory_space<vmem>>, %arg7: memref<32x128xf32, #tpu.memory_space<vmem>>) attributes {dimension_semantics = [#tpu.dimension_semantics<parallel>, #tpu.dimension_semantics<parallel>, #tpu.dimension_semantics<arbitrary>], iteration_bounds = array<i64: 1, 1, 1>, scalar_prefetch = 0 : i64, scratch_operands = 1 : i64, tpu.core_type = #tpu.core_type<tc>, window_params = [{transform_indices = @transform_0, window_bounds = array<i64: 32, 128>}, {transform_indices = @transform_1, window_bounds = array<i64: 128, 128>}, {transform_indices = @transform_2, window_bounds = array<i64: 1, 128>}, {transform_indices = @transform_3, window_bounds = array<i64: 32, 128>}]} {
    %c0_i32 = arith.constant 0 : i32
    %0 = arith.cmpi eq, %arg2, %c0_i32 : i32
    %1 = arith.extui %0 : i1 to i32
    %c0_i32_0 = arith.constant 0 : i32
    %2 = arith.cmpi ne, %1, %c0_i32_0 : i32
    scf.if %2 {
      %cst_10 = arith.constant 0.000000e+00 : f32
      %12 = vector.broadcast %cst_10 : f32 to vector<32x128xf32>
      %c0_11 = arith.constant 0 : index
      %c0_12 = arith.constant 0 : index
      %13 = vector.load %arg7[%c0_11, %c0_12] : memref<32x128xf32, #tpu.memory_space<vmem>>, vector<32x128xf32>
      tpu.vector_store %arg7[%c0_11, %c0_12], %12 {strides = array<i32>} : memref<32x128xf32, #tpu.memory_space<vmem>>, vector<32x128xf32>,
    } else {
    }
    %c0 = arith.constant 0 : index
    %c0_1 = arith.constant 0 : index
    %3 = vector.load %arg7[%c0, %c0_1] : memref<32x128xf32, #tpu.memory_space<vmem>>, vector<32x128xf32>
    %c0_2 = arith.constant 0 : index
    %c0_3 = arith.constant 0 : index
    %4 = vector.load %arg3[%c0_2, %c0_3] : memref<32x128xbf16, #tpu.memory_space<vmem>>, vector<32x128xbf16>
    %c0_4 = arith.constant 0 : index
    %c0_5 = arith.constant 0 : index
    %5 = vector.load %arg4[%c0_4, %c0_5] : memref<128x128xbf16, #tpu.memory_space<vmem>>, vector<128x128xbf16>
    %cst = arith.constant dense<0.000000e+00> : vector<32x128xf32>
    %6 = tpu.matmul %4, %5, %cst {dimension_numbers = #tpu.dot_dimension_numbers<[1], [0], [0], [1], [0, 0, 1, 1], [], []>} : vector<32x128xbf16>, vector<128x128xbf16>, vector<32x128xf32> -> vector<32x128xf32>
    %7 = arith.addf %3, %6 : vector<32x128xf32>
    %c0_6 = arith.constant 0 : index
    %c0_7 = arith.constant 0 : index
    %8 = vector.load %arg7[%c0_6, %c0_7] : memref<32x128xf32, #tpu.memory_space<vmem>>, vector<32x128xf32>
    tpu.vector_store %arg7[%c0_6, %c0_7], %7 {strides = array<i32>} : memref<32x128xf32, #tpu.memory_space<vmem>>, vector<32x128xf32>,
    %c0_i32_8 = arith.constant 0 : i32
    %9 = arith.cmpi eq, %arg2, %c0_i32_8 : i32
    %10 = arith.extui %9 : i1 to i32
    %c0_i32_9 = arith.constant 0 : i32
    %11 = arith.cmpi ne, %10, %c0_i32_9 : i32
    scf.if %11 {
      %c0_10 = arith.constant 0 : index
      %c0_11 = arith.constant 0 : index
      %12 = vector.load %arg7[%c0_10, %c0_11] : memref<32x128xf32, #tpu.memory_space<vmem>>, vector<32x128xf32>
      %c0_12 = arith.constant 0 : index
      %c0_13 = arith.constant 0 : index
      %13 = vector.load %arg5[%c0_12, %c0_13] : memref<1x128xf32, #tpu.memory_space<vmem>>, vector<1x128xf32>
      %14 = vector.broadcast %13 : vector<1x128xf32> to vector<32x128xf32>
      %15 = arith.addf %12, %14 : vector<32x128xf32>
      %c0_14 = arith.constant 0 : index
      %c0_15 = arith.constant 0 : index
      %16 = vector.load %arg6[%c0_14, %c0_15] : memref<32x128xf32, #tpu.memory_space<vmem>>, vector<32x128xf32>
      tpu.vector_store %arg6[%c0_14, %c0_15], %15 {strides = array<i32>} : memref<32x128xf32, #tpu.memory_space<vmem>>, vector<32x128xf32>,
    } else {
    }
    return
  }
  func.func @transform_0(%arg0: i32, %arg1: i32, %arg2: i32) -> (i32, i32) {
    %c0_i32 = arith.constant 0 : i32
    return %arg0, %arg2 : i32, i32
  }
  func.func @transform_1(%arg0: i32, %arg1: i32, %arg2: i32) -> (i32, i32) {
    %c0_i32 = arith.constant 0 : i32
    return %arg2, %arg1 : i32, i32
  }
  func.func @transform_2(%arg0: i32, %arg1: i32, %arg2: i32) -> (i32, i32) {
    %c0_i32 = arith.constant 0 : i32
    %c0_i32_0 = arith.constant 0 : i32
    return %c0_i32, %arg1 : i32, i32
  }
  func.func @transform_3(%arg0: i32, %arg1: i32, %arg2: i32) -> (i32, i32) {
    %c0_i32 = arith.constant 0 : i32
    return %arg0, %arg1 : i32, i32
  }
}

module attributes {stable_mosaic.version = 11 : i64} {
  func.func @_conv_mm_kernel(%arg0: i32, %arg1: i32, %arg2: i32, %arg3: memref<32x384xbf16, #tpu.memory_space<vmem>>, %arg4: memref<384x128xbf16, #tpu.memory_space<vmem>>, %arg5: memref<1x128xf32, #tpu.memory_space<vmem>>, %arg6: memref<32x128xf32, #tpu.memory_space<vmem>>, %arg7: memref<32x128xf32, #tpu.memory_space<vmem>>) attributes {dimension_semantics = [#tpu.dimension_semantics<parallel>, #tpu.dimension_semantics<parallel>, #tpu.dimension_semantics<arbitrary>], iteration_bounds = array<i64: 1, 1, 3>, scalar_prefetch = 0 : i64, scratch_operands = 1 : i64, tpu.core_type = #tpu.core_type<tc>, window_params = [{transform_indices = @transform_0, window_bounds = array<i64: 32, 384>}, {transform_indices = @transform_1, window_bounds = array<i64: 384, 128>}, {transform_indices = @transform_2, window_bounds = array<i64: 1, 128>}, {transform_indices = @transform_3, window_bounds = array<i64: 32, 128>}]} {
    %c0_i32 = arith.constant 0 : i32
    %0 = arith.cmpi eq, %arg2, %c0_i32 : i32
    %1 = arith.extui %0 : i1 to i32
    %c0_i32_0 = arith.constant 0 : i32
    %2 = arith.cmpi ne, %1, %c0_i32_0 : i32
    scf.if %2 {
      %cst_9 = arith.constant 0.000000e+00 : f32
      %12 = vector.broadcast %cst_9 : f32 to vector<32x128xf32>
      %c0_10 = arith.constant 0 : index
      %c0_11 = arith.constant 0 : index
      %13 = vector.load %arg7[%c0_10, %c0_11] : memref<32x128xf32, #tpu.memory_space<vmem>>, vector<32x128xf32>
      tpu.vector_store %arg7[%c0_10, %c0_11], %12 {strides = array<i32>} : memref<32x128xf32, #tpu.memory_space<vmem>>, vector<32x128xf32>,
    } else {
    }
    %c0 = arith.constant 0 : index
    %c0_1 = arith.constant 0 : index
    %3 = vector.load %arg7[%c0, %c0_1] : memref<32x128xf32, #tpu.memory_space<vmem>>, vector<32x128xf32>
    %c0_2 = arith.constant 0 : index
    %c0_3 = arith.constant 0 : index
    %4 = vector.load %arg3[%c0_2, %c0_3] : memref<32x384xbf16, #tpu.memory_space<vmem>>, vector<32x384xbf16>
    %c0_4 = arith.constant 0 : index
    %c0_5 = arith.constant 0 : index
    %5 = vector.load %arg4[%c0_4, %c0_5] : memref<384x128xbf16, #tpu.memory_space<vmem>>, vector<384x128xbf16>
    %cst = arith.constant dense<0.000000e+00> : vector<32x128xf32>
    %6 = tpu.matmul %4, %5, %cst {dimension_numbers = #tpu.dot_dimension_numbers<[1], [0], [0], [1], [0, 0, 1, 1], [], []>} : vector<32x384xbf16>, vector<384x128xbf16>, vector<32x128xf32> -> vector<32x128xf32>
    %7 = arith.addf %3, %6 : vector<32x128xf32>
    %c0_6 = arith.constant 0 : index
    %c0_7 = arith.constant 0 : index
    %8 = vector.load %arg7[%c0_6, %c0_7] : memref<32x128xf32, #tpu.memory_space<vmem>>, vector<32x128xf32>
    tpu.vector_store %arg7[%c0_6, %c0_7], %7 {strides = array<i32>} : memref<32x128xf32, #tpu.memory_space<vmem>>, vector<32x128xf32>,
    %c2_i32 = arith.constant 2 : i32
    %9 = arith.cmpi eq, %arg2, %c2_i32 : i32
    %10 = arith.extui %9 : i1 to i32
    %c0_i32_8 = arith.constant 0 : i32
    %11 = arith.cmpi ne, %10, %c0_i32_8 : i32
    scf.if %11 {
      %c0_9 = arith.constant 0 : index
      %c0_10 = arith.constant 0 : index
      %12 = vector.load %arg7[%c0_9, %c0_10] : memref<32x128xf32, #tpu.memory_space<vmem>>, vector<32x128xf32>
      %c0_11 = arith.constant 0 : index
      %c0_12 = arith.constant 0 : index
      %13 = vector.load %arg5[%c0_11, %c0_12] : memref<1x128xf32, #tpu.memory_space<vmem>>, vector<1x128xf32>
      %14 = vector.broadcast %13 : vector<1x128xf32> to vector<32x128xf32>
      %15 = arith.addf %12, %14 : vector<32x128xf32>
      %cst_13 = arith.constant 0.000000e+00 : f32
      %16 = vector.broadcast %cst_13 : f32 to vector<32x128xf32>
      %17 = arith.maximumf %15, %16 : vector<32x128xf32>
      %c0_14 = arith.constant 0 : index
      %c0_15 = arith.constant 0 : index
      %18 = vector.load %arg6[%c0_14, %c0_15] : memref<32x128xf32, #tpu.memory_space<vmem>>, vector<32x128xf32>
      tpu.vector_store %arg6[%c0_14, %c0_15], %17 {strides = array<i32>} : memref<32x128xf32, #tpu.memory_space<vmem>>, vector<32x128xf32>,
    } else {
    }
    return
  }
  func.func @transform_0(%arg0: i32, %arg1: i32, %arg2: i32) -> (i32, i32) {
    %c0_i32 = arith.constant 0 : i32
    return %arg0, %arg2 : i32, i32
  }
  func.func @transform_1(%arg0: i32, %arg1: i32, %arg2: i32) -> (i32, i32) {
    %c0_i32 = arith.constant 0 : i32
    return %arg2, %arg1 : i32, i32
  }
  func.func @transform_2(%arg0: i32, %arg1: i32, %arg2: i32) -> (i32, i32) {
    %c0_i32 = arith.constant 0 : i32
    %c0_i32_0 = arith.constant 0 : i32
    return %c0_i32, %arg1 : i32, i32
  }
  func.func @transform_3(%arg0: i32, %arg1: i32, %arg2: i32) -> (i32, i32) {
    %c0_i32 = arith.constant 0 : i32
    return %arg0, %arg1 : i32, i32
  }
}

module attributes {stable_mosaic.version = 11 : i64} {
  func.func @_conv_mm_kernel(%arg0: i32, %arg1: i32, %arg2: i32, %arg3: memref<16x384xbf16, #tpu.memory_space<vmem>>, %arg4: memref<384x256xbf16, #tpu.memory_space<vmem>>, %arg5: memref<1x256xf32, #tpu.memory_space<vmem>>, %arg6: memref<16x256xf32, #tpu.memory_space<vmem>>, %arg7: memref<16x256xf32, #tpu.memory_space<vmem>>) attributes {dimension_semantics = [#tpu.dimension_semantics<parallel>, #tpu.dimension_semantics<parallel>, #tpu.dimension_semantics<arbitrary>], iteration_bounds = array<i64: 1, 1, 3>, scalar_prefetch = 0 : i64, scratch_operands = 1 : i64, tpu.core_type = #tpu.core_type<tc>, window_params = [{transform_indices = @transform_0, window_bounds = array<i64: 16, 384>}, {transform_indices = @transform_1, window_bounds = array<i64: 384, 256>}, {transform_indices = @transform_2, window_bounds = array<i64: 1, 256>}, {transform_indices = @transform_3, window_bounds = array<i64: 16, 256>}]} {
    %c0_i32 = arith.constant 0 : i32
    %0 = arith.cmpi eq, %arg2, %c0_i32 : i32
    %1 = arith.extui %0 : i1 to i32
    %c0_i32_0 = arith.constant 0 : i32
    %2 = arith.cmpi ne, %1, %c0_i32_0 : i32
    scf.if %2 {
      %cst_9 = arith.constant 0.000000e+00 : f32
      %12 = vector.broadcast %cst_9 : f32 to vector<16x256xf32>
      %c0_10 = arith.constant 0 : index
      %c0_11 = arith.constant 0 : index
      %13 = vector.load %arg7[%c0_10, %c0_11] : memref<16x256xf32, #tpu.memory_space<vmem>>, vector<16x256xf32>
      tpu.vector_store %arg7[%c0_10, %c0_11], %12 {strides = array<i32>} : memref<16x256xf32, #tpu.memory_space<vmem>>, vector<16x256xf32>,
    } else {
    }
    %c0 = arith.constant 0 : index
    %c0_1 = arith.constant 0 : index
    %3 = vector.load %arg7[%c0, %c0_1] : memref<16x256xf32, #tpu.memory_space<vmem>>, vector<16x256xf32>
    %c0_2 = arith.constant 0 : index
    %c0_3 = arith.constant 0 : index
    %4 = vector.load %arg3[%c0_2, %c0_3] : memref<16x384xbf16, #tpu.memory_space<vmem>>, vector<16x384xbf16>
    %c0_4 = arith.constant 0 : index
    %c0_5 = arith.constant 0 : index
    %5 = vector.load %arg4[%c0_4, %c0_5] : memref<384x256xbf16, #tpu.memory_space<vmem>>, vector<384x256xbf16>
    %cst = arith.constant dense<0.000000e+00> : vector<16x256xf32>
    %6 = tpu.matmul %4, %5, %cst {dimension_numbers = #tpu.dot_dimension_numbers<[1], [0], [0], [1], [0, 0, 1, 1], [], []>} : vector<16x384xbf16>, vector<384x256xbf16>, vector<16x256xf32> -> vector<16x256xf32>
    %7 = arith.addf %3, %6 : vector<16x256xf32>
    %c0_6 = arith.constant 0 : index
    %c0_7 = arith.constant 0 : index
    %8 = vector.load %arg7[%c0_6, %c0_7] : memref<16x256xf32, #tpu.memory_space<vmem>>, vector<16x256xf32>
    tpu.vector_store %arg7[%c0_6, %c0_7], %7 {strides = array<i32>} : memref<16x256xf32, #tpu.memory_space<vmem>>, vector<16x256xf32>,
    %c2_i32 = arith.constant 2 : i32
    %9 = arith.cmpi eq, %arg2, %c2_i32 : i32
    %10 = arith.extui %9 : i1 to i32
    %c0_i32_8 = arith.constant 0 : i32
    %11 = arith.cmpi ne, %10, %c0_i32_8 : i32
    scf.if %11 {
      %c0_9 = arith.constant 0 : index
      %c0_10 = arith.constant 0 : index
      %12 = vector.load %arg7[%c0_9, %c0_10] : memref<16x256xf32, #tpu.memory_space<vmem>>, vector<16x256xf32>
      %c0_11 = arith.constant 0 : index
      %c0_12 = arith.constant 0 : index
      %13 = vector.load %arg5[%c0_11, %c0_12] : memref<1x256xf32, #tpu.memory_space<vmem>>, vector<1x256xf32>
      %14 = vector.broadcast %13 : vector<1x256xf32> to vector<16x256xf32>
      %15 = arith.addf %12, %14 : vector<16x256xf32>
      %cst_13 = arith.constant 0.000000e+00 : f32
      %16 = vector.broadcast %cst_13 : f32 to vector<16x256xf32>
      %17 = arith.maximumf %15, %16 : vector<16x256xf32>
      %c0_14 = arith.constant 0 : index
      %c0_15 = arith.constant 0 : index
      %18 = vector.load %arg6[%c0_14, %c0_15] : memref<16x256xf32, #tpu.memory_space<vmem>>, vector<16x256xf32>
      tpu.vector_store %arg6[%c0_14, %c0_15], %17 {strides = array<i32>} : memref<16x256xf32, #tpu.memory_space<vmem>>, vector<16x256xf32>,
    } else {
    }
    return
  }
  func.func @transform_0(%arg0: i32, %arg1: i32, %arg2: i32) -> (i32, i32) {
    %c0_i32 = arith.constant 0 : i32
    return %arg0, %arg2 : i32, i32
  }
  func.func @transform_1(%arg0: i32, %arg1: i32, %arg2: i32) -> (i32, i32) {
    %c0_i32 = arith.constant 0 : i32
    return %arg2, %arg1 : i32, i32
  }
  func.func @transform_2(%arg0: i32, %arg1: i32, %arg2: i32) -> (i32, i32) {
    %c0_i32 = arith.constant 0 : i32
    %c0_i32_0 = arith.constant 0 : i32
    return %c0_i32, %arg1 : i32, i32
  }
  func.func @transform_3(%arg0: i32, %arg1: i32, %arg2: i32) -> (i32, i32) {
    %c0_i32 = arith.constant 0 : i32
    return %arg0, %arg1 : i32, i32
  }
}

module attributes {stable_mosaic.version = 11 : i64} {
  func.func @_conv_mm_kernel(%arg0: i32, %arg1: i32, %arg2: i32, %arg3: memref<16x384xbf16, #tpu.memory_space<vmem>>, %arg4: memref<384x256xbf16, #tpu.memory_space<vmem>>, %arg5: memref<1x256xf32, #tpu.memory_space<vmem>>, %arg6: memref<16x256xf32, #tpu.memory_space<vmem>>, %arg7: memref<16x256xf32, #tpu.memory_space<vmem>>) attributes {dimension_semantics = [#tpu.dimension_semantics<parallel>, #tpu.dimension_semantics<parallel>, #tpu.dimension_semantics<arbitrary>], iteration_bounds = array<i64: 1, 1, 6>, scalar_prefetch = 0 : i64, scratch_operands = 1 : i64, tpu.core_type = #tpu.core_type<tc>, window_params = [{transform_indices = @transform_0, window_bounds = array<i64: 16, 384>}, {transform_indices = @transform_1, window_bounds = array<i64: 384, 256>}, {transform_indices = @transform_2, window_bounds = array<i64: 1, 256>}, {transform_indices = @transform_3, window_bounds = array<i64: 16, 256>}]} {
    %c0_i32 = arith.constant 0 : i32
    %0 = arith.cmpi eq, %arg2, %c0_i32 : i32
    %1 = arith.extui %0 : i1 to i32
    %c0_i32_0 = arith.constant 0 : i32
    %2 = arith.cmpi ne, %1, %c0_i32_0 : i32
    scf.if %2 {
      %cst_9 = arith.constant 0.000000e+00 : f32
      %12 = vector.broadcast %cst_9 : f32 to vector<16x256xf32>
      %c0_10 = arith.constant 0 : index
      %c0_11 = arith.constant 0 : index
      %13 = vector.load %arg7[%c0_10, %c0_11] : memref<16x256xf32, #tpu.memory_space<vmem>>, vector<16x256xf32>
      tpu.vector_store %arg7[%c0_10, %c0_11], %12 {strides = array<i32>} : memref<16x256xf32, #tpu.memory_space<vmem>>, vector<16x256xf32>,
    } else {
    }
    %c0 = arith.constant 0 : index
    %c0_1 = arith.constant 0 : index
    %3 = vector.load %arg7[%c0, %c0_1] : memref<16x256xf32, #tpu.memory_space<vmem>>, vector<16x256xf32>
    %c0_2 = arith.constant 0 : index
    %c0_3 = arith.constant 0 : index
    %4 = vector.load %arg3[%c0_2, %c0_3] : memref<16x384xbf16, #tpu.memory_space<vmem>>, vector<16x384xbf16>
    %c0_4 = arith.constant 0 : index
    %c0_5 = arith.constant 0 : index
    %5 = vector.load %arg4[%c0_4, %c0_5] : memref<384x256xbf16, #tpu.memory_space<vmem>>, vector<384x256xbf16>
    %cst = arith.constant dense<0.000000e+00> : vector<16x256xf32>
    %6 = tpu.matmul %4, %5, %cst {dimension_numbers = #tpu.dot_dimension_numbers<[1], [0], [0], [1], [0, 0, 1, 1], [], []>} : vector<16x384xbf16>, vector<384x256xbf16>, vector<16x256xf32> -> vector<16x256xf32>
    %7 = arith.addf %3, %6 : vector<16x256xf32>
    %c0_6 = arith.constant 0 : index
    %c0_7 = arith.constant 0 : index
    %8 = vector.load %arg7[%c0_6, %c0_7] : memref<16x256xf32, #tpu.memory_space<vmem>>, vector<16x256xf32>
    tpu.vector_store %arg7[%c0_6, %c0_7], %7 {strides = array<i32>} : memref<16x256xf32, #tpu.memory_space<vmem>>, vector<16x256xf32>,
    %c5_i32 = arith.constant 5 : i32
    %9 = arith.cmpi eq, %arg2, %c5_i32 : i32
    %10 = arith.extui %9 : i1 to i32
    %c0_i32_8 = arith.constant 0 : i32
    %11 = arith.cmpi ne, %10, %c0_i32_8 : i32
    scf.if %11 {
      %c0_9 = arith.constant 0 : index
      %c0_10 = arith.constant 0 : index
      %12 = vector.load %arg7[%c0_9, %c0_10] : memref<16x256xf32, #tpu.memory_space<vmem>>, vector<16x256xf32>
      %c0_11 = arith.constant 0 : index
      %c0_12 = arith.constant 0 : index
      %13 = vector.load %arg5[%c0_11, %c0_12] : memref<1x256xf32, #tpu.memory_space<vmem>>, vector<1x256xf32>
      %14 = vector.broadcast %13 : vector<1x256xf32> to vector<16x256xf32>
      %15 = arith.addf %12, %14 : vector<16x256xf32>
      %c0_13 = arith.constant 0 : index
      %c0_14 = arith.constant 0 : index
      %16 = vector.load %arg6[%c0_13, %c0_14] : memref<16x256xf32, #tpu.memory_space<vmem>>, vector<16x256xf32>
      tpu.vector_store %arg6[%c0_13, %c0_14], %15 {strides = array<i32>} : memref<16x256xf32, #tpu.memory_space<vmem>>, vector<16x256xf32>,
    } else {
    }
    return
  }
  func.func @transform_0(%arg0: i32, %arg1: i32, %arg2: i32) -> (i32, i32) {
    %c0_i32 = arith.constant 0 : i32
    return %arg0, %arg2 : i32, i32
  }
  func.func @transform_1(%arg0: i32, %arg1: i32, %arg2: i32) -> (i32, i32) {
    %c0_i32 = arith.constant 0 : i32
    return %arg2, %arg1 : i32, i32
  }
  func.func @transform_2(%arg0: i32, %arg1: i32, %arg2: i32) -> (i32, i32) {
    %c0_i32 = arith.constant 0 : i32
    %c0_i32_0 = arith.constant 0 : i32
    return %c0_i32, %arg1 : i32, i32
  }
  func.func @transform_3(%arg0: i32, %arg1: i32, %arg2: i32) -> (i32, i32) {
    %c0_i32 = arith.constant 0 : i32
    return %arg0, %arg1 : i32, i32
  }
}

module attributes {stable_mosaic.version = 11 : i64} {
  func.func @_conv_mm_kernel(%arg0: i32, %arg1: i32, %arg2: i32, %arg3: memref<16x128xbf16, #tpu.memory_space<vmem>>, %arg4: memref<128x256xbf16, #tpu.memory_space<vmem>>, %arg5: memref<1x256xf32, #tpu.memory_space<vmem>>, %arg6: memref<16x256xf32, #tpu.memory_space<vmem>>, %arg7: memref<16x256xf32, #tpu.memory_space<vmem>>) attributes {dimension_semantics = [#tpu.dimension_semantics<parallel>, #tpu.dimension_semantics<parallel>, #tpu.dimension_semantics<arbitrary>], iteration_bounds = array<i64: 1, 1, 1>, scalar_prefetch = 0 : i64, scratch_operands = 1 : i64, tpu.core_type = #tpu.core_type<tc>, window_params = [{transform_indices = @transform_0, window_bounds = array<i64: 16, 128>}, {transform_indices = @transform_1, window_bounds = array<i64: 128, 256>}, {transform_indices = @transform_2, window_bounds = array<i64: 1, 256>}, {transform_indices = @transform_3, window_bounds = array<i64: 16, 256>}]} {
    %c0_i32 = arith.constant 0 : i32
    %0 = arith.cmpi eq, %arg2, %c0_i32 : i32
    %1 = arith.extui %0 : i1 to i32
    %c0_i32_0 = arith.constant 0 : i32
    %2 = arith.cmpi ne, %1, %c0_i32_0 : i32
    scf.if %2 {
      %cst_10 = arith.constant 0.000000e+00 : f32
      %12 = vector.broadcast %cst_10 : f32 to vector<16x256xf32>
      %c0_11 = arith.constant 0 : index
      %c0_12 = arith.constant 0 : index
      %13 = vector.load %arg7[%c0_11, %c0_12] : memref<16x256xf32, #tpu.memory_space<vmem>>, vector<16x256xf32>
      tpu.vector_store %arg7[%c0_11, %c0_12], %12 {strides = array<i32>} : memref<16x256xf32, #tpu.memory_space<vmem>>, vector<16x256xf32>,
    } else {
    }
    %c0 = arith.constant 0 : index
    %c0_1 = arith.constant 0 : index
    %3 = vector.load %arg7[%c0, %c0_1] : memref<16x256xf32, #tpu.memory_space<vmem>>, vector<16x256xf32>
    %c0_2 = arith.constant 0 : index
    %c0_3 = arith.constant 0 : index
    %4 = vector.load %arg3[%c0_2, %c0_3] : memref<16x128xbf16, #tpu.memory_space<vmem>>, vector<16x128xbf16>
    %c0_4 = arith.constant 0 : index
    %c0_5 = arith.constant 0 : index
    %5 = vector.load %arg4[%c0_4, %c0_5] : memref<128x256xbf16, #tpu.memory_space<vmem>>, vector<128x256xbf16>
    %cst = arith.constant dense<0.000000e+00> : vector<16x256xf32>
    %6 = tpu.matmul %4, %5, %cst {dimension_numbers = #tpu.dot_dimension_numbers<[1], [0], [0], [1], [0, 0, 1, 1], [], []>} : vector<16x128xbf16>, vector<128x256xbf16>, vector<16x256xf32> -> vector<16x256xf32>
    %7 = arith.addf %3, %6 : vector<16x256xf32>
    %c0_6 = arith.constant 0 : index
    %c0_7 = arith.constant 0 : index
    %8 = vector.load %arg7[%c0_6, %c0_7] : memref<16x256xf32, #tpu.memory_space<vmem>>, vector<16x256xf32>
    tpu.vector_store %arg7[%c0_6, %c0_7], %7 {strides = array<i32>} : memref<16x256xf32, #tpu.memory_space<vmem>>, vector<16x256xf32>,
    %c0_i32_8 = arith.constant 0 : i32
    %9 = arith.cmpi eq, %arg2, %c0_i32_8 : i32
    %10 = arith.extui %9 : i1 to i32
    %c0_i32_9 = arith.constant 0 : i32
    %11 = arith.cmpi ne, %10, %c0_i32_9 : i32
    scf.if %11 {
      %c0_10 = arith.constant 0 : index
      %c0_11 = arith.constant 0 : index
      %12 = vector.load %arg7[%c0_10, %c0_11] : memref<16x256xf32, #tpu.memory_space<vmem>>, vector<16x256xf32>
      %c0_12 = arith.constant 0 : index
      %c0_13 = arith.constant 0 : index
      %13 = vector.load %arg5[%c0_12, %c0_13] : memref<1x256xf32, #tpu.memory_space<vmem>>, vector<1x256xf32>
      %14 = vector.broadcast %13 : vector<1x256xf32> to vector<16x256xf32>
      %15 = arith.addf %12, %14 : vector<16x256xf32>
      %c0_14 = arith.constant 0 : index
      %c0_15 = arith.constant 0 : index
      %16 = vector.load %arg6[%c0_14, %c0_15] : memref<16x256xf32, #tpu.memory_space<vmem>>, vector<16x256xf32>
      tpu.vector_store %arg6[%c0_14, %c0_15], %15 {strides = array<i32>} : memref<16x256xf32, #tpu.memory_space<vmem>>, vector<16x256xf32>,
    } else {
    }
    return
  }
  func.func @transform_0(%arg0: i32, %arg1: i32, %arg2: i32) -> (i32, i32) {
    %c0_i32 = arith.constant 0 : i32
    return %arg0, %arg2 : i32, i32
  }
  func.func @transform_1(%arg0: i32, %arg1: i32, %arg2: i32) -> (i32, i32) {
    %c0_i32 = arith.constant 0 : i32
    return %arg2, %arg1 : i32, i32
  }
  func.func @transform_2(%arg0: i32, %arg1: i32, %arg2: i32) -> (i32, i32) {
    %c0_i32 = arith.constant 0 : i32
    %c0_i32_0 = arith.constant 0 : i32
    return %c0_i32, %arg1 : i32, i32
  }
  func.func @transform_3(%arg0: i32, %arg1: i32, %arg2: i32) -> (i32, i32) {
    %c0_i32 = arith.constant 0 : i32
    return %arg0, %arg1 : i32, i32
  }
}

module attributes {stable_mosaic.version = 11 : i64} {
  func.func @_add_relu_kernel(%arg0: i32, %arg1: memref<16x128xf32, #tpu.memory_space<vmem>>, %arg2: memref<16x128xf32, #tpu.memory_space<vmem>>, %arg3: memref<16x128xf32, #tpu.memory_space<vmem>>) attributes {dimension_semantics = [#tpu.dimension_semantics<parallel>], iteration_bounds = array<i64: 1>, scalar_prefetch = 0 : i64, scratch_operands = 0 : i64, tpu.core_type = #tpu.core_type<tc>, window_params = [{transform_indices = @transform_0, window_bounds = array<i64: 16, 128>}, {transform_indices = @transform_1, window_bounds = array<i64: 16, 128>}, {transform_indices = @transform_2, window_bounds = array<i64: 16, 128>}]} {
    %c0 = arith.constant 0 : index
    %c0_0 = arith.constant 0 : index
    %0 = vector.load %arg1[%c0, %c0_0] : memref<16x128xf32, #tpu.memory_space<vmem>>, vector<16x128xf32>
    %c0_1 = arith.constant 0 : index
    %c0_2 = arith.constant 0 : index
    %1 = vector.load %arg2[%c0_1, %c0_2] : memref<16x128xf32, #tpu.memory_space<vmem>>, vector<16x128xf32>
    %2 = arith.addf %0, %1 : vector<16x128xf32>
    %cst = arith.constant 0.000000e+00 : f32
    %3 = vector.broadcast %cst : f32 to vector<16x128xf32>
    %4 = arith.maximumf %2, %3 : vector<16x128xf32>
    %c0_3 = arith.constant 0 : index
    %c0_4 = arith.constant 0 : index
    %5 = vector.load %arg3[%c0_3, %c0_4] : memref<16x128xf32, #tpu.memory_space<vmem>>, vector<16x128xf32>
    tpu.vector_store %arg3[%c0_3, %c0_4], %4 {strides = array<i32>} : memref<16x128xf32, #tpu.memory_space<vmem>>, vector<16x128xf32>,
    return
  }
  func.func @transform_0(%arg0: i32) -> (i32, i32) {
    %c0_i32 = arith.constant 0 : i32
    %c0_i32_0 = arith.constant 0 : i32
    return %arg0, %c0_i32 : i32, i32
  }
  func.func @transform_1(%arg0: i32) -> (i32, i32) {
    %c0_i32 = arith.constant 0 : i32
    %c0_i32_0 = arith.constant 0 : i32
    return %arg0, %c0_i32 : i32, i32
  }
  func.func @transform_2(%arg0: i32) -> (i32, i32) {
    %c0_i32 = arith.constant 0 : i32
    %c0_i32_0 = arith.constant 0 : i32
    return %arg0, %c0_i32 : i32, i32
  }
}

module attributes {stable_mosaic.version = 11 : i64} {
  func.func @_conv_mm_kernel(%arg0: i32, %arg1: i32, %arg2: i32, %arg3: memref<16x384xbf16, #tpu.memory_space<vmem>>, %arg4: memref<384x256xbf16, #tpu.memory_space<vmem>>, %arg5: memref<1x256xf32, #tpu.memory_space<vmem>>, %arg6: memref<16x256xf32, #tpu.memory_space<vmem>>, %arg7: memref<16x256xf32, #tpu.memory_space<vmem>>) attributes {dimension_semantics = [#tpu.dimension_semantics<parallel>, #tpu.dimension_semantics<parallel>, #tpu.dimension_semantics<arbitrary>], iteration_bounds = array<i64: 1, 1, 6>, scalar_prefetch = 0 : i64, scratch_operands = 1 : i64, tpu.core_type = #tpu.core_type<tc>, window_params = [{transform_indices = @transform_0, window_bounds = array<i64: 16, 384>}, {transform_indices = @transform_1, window_bounds = array<i64: 384, 256>}, {transform_indices = @transform_2, window_bounds = array<i64: 1, 256>}, {transform_indices = @transform_3, window_bounds = array<i64: 16, 256>}]} {
    %c0_i32 = arith.constant 0 : i32
    %0 = arith.cmpi eq, %arg2, %c0_i32 : i32
    %1 = arith.extui %0 : i1 to i32
    %c0_i32_0 = arith.constant 0 : i32
    %2 = arith.cmpi ne, %1, %c0_i32_0 : i32
    scf.if %2 {
      %cst_9 = arith.constant 0.000000e+00 : f32
      %12 = vector.broadcast %cst_9 : f32 to vector<16x256xf32>
      %c0_10 = arith.constant 0 : index
      %c0_11 = arith.constant 0 : index
      %13 = vector.load %arg7[%c0_10, %c0_11] : memref<16x256xf32, #tpu.memory_space<vmem>>, vector<16x256xf32>
      tpu.vector_store %arg7[%c0_10, %c0_11], %12 {strides = array<i32>} : memref<16x256xf32, #tpu.memory_space<vmem>>, vector<16x256xf32>,
    } else {
    }
    %c0 = arith.constant 0 : index
    %c0_1 = arith.constant 0 : index
    %3 = vector.load %arg7[%c0, %c0_1] : memref<16x256xf32, #tpu.memory_space<vmem>>, vector<16x256xf32>
    %c0_2 = arith.constant 0 : index
    %c0_3 = arith.constant 0 : index
    %4 = vector.load %arg3[%c0_2, %c0_3] : memref<16x384xbf16, #tpu.memory_space<vmem>>, vector<16x384xbf16>
    %c0_4 = arith.constant 0 : index
    %c0_5 = arith.constant 0 : index
    %5 = vector.load %arg4[%c0_4, %c0_5] : memref<384x256xbf16, #tpu.memory_space<vmem>>, vector<384x256xbf16>
    %cst = arith.constant dense<0.000000e+00> : vector<16x256xf32>
    %6 = tpu.matmul %4, %5, %cst {dimension_numbers = #tpu.dot_dimension_numbers<[1], [0], [0], [1], [0, 0, 1, 1], [], []>} : vector<16x384xbf16>, vector<384x256xbf16>, vector<16x256xf32> -> vector<16x256xf32>
    %7 = arith.addf %3, %6 : vector<16x256xf32>
    %c0_6 = arith.constant 0 : index
    %c0_7 = arith.constant 0 : index
    %8 = vector.load %arg7[%c0_6, %c0_7] : memref<16x256xf32, #tpu.memory_space<vmem>>, vector<16x256xf32>
    tpu.vector_store %arg7[%c0_6, %c0_7], %7 {strides = array<i32>} : memref<16x256xf32, #tpu.memory_space<vmem>>, vector<16x256xf32>,
    %c5_i32 = arith.constant 5 : i32
    %9 = arith.cmpi eq, %arg2, %c5_i32 : i32
    %10 = arith.extui %9 : i1 to i32
    %c0_i32_8 = arith.constant 0 : i32
    %11 = arith.cmpi ne, %10, %c0_i32_8 : i32
    scf.if %11 {
      %c0_9 = arith.constant 0 : index
      %c0_10 = arith.constant 0 : index
      %12 = vector.load %arg7[%c0_9, %c0_10] : memref<16x256xf32, #tpu.memory_space<vmem>>, vector<16x256xf32>
      %c0_11 = arith.constant 0 : index
      %c0_12 = arith.constant 0 : index
      %13 = vector.load %arg5[%c0_11, %c0_12] : memref<1x256xf32, #tpu.memory_space<vmem>>, vector<1x256xf32>
      %14 = vector.broadcast %13 : vector<1x256xf32> to vector<16x256xf32>
      %15 = arith.addf %12, %14 : vector<16x256xf32>
      %cst_13 = arith.constant 0.000000e+00 : f32
      %16 = vector.broadcast %cst_13 : f32 to vector<16x256xf32>
      %17 = arith.maximumf %15, %16 : vector<16x256xf32>
      %c0_14 = arith.constant 0 : index
      %c0_15 = arith.constant 0 : index
      %18 = vector.load %arg6[%c0_14, %c0_15] : memref<16x256xf32, #tpu.memory_space<vmem>>, vector<16x256xf32>
      tpu.vector_store %arg6[%c0_14, %c0_15], %17 {strides = array<i32>} : memref<16x256xf32, #tpu.memory_space<vmem>>, vector<16x256xf32>,
    } else {
    }
    return
  }
  func.func @transform_0(%arg0: i32, %arg1: i32, %arg2: i32) -> (i32, i32) {
    %c0_i32 = arith.constant 0 : i32
    return %arg0, %arg2 : i32, i32
  }
  func.func @transform_1(%arg0: i32, %arg1: i32, %arg2: i32) -> (i32, i32) {
    %c0_i32 = arith.constant 0 : i32
    return %arg2, %arg1 : i32, i32
  }
  func.func @transform_2(%arg0: i32, %arg1: i32, %arg2: i32) -> (i32, i32) {
    %c0_i32 = arith.constant 0 : i32
    %c0_i32_0 = arith.constant 0 : i32
    return %c0_i32, %arg1 : i32, i32
  }
  func.func @transform_3(%arg0: i32, %arg1: i32, %arg2: i32) -> (i32, i32) {
    %c0_i32 = arith.constant 0 : i32
    return %arg0, %arg1 : i32, i32
  }
}

module attributes {stable_mosaic.version = 11 : i64} {
  func.func @_conv_mm_kernel(%arg0: i32, %arg1: i32, %arg2: i32, %arg3: memref<16x384xbf16, #tpu.memory_space<vmem>>, %arg4: memref<384x256xbf16, #tpu.memory_space<vmem>>, %arg5: memref<1x256xf32, #tpu.memory_space<vmem>>, %arg6: memref<16x256xf32, #tpu.memory_space<vmem>>, %arg7: memref<16x256xf32, #tpu.memory_space<vmem>>) attributes {dimension_semantics = [#tpu.dimension_semantics<parallel>, #tpu.dimension_semantics<parallel>, #tpu.dimension_semantics<arbitrary>], iteration_bounds = array<i64: 1, 2, 6>, scalar_prefetch = 0 : i64, scratch_operands = 1 : i64, tpu.core_type = #tpu.core_type<tc>, window_params = [{transform_indices = @transform_0, window_bounds = array<i64: 16, 384>}, {transform_indices = @transform_1, window_bounds = array<i64: 384, 256>}, {transform_indices = @transform_2, window_bounds = array<i64: 1, 256>}, {transform_indices = @transform_3, window_bounds = array<i64: 16, 256>}]} {
    %c0_i32 = arith.constant 0 : i32
    %0 = arith.cmpi eq, %arg2, %c0_i32 : i32
    %1 = arith.extui %0 : i1 to i32
    %c0_i32_0 = arith.constant 0 : i32
    %2 = arith.cmpi ne, %1, %c0_i32_0 : i32
    scf.if %2 {
      %cst_9 = arith.constant 0.000000e+00 : f32
      %12 = vector.broadcast %cst_9 : f32 to vector<16x256xf32>
      %c0_10 = arith.constant 0 : index
      %c0_11 = arith.constant 0 : index
      %13 = vector.load %arg7[%c0_10, %c0_11] : memref<16x256xf32, #tpu.memory_space<vmem>>, vector<16x256xf32>
      tpu.vector_store %arg7[%c0_10, %c0_11], %12 {strides = array<i32>} : memref<16x256xf32, #tpu.memory_space<vmem>>, vector<16x256xf32>,
    } else {
    }
    %c0 = arith.constant 0 : index
    %c0_1 = arith.constant 0 : index
    %3 = vector.load %arg7[%c0, %c0_1] : memref<16x256xf32, #tpu.memory_space<vmem>>, vector<16x256xf32>
    %c0_2 = arith.constant 0 : index
    %c0_3 = arith.constant 0 : index
    %4 = vector.load %arg3[%c0_2, %c0_3] : memref<16x384xbf16, #tpu.memory_space<vmem>>, vector<16x384xbf16>
    %c0_4 = arith.constant 0 : index
    %c0_5 = arith.constant 0 : index
    %5 = vector.load %arg4[%c0_4, %c0_5] : memref<384x256xbf16, #tpu.memory_space<vmem>>, vector<384x256xbf16>
    %cst = arith.constant dense<0.000000e+00> : vector<16x256xf32>
    %6 = tpu.matmul %4, %5, %cst {dimension_numbers = #tpu.dot_dimension_numbers<[1], [0], [0], [1], [0, 0, 1, 1], [], []>} : vector<16x384xbf16>, vector<384x256xbf16>, vector<16x256xf32> -> vector<16x256xf32>
    %7 = arith.addf %3, %6 : vector<16x256xf32>
    %c0_6 = arith.constant 0 : index
    %c0_7 = arith.constant 0 : index
    %8 = vector.load %arg7[%c0_6, %c0_7] : memref<16x256xf32, #tpu.memory_space<vmem>>, vector<16x256xf32>
    tpu.vector_store %arg7[%c0_6, %c0_7], %7 {strides = array<i32>} : memref<16x256xf32, #tpu.memory_space<vmem>>, vector<16x256xf32>,
    %c5_i32 = arith.constant 5 : i32
    %9 = arith.cmpi eq, %arg2, %c5_i32 : i32
    %10 = arith.extui %9 : i1 to i32
    %c0_i32_8 = arith.constant 0 : i32
    %11 = arith.cmpi ne, %10, %c0_i32_8 : i32
    scf.if %11 {
      %c0_9 = arith.constant 0 : index
      %c0_10 = arith.constant 0 : index
      %12 = vector.load %arg7[%c0_9, %c0_10] : memref<16x256xf32, #tpu.memory_space<vmem>>, vector<16x256xf32>
      %c0_11 = arith.constant 0 : index
      %c0_12 = arith.constant 0 : index
      %13 = vector.load %arg5[%c0_11, %c0_12] : memref<1x256xf32, #tpu.memory_space<vmem>>, vector<1x256xf32>
      %14 = vector.broadcast %13 : vector<1x256xf32> to vector<16x256xf32>
      %15 = arith.addf %12, %14 : vector<16x256xf32>
      %cst_13 = arith.constant 0.000000e+00 : f32
      %16 = vector.broadcast %cst_13 : f32 to vector<16x256xf32>
      %17 = arith.maximumf %15, %16 : vector<16x256xf32>
      %c0_14 = arith.constant 0 : index
      %c0_15 = arith.constant 0 : index
      %18 = vector.load %arg6[%c0_14, %c0_15] : memref<16x256xf32, #tpu.memory_space<vmem>>, vector<16x256xf32>
      tpu.vector_store %arg6[%c0_14, %c0_15], %17 {strides = array<i32>} : memref<16x256xf32, #tpu.memory_space<vmem>>, vector<16x256xf32>,
    } else {
    }
    return
  }
  func.func @transform_0(%arg0: i32, %arg1: i32, %arg2: i32) -> (i32, i32) {
    %c0_i32 = arith.constant 0 : i32
    return %arg0, %arg2 : i32, i32
  }
  func.func @transform_1(%arg0: i32, %arg1: i32, %arg2: i32) -> (i32, i32) {
    %c0_i32 = arith.constant 0 : i32
    return %arg2, %arg1 : i32, i32
  }
  func.func @transform_2(%arg0: i32, %arg1: i32, %arg2: i32) -> (i32, i32) {
    %c0_i32 = arith.constant 0 : i32
    %c0_i32_0 = arith.constant 0 : i32
    return %c0_i32, %arg1 : i32, i32
  }
  func.func @transform_3(%arg0: i32, %arg1: i32, %arg2: i32) -> (i32, i32) {
    %c0_i32 = arith.constant 0 : i32
    return %arg0, %arg1 : i32, i32
  }
}

module attributes {stable_mosaic.version = 11 : i64} {
  func.func @_conv_mm_kernel(%arg0: i32, %arg1: i32, %arg2: i32, %arg3: memref<16x512xbf16, #tpu.memory_space<vmem>>, %arg4: memref<512x256xbf16, #tpu.memory_space<vmem>>, %arg5: memref<1x256xf32, #tpu.memory_space<vmem>>, %arg6: memref<16x256xf32, #tpu.memory_space<vmem>>, %arg7: memref<16x256xf32, #tpu.memory_space<vmem>>) attributes {dimension_semantics = [#tpu.dimension_semantics<parallel>, #tpu.dimension_semantics<parallel>, #tpu.dimension_semantics<arbitrary>], iteration_bounds = array<i64: 1, 2, 9>, scalar_prefetch = 0 : i64, scratch_operands = 1 : i64, tpu.core_type = #tpu.core_type<tc>, window_params = [{transform_indices = @transform_0, window_bounds = array<i64: 16, 512>}, {transform_indices = @transform_1, window_bounds = array<i64: 512, 256>}, {transform_indices = @transform_2, window_bounds = array<i64: 1, 256>}, {transform_indices = @transform_3, window_bounds = array<i64: 16, 256>}]} {
    %c0_i32 = arith.constant 0 : i32
    %0 = arith.cmpi eq, %arg2, %c0_i32 : i32
    %1 = arith.extui %0 : i1 to i32
    %c0_i32_0 = arith.constant 0 : i32
    %2 = arith.cmpi ne, %1, %c0_i32_0 : i32
    scf.if %2 {
      %cst_9 = arith.constant 0.000000e+00 : f32
      %12 = vector.broadcast %cst_9 : f32 to vector<16x256xf32>
      %c0_10 = arith.constant 0 : index
      %c0_11 = arith.constant 0 : index
      %13 = vector.load %arg7[%c0_10, %c0_11] : memref<16x256xf32, #tpu.memory_space<vmem>>, vector<16x256xf32>
      tpu.vector_store %arg7[%c0_10, %c0_11], %12 {strides = array<i32>} : memref<16x256xf32, #tpu.memory_space<vmem>>, vector<16x256xf32>,
    } else {
    }
    %c0 = arith.constant 0 : index
    %c0_1 = arith.constant 0 : index
    %3 = vector.load %arg7[%c0, %c0_1] : memref<16x256xf32, #tpu.memory_space<vmem>>, vector<16x256xf32>
    %c0_2 = arith.constant 0 : index
    %c0_3 = arith.constant 0 : index
    %4 = vector.load %arg3[%c0_2, %c0_3] : memref<16x512xbf16, #tpu.memory_space<vmem>>, vector<16x512xbf16>
    %c0_4 = arith.constant 0 : index
    %c0_5 = arith.constant 0 : index
    %5 = vector.load %arg4[%c0_4, %c0_5] : memref<512x256xbf16, #tpu.memory_space<vmem>>, vector<512x256xbf16>
    %cst = arith.constant dense<0.000000e+00> : vector<16x256xf32>
    %6 = tpu.matmul %4, %5, %cst {dimension_numbers = #tpu.dot_dimension_numbers<[1], [0], [0], [1], [0, 0, 1, 1], [], []>} : vector<16x512xbf16>, vector<512x256xbf16>, vector<16x256xf32> -> vector<16x256xf32>
    %7 = arith.addf %3, %6 : vector<16x256xf32>
    %c0_6 = arith.constant 0 : index
    %c0_7 = arith.constant 0 : index
    %8 = vector.load %arg7[%c0_6, %c0_7] : memref<16x256xf32, #tpu.memory_space<vmem>>, vector<16x256xf32>
    tpu.vector_store %arg7[%c0_6, %c0_7], %7 {strides = array<i32>} : memref<16x256xf32, #tpu.memory_space<vmem>>, vector<16x256xf32>,
    %c8_i32 = arith.constant 8 : i32
    %9 = arith.cmpi eq, %arg2, %c8_i32 : i32
    %10 = arith.extui %9 : i1 to i32
    %c0_i32_8 = arith.constant 0 : i32
    %11 = arith.cmpi ne, %10, %c0_i32_8 : i32
    scf.if %11 {
      %c0_9 = arith.constant 0 : index
      %c0_10 = arith.constant 0 : index
      %12 = vector.load %arg7[%c0_9, %c0_10] : memref<16x256xf32, #tpu.memory_space<vmem>>, vector<16x256xf32>
      %c0_11 = arith.constant 0 : index
      %c0_12 = arith.constant 0 : index
      %13 = vector.load %arg5[%c0_11, %c0_12] : memref<1x256xf32, #tpu.memory_space<vmem>>, vector<1x256xf32>
      %14 = vector.broadcast %13 : vector<1x256xf32> to vector<16x256xf32>
      %15 = arith.addf %12, %14 : vector<16x256xf32>
      %c0_13 = arith.constant 0 : index
      %c0_14 = arith.constant 0 : index
      %16 = vector.load %arg6[%c0_13, %c0_14] : memref<16x256xf32, #tpu.memory_space<vmem>>, vector<16x256xf32>
      tpu.vector_store %arg6[%c0_13, %c0_14], %15 {strides = array<i32>} : memref<16x256xf32, #tpu.memory_space<vmem>>, vector<16x256xf32>,
    } else {
    }
    return
  }
  func.func @transform_0(%arg0: i32, %arg1: i32, %arg2: i32) -> (i32, i32) {
    %c0_i32 = arith.constant 0 : i32
    return %arg0, %arg2 : i32, i32
  }
  func.func @transform_1(%arg0: i32, %arg1: i32, %arg2: i32) -> (i32, i32) {
    %c0_i32 = arith.constant 0 : i32
    return %arg2, %arg1 : i32, i32
  }
  func.func @transform_2(%arg0: i32, %arg1: i32, %arg2: i32) -> (i32, i32) {
    %c0_i32 = arith.constant 0 : i32
    %c0_i32_0 = arith.constant 0 : i32
    return %c0_i32, %arg1 : i32, i32
  }
  func.func @transform_3(%arg0: i32, %arg1: i32, %arg2: i32) -> (i32, i32) {
    %c0_i32 = arith.constant 0 : i32
    return %arg0, %arg1 : i32, i32
  }
}

module attributes {stable_mosaic.version = 11 : i64} {
  func.func @_conv_mm_kernel(%arg0: i32, %arg1: i32, %arg2: i32, %arg3: memref<16x256xbf16, #tpu.memory_space<vmem>>, %arg4: memref<256x256xbf16, #tpu.memory_space<vmem>>, %arg5: memref<1x256xf32, #tpu.memory_space<vmem>>, %arg6: memref<16x256xf32, #tpu.memory_space<vmem>>, %arg7: memref<16x256xf32, #tpu.memory_space<vmem>>) attributes {dimension_semantics = [#tpu.dimension_semantics<parallel>, #tpu.dimension_semantics<parallel>, #tpu.dimension_semantics<arbitrary>], iteration_bounds = array<i64: 1, 2, 1>, scalar_prefetch = 0 : i64, scratch_operands = 1 : i64, tpu.core_type = #tpu.core_type<tc>, window_params = [{transform_indices = @transform_0, window_bounds = array<i64: 16, 256>}, {transform_indices = @transform_1, window_bounds = array<i64: 256, 256>}, {transform_indices = @transform_2, window_bounds = array<i64: 1, 256>}, {transform_indices = @transform_3, window_bounds = array<i64: 16, 256>}]} {
    %c0_i32 = arith.constant 0 : i32
    %0 = arith.cmpi eq, %arg2, %c0_i32 : i32
    %1 = arith.extui %0 : i1 to i32
    %c0_i32_0 = arith.constant 0 : i32
    %2 = arith.cmpi ne, %1, %c0_i32_0 : i32
    scf.if %2 {
      %cst_10 = arith.constant 0.000000e+00 : f32
      %12 = vector.broadcast %cst_10 : f32 to vector<16x256xf32>
      %c0_11 = arith.constant 0 : index
      %c0_12 = arith.constant 0 : index
      %13 = vector.load %arg7[%c0_11, %c0_12] : memref<16x256xf32, #tpu.memory_space<vmem>>, vector<16x256xf32>
      tpu.vector_store %arg7[%c0_11, %c0_12], %12 {strides = array<i32>} : memref<16x256xf32, #tpu.memory_space<vmem>>, vector<16x256xf32>,
    } else {
    }
    %c0 = arith.constant 0 : index
    %c0_1 = arith.constant 0 : index
    %3 = vector.load %arg7[%c0, %c0_1] : memref<16x256xf32, #tpu.memory_space<vmem>>, vector<16x256xf32>
    %c0_2 = arith.constant 0 : index
    %c0_3 = arith.constant 0 : index
    %4 = vector.load %arg3[%c0_2, %c0_3] : memref<16x256xbf16, #tpu.memory_space<vmem>>, vector<16x256xbf16>
    %c0_4 = arith.constant 0 : index
    %c0_5 = arith.constant 0 : index
    %5 = vector.load %arg4[%c0_4, %c0_5] : memref<256x256xbf16, #tpu.memory_space<vmem>>, vector<256x256xbf16>
    %cst = arith.constant dense<0.000000e+00> : vector<16x256xf32>
    %6 = tpu.matmul %4, %5, %cst {dimension_numbers = #tpu.dot_dimension_numbers<[1], [0], [0], [1], [0, 0, 1, 1], [], []>} : vector<16x256xbf16>, vector<256x256xbf16>, vector<16x256xf32> -> vector<16x256xf32>
    %7 = arith.addf %3, %6 : vector<16x256xf32>
    %c0_6 = arith.constant 0 : index
    %c0_7 = arith.constant 0 : index
    %8 = vector.load %arg7[%c0_6, %c0_7] : memref<16x256xf32, #tpu.memory_space<vmem>>, vector<16x256xf32>
    tpu.vector_store %arg7[%c0_6, %c0_7], %7 {strides = array<i32>} : memref<16x256xf32, #tpu.memory_space<vmem>>, vector<16x256xf32>,
    %c0_i32_8 = arith.constant 0 : i32
    %9 = arith.cmpi eq, %arg2, %c0_i32_8 : i32
    %10 = arith.extui %9 : i1 to i32
    %c0_i32_9 = arith.constant 0 : i32
    %11 = arith.cmpi ne, %10, %c0_i32_9 : i32
    scf.if %11 {
      %c0_10 = arith.constant 0 : index
      %c0_11 = arith.constant 0 : index
      %12 = vector.load %arg7[%c0_10, %c0_11] : memref<16x256xf32, #tpu.memory_space<vmem>>, vector<16x256xf32>
      %c0_12 = arith.constant 0 : index
      %c0_13 = arith.constant 0 : index
      %13 = vector.load %arg5[%c0_12, %c0_13] : memref<1x256xf32, #tpu.memory_space<vmem>>, vector<1x256xf32>
      %14 = vector.broadcast %13 : vector<1x256xf32> to vector<16x256xf32>
      %15 = arith.addf %12, %14 : vector<16x256xf32>
      %c0_14 = arith.constant 0 : index
      %c0_15 = arith.constant 0 : index
      %16 = vector.load %arg6[%c0_14, %c0_15] : memref<16x256xf32, #tpu.memory_space<vmem>>, vector<16x256xf32>
      tpu.vector_store %arg6[%c0_14, %c0_15], %15 {strides = array<i32>} : memref<16x256xf32, #tpu.memory_space<vmem>>, vector<16x256xf32>,
    } else {
    }
    return
  }
  func.func @transform_0(%arg0: i32, %arg1: i32, %arg2: i32) -> (i32, i32) {
    %c0_i32 = arith.constant 0 : i32
    return %arg0, %arg2 : i32, i32
  }
  func.func @transform_1(%arg0: i32, %arg1: i32, %arg2: i32) -> (i32, i32) {
    %c0_i32 = arith.constant 0 : i32
    return %arg2, %arg1 : i32, i32
  }
  func.func @transform_2(%arg0: i32, %arg1: i32, %arg2: i32) -> (i32, i32) {
    %c0_i32 = arith.constant 0 : i32
    %c0_i32_0 = arith.constant 0 : i32
    return %c0_i32, %arg1 : i32, i32
  }
  func.func @transform_3(%arg0: i32, %arg1: i32, %arg2: i32) -> (i32, i32) {
    %c0_i32 = arith.constant 0 : i32
    return %arg0, %arg1 : i32, i32
  }
}

module attributes {stable_mosaic.version = 11 : i64} {
  func.func @_add_relu_kernel(%arg0: i32, %arg1: memref<8x128xf32, #tpu.memory_space<vmem>>, %arg2: memref<8x128xf32, #tpu.memory_space<vmem>>, %arg3: memref<8x128xf32, #tpu.memory_space<vmem>>) attributes {dimension_semantics = [#tpu.dimension_semantics<parallel>], iteration_bounds = array<i64: 1>, scalar_prefetch = 0 : i64, scratch_operands = 0 : i64, tpu.core_type = #tpu.core_type<tc>, window_params = [{transform_indices = @transform_0, window_bounds = array<i64: 8, 128>}, {transform_indices = @transform_1, window_bounds = array<i64: 8, 128>}, {transform_indices = @transform_2, window_bounds = array<i64: 8, 128>}]} {
    %c0 = arith.constant 0 : index
    %c0_0 = arith.constant 0 : index
    %0 = vector.load %arg1[%c0, %c0_0] : memref<8x128xf32, #tpu.memory_space<vmem>>, vector<8x128xf32>
    %c0_1 = arith.constant 0 : index
    %c0_2 = arith.constant 0 : index
    %1 = vector.load %arg2[%c0_1, %c0_2] : memref<8x128xf32, #tpu.memory_space<vmem>>, vector<8x128xf32>
    %2 = arith.addf %0, %1 : vector<8x128xf32>
    %cst = arith.constant 0.000000e+00 : f32
    %3 = vector.broadcast %cst : f32 to vector<8x128xf32>
    %4 = arith.maximumf %2, %3 : vector<8x128xf32>
    %c0_3 = arith.constant 0 : index
    %c0_4 = arith.constant 0 : index
    %5 = vector.load %arg3[%c0_3, %c0_4] : memref<8x128xf32, #tpu.memory_space<vmem>>, vector<8x128xf32>
    tpu.vector_store %arg3[%c0_3, %c0_4], %4 {strides = array<i32>} : memref<8x128xf32, #tpu.memory_space<vmem>>, vector<8x128xf32>,
    return
  }
  func.func @transform_0(%arg0: i32) -> (i32, i32) {
    %c0_i32 = arith.constant 0 : i32
    %c0_i32_0 = arith.constant 0 : i32
    return %arg0, %c0_i32 : i32, i32
  }
  func.func @transform_1(%arg0: i32) -> (i32, i32) {
    %c0_i32 = arith.constant 0 : i32
    %c0_i32_0 = arith.constant 0 : i32
    return %arg0, %c0_i32 : i32, i32
  }
  func.func @transform_2(%arg0: i32) -> (i32, i32) {
    %c0_i32 = arith.constant 0 : i32
    %c0_i32_0 = arith.constant 0 : i32
    return %arg0, %c0_i32 : i32, i32
  }
}

module attributes {stable_mosaic.version = 11 : i64} {
  func.func @_conv_mm_kernel(%arg0: i32, %arg1: i32, %arg2: i32, %arg3: memref<16x512xbf16, #tpu.memory_space<vmem>>, %arg4: memref<512x256xbf16, #tpu.memory_space<vmem>>, %arg5: memref<1x256xf32, #tpu.memory_space<vmem>>, %arg6: memref<16x256xf32, #tpu.memory_space<vmem>>, %arg7: memref<16x256xf32, #tpu.memory_space<vmem>>) attributes {dimension_semantics = [#tpu.dimension_semantics<parallel>, #tpu.dimension_semantics<parallel>, #tpu.dimension_semantics<arbitrary>], iteration_bounds = array<i64: 1, 2, 9>, scalar_prefetch = 0 : i64, scratch_operands = 1 : i64, tpu.core_type = #tpu.core_type<tc>, window_params = [{transform_indices = @transform_0, window_bounds = array<i64: 16, 512>}, {transform_indices = @transform_1, window_bounds = array<i64: 512, 256>}, {transform_indices = @transform_2, window_bounds = array<i64: 1, 256>}, {transform_indices = @transform_3, window_bounds = array<i64: 16, 256>}]} {
    %c0_i32 = arith.constant 0 : i32
    %0 = arith.cmpi eq, %arg2, %c0_i32 : i32
    %1 = arith.extui %0 : i1 to i32
    %c0_i32_0 = arith.constant 0 : i32
    %2 = arith.cmpi ne, %1, %c0_i32_0 : i32
    scf.if %2 {
      %cst_9 = arith.constant 0.000000e+00 : f32
      %12 = vector.broadcast %cst_9 : f32 to vector<16x256xf32>
      %c0_10 = arith.constant 0 : index
      %c0_11 = arith.constant 0 : index
      %13 = vector.load %arg7[%c0_10, %c0_11] : memref<16x256xf32, #tpu.memory_space<vmem>>, vector<16x256xf32>
      tpu.vector_store %arg7[%c0_10, %c0_11], %12 {strides = array<i32>} : memref<16x256xf32, #tpu.memory_space<vmem>>, vector<16x256xf32>,
    } else {
    }
    %c0 = arith.constant 0 : index
    %c0_1 = arith.constant 0 : index
    %3 = vector.load %arg7[%c0, %c0_1] : memref<16x256xf32, #tpu.memory_space<vmem>>, vector<16x256xf32>
    %c0_2 = arith.constant 0 : index
    %c0_3 = arith.constant 0 : index
    %4 = vector.load %arg3[%c0_2, %c0_3] : memref<16x512xbf16, #tpu.memory_space<vmem>>, vector<16x512xbf16>
    %c0_4 = arith.constant 0 : index
    %c0_5 = arith.constant 0 : index
    %5 = vector.load %arg4[%c0_4, %c0_5] : memref<512x256xbf16, #tpu.memory_space<vmem>>, vector<512x256xbf16>
    %cst = arith.constant dense<0.000000e+00> : vector<16x256xf32>
    %6 = tpu.matmul %4, %5, %cst {dimension_numbers = #tpu.dot_dimension_numbers<[1], [0], [0], [1], [0, 0, 1, 1], [], []>} : vector<16x512xbf16>, vector<512x256xbf16>, vector<16x256xf32> -> vector<16x256xf32>
    %7 = arith.addf %3, %6 : vector<16x256xf32>
    %c0_6 = arith.constant 0 : index
    %c0_7 = arith.constant 0 : index
    %8 = vector.load %arg7[%c0_6, %c0_7] : memref<16x256xf32, #tpu.memory_space<vmem>>, vector<16x256xf32>
    tpu.vector_store %arg7[%c0_6, %c0_7], %7 {strides = array<i32>} : memref<16x256xf32, #tpu.memory_space<vmem>>, vector<16x256xf32>,
    %c8_i32 = arith.constant 8 : i32
    %9 = arith.cmpi eq, %arg2, %c8_i32 : i32
    %10 = arith.extui %9 : i1 to i32
    %c0_i32_8 = arith.constant 0 : i32
    %11 = arith.cmpi ne, %10, %c0_i32_8 : i32
    scf.if %11 {
      %c0_9 = arith.constant 0 : index
      %c0_10 = arith.constant 0 : index
      %12 = vector.load %arg7[%c0_9, %c0_10] : memref<16x256xf32, #tpu.memory_space<vmem>>, vector<16x256xf32>
      %c0_11 = arith.constant 0 : index
      %c0_12 = arith.constant 0 : index
      %13 = vector.load %arg5[%c0_11, %c0_12] : memref<1x256xf32, #tpu.memory_space<vmem>>, vector<1x256xf32>
      %14 = vector.broadcast %13 : vector<1x256xf32> to vector<16x256xf32>
      %15 = arith.addf %12, %14 : vector<16x256xf32>
      %cst_13 = arith.constant 0.000000e+00 : f32
      %16 = vector.broadcast %cst_13 : f32 to vector<16x256xf32>
      %17 = arith.maximumf %15, %16 : vector<16x256xf32>
      %c0_14 = arith.constant 0 : index
      %c0_15 = arith.constant 0 : index
      %18 = vector.load %arg6[%c0_14, %c0_15] : memref<16x256xf32, #tpu.memory_space<vmem>>, vector<16x256xf32>
      tpu.vector_store %arg6[%c0_14, %c0_15], %17 {strides = array<i32>} : memref<16x256xf32, #tpu.memory_space<vmem>>, vector<16x256xf32>,
    } else {
    }
    return
  }
  func.func @transform_0(%arg0: i32, %arg1: i32, %arg2: i32) -> (i32, i32) {
    %c0_i32 = arith.constant 0 : i32
    return %arg0, %arg2 : i32, i32
  }
  func.func @transform_1(%arg0: i32, %arg1: i32, %arg2: i32) -> (i32, i32) {
    %c0_i32 = arith.constant 0 : i32
    return %arg2, %arg1 : i32, i32
  }
  func.func @transform_2(%arg0: i32, %arg1: i32, %arg2: i32) -> (i32, i32) {
    %c0_i32 = arith.constant 0 : i32
    %c0_i32_0 = arith.constant 0 : i32
    return %c0_i32, %arg1 : i32, i32
  }
  func.func @transform_3(%arg0: i32, %arg1: i32, %arg2: i32) -> (i32, i32) {
    %c0_i32 = arith.constant 0 : i32
    return %arg0, %arg1 : i32, i32
  }
}

module attributes {stable_mosaic.version = 11 : i64} {
  func.func @_avgpool_kernel(%arg0: memref<8x1x512xf32, #tpu.memory_space<vmem>>, %arg1: memref<8x512xf32, #tpu.memory_space<vmem>>) attributes {dimension_semantics = [], scalar_prefetch = 0 : i64, scratch_operands = 0 : i64, tpu.core_type = #tpu.core_type<tc>} {
    %c0 = arith.constant 0 : index
    %c0_0 = arith.constant 0 : index
    %c0_1 = arith.constant 0 : index
    %0 = vector.load %arg0[%c0, %c0_0, %c0_1] : memref<8x1x512xf32, #tpu.memory_space<vmem>>, vector<8x1x512xf32>
    %cst = arith.constant dense<0.000000e+00> : vector<8x512xf32>
    %1 = vector.multi_reduction <add>, %0, %cst [1] : vector<8x1x512xf32> to vector<8x512xf32>
    %cst_2 = arith.constant 1.000000e+00 : f32
    %2 = vector.broadcast %cst_2 : f32 to vector<8x512xf32>
    %3 = arith.mulf %1, %2 : vector<8x512xf32>
    %c0_3 = arith.constant 0 : index
    %c0_4 = arith.constant 0 : index
    %4 = vector.load %arg1[%c0_3, %c0_4] : memref<8x512xf32, #tpu.memory_space<vmem>>, vector<8x512xf32>
    tpu.vector_store %arg1[%c0_3, %c0_4], %3 {strides = array<i32>} : memref<8x512xf32, #tpu.memory_space<vmem>>, vector<8x512xf32>,
    return
  }
}

module attributes {stable_mosaic.version = 11 : i64} {
  func.func @_fc_sigmoid_kernel(%arg0: memref<8x512xf32, #tpu.memory_space<vmem>>, %arg1: memref<512x128xf32, #tpu.memory_space<vmem>>, %arg2: memref<1x128xf32, #tpu.memory_space<vmem>>, %arg3: memref<8x128xf32, #tpu.memory_space<vmem>>, %arg4: memref<8x128xf32, #tpu.memory_space<vmem>>) attributes {dimension_semantics = [], scalar_prefetch = 0 : i64, scratch_operands = 0 : i64, tpu.core_type = #tpu.core_type<tc>} {
    %c0 = arith.constant 0 : index
    %c0_0 = arith.constant 0 : index
    %0 = vector.load %arg0[%c0, %c0_0] : memref<8x512xf32, #tpu.memory_space<vmem>>, vector<8x512xf32>
    %c0_1 = arith.constant 0 : index
    %c0_2 = arith.constant 0 : index
    %1 = vector.load %arg1[%c0_1, %c0_2] : memref<512x128xf32, #tpu.memory_space<vmem>>, vector<512x128xf32>
    %cst = arith.constant dense<0.000000e+00> : vector<8x128xf32>
    %2 = tpu.matmul %0, %1, %cst {dimension_numbers = #tpu.dot_dimension_numbers<[1], [0], [0], [1], [0, 0, 1, 1], [], []>} : vector<8x512xf32>, vector<512x128xf32>, vector<8x128xf32> -> vector<8x128xf32>
    %c0_3 = arith.constant 0 : index
    %c0_4 = arith.constant 0 : index
    %3 = vector.load %arg2[%c0_3, %c0_4] : memref<1x128xf32, #tpu.memory_space<vmem>>, vector<1x128xf32>
    %4 = vector.broadcast %3 : vector<1x128xf32> to vector<8x128xf32>
    %5 = arith.addf %2, %4 : vector<8x128xf32>
    %c0_5 = arith.constant 0 : index
    %c0_6 = arith.constant 0 : index
    %6 = vector.load %arg3[%c0_5, %c0_6] : memref<8x128xf32, #tpu.memory_space<vmem>>, vector<8x128xf32>
    tpu.vector_store %arg3[%c0_5, %c0_6], %5 {strides = array<i32>} : memref<8x128xf32, #tpu.memory_space<vmem>>, vector<8x128xf32>,
    %7 = arith.negf %5 : vector<8x128xf32>
    %8 = math.exp %7 : vector<8x128xf32>
    %cst_7 = arith.constant 1.000000e+00 : f32
    %9 = vector.broadcast %cst_7 : f32 to vector<8x128xf32>
    %10 = arith.addf %9, %8 : vector<8x128xf32>
    %11 = arith.divf %9, %10 : vector<8x128xf32>
    %c0_8 = arith.constant 0 : index
    %c0_9 = arith.constant 0 : index
    %12 = vector.load %arg4[%c0_8, %c0_9] : memref<8x128xf32, #tpu.memory_space<vmem>>, vector<8x128xf32>
    tpu.vector_store %arg4[%c0_8, %c0_9], %11 {strides = array<i32>} : memref<8x128xf32, #tpu.memory_space<vmem>>, vector<8x128xf32>,
    return
  }
}

</mosaic_0001>

<bundles_post_ra>
// kernel: _lambda_.32
= control target key start
LH: loop header
LB: loop body
LE: loop exit
PB: predicated region body
PF: predicated region fallthrough
CT: control target
= control target key end

     0   :  { %s470_s0 = inlined_call_operand.vmem [shape: f32[64,128], index: 0, kind: input, shape index: {}]   ;;  %s471_s1 = inlined_call_operand.vmem [shape: f32[64,128], index: 1, kind: input, shape index: {}]   ;;  %s472_s2 = inlined_call_operand.vmem [shape: f32[64,128], index: 2, kind: input, shape index: {}]   ;;  %s473_s3 = inlined_call_operand.vmem [shape: f32[64,128], index: 3, kind: input, shape index: {}]   ;;  %s474_s4 = inlined_call_operand.vmem [shape: f32[64,128], index: 4, kind: input, shape index: {}]   ;;  %s475_s5 = inlined_call_operand.vmem [shape: f32[64,128], index: 5, kind: input, shape index: {}]   ;;  %s476_s6 = inlined_call_operand.vmem [shape: f32[64,128], index: 6, kind: input, shape index: {}]   ;;  %s477_s7 = inlined_call_operand.vmem [shape: f32[64,128], index: 7, kind: input, shape index: {}]   ;;  %s478_s8 = inlined_call_operand.vmem [shape: f32[64,128], index: 8, kind: input, shape index: {}]   ;;  %s479_s9 = inlined_call_operand.vmem [shape: f32[64,128], index: 9, kind: output, shape index: {}]  }
   0x1   :  { %v32_v0 = vld [vmem:[%s470_s0] sm:$0xff]  ;;  %v33_v6 = vld [vmem:[%s470_s0 + $0x8] sm:$0xff]  ;;  %v34_v15 = vld [vmem:[%s470_s0 + $0x10] sm:$0xff] }
   0x2   :  { %v40_v1 = vld [vmem:[%s471_s1] sm:$0xff]  ;;  %v41_v7 = vld [vmem:[%s471_s1 + $0x8] sm:$0xff]  ;;  %v42_v16 = vld [vmem:[%s471_s1 + $0x10] sm:$0xff] }
   0x3   :  { %v56_v2 = vld [vmem:[%s472_s2] sm:$0xff]  ;;  %v48_v3 = vmax.f32 %v32_v0, %v40_v1  ;;  %v57_v8 = vld [vmem:[%s472_s2 + $0x8] sm:$0xff]  ;;  %v49_v10 = vmax.f32 %v33_v6, %v41_v7  ;;  %v58_v17 = vld [vmem:[%s472_s2 + $0x10] sm:$0xff]  ;;  %v50_v20 = vmax.f32 %v34_v15, %v42_v16 }
   0x4   :  { %v72_v4 = vld [vmem:[%s473_s3] sm:$0xff]  ;;  %v73_v13 = vld [vmem:[%s473_s3 + $0x8] sm:$0xff]  ;;  %v74_v24 = vld [vmem:[%s473_s3 + $0x10] sm:$0xff] }
   0x5   :  { %v64_v5 = vmax.f32 %v48_v3, %v56_v2  ;;  %v88_v9 = vld [vmem:[%s474_s4] sm:$0xff]  ;;  %v65_v14 = vmax.f32 %v49_v10, %v57_v8  ;;  %v89_v19 = vld [vmem:[%s474_s4 + $0x8] sm:$0xff]  ;;  %v66_v26 = vmax.f32 %v50_v20, %v58_v17  ;;  %v35_v27 = vld [vmem:[%s470_s0 + $0x18] sm:$0xff] }
   0x6   :  { %v104_v12 = vld [vmem:[%s475_s5] sm:$0xff]  ;;  %v105_v23 = vld [vmem:[%s475_s5 + $0x8] sm:$0xff]  ;;  %v43_v28 = vld [vmem:[%s471_s1 + $0x18] sm:$0xff] }
   0x7   :  { %v80_v11 = vmax.f32 %v64_v5, %v72_v4  ;;  %v120_v21 = vld [vmem:[%s476_s6] sm:$0xff]  ;;  %v81_v22 = vmax.f32 %v65_v14, %v73_v13  ;;  %v59_v29 = vld [vmem:[%s472_s2 + $0x18] sm:$0xff]  ;;  %v90_v33 = vld [vmem:[%s474_s4 + $0x10] sm:$0xff]  ;;  %v51_v34 = vmax.f32 %v35_v27, %v43_v28  ;;  %v82_v37 = vmax.f32 %v66_v26, %v74_v24 }
   0x8   :  { %v136_v30 = vld [vmem:[%s477_s7] sm:$0xff]  ;;  %v121_v36 = vld [vmem:[%s476_s6 + $0x8] sm:$0xff]  ;;  %v106_v38 = vld [vmem:[%s475_s5 + $0x10] sm:$0xff] }
   0x9   :  { %v96_v18 = vmax.f32 %v80_v11, %v88_v9  ;;  %v152_v31 = vld [vmem:[%s478_s8] sm:$0xff]  ;;  %v97_v32 = vmax.f32 %v81_v22, %v89_v19  ;;  %v75_v39 = vld [vmem:[%s473_s3 + $0x18] sm:$0xff]  ;;  %v67_v41 = vmax.f32 %v51_v34, %v59_v29  ;;  %v137_v46 = vld [vmem:[%s477_s7 + $0x8] sm:$0xff]  ;;  %v98_v48 = vmax.f32 %v82_v37, %v90_v33 }
   0xa   :  { %v36_v42 = vld [vmem:[%s470_s0 + $0x20] sm:$0xff]  ;;  %v153_v47 = vld [vmem:[%s478_s8 + $0x8] sm:$0xff]  ;;  %v91_v49 = vld [vmem:[%s474_s4 + $0x18] sm:$0xff] }
   0xb   :  { %v112_v25 = vmax.f32 %v96_v18, %v104_v12  ;;  %v113_v40 = vmax.f32 %v97_v32, %v105_v23  ;;  %v44_v43 = vld [vmem:[%s471_s1 + $0x20] sm:$0xff]  ;;  %v122_v52 = vld [vmem:[%s476_s6 + $0x10] sm:$0xff]  ;;  %v83_v53 = vmax.f32 %v67_v41, %v75_v39  ;;  %v107_v54 = vld [vmem:[%s475_s5 + $0x18] sm:$0xff]  ;;  %v114_v57 = vmax.f32 %v98_v48, %v106_v38 }
   0xc   :  { %v60_v44 = vld [vmem:[%s472_s2 + $0x20] sm:$0xff]  ;;  %v52_v50 = vmax.f32 %v36_v42, %v44_v43  ;;  %v37_v59 = vld [vmem:[%s470_s0 + $0x28] sm:$0xff]  ;;  %v138_v63 = vld [vmem:[%s477_s7 + $0x10] sm:$0xff] }
   0xd   :  { %v128_v35 = vmax.f32 %v112_v25, %v120_v21  ;;  %v129_v51 = vmax.f32 %v113_v40, %v121_v36  ;;  %v76_v55 = vld [vmem:[%s473_s3 + $0x20] sm:$0xff]  ;;  %v45_v60 = vld [vmem:[%s471_s1 + $0x28] sm:$0xff]  ;;  %v154_v0 = vld [vmem:[%s478_s8 + $0x10] sm:$0xff]  ;;  %v99_v1 = vmax.f32 %v83_v53, %v91_v49  ;;  %v130_v4 = vmax.f32 %v114_v57, %v122_v52 }
   0xe   :  { %v68_v58 = vmax.f32 %v52_v50, %v60_v44  ;;  %v61_v61 = vld [vmem:[%s472_s2 + $0x28] sm:$0xff]  ;;  %v92_v2 = vld [vmem:[%s474_s4 + $0x20] sm:$0xff]  ;;  %v53_v3 = vmax.f32 %v37_v59, %v45_v60  ;;  %v123_v5 = vld [vmem:[%s476_s6 + $0x18] sm:$0xff] }
   0xf   :  { %v144_v45 = vmax.f32 %v128_v35, %v136_v30  ;;  %v145_v62 = vmax.f32 %v129_v51, %v137_v46  ;;  %v108_v7 = vld [vmem:[%s475_s5 + $0x20] sm:$0xff]  ;;  %v77_v8 = vld [vmem:[%s473_s3 + $0x28] sm:$0xff]  ;;  %v115_v10 = vmax.f32 %v99_v1, %v107_v54  ;;  %v38_v12 = vld [vmem:[%s470_s0 + $0x30] sm:$0xff]  ;;  %v146_v15 = vmax.f32 %v130_v4, %v138_v63 }
  0x10   :  { %v84_v6 = vmax.f32 %v68_v58, %v76_v55  ;;  %v69_v11 = vmax.f32 %v53_v3, %v61_v61  ;;  %v46_v13 = vld [vmem:[%s471_s1 + $0x30] sm:$0xff]  ;;  %v139_v16 = vld [vmem:[%s477_s7 + $0x18] sm:$0xff]  ;;  %v93_v19 = vld [vmem:[%s474_s4 + $0x28] sm:$0xff] }
  0x11   :  { %v160_v56 = vmax.f32 %v144_v45, %v152_v31  ;;  %v161_v9 = vmax.f32 %v145_v62, %v153_v47  ;;  %v62_v14 = vld [vmem:[%s472_s2 + $0x30] sm:$0xff]  ;;  %v155_v17 = vld [vmem:[%s478_s8 + $0x18] sm:$0xff]  ;;  %v54_v20 = vmax.f32 %v38_v12, %v46_v13  ;;  %v131_v21 = vmax.f32 %v115_v10, %v123_v5  ;;  %v124_v22 = vld [vmem:[%s476_s6 + $0x20] sm:$0xff] }
  0x12   :  { %v100_v18 = vmax.f32 %v84_v6, %v92_v2  ;;  %v85_v23 = vmax.f32 %v69_v11, %v77_v8  ;;  %v109_v24 = vld [vmem:[%s475_s5 + $0x28] sm:$0xff]  ;;  %v78_v25 = vld [vmem:[%s473_s3 + $0x30] sm:$0xff]  ;;  %v162_v26 = vmax.f32 %v146_v15, %v154_v0  ;;  %v39_v29 = vld [vmem:[%s470_s0 + $0x38] sm:$0xff] }
  0x13   :  { %168 = vst [vmem:[%s479_s9] sm:$0xff] %v160_v56  ;;  %v70_v28 = vmax.f32 %v54_v20, %v62_v14  ;;  %v47_v30 = vld [vmem:[%s471_s1 + $0x38] sm:$0xff]  ;;  %v147_v32 = vmax.f32 %v131_v21, %v139_v16  ;;  %v140_v33 = vld [vmem:[%s477_s7 + $0x20] sm:$0xff]  ;;  %v94_v35 = vld [vmem:[%s474_s4 + $0x30] sm:$0xff] }
  0x14   :  { %169 = vst [vmem:[%s479_s9 + $0x8] sm:$0xff] %v161_v9  ;;  %v116_v27 = vmax.f32 %v100_v18, %v108_v7  ;;  %v63_v31 = vld [vmem:[%s472_s2 + $0x38] sm:$0xff]  ;;  %v101_v34 = vmax.f32 %v85_v23, %v93_v19  ;;  %v55_v36 = vmax.f32 %v39_v29, %v47_v30  ;;  %v125_v38 = vld [vmem:[%s476_s6 + $0x28] sm:$0xff]  ;;  %v156_v42 = vld [vmem:[%s478_s8 + $0x20] sm:$0xff] }
  0x15   :  { %170 = vst [vmem:[%s479_s9 + $0x10] sm:$0xff] %v162_v26  ;;  %v86_v39 = vmax.f32 %v70_v28, %v78_v25  ;;  %v79_v40 = vld [vmem:[%s473_s3 + $0x38] sm:$0xff]  ;;  %v163_v41 = vmax.f32 %v147_v32, %v155_v17  ;;  %v110_v44 = vld [vmem:[%s475_s5 + $0x30] sm:$0xff]  ;;  %v141_v47 = vld [vmem:[%s477_s7 + $0x28] sm:$0xff] }
  0x16   :  { %v132_v37 = vmax.f32 %v116_v27, %v124_v22  ;;  %v117_v43 = vmax.f32 %v101_v34, %v109_v24  ;;  %v71_v45 = vmax.f32 %v55_v36, %v63_v31  ;;  %v95_v49 = vld [vmem:[%s474_s4 + $0x38] sm:$0xff]  ;;  %v126_v51 = vld [vmem:[%s476_s6 + $0x30] sm:$0xff]  ;;  %v157_v54 = vld [vmem:[%s478_s8 + $0x28] sm:$0xff] }
  0x17   :  { %v102_v48 = vmax.f32 %v86_v39, %v94_v35  ;;  %171 = vst [vmem:[%s479_s9 + $0x18] sm:$0xff] %v163_v41  ;;  %v111_v56 = vld [vmem:[%s475_s5 + $0x38] sm:$0xff]  ;;  %v142_v58 = vld [vmem:[%s477_s7 + $0x30] sm:$0xff] }
  0x18   :  { %v148_v46 = vmax.f32 %v132_v37, %v140_v33  ;;  %v133_v50 = vmax.f32 %v117_v43, %v125_v38  ;;  %v87_v52 = vmax.f32 %v71_v45, %v79_v40  ;;  %v127_v61 = vld [vmem:[%s476_s6 + $0x38] sm:$0xff]  ;;  %v158_v63 = vld [vmem:[%s478_s8 + $0x30] sm:$0xff] }
  0x19   :  { %v118_v55 = vmax.f32 %v102_v48, %v110_v44  ;;  %v143_v2 = vld [vmem:[%s477_s7 + $0x38] sm:$0xff] }
  0x1a   :  { %v164_v53 = vmax.f32 %v148_v46, %v156_v42  ;;  %v149_v57 = vmax.f32 %v133_v50, %v141_v47  ;;  %v103_v59 = vmax.f32 %v87_v52, %v95_v49  ;;  %v159_v5 = vld [vmem:[%s478_s8 + $0x38] sm:$0xff] }
  0x1b   :  { %v134_v60 = vmax.f32 %v118_v55, %v126_v51 }
  0x1c   :  { %172 = vst [vmem:[%s479_s9 + $0x20] sm:$0xff] %v164_v53  ;;  %v165_v62 = vmax.f32 %v149_v57, %v157_v54  ;;  %v119_v0 = vmax.f32 %v103_v59, %v111_v56 }
  0x1d   :  { %v150_v1 = vmax.f32 %v134_v60, %v142_v58 }
  0x1e   :  { %173 = vst [vmem:[%s479_s9 + $0x28] sm:$0xff] %v165_v62  ;;  %v135_v3 = vmax.f32 %v119_v0, %v127_v61 }
  0x1f   :  { %v166_v4 = vmax.f32 %v150_v1, %v158_v63 }
  0x20   :  { %v151_v6 = vmax.f32 %v135_v3, %v143_v2 }
  0x21   :  { %174 = vst [vmem:[%s479_s9 + $0x30] sm:$0xff] %v166_v4 }
  0x22   :  { %v167_v7 = vmax.f32 %v151_v6, %v159_v5 }
  0x24   :  { %175 = vst [vmem:[%s479_s9 + $0x38] sm:$0xff] %v167_v7 }

// kernel: _lambda_.31
= control target key start
LH: loop header
LB: loop body
LE: loop exit
PB: predicated region body
PF: predicated region fallthrough
CT: control target
= control target key end

     0   :  { %s1486_s12 = smov 0   ;;  %s1488_s13 = smov 0   ;;  %s1714_s0 = inlined_call_operand.vmem [shape: bf16[512,256], index: 0, kind: input, shape index: {}]   ;;  %s1715_s1 = inlined_call_operand.vmem [shape: bf16[256,128], index: 1, kind: input, shape index: {}]   ;;  %s1716_s2 = inlined_call_operand.vmem [shape: f32[1,128], index: 2, kind: input, shape index: {}]   ;;  %s1717_s3 = inlined_call_operand.vmem [shape: f32[512,128], index: 3, kind: output, shape index: {}]  }
   0x1   :  { %s1490_s14 = smov 0  }
   0x2 LB: > { %s32_s15 = sadd.s32 1, %s1460_s13  ;;  %p1152_p0 = scmp.ge.s32.totalorder %s1464_s14, 1  ;;  %s1464_s14 = sphi %s1490_s14, %s13_s14   ;;  %s1460_s13 = sphi %s1488_s13, %s1719_s13   ;;  %s1456_s12 = sphi %s1486_s12, %s1718_s12  }
   0x3   : > { %p34_p1 = scmp.ge.s32.totalorder %s32_s15, 2  ;;  %p191_p2 = scmp.lt.s32.totalorder %s1464_s14, 3 }
   0x5   : > { %s1721_s15 = smov (%p34_p1, %s32_s15), 0  ;;  %p192_p3 = pnand %p1152_p0, %p191_p2 }
   0x6   : > { %s1153_s28 = sshll.u32 (!%p192_p3), %s1456_s12, 5 }
   0x7   : > { %195 = sbr.rel (%p192_p3) target bundleno = 304 (0x130), region = 32  ;;  %p236_p4 = scmp.lt.s32.totalorder (!%p192_p3), %s1153_s28, 63 }
   0xc   : > { %v1392_v0 = vld [vmem:[%s1715_s1 + $0x38] sm:$0xff]  ;;  %v1391_v2 = vld [vmem:[%s1715_s1 + $0x30] sm:$0xff]  ;;  %v1390_v4 = vld [vmem:[%s1715_s1 + $0x28] sm:$0xff]  ;;  %s1723_s28 = smov (!%p236_p4, %s1153_s28), 63 }
   0xd   : > { %v1400_v1 = vld [vmem:[%s1715_s1 + $0x78] sm:$0xff]  ;;  %655 = vmatpush.bf16.msra.mxu0 %v1392_v0  ;;  %1401 = vmatpush.bf16.msra.mxu2 %v1392_v0  ;;  %v1399_v3 = vld [vmem:[%s1715_s1 + $0x70] sm:$0xff]  ;;  %v1398_v5 = vld [vmem:[%s1715_s1 + $0x68] sm:$0xff]  ;;  %s1352_s17 = sshll.u32 %s1723_s28, 3 }
   0xe   : > { %744 = vmatpush.bf16.msra.mxu1 %v1400_v1  ;;  %1409 = vmatpush.bf16.msra.mxu3 %v1400_v1  ;;  %v1389_v6 = vld [vmem:[%s1715_s1 + $0x20] sm:$0xff]  ;;  %v1388_v8 = vld [vmem:[%s1715_s1 + $0x18] sm:$0xff]  ;;  %v1387_v10 = vld [vmem:[%s1715_s1 + $0x10] sm:$0xff]  ;;  %s1554_s22 = scalar_lea.vmem %s1714_s0, %s1352_s17  ;;  %s1640_s7 = scalar_lea.vmem %s1717_s3, %s1352_s17 }
   0xf   : > { %v1397_v7 = vld [vmem:[%s1715_s1 + $0x60] sm:$0xff]  ;;  %v1396_v9 = vld [vmem:[%s1715_s1 + $0x58] sm:$0xff]  ;;  %v1395_v11 = vld [vmem:[%s1715_s1 + $0x50] sm:$0xff] }
  0x10   : > { %v1386_v12 = vld [vmem:[%s1715_s1 + $0x8] sm:$0xff]  ;;  %v1385_v14 = vld [vmem:[%s1715_s1] sm:$0xff]  ;;  %v1168_v28 = vld [vmem:[%s1554_s22 + $0x10] sm:$0xf] }
  0x11   : > { %656 = vmatpush.bf16.msra.mxu0 %v1391_v2  ;;  %1402 = vmatpush.bf16.msra.mxu2 %v1391_v2  ;;  %v1394_v13 = vld [vmem:[%s1715_s1 + $0x48] sm:$0xff]  ;;  %v1393_v15 = vld [vmem:[%s1715_s1 + $0x40] sm:$0xff]  ;;  %v1356_v29 = vld [vmem:[%s1554_s22 + $0x14] sm:$0xf0] }
  0x12   : > { %745 = vmatpush.bf16.msra.mxu1 %v1399_v3  ;;  %1410 = vmatpush.bf16.msra.mxu3 %v1399_v3  ;;  %v1160_v16 = vld [vmem:[%s1554_s22] sm:$0xf]  ;;  %v1354_v17 = vld [vmem:[%s1554_s22 + $0x4] sm:$0xf0]  ;;  %v1353_v20 = vld [vmem:[%s1554_s22 + $0x4] sm:$0xf]  ;;  %v1169_v36 = vor.u32 %v1356_v29, %v1168_v28 }
  0x13   : > { %v1224_v18 = vld [vmem:[%s1554_s22 + $0x80] sm:$0xf]  ;;  %v1370_v19 = vld [vmem:[%s1554_s22 + $0x84] sm:$0xf0]  ;;  %v1162_v21 = vld [vmem:[%s1554_s22 + $0x8] sm:$0xf0]  ;;  %v1161_v24 = vor.u32 %v1354_v17, %v1160_v16 }
  0x14   : > { %v1369_v22 = vld [vmem:[%s1554_s22 + $0x84] sm:$0xf]  ;;  %v1226_v23 = vld [vmem:[%s1554_s22 + $0x88] sm:$0xf0]  ;;  %v1225_v25 = vor.u32 %v1370_v19, %v1224_v18  ;;  %v1165_v26 = vor.u32 %v1353_v20, %v1162_v21  ;;  %v1232_v30 = vld [vmem:[%s1554_s22 + $0x90] sm:$0xf] }
  0x15   : > { %657 = vmatpush.bf16.msra.mxu0 %v1390_v4  ;;  %1403 = vmatpush.bf16.msra.mxu2 %v1390_v4  ;;  %v1229_v27 = vor.u32 %v1369_v22, %v1226_v23  ;;  %v1372_v31 = vld [vmem:[%s1554_s22 + $0x94] sm:$0xf0]  ;;  %v1355_v32 = vld [vmem:[%s1554_s22 + $0x14] sm:$0xf]  ;;  %v1170_v33 = vld [vmem:[%s1554_s22 + $0x18] sm:$0xf0] }
  0x16   : > { %746 = vmatpush.bf16.msra.mxu1 %v1398_v5  ;;  %1411 = vmatpush.bf16.msra.mxu3 %v1398_v5  ;;  %v1371_v34 = vld [vmem:[%s1554_s22 + $0x94] sm:$0xf]  ;;  %v1234_v35 = vld [vmem:[%s1554_s22 + $0x98] sm:$0xf0]  ;;  %v1233_v37 = vor.u32 %v1372_v31, %v1232_v30  ;;  %v1173_v38 = vor.u32 %v1355_v32, %v1170_v33  ;;  %v1176_v40 = vld [vmem:[%s1554_s22 + $0x20] sm:$0xf] }
  0x17   : > { %v1237_v39 = vor.u32 %v1371_v34, %v1234_v35  ;;  %v1358_v41 = vld [vmem:[%s1554_s22 + $0x24] sm:$0xf0]  ;;  %v1240_v42 = vld [vmem:[%s1554_s22 + $0xa0] sm:$0xf]  ;;  %v1357_v44 = vld [vmem:[%s1554_s22 + $0x24] sm:$0xf] }
  0x18   : > { %v1374_v43 = vld [vmem:[%s1554_s22 + $0xa4] sm:$0xf0]  ;;  %v1178_v45 = vld [vmem:[%s1554_s22 + $0x28] sm:$0xf0]  ;;  %v1373_v46 = vld [vmem:[%s1554_s22 + $0xa4] sm:$0xf]  ;;  %v1177_v48 = vor.u32 %v1358_v41, %v1176_v40 }
  0x19   : > { %658 = vmatpush.bf16.msra.mxu0 %v1389_v6  ;;  %1404 = vmatpush.bf16.msra.mxu2 %v1389_v6  ;;  %v1242_v47 = vld [vmem:[%s1554_s22 + $0xa8] sm:$0xf0]  ;;  %v1241_v49 = vor.u32 %v1374_v43, %v1240_v42  ;;  %v1181_v50 = vor.u32 %v1357_v44, %v1178_v45  ;;  %v1184_v52 = vld [vmem:[%s1554_s22 + $0x30] sm:$0xf]  ;;  %v1360_v53 = vld [vmem:[%s1554_s22 + $0x34] sm:$0xf0] }
  0x1a   : > { %747 = vmatpush.bf16.msra.mxu1 %v1397_v7  ;;  %1412 = vmatpush.bf16.msra.mxu3 %v1397_v7  ;;  %v1245_v51 = vor.u32 %v1373_v46, %v1242_v47  ;;  %v1248_v54 = vld [vmem:[%s1554_s22 + $0xb0] sm:$0xf]  ;;  %v1376_v55 = vld [vmem:[%s1554_s22 + $0xb4] sm:$0xf0]  ;;  %v1359_v56 = vld [vmem:[%s1554_s22 + $0x34] sm:$0xf]  ;;  %v1185_v60 = vor.u32 %v1360_v53, %v1184_v52 }
  0x1b   : > { %v1186_v57 = vld [vmem:[%s1554_s22 + $0x38] sm:$0xf0]  ;;  %v1375_v58 = vld [vmem:[%s1554_s22 + $0xb4] sm:$0xf]  ;;  %v1249_v61 = vor.u32 %v1376_v55, %v1248_v54  ;;  %v1192_v0 = vld [vmem:[%s1554_s22 + $0x40] sm:$0xf] }
  0x1c   : > { %v1250_v59 = vld [vmem:[%s1554_s22 + $0xb8] sm:$0xf0]  ;;  %v1189_v62 = vor.u32 %v1359_v56, %v1186_v57  ;;  %v1362_v1 = vld [vmem:[%s1554_s22 + $0x44] sm:$0xf0]  ;;  %v1256_v2 = vld [vmem:[%s1554_s22 + $0xc0] sm:$0xf] }
  0x1d   : > { %659 = vmatpush.bf16.msra.mxu0 %v1388_v8  ;;  %1405 = vmatpush.bf16.msra.mxu2 %v1388_v8  ;;  %v1253_v63 = vor.u32 %v1375_v58, %v1250_v59  ;;  %v1378_v3 = vld [vmem:[%s1554_s22 + $0xc4] sm:$0xf0]  ;;  %v1361_v4 = vld [vmem:[%s1554_s22 + $0x44] sm:$0xf]  ;;  %v1194_v5 = vld [vmem:[%s1554_s22 + $0x48] sm:$0xf0]  ;;  %v1193_v8 = vor.u32 %v1362_v1, %v1192_v0 }
  0x1e   : > { %748 = vmatpush.bf16.msra.mxu1 %v1396_v9  ;;  %1413 = vmatpush.bf16.msra.mxu3 %v1396_v9  ;;  %v1377_v6 = vld [vmem:[%s1554_s22 + $0xc4] sm:$0xf]  ;;  %v1258_v7 = vld [vmem:[%s1554_s22 + $0xc8] sm:$0xf0]  ;;  %v1257_v9 = vor.u32 %v1378_v3, %v1256_v2  ;;  %v1363_v16 = vld [vmem:[%s1554_s22 + $0x54] sm:$0xf] }
  0x1f   : > { %v1202_v17 = vld [vmem:[%s1554_s22 + $0x58] sm:$0xf0]  ;;  %v1379_v18 = vld [vmem:[%s1554_s22 + $0xd4] sm:$0xf]  ;;  %v1365_v28 = vld [vmem:[%s1554_s22 + $0x64] sm:$0xf] }
  0x20   : > { %v1266_v19 = vld [vmem:[%s1554_s22 + $0xd8] sm:$0xf0]  ;;  %v1205_v22 = vor.u32 %v1363_v16, %v1202_v17  ;;  %v1210_v29 = vld [vmem:[%s1554_s22 + $0x68] sm:$0xf0]  ;;  %v1381_v30 = vld [vmem:[%s1554_s22 + $0xe4] sm:$0xf] }
  0x21   : > { %660 = vmatpush.bf16.msra.mxu0 %v1387_v10  ;;  %1406 = vmatpush.bf16.msra.mxu2 %v1387_v10  ;;  %v1197_v10 = vor.u32 %v1361_v4, %v1194_v5  ;;  %v1269_v23 = vor.u32 %v1379_v18, %v1266_v19  ;;  %v1274_v31 = vld [vmem:[%s1554_s22 + $0xe8] sm:$0xf0]  ;;  %v1213_v34 = vor.u32 %v1365_v28, %v1210_v29  ;;  %v1367_v40 = vld [vmem:[%s1554_s22 + $0x74] sm:$0xf]  ;;  %v1218_v41 = vld [vmem:[%s1554_s22 + $0x78] sm:$0xf0] }
  0x22   : > { %749 = vmatpush.bf16.msra.mxu1 %v1395_v11  ;;  %1414 = vmatpush.bf16.msra.mxu3 %v1395_v11  ;;  %v1261_v11 = vor.u32 %v1377_v6, %v1258_v7  ;;  %v1277_v35 = vor.u32 %v1381_v30, %v1274_v31  ;;  %v1383_v42 = vld [vmem:[%s1554_s22 + $0xf4] sm:$0xf]  ;;  %v1282_v43 = vld [vmem:[%s1554_s22 + $0xf8] sm:$0xf0]  ;;  %v1221_v46 = vor.u32 %v1367_v40, %v1218_v41 }
  0x23   : > { %v1285_v47 = vor.u32 %v1383_v42, %v1282_v43 }
  0x25   : > { %661 = vmatpush.bf16.msra.mxu0 %v1386_v12  ;;  %1407 = vmatpush.bf16.msra.mxu2 %v1386_v12  ;;  %v1200_v12 = vld [vmem:[%s1554_s22 + $0x50] sm:$0xf] }
  0x26   : > { %750 = vmatpush.bf16.msra.mxu1 %v1394_v13  ;;  %1415 = vmatpush.bf16.msra.mxu3 %v1394_v13  ;;  %v1364_v13 = vld [vmem:[%s1554_s22 + $0x54] sm:$0xf0] }
  0x27   : > { %v1201_v20 = vor.u32 %v1364_v13, %v1200_v12 }
  0x29   : > { %662 = vmatpush.bf16.msra.mxu0 %v1385_v14  ;;  %1408 = vmatpush.bf16.msra.mxu2 %v1385_v14  ;;  %v1264_v14 = vld [vmem:[%s1554_s22 + $0xd0] sm:$0xf] }
  0x2a   : > { %751 = vmatpush.bf16.msra.mxu1 %v1393_v15  ;;  %1416 = vmatpush.bf16.msra.mxu3 %v1393_v15  ;;  %v1380_v15 = vld [vmem:[%s1554_s22 + $0xd4] sm:$0xf0] }
  0x2b   : > { %v1265_v21 = vor.u32 %v1380_v15, %v1264_v14 }
  0x2c   : > { %663 = vmatmul.bf16.vlgmr.msra.gmra.mxu0 %v1161_v24  ;;  %703 = vmatmul.bf16.vlgmr.msra.gmra.mxu2 %v1225_v25  ;;  %v1208_v24 = vld [vmem:[%s1554_s22 + $0x60] sm:$0xf]  ;;  %v1366_v25 = vld [vmem:[%s1554_s22 + $0x64] sm:$0xf0] }
  0x2d   : > { %752 = vmatmul.bf16.vlgmr.msra.gmra.mxu1 %v1165_v26  ;;  %792 = vmatmul.bf16.vlgmr.msra.gmra.mxu3 %v1229_v27  ;;  %v1272_v26 = vld [vmem:[%s1554_s22 + $0xe0] sm:$0xf]  ;;  %v1382_v27 = vld [vmem:[%s1554_s22 + $0xe4] sm:$0xf0]  ;;  %v1209_v32 = vor.u32 %v1366_v25, %v1208_v24 }
  0x2e   : > { %v1273_v33 = vor.u32 %v1382_v27, %v1272_v26 }
  0x3c   : > { %668 = vmatmul.bf16.gmra.mxu0 %v1169_v36  ;;  %708 = vmatmul.bf16.gmra.mxu2 %v1233_v37  ;;  %v1216_v36 = vld [vmem:[%s1554_s22 + $0x70] sm:$0xf]  ;;  %v1368_v37 = vld [vmem:[%s1554_s22 + $0x74] sm:$0xf0] }
  0x3d   : > { %757 = vmatmul.bf16.gmra.mxu1 %v1173_v38  ;;  %797 = vmatmul.bf16.gmra.mxu3 %v1237_v39  ;;  %v1280_v38 = vld [vmem:[%s1554_s22 + $0xf0] sm:$0xf]  ;;  %v1384_v39 = vld [vmem:[%s1554_s22 + $0xf4] sm:$0xf0]  ;;  %v1217_v44 = vor.u32 %v1368_v37, %v1216_v36 }
  0x3e   : > { %v1281_v45 = vor.u32 %v1384_v39, %v1280_v38 }
  0x4c   : > { %673 = vmatmul.bf16.gmra.mxu0 %v1177_v48  ;;  %713 = vmatmul.bf16.gmra.mxu2 %v1241_v49  ;;  %v1632_v49 = vld [vmem:[%s1716_s2] ss:$0 sm:$0xff] }
  0x4d   : > { %762 = vmatmul.bf16.gmra.mxu1 %v1181_v50  ;;  %802 = vmatmul.bf16.gmra.mxu3 %v1245_v51 }
  0x5c   : > { %678 = vmatmul.bf16.gmra.mxu0 %v1185_v60  ;;  %718 = vmatmul.bf16.gmra.mxu2 %v1249_v61 }
  0x5d   : > { %767 = vmatmul.bf16.gmra.mxu1 %v1189_v62  ;;  %807 = vmatmul.bf16.gmra.mxu3 %v1253_v63 }
  0x6c   : > { %683 = vmatmul.bf16.gmra.mxu0 %v1193_v8  ;;  %723 = vmatmul.bf16.gmra.mxu2 %v1257_v9 }
  0x6d   : > { %772 = vmatmul.bf16.gmra.mxu1 %v1197_v10  ;;  %812 = vmatmul.bf16.gmra.mxu3 %v1261_v11 }
  0x7c   : > { %688 = vmatmul.bf16.gmra.mxu0 %v1201_v20  ;;  %728 = vmatmul.bf16.gmra.mxu2 %v1265_v21 }
  0x7d   : > { %777 = vmatmul.bf16.gmra.mxu1 %v1205_v22  ;;  %817 = vmatmul.bf16.gmra.mxu3 %v1269_v23 }
  0x8c   : > { %693 = vmatmul.bf16.gmra.mxu0 %v1209_v32  ;;  %733 = vmatmul.bf16.gmra.mxu2 %v1273_v33 }
  0x8d   : > { %782 = vmatmul.bf16.gmra.mxu1 %v1213_v34  ;;  %822 = vmatmul.bf16.gmra.mxu3 %v1277_v35 }
  0x9c   : > { %698 = vmatmul.bf16.gmra.mxu0 %v1217_v44  ;;  %738 = vmatmul.bf16.gmra.mxu2 %v1281_v45 }
  0x9d   : > { %787 = vmatmul.bf16.gmra.mxu1 %v1221_v46  ;;  %827 = vmatmul.bf16.gmra.mxu3 %v1285_v47 }
  0xa9   : > { %v664_v48 = vpop.f32.mrf.mxu0 }
  0xaa   : > { %v753_v50 = vpop.f32.mrf.mxu1 }
  0xab   : > { %v754_v51 = vadd.f32 %v753_v50, %v664_v48 }
  0xad   : > { %v936_v52 = vadd.f32 %v1632_v49, %v754_v51 }
  0xaf   : > { %v968_v53 = vmax.f32 %v936_v52, 0.0  ;;  %v704_v54 = vpop.f32.mrf.mxu2 }
  0xb0   : > { %v793_v55 = vpop.f32.mrf.mxu3 }
  0xb1   : > { %1000 = vst [vmem:[%s1640_s7] sm:$0xff] %v968_v53  ;;  %v794_v56 = vadd.f32 %v793_v55, %v704_v54  ;;  %v666_v57 = vpop.f32.mrf.mxu0 }
  0xb2   : > { %v755_v58 = vpop.f32.mrf.mxu1 }
  0xb3   : > { %v952_v59 = vadd.f32 %v1632_v49, %v794_v56  ;;  %v756_v60 = vadd.f32 %v755_v58, %v666_v57 }
  0xb5   : > { %v984_v61 = vmax.f32 %v952_v59, 0.0  ;;  %v937_v62 = vadd.f32 %v1632_v49, %v756_v60 }
  0xb7   : > { %1016 = vst [vmem:[%s1640_s7 + $0x80] sm:$0xff] %v984_v61  ;;  %v969_v63 = vmax.f32 %v937_v62, 0.0  ;;  %v706_v0 = vpop.f32.mrf.mxu2 }
  0xb8   : > { %v795_v1 = vpop.f32.mrf.mxu3 }
  0xb9   : > { %1001 = vst [vmem:[%s1640_s7 + $0x8] sm:$0xff] %v969_v63  ;;  %v796_v2 = vadd.f32 %v795_v1, %v706_v0  ;;  %v669_v3 = vpop.f32.mrf.mxu0 }
  0xba   : > { %v758_v4 = vpop.f32.mrf.mxu1 }
  0xbb   : > { %v953_v5 = vadd.f32 %v1632_v49, %v796_v2  ;;  %v759_v6 = vadd.f32 %v758_v4, %v669_v3 }
  0xbd   : > { %v985_v7 = vmax.f32 %v953_v5, 0.0  ;;  %v938_v8 = vadd.f32 %v1632_v49, %v759_v6 }
  0xbf   : > { %1017 = vst [vmem:[%s1640_s7 + $0x88] sm:$0xff] %v985_v7  ;;  %v970_v9 = vmax.f32 %v938_v8, 0.0  ;;  %v709_v10 = vpop.f32.mrf.mxu2 }
  0xc0   : > { %v798_v11 = vpop.f32.mrf.mxu3 }
  0xc1   : > { %1002 = vst [vmem:[%s1640_s7 + $0x10] sm:$0xff] %v970_v9  ;;  %v799_v12 = vadd.f32 %v798_v11, %v709_v10  ;;  %v671_v13 = vpop.f32.mrf.mxu0 }
  0xc2   : > { %v760_v14 = vpop.f32.mrf.mxu1 }
  0xc3   : > { %v954_v15 = vadd.f32 %v1632_v49, %v799_v12  ;;  %v761_v16 = vadd.f32 %v760_v14, %v671_v13 }
  0xc5   : > { %v986_v17 = vmax.f32 %v954_v15, 0.0  ;;  %v939_v18 = vadd.f32 %v1632_v49, %v761_v16 }
  0xc7   : > { %1018 = vst [vmem:[%s1640_s7 + $0x90] sm:$0xff] %v986_v17  ;;  %v971_v19 = vmax.f32 %v939_v18, 0.0  ;;  %v711_v20 = vpop.f32.mrf.mxu2 }
  0xc8   : > { %v800_v21 = vpop.f32.mrf.mxu3 }
  0xc9   : > { %1003 = vst [vmem:[%s1640_s7 + $0x18] sm:$0xff] %v971_v19  ;;  %v801_v22 = vadd.f32 %v800_v21, %v711_v20  ;;  %v674_v23 = vpop.f32.mrf.mxu0 }
  0xca   : > { %v763_v24 = vpop.f32.mrf.mxu1 }
  0xcb   : > { %v955_v25 = vadd.f32 %v1632_v49, %v801_v22  ;;  %v764_v26 = vadd.f32 %v763_v24, %v674_v23 }
  0xcd   : > { %v987_v27 = vmax.f32 %v955_v25, 0.0  ;;  %v940_v28 = vadd.f32 %v1632_v49, %v764_v26 }
  0xcf   : > { %1019 = vst [vmem:[%s1640_s7 + $0x98] sm:$0xff] %v987_v27  ;;  %v972_v29 = vmax.f32 %v940_v28, 0.0  ;;  %v714_v30 = vpop.f32.mrf.mxu2 }
  0xd0   : > { %v803_v31 = vpop.f32.mrf.mxu3 }
  0xd1   : > { %1004 = vst [vmem:[%s1640_s7 + $0x20] sm:$0xff] %v972_v29  ;;  %v804_v32 = vadd.f32 %v803_v31, %v714_v30  ;;  %v676_v33 = vpop.f32.mrf.mxu0 }
  0xd2   : > { %v765_v34 = vpop.f32.mrf.mxu1 }
  0xd3   : > { %v956_v35 = vadd.f32 %v1632_v49, %v804_v32  ;;  %v766_v36 = vadd.f32 %v765_v34, %v676_v33 }
  0xd5   : > { %v988_v37 = vmax.f32 %v956_v35, 0.0  ;;  %v941_v38 = vadd.f32 %v1632_v49, %v766_v36 }
  0xd7   : > { %1020 = vst [vmem:[%s1640_s7 + $0xa0] sm:$0xff] %v988_v37  ;;  %v973_v39 = vmax.f32 %v941_v38, 0.0  ;;  %v716_v40 = vpop.f32.mrf.mxu2 }
  0xd8   : > { %v805_v41 = vpop.f32.mrf.mxu3 }
  0xd9   : > { %1005 = vst [vmem:[%s1640_s7 + $0x28] sm:$0xff] %v973_v39  ;;  %v806_v42 = vadd.f32 %v805_v41, %v716_v40  ;;  %v679_v43 = vpop.f32.mrf.mxu0 }
  0xda   : > { %v768_v44 = vpop.f32.mrf.mxu1 }
  0xdb   : > { %v957_v45 = vadd.f32 %v1632_v49, %v806_v42  ;;  %v769_v46 = vadd.f32 %v768_v44, %v679_v43 }
  0xdd   : > { %v989_v47 = vmax.f32 %v957_v45, 0.0  ;;  %v942_v48 = vadd.f32 %v1632_v49, %v769_v46 }
  0xdf   : > { %1021 = vst [vmem:[%s1640_s7 + $0xa8] sm:$0xff] %v989_v47  ;;  %v974_v50 = vmax.f32 %v942_v48, 0.0  ;;  %v719_v51 = vpop.f32.mrf.mxu2 }
  0xe0   : > { %v808_v52 = vpop.f32.mrf.mxu3 }
  0xe1   : > { %1006 = vst [vmem:[%s1640_s7 + $0x30] sm:$0xff] %v974_v50  ;;  %v809_v53 = vadd.f32 %v808_v52, %v719_v51  ;;  %v681_v54 = vpop.f32.mrf.mxu0 }
  0xe2   : > { %v770_v55 = vpop.f32.mrf.mxu1 }
  0xe3   : > { %v958_v56 = vadd.f32 %v1632_v49, %v809_v53  ;;  %v771_v57 = vadd.f32 %v770_v55, %v681_v54 }
  0xe5   : > { %v990_v58 = vmax.f32 %v958_v56, 0.0  ;;  %v943_v59 = vadd.f32 %v1632_v49, %v771_v57 }
  0xe7   : > { %1022 = vst [vmem:[%s1640_s7 + $0xb0] sm:$0xff] %v990_v58  ;;  %v975_v60 = vmax.f32 %v943_v59, 0.0  ;;  %v721_v61 = vpop.f32.mrf.mxu2 }
  0xe8   : > { %v810_v62 = vpop.f32.mrf.mxu3 }
  0xe9   : > { %1007 = vst [vmem:[%s1640_s7 + $0x38] sm:$0xff] %v975_v60  ;;  %v811_v63 = vadd.f32 %v810_v62, %v721_v61  ;;  %v684_v0 = vpop.f32.mrf.mxu0 }
  0xea   : > { %v773_v1 = vpop.f32.mrf.mxu1 }
  0xeb   : > { %v959_v2 = vadd.f32 %v1632_v49, %v811_v63  ;;  %v774_v3 = vadd.f32 %v773_v1, %v684_v0 }
  0xed   : > { %v991_v4 = vmax.f32 %v959_v2, 0.0  ;;  %v944_v5 = vadd.f32 %v1632_v49, %v774_v3 }
  0xef   : > { %1023 = vst [vmem:[%s1640_s7 + $0xb8] sm:$0xff] %v991_v4  ;;  %v976_v6 = vmax.f32 %v944_v5, 0.0  ;;  %v724_v7 = vpop.f32.mrf.mxu2 }
  0xf0   : > { %v813_v8 = vpop.f32.mrf.mxu3 }
  0xf1   : > { %1008 = vst [vmem:[%s1640_s7 + $0x40] sm:$0xff] %v976_v6  ;;  %v814_v9 = vadd.f32 %v813_v8, %v724_v7  ;;  %v686_v10 = vpop.f32.mrf.mxu0 }
  0xf2   : > { %v775_v11 = vpop.f32.mrf.mxu1 }
  0xf3   : > { %v960_v12 = vadd.f32 %v1632_v49, %v814_v9  ;;  %v776_v13 = vadd.f32 %v775_v11, %v686_v10 }
  0xf5   : > { %v992_v14 = vmax.f32 %v960_v12, 0.0  ;;  %v945_v15 = vadd.f32 %v1632_v49, %v776_v13 }
  0xf7   : > { %1024 = vst [vmem:[%s1640_s7 + $0xc0] sm:$0xff] %v992_v14  ;;  %v977_v16 = vmax.f32 %v945_v15, 0.0  ;;  %v726_v17 = vpop.f32.mrf.mxu2 }
  0xf8   : > { %v815_v18 = vpop.f32.mrf.mxu3 }
  0xf9   : > { %1009 = vst [vmem:[%s1640_s7 + $0x48] sm:$0xff] %v977_v16  ;;  %v816_v19 = vadd.f32 %v815_v18, %v726_v17  ;;  %v689_v20 = vpop.f32.mrf.mxu0 }
  0xfa   : > { %v778_v21 = vpop.f32.mrf.mxu1 }
  0xfb   : > { %v961_v22 = vadd.f32 %v1632_v49, %v816_v19  ;;  %v779_v23 = vadd.f32 %v778_v21, %v689_v20 }
  0xfd   : > { %v993_v24 = vmax.f32 %v961_v22, 0.0  ;;  %v946_v25 = vadd.f32 %v1632_v49, %v779_v23 }
  0xff   : > { %1025 = vst [vmem:[%s1640_s7 + $0xc8] sm:$0xff] %v993_v24  ;;  %v978_v26 = vmax.f32 %v946_v25, 0.0  ;;  %v729_v27 = vpop.f32.mrf.mxu2 }
 0x100   : > { %v818_v28 = vpop.f32.mrf.mxu3 }
 0x101   : > { %1010 = vst [vmem:[%s1640_s7 + $0x50] sm:$0xff] %v978_v26  ;;  %v819_v29 = vadd.f32 %v818_v28, %v729_v27  ;;  %v691_v30 = vpop.f32.mrf.mxu0 }
 0x102   : > { %v780_v31 = vpop.f32.mrf.mxu1 }
 0x103   : > { %v962_v32 = vadd.f32 %v1632_v49, %v819_v29  ;;  %v781_v33 = vadd.f32 %v780_v31, %v691_v30 }
 0x105   : > { %v994_v34 = vmax.f32 %v962_v32, 0.0  ;;  %v947_v35 = vadd.f32 %v1632_v49, %v781_v33 }
 0x107   : > { %1026 = vst [vmem:[%s1640_s7 + $0xd0] sm:$0xff] %v994_v34  ;;  %v979_v36 = vmax.f32 %v947_v35, 0.0  ;;  %v731_v37 = vpop.f32.mrf.mxu2 }
 0x108   : > { %v820_v38 = vpop.f32.mrf.mxu3 }
 0x109   : > { %1011 = vst [vmem:[%s1640_s7 + $0x58] sm:$0xff] %v979_v36  ;;  %v821_v39 = vadd.f32 %v820_v38, %v731_v37  ;;  %v694_v40 = vpop.f32.mrf.mxu0 }
 0x10a   : > { %v783_v41 = vpop.f32.mrf.mxu1 }
 0x10b   : > { %v963_v42 = vadd.f32 %v1632_v49, %v821_v39  ;;  %v784_v43 = vadd.f32 %v783_v41, %v694_v40 }
 0x10d   : > { %v995_v44 = vmax.f32 %v963_v42, 0.0  ;;  %v948_v45 = vadd.f32 %v1632_v49, %v784_v43 }
 0x10f   : > { %1027 = vst [vmem:[%s1640_s7 + $0xd8] sm:$0xff] %v995_v44  ;;  %v980_v46 = vmax.f32 %v948_v45, 0.0  ;;  %v734_v47 = vpop.f32.mrf.mxu2 }
 0x110   : > { %v823_v48 = vpop.f32.mrf.mxu3 }
 0x111   : > { %1012 = vst [vmem:[%s1640_s7 + $0x60] sm:$0xff] %v980_v46  ;;  %v824_v50 = vadd.f32 %v823_v48, %v734_v47  ;;  %v696_v51 = vpop.f32.mrf.mxu0 }
 0x112   : > { %v785_v52 = vpop.f32.mrf.mxu1 }
 0x113   : > { %v964_v53 = vadd.f32 %v1632_v49, %v824_v50  ;;  %v786_v54 = vadd.f32 %v785_v52, %v696_v51 }
 0x115   : > { %v996_v55 = vmax.f32 %v964_v53, 0.0  ;;  %v949_v56 = vadd.f32 %v1632_v49, %v786_v54 }
 0x117   : > { %1028 = vst [vmem:[%s1640_s7 + $0xe0] sm:$0xff] %v996_v55  ;;  %v981_v57 = vmax.f32 %v949_v56, 0.0  ;;  %v736_v58 = vpop.f32.mrf.mxu2 }
 0x118   : > { %v825_v59 = vpop.f32.mrf.mxu3 }
 0x119   : > { %1013 = vst [vmem:[%s1640_s7 + $0x68] sm:$0xff] %v981_v57  ;;  %v826_v60 = vadd.f32 %v825_v59, %v736_v58  ;;  %v699_v61 = vpop.f32.mrf.mxu0 }
 0x11a   : > { %v788_v62 = vpop.f32.mrf.mxu1 }
 0x11b   : > { %v965_v63 = vadd.f32 %v1632_v49, %v826_v60  ;;  %v789_v0 = vadd.f32 %v788_v62, %v699_v61 }
 0x11d   : > { %v997_v1 = vmax.f32 %v965_v63, 0.0  ;;  %v950_v2 = vadd.f32 %v1632_v49, %v789_v0 }
 0x11f   : > { %1029 = vst [vmem:[%s1640_s7 + $0xe8] sm:$0xff] %v997_v1  ;;  %v982_v3 = vmax.f32 %v950_v2, 0.0  ;;  %v739_v4 = vpop.f32.mrf.mxu2 }
 0x120   : > { %v828_v5 = vpop.f32.mrf.mxu3 }
 0x121   : > { %1014 = vst [vmem:[%s1640_s7 + $0x70] sm:$0xff] %v982_v3  ;;  %v829_v6 = vadd.f32 %v828_v5, %v739_v4  ;;  %v701_v7 = vpop.f32.mrf.mxu0 }
 0x122   : > { %v790_v8 = vpop.f32.mrf.mxu1 }
 0x123   : > { %v966_v9 = vadd.f32 %v1632_v49, %v829_v6  ;;  %v791_v10 = vadd.f32 %v790_v8, %v701_v7 }
 0x125   : > { %v998_v11 = vmax.f32 %v966_v9, 0.0  ;;  %v951_v12 = vadd.f32 %v1632_v49, %v791_v10 }
 0x127   : > { %1030 = vst [vmem:[%s1640_s7 + $0xf0] sm:$0xff] %v998_v11  ;;  %v983_v13 = vmax.f32 %v951_v12, 0.0  ;;  %v741_v14 = vpop.f32.mrf.mxu2 }
 0x128   : > { %v830_v15 = vpop.f32.mrf.mxu3 }
 0x129   : > { %1015 = vst [vmem:[%s1640_s7 + $0x78] sm:$0xff] %v983_v13  ;;  %v831_v16 = vadd.f32 %v830_v15, %v741_v14 }
 0x12b   : > { %v967_v17 = vadd.f32 %v1632_v49, %v831_v16 }
 0x12d   : > { %v999_v18 = vmax.f32 %v967_v17, 0.0 }
 0x12f   : > { %1031 = vst [vmem:[%s1640_s7 + $0xf8] sm:$0xff] %v999_v18 }
 0x130 PF: > { %s13_s14 = sadd.s32 1, %s1464_s14   ;;  %s1718_s12 = smov %s1460_s13 }
 0x131   : > { %p10_p5 = scmp.ge.s32.totalorder %s13_s14, 4   ;;  %s1719_s13 = smov %s1721_s15 }
 0x133   :  { %12 = sbr.rel (!%p10_p5) target bundleno = 2 (0x2), region = 76 }

// kernel: _lambda_.35
= control target key start
LH: loop header
LB: loop body
LE: loop exit
PB: predicated region body
PF: predicated region fallthrough
CT: control target
= control target key end

     0   :  { %s142_s0 = inlined_call_operand.vmem [shape: f32[64,128], index: 0, kind: input, shape index: {}]   ;;  %s143_s1 = inlined_call_operand.vmem [shape: f32[64,128], index: 1, kind: input, shape index: {}]   ;;  %s144_s2 = inlined_call_operand.vmem [shape: f32[64,128], index: 2, kind: output, shape index: {}]  }
   0x1   :  { %v11_v0 = vld [vmem:[%s142_s0] sm:$0xff]  ;;  %v12_v2 = vld [vmem:[%s142_s0 + $0x8] sm:$0xff]  ;;  %v13_v5 = vld [vmem:[%s142_s0 + $0x10] sm:$0xff] }
   0x2   :  { %v19_v1 = vld [vmem:[%s143_s1] sm:$0xff]  ;;  %v20_v4 = vld [vmem:[%s143_s1 + $0x8] sm:$0xff]  ;;  %v21_v6 = vld [vmem:[%s143_s1 + $0x10] sm:$0xff] }
   0x3   :  { %v27_v3 = vadd.f32 %v19_v1, %v11_v0  ;;  %v28_v7 = vadd.f32 %v20_v4, %v12_v2  ;;  %v29_v8 = vadd.f32 %v21_v6, %v13_v5  ;;  %v14_v9 = vld [vmem:[%s142_s0 + $0x18] sm:$0xff]  ;;  %v15_v11 = vld [vmem:[%s142_s0 + $0x20] sm:$0xff]  ;;  %v16_v15 = vld [vmem:[%s142_s0 + $0x28] sm:$0xff] }
   0x4   :  { %v22_v10 = vld [vmem:[%s143_s1 + $0x18] sm:$0xff]  ;;  %v23_v14 = vld [vmem:[%s143_s1 + $0x20] sm:$0xff]  ;;  %v24_v16 = vld [vmem:[%s143_s1 + $0x28] sm:$0xff] }
   0x5   :  { %v35_v12 = vmax.f32 %v27_v3, 0.0  ;;  %v30_v13 = vadd.f32 %v22_v10, %v14_v9  ;;  %v36_v17 = vmax.f32 %v28_v7, 0.0  ;;  %v37_v18 = vmax.f32 %v29_v8, 0.0  ;;  %v17_v21 = vld [vmem:[%s142_s0 + $0x30] sm:$0xff]  ;;  %v18_v23 = vld [vmem:[%s142_s0 + $0x38] sm:$0xff] }
   0x6   :  { %v31_v19 = vadd.f32 %v23_v14, %v15_v11  ;;  %v32_v20 = vadd.f32 %v24_v16, %v16_v15  ;;  %v25_v22 = vld [vmem:[%s143_s1 + $0x30] sm:$0xff]  ;;  %v26_v26 = vld [vmem:[%s143_s1 + $0x38] sm:$0xff] }
   0x7   :  { %43 = vst [vmem:[%s144_s2] sm:$0xff] %v35_v12  ;;  %v38_v24 = vmax.f32 %v30_v13, 0.0  ;;  %v33_v25 = vadd.f32 %v25_v22, %v17_v21  ;;  %v34_v29 = vadd.f32 %v26_v26, %v18_v23 }
   0x8   :  { %44 = vst [vmem:[%s144_s2 + $0x8] sm:$0xff] %v36_v17  ;;  %v39_v27 = vmax.f32 %v31_v19, 0.0  ;;  %v40_v28 = vmax.f32 %v32_v20, 0.0 }
   0x9   :  { %45 = vst [vmem:[%s144_s2 + $0x10] sm:$0xff] %v37_v18  ;;  %v41_v30 = vmax.f32 %v33_v25, 0.0  ;;  %v42_v31 = vmax.f32 %v34_v29, 0.0 }
   0xa   :  { %46 = vst [vmem:[%s144_s2 + $0x18] sm:$0xff] %v38_v24 }
   0xb   :  { %47 = vst [vmem:[%s144_s2 + $0x20] sm:$0xff] %v39_v27 }
   0xc   :  { %48 = vst [vmem:[%s144_s2 + $0x28] sm:$0xff] %v40_v28 }
   0xd   :  { %49 = vst [vmem:[%s144_s2 + $0x30] sm:$0xff] %v41_v30 }
   0xe   :  { %50 = vst [vmem:[%s144_s2 + $0x38] sm:$0xff] %v42_v31 }

// kernel: _lambda_.33
= control target key start
LH: loop header
LB: loop body
LE: loop exit
PB: predicated region body
PF: predicated region fallthrough
CT: control target
= control target key end

     0   :  { %s1888_s1 = inlined_call_operand.vmem [shape: bf16[640,128], index: 1, kind: input, shape index: {}]   ;;  %s1889_s0 = inlined_call_operand.vmem [shape: bf16[128,640], index: 0, kind: input, shape index: {}]   ;;  %s1890_s2 = inlined_call_operand.vmem [shape: f32[1,128], index: 2, kind: input, shape index: {}]   ;;  %s1891_s3 = inlined_call_operand.vmem [shape: f32[128,128], index: 3, kind: output, shape index: {}]  }
   0x1   :  { %v1345_v0 = vld [vmem:[%s1888_s1 + $0x38] sm:$0xff]  ;;  %v1344_v1 = vld [vmem:[%s1888_s1 + $0x30] sm:$0xff]  ;;  %v1343_v2 = vld [vmem:[%s1888_s1 + $0x28] sm:$0xff] }
   0x2   :  { %1378 = vmatpush.bf16.msra.mxu1 %v1345_v0  ;;  %1379 = vmatpush.bf16.msra.mxu2 %v1345_v0  ;;  %v1342_v3 = vld [vmem:[%s1888_s1 + $0x20] sm:$0xff]  ;;  %v1341_v4 = vld [vmem:[%s1888_s1 + $0x18] sm:$0xff]  ;;  %v1340_v5 = vld [vmem:[%s1888_s1 + $0x10] sm:$0xff] }
   0x3   :  { %1380 = vmatpush.bf16.msra.mxu3 %v1345_v0  ;;  %626 = vmatpush.bf16.msra.mxu0 %v1345_v0  ;;  %v1339_v6 = vld [vmem:[%s1888_s1 + $0x8] sm:$0xff]  ;;  %v1338_v7 = vld [vmem:[%s1888_s1] sm:$0xff]  ;;  %v1020_v8 = vld [vmem:[%s1889_s0 + $0x50] sm:$0xf] }
   0x4   :  { %v1310_v9 = vld [vmem:[%s1889_s0 + $0x60] sm:$0xf0]  ;;  %v1060_v10 = vld [vmem:[%s1889_s0 + $0xa0] sm:$0xf]  ;;  %v1320_v11 = vld [vmem:[%s1889_s0 + $0xb0] sm:$0xf0] }
   0x5   :  { %v1100_v12 = vld [vmem:[%s1889_s0 + $0xf0] sm:$0xf]  ;;  %v1330_v13 = vld [vmem:[%s1889_s0 + $0x100] sm:$0xf0]  ;;  %v980_v14 = vld [vmem:[%s1889_s0] sm:$0xf]  ;;  %v1021_v18 = vor.u32 %v1310_v9, %v1020_v8  ;;  %v1061_v19 = vor.u32 %v1320_v11, %v1060_v10 }
   0x6   :  { %1381 = vmatpush.bf16.msra.mxu1 %v1344_v1  ;;  %1382 = vmatpush.bf16.msra.mxu2 %v1344_v1  ;;  %v1300_v15 = vld [vmem:[%s1889_s0 + $0x10] sm:$0xf0]  ;;  %v1361_v16 = vld [vmem:[%s1888_s1 + $0xb8] sm:$0xff]  ;;  %v1101_v20 = vor.u32 %v1330_v13, %v1100_v12  ;;  %v1359_v28 = vld [vmem:[%s1888_s1 + $0xa8] sm:$0xff] }
   0x7   :  { %1383 = vmatpush.bf16.msra.mxu3 %v1344_v1  ;;  %627 = vmatpush.bf16.msra.mxu0 %v1344_v1  ;;  %v1353_v17 = vld [vmem:[%s1888_s1 + $0x78] sm:$0xff]  ;;  %v981_v21 = vor.u32 %v1300_v15, %v980_v14  ;;  %v1360_v24 = vld [vmem:[%s1888_s1 + $0xb0] sm:$0xff]  ;;  %v1351_v29 = vld [vmem:[%s1888_s1 + $0x68] sm:$0xff] }
   0x8   :  { %v1369_v22 = vld [vmem:[%s1888_s1 + $0xf8] sm:$0xff]  ;;  %v1352_v25 = vld [vmem:[%s1888_s1 + $0x70] sm:$0xff]  ;;  %v1367_v30 = vld [vmem:[%s1888_s1 + $0xe8] sm:$0xff] }
   0x9   :  { %v1377_v23 = vld [vmem:[%s1888_s1 + $0x138] sm:$0xff]  ;;  %v1368_v26 = vld [vmem:[%s1888_s1 + $0xf0] sm:$0xff]  ;;  %v1375_v31 = vld [vmem:[%s1888_s1 + $0x128] sm:$0xff] }
   0xa   :  { %1384 = vmatpush.bf16.msra.mxu1 %v1343_v2  ;;  %1385 = vmatpush.bf16.msra.mxu2 %v1343_v2  ;;  %v1376_v27 = vld [vmem:[%s1888_s1 + $0x130] sm:$0xff]  ;;  %v1358_v32 = vld [vmem:[%s1888_s1 + $0xa0] sm:$0xff]  ;;  %v1040_v36 = vld [vmem:[%s1889_s0 + $0x78] sm:$0xf] }
   0xb   :  { %1386 = vmatpush.bf16.msra.mxu3 %v1343_v2  ;;  %628 = vmatpush.bf16.msra.mxu0 %v1343_v2  ;;  %v1350_v33 = vld [vmem:[%s1888_s1 + $0x60] sm:$0xff]  ;;  %v1315_v37 = vld [vmem:[%s1889_s0 + $0x88] sm:$0xf0]  ;;  %v1080_v38 = vld [vmem:[%s1889_s0 + $0xc8] sm:$0xf] }
   0xc   :  { %v1366_v34 = vld [vmem:[%s1888_s1 + $0xe0] sm:$0xff]  ;;  %v1325_v39 = vld [vmem:[%s1889_s0 + $0xd8] sm:$0xf0]  ;;  %v1120_v40 = vld [vmem:[%s1889_s0 + $0x118] sm:$0xf]  ;;  %v1041_v46 = vor.u32 %v1315_v37, %v1040_v36 }
   0xd   :  { %v1374_v35 = vld [vmem:[%s1888_s1 + $0x120] sm:$0xff]  ;;  %v1335_v41 = vld [vmem:[%s1889_s0 + $0x128] sm:$0xf0]  ;;  %v1000_v42 = vld [vmem:[%s1889_s0 + $0x28] sm:$0xf]  ;;  %v1081_v47 = vor.u32 %v1325_v39, %v1080_v38 }
   0xe   :  { %1387 = vmatpush.bf16.msra.mxu1 %v1342_v3  ;;  %1388 = vmatpush.bf16.msra.mxu2 %v1342_v3  ;;  %v1305_v43 = vld [vmem:[%s1889_s0 + $0x38] sm:$0xf0]  ;;  %v1121_v48 = vor.u32 %v1335_v41, %v1120_v40  ;;  %v1356_v52 = vld [vmem:[%s1888_s1 + $0x90] sm:$0xff]  ;;  %v1355_v56 = vld [vmem:[%s1888_s1 + $0x88] sm:$0xff] }
   0xf   :  { %1389 = vmatpush.bf16.msra.mxu3 %v1342_v3  ;;  %629 = vmatpush.bf16.msra.mxu0 %v1342_v3  ;;  %v1357_v44 = vld [vmem:[%s1888_s1 + $0x98] sm:$0xff]  ;;  %v1001_v49 = vor.u32 %v1305_v43, %v1000_v42  ;;  %v1348_v53 = vld [vmem:[%s1888_s1 + $0x50] sm:$0xff]  ;;  %v1347_v57 = vld [vmem:[%s1888_s1 + $0x48] sm:$0xff] }
  0x10   :  { %v1349_v45 = vld [vmem:[%s1888_s1 + $0x58] sm:$0xff]  ;;  %v1364_v54 = vld [vmem:[%s1888_s1 + $0xd0] sm:$0xff]  ;;  %v1363_v58 = vld [vmem:[%s1888_s1 + $0xc8] sm:$0xff] }
  0x11   :  { %v1365_v50 = vld [vmem:[%s1888_s1 + $0xd8] sm:$0xff]  ;;  %v1372_v55 = vld [vmem:[%s1888_s1 + $0x110] sm:$0xff]  ;;  %v1371_v59 = vld [vmem:[%s1888_s1 + $0x108] sm:$0xff] }
  0x12   :  { %1390 = vmatpush.bf16.msra.mxu1 %v1341_v4  ;;  %1391 = vmatpush.bf16.msra.mxu2 %v1341_v4  ;;  %v1373_v51 = vld [vmem:[%s1888_s1 + $0x118] sm:$0xff]  ;;  %v1354_v60 = vld [vmem:[%s1888_s1 + $0x80] sm:$0xff]  ;;  %v988_v2 = vld [vmem:[%s1889_s0 + $0x8] sm:$0xf] }
  0x13   :  { %1392 = vmatpush.bf16.msra.mxu3 %v1341_v4  ;;  %630 = vmatpush.bf16.msra.mxu0 %v1341_v4  ;;  %v1346_v61 = vld [vmem:[%s1888_s1 + $0x40] sm:$0xff]  ;;  %v982_v1 = vld [vmem:[%s1889_s0 + $0x14] sm:$0xf0]  ;;  %v1301_v3 = vld [vmem:[%s1889_s0 + $0x18] sm:$0xf0] }
  0x14   :  { %v1362_v62 = vld [vmem:[%s1888_s1 + $0xc0] sm:$0xff]  ;;  %v1299_v4 = vld [vmem:[%s1889_s0 + $0xc] sm:$0xf]  ;;  %v989_v9 = vor.u32 %v1301_v3, %v988_v2  ;;  %v1008_v14 = vld [vmem:[%s1889_s0 + $0x30] sm:$0xf] }
  0x15   :  { %v1370_v63 = vld [vmem:[%s1888_s1 + $0x100] sm:$0xff]  ;;  %v1303_v12 = vld [vmem:[%s1889_s0 + $0x2c] sm:$0xf]  ;;  %v1313_v36 = vld [vmem:[%s1889_s0 + $0x7c] sm:$0xf] }
  0x16   :  { %1393 = vmatpush.bf16.msra.mxu1 %v1340_v5  ;;  %1394 = vmatpush.bf16.msra.mxu2 %v1340_v5  ;;  %v1298_v0 = vld [vmem:[%s1889_s0 + $0x4] sm:$0xf]  ;;  %v1002_v13 = vld [vmem:[%s1889_s0 + $0x3c] sm:$0xf0]  ;;  %v1042_v37 = vld [vmem:[%s1889_s0 + $0x8c] sm:$0xf0] }
  0x17   :  { %1395 = vmatpush.bf16.msra.mxu3 %v1340_v5  ;;  %631 = vmatpush.bf16.msra.mxu0 %v1340_v5  ;;  %v990_v5 = vld [vmem:[%s1889_s0 + $0x1c] sm:$0xf0]  ;;  %v985_v8 = vor.u32 %v1298_v0, %v982_v1  ;;  %v1306_v15 = vld [vmem:[%s1889_s0 + $0x40] sm:$0xf0]  ;;  %v1316_v39 = vld [vmem:[%s1889_s0 + $0x90] sm:$0xf0] }
  0x18   :  { %v993_v10 = vor.u32 %v1299_v4, %v990_v5  ;;  %v1048_v38 = vld [vmem:[%s1889_s0 + $0x80] sm:$0xf]  ;;  %v1314_v40 = vld [vmem:[%s1889_s0 + $0x84] sm:$0xf]  ;;  %v1050_v41 = vld [vmem:[%s1889_s0 + $0x94] sm:$0xf0] }
  0x19   :  { %v1056_v42 = vld [vmem:[%s1889_s0 + $0x88] sm:$0xf]  ;;  %v1317_v43 = vld [vmem:[%s1889_s0 + $0x98] sm:$0xf0]  ;;  %v1324_v0 = vld [vmem:[%s1889_s0 + $0xd4] sm:$0xf] }
  0x1a   :  { %1396 = vmatpush.bf16.msra.mxu1 %v1339_v6  ;;  %1397 = vmatpush.bf16.msra.mxu2 %v1339_v6  ;;  %v1090_v1 = vld [vmem:[%s1889_s0 + $0xe4] sm:$0xf0]  ;;  %v1096_v2 = vld [vmem:[%s1889_s0 + $0xd8] sm:$0xf]  ;;  %v1327_v3 = vld [vmem:[%s1889_s0 + $0xe8] sm:$0xf0] }
  0x1b   :  { %1398 = vmatpush.bf16.msra.mxu3 %v1339_v6  ;;  %632 = vmatpush.bf16.msra.mxu0 %v1339_v6  ;;  %v996_v6 = vld [vmem:[%s1889_s0 + $0x10] sm:$0xf] }
  0x1e   :  { %1399 = vmatpush.bf16.msra.mxu1 %v1338_v7  ;;  %1400 = vmatpush.bf16.msra.mxu2 %v1338_v7 }
  0x1f   :  { %1401 = vmatpush.bf16.msra.mxu3 %v1338_v7  ;;  %633 = vmatpush.bf16.msra.mxu0 %v1338_v7  ;;  %v1302_v7 = vld [vmem:[%s1889_s0 + $0x20] sm:$0xf0] }
  0x20   :  { %v997_v11 = vor.u32 %v1302_v7, %v996_v6  ;;  %v1093_v6 = vor.u32 %v1324_v0, %v1090_v1  ;;  %v1097_v7 = vor.u32 %v1327_v3, %v1096_v2 }
  0x21   :  { %644 = vmatmul.bf16.vlgmr.msra.gmra.mxu1 %v1021_v18  ;;  %654 = vmatmul.bf16.vlgmr.msra.gmra.mxu2 %v1061_v19  ;;  %v1016_v18 = vld [vmem:[%s1889_s0 + $0x38] sm:$0xf]  ;;  %v1307_v19 = vld [vmem:[%s1889_s0 + $0x48] sm:$0xf0] }
  0x22   :  { %724 = vmatpush.bf16.msrb.mxu2 %v1361_v16  ;;  %675 = vmatpush.bf16.msrb.mxu1 %v1353_v17  ;;  %v1304_v16 = vld [vmem:[%s1889_s0 + $0x34] sm:$0xf]  ;;  %v1010_v17 = vld [vmem:[%s1889_s0 + $0x44] sm:$0xf0] }
  0x23   :  { %664 = vmatmul.bf16.vlgmr.msra.gmra.mxu3 %v1101_v20  ;;  %634 = vmatmul.bf16.vlgmr.msra.gmra.mxu0 %v981_v21  ;;  %v1005_v20 = vor.u32 %v1303_v12, %v1002_v13  ;;  %v1009_v21 = vor.u32 %v1306_v15, %v1008_v14  ;;  %v1329_v12 = vld [vmem:[%s1889_s0 + $0xfc] sm:$0xf]  ;;  %v1110_v13 = vld [vmem:[%s1889_s0 + $0x10c] sm:$0xf0]  ;;  %v1116_v14 = vld [vmem:[%s1889_s0 + $0x100] sm:$0xf] }
  0x24   :  { %773 = vmatpush.bf16.msrb.mxu3 %v1369_v22  ;;  %822 = vmatpush.bf16.msrb.mxu0 %v1377_v23  ;;  %v1013_v22 = vor.u32 %v1304_v16, %v1010_v17  ;;  %v1017_v23 = vor.u32 %v1307_v19, %v1016_v18  ;;  %v1332_v15 = vld [vmem:[%s1889_s0 + $0x110] sm:$0xf0]  ;;  %v1113_v19 = vor.u32 %v1329_v12, %v1110_v13 }
  0x26   :  { %725 = vmatpush.bf16.msrb.mxu2 %v1360_v24  ;;  %676 = vmatpush.bf16.msrb.mxu1 %v1352_v25  ;;  %v1308_v24 = vld [vmem:[%s1889_s0 + $0x54] sm:$0xf]  ;;  %v1022_v25 = vld [vmem:[%s1889_s0 + $0x64] sm:$0xf0] }
  0x28   :  { %774 = vmatpush.bf16.msrb.mxu3 %v1368_v26  ;;  %823 = vmatpush.bf16.msrb.mxu0 %v1376_v27  ;;  %v1028_v26 = vld [vmem:[%s1889_s0 + $0x58] sm:$0xf]  ;;  %v1311_v27 = vld [vmem:[%s1889_s0 + $0x68] sm:$0xf0] }
  0x2a   :  { %726 = vmatpush.bf16.msrb.mxu2 %v1359_v28  ;;  %677 = vmatpush.bf16.msrb.mxu1 %v1351_v29  ;;  %v1309_v28 = vld [vmem:[%s1889_s0 + $0x5c] sm:$0xf]  ;;  %v1030_v29 = vld [vmem:[%s1889_s0 + $0x6c] sm:$0xf0] }
  0x2c   :  { %775 = vmatpush.bf16.msrb.mxu3 %v1367_v30  ;;  %824 = vmatpush.bf16.msrb.mxu0 %v1375_v31  ;;  %v1036_v30 = vld [vmem:[%s1889_s0 + $0x60] sm:$0xf]  ;;  %v1312_v31 = vld [vmem:[%s1889_s0 + $0x70] sm:$0xf0] }
  0x2e   :  { %727 = vmatpush.bf16.msrb.mxu2 %v1358_v32  ;;  %678 = vmatpush.bf16.msrb.mxu1 %v1350_v33  ;;  %v1025_v32 = vor.u32 %v1308_v24, %v1022_v25  ;;  %v1029_v33 = vor.u32 %v1311_v27, %v1028_v26  ;;  %v1333_v26 = vld [vmem:[%s1889_s0 + $0x11c] sm:$0xf]  ;;  %v1122_v27 = vld [vmem:[%s1889_s0 + $0x12c] sm:$0xf0] }
  0x30   :  { %776 = vmatpush.bf16.msrb.mxu3 %v1366_v34  ;;  %825 = vmatpush.bf16.msrb.mxu0 %v1374_v35  ;;  %v1033_v34 = vor.u32 %v1309_v28, %v1030_v29  ;;  %v1037_v35 = vor.u32 %v1312_v31, %v1036_v30  ;;  %v1128_v28 = vld [vmem:[%s1889_s0 + $0x120] sm:$0xf]  ;;  %v1336_v29 = vld [vmem:[%s1889_s0 + $0x130] sm:$0xf0]  ;;  %v1334_v30 = vld [vmem:[%s1889_s0 + $0x124] sm:$0xf] }
  0x31   :  { %649 = vmatmul.bf16.gmra.mxu1 %v1041_v46  ;;  %659 = vmatmul.bf16.gmra.mxu2 %v1081_v47  ;;  %v1053_v46 = vor.u32 %v1314_v40, %v1050_v41  ;;  %v1057_v47 = vor.u32 %v1317_v43, %v1056_v42  ;;  %v1130_v31 = vld [vmem:[%s1889_s0 + $0x134] sm:$0xf0] }
  0x32   :  { %728 = vmatpush.bf16.msrb.mxu2 %v1357_v44  ;;  %679 = vmatpush.bf16.msrb.mxu1 %v1349_v45  ;;  %v1045_v44 = vor.u32 %v1313_v36, %v1042_v37  ;;  %v1049_v45 = vor.u32 %v1316_v39, %v1048_v38  ;;  %v1125_v36 = vor.u32 %v1333_v26, %v1122_v27 }
  0x33   :  { %669 = vmatmul.bf16.gmra.mxu3 %v1121_v48  ;;  %639 = vmatmul.bf16.gmra.mxu0 %v1001_v49  ;;  %v1318_v48 = vld [vmem:[%s1889_s0 + $0xa4] sm:$0xf]  ;;  %v1062_v49 = vld [vmem:[%s1889_s0 + $0xb4] sm:$0xf0]  ;;  %v1129_v37 = vor.u32 %v1336_v29, %v1128_v28  ;;  %v1133_v39 = vor.u32 %v1334_v30, %v1130_v31 }
  0x34   :  { %777 = vmatpush.bf16.msrb.mxu3 %v1365_v50  ;;  %826 = vmatpush.bf16.msrb.mxu0 %v1373_v51  ;;  %v1068_v50 = vld [vmem:[%s1889_s0 + $0xa8] sm:$0xf]  ;;  %v1321_v51 = vld [vmem:[%s1889_s0 + $0xb8] sm:$0xf0] }
  0x36   :  { %729 = vmatpush.bf16.msrb.mxu2 %v1356_v52  ;;  %680 = vmatpush.bf16.msrb.mxu1 %v1348_v53  ;;  %v1319_v52 = vld [vmem:[%s1889_s0 + $0xac] sm:$0xf]  ;;  %v1070_v53 = vld [vmem:[%s1889_s0 + $0xbc] sm:$0xf0] }
  0x38   :  { %778 = vmatpush.bf16.msrb.mxu3 %v1364_v54  ;;  %827 = vmatpush.bf16.msrb.mxu0 %v1372_v55  ;;  %v1076_v54 = vld [vmem:[%s1889_s0 + $0xb0] sm:$0xf]  ;;  %v1322_v55 = vld [vmem:[%s1889_s0 + $0xc0] sm:$0xf0] }
  0x3a   :  { %730 = vmatpush.bf16.msrb.mxu2 %v1355_v56  ;;  %681 = vmatpush.bf16.msrb.mxu1 %v1347_v57  ;;  %v1065_v56 = vor.u32 %v1318_v48, %v1062_v49  ;;  %v1069_v57 = vor.u32 %v1321_v51, %v1068_v50 }
  0x3c   :  { %779 = vmatpush.bf16.msrb.mxu3 %v1363_v58  ;;  %828 = vmatpush.bf16.msrb.mxu0 %v1371_v59  ;;  %v1073_v58 = vor.u32 %v1319_v52, %v1070_v53  ;;  %v1077_v59 = vor.u32 %v1322_v55, %v1076_v54 }
  0x3e   :  { %731 = vmatpush.bf16.msrb.mxu2 %v1354_v60  ;;  %682 = vmatpush.bf16.msrb.mxu1 %v1346_v61  ;;  %v1323_v60 = vld [vmem:[%s1889_s0 + $0xcc] sm:$0xf]  ;;  %v1082_v61 = vld [vmem:[%s1889_s0 + $0xdc] sm:$0xf0] }
  0x3f   :  { %v1085_v4 = vor.u32 %v1323_v60, %v1082_v61 }
  0x40   :  { %780 = vmatpush.bf16.msrb.mxu3 %v1362_v62  ;;  %829 = vmatpush.bf16.msrb.mxu0 %v1370_v63  ;;  %v1088_v62 = vld [vmem:[%s1889_s0 + $0xd0] sm:$0xf]  ;;  %v1326_v63 = vld [vmem:[%s1889_s0 + $0xe0] sm:$0xf0] }
  0x41   :  { %683 = vmatmul.bf16.vlgmr.msrb.gmra.mxu1 %v985_v8  ;;  %732 = vmatmul.bf16.vlgmr.msrb.gmra.mxu2 %v989_v9  ;;  %v1089_v5 = vor.u32 %v1326_v63, %v1088_v62  ;;  %v1328_v8 = vld [vmem:[%s1889_s0 + $0xf4] sm:$0xf]  ;;  %v1102_v9 = vld [vmem:[%s1889_s0 + $0x104] sm:$0xf0] }
  0x42   :  { %v1105_v16 = vor.u32 %v1328_v8, %v1102_v9 }
  0x43   :  { %781 = vmatmul.bf16.vlgmr.msrb.gmra.mxu3 %v993_v10  ;;  %830 = vmatmul.bf16.vlgmr.msrb.gmra.mxu0 %v997_v11  ;;  %v1108_v10 = vld [vmem:[%s1889_s0 + $0xf8] sm:$0xf]  ;;  %v1331_v11 = vld [vmem:[%s1889_s0 + $0x108] sm:$0xf0] }
  0x44   :  { %v1109_v17 = vor.u32 %v1331_v11, %v1108_v10 }
  0x51   :  { %688 = vmatmul.bf16.gmra.mxu1 %v1005_v20  ;;  %737 = vmatmul.bf16.gmra.mxu2 %v1009_v21  ;;  %v1117_v20 = vor.u32 %v1332_v15, %v1116_v14 }
  0x53   :  { %786 = vmatmul.bf16.gmra.mxu3 %v1013_v22  ;;  %835 = vmatmul.bf16.gmra.mxu0 %v1017_v23 }
  0x61   :  { %693 = vmatmul.bf16.gmra.mxu1 %v1025_v32  ;;  %742 = vmatmul.bf16.gmra.mxu2 %v1029_v33  ;;  %v1136_v32 = vld [vmem:[%s1889_s0 + $0x128] sm:$0xf]  ;;  %v1337_v33 = vld [vmem:[%s1889_s0 + $0x138] sm:$0xf0] }
  0x62   :  { %v1137_v40 = vor.u32 %v1337_v33, %v1136_v32 }
  0x63   :  { %791 = vmatmul.bf16.gmra.mxu3 %v1033_v34  ;;  %840 = vmatmul.bf16.gmra.mxu0 %v1037_v35 }
  0x71   :  { %698 = vmatmul.bf16.gmra.mxu1 %v1045_v44  ;;  %747 = vmatmul.bf16.gmra.mxu2 %v1049_v45 }
  0x73   :  { %796 = vmatmul.bf16.gmra.mxu3 %v1053_v46  ;;  %845 = vmatmul.bf16.gmra.mxu0 %v1057_v47 }
  0x81   :  { %703 = vmatmul.bf16.gmra.mxu1 %v1065_v56  ;;  %752 = vmatmul.bf16.gmra.mxu2 %v1069_v57  ;;  %v1810_v56 = vld [vmem:[%s1890_s2] ss:$0 sm:$0xff] }
  0x83   :  { %801 = vmatmul.bf16.gmra.mxu3 %v1073_v58  ;;  %850 = vmatmul.bf16.gmra.mxu0 %v1077_v59 }
  0x91   :  { %708 = vmatmul.bf16.gmra.mxu1 %v1085_v4  ;;  %757 = vmatmul.bf16.gmra.mxu2 %v1089_v5 }
  0x93   :  { %806 = vmatmul.bf16.gmra.mxu3 %v1093_v6  ;;  %855 = vmatmul.bf16.gmra.mxu0 %v1097_v7 }
  0x9e   :  { %v1759_v18 = vpop.f32.mrf.mxu1 }
  0xa0   :  { %v635_v21 = vpop.f32.mrf.mxu0 }
  0xa1   :  { %713 = vmatmul.bf16.gmra.mxu1 %v1105_v16  ;;  %762 = vmatmul.bf16.gmra.mxu2 %v1109_v17 }
  0xa3   :  { %811 = vmatmul.bf16.gmra.mxu3 %v1113_v19  ;;  %860 = vmatmul.bf16.gmra.mxu0 %v1117_v20 }
  0xa4   :  { %v1761_v22 = vpop.f32.mrf.mxu2 }
  0xa6   :  { %v1763_v23 = vpop.f32.mrf.mxu3  ;;  %v1765_v24 = vpop.f32.mrf.mxu1 }
  0xa8   :  { %v637_v25 = vpop.f32.mrf.mxu0 }
  0xac   :  { %v1791_v34 = vpop.f32.mrf.mxu2 }
  0xae   :  { %v1793_v35 = vpop.f32.mrf.mxu3  ;;  %v1795_v38 = vpop.f32.mrf.mxu1 }
  0xb0   :  { %v640_v41 = vpop.f32.mrf.mxu0 }
  0xb1   :  { %718 = vmatmul.bf16.gmra.mxu1 %v1125_v36  ;;  %767 = vmatmul.bf16.gmra.mxu2 %v1129_v37 }
  0xb3   :  { %816 = vmatmul.bf16.gmra.mxu3 %v1133_v39  ;;  %865 = vmatmul.bf16.gmra.mxu0 %v1137_v40 }
  0xb4   :  { %v1797_v42 = vpop.f32.mrf.mxu2 }
  0xb6   :  { %v1799_v43 = vpop.f32.mrf.mxu3  ;;  %v1801_v44 = vpop.f32.mrf.mxu1 }
  0xb8   :  { %v642_v45 = vpop.f32.mrf.mxu0 }
  0xbc   :  { %v1803_v46 = vpop.f32.mrf.mxu2 }
  0xbe   :  { %v1805_v47 = vpop.f32.mrf.mxu3  ;;  %v684_v48 = vpop.f32.mrf.mxu1 }
  0xbf   :  { %v685_v50 = vadd.f32 %v684_v48, %v635_v21 }
  0xc0   :  { %v831_v49 = vpop.f32.mrf.mxu0 }
  0xc4   :  { %v733_v51 = vpop.f32.mrf.mxu2 }
  0xc5   :  { %v734_v52 = vadd.f32 %v733_v51, %v685_v50 }
  0xc6   :  { %v782_v53 = vpop.f32.mrf.mxu3  ;;  %v686_v54 = vpop.f32.mrf.mxu1 }
  0xc7   :  { %v783_v55 = vadd.f32 %v782_v53, %v734_v52  ;;  %v687_v60 = vadd.f32 %v686_v54, %v637_v25 }
  0xc8   :  { %v833_v57 = vpop.f32.mrf.mxu0 }
  0xc9   :  { %v832_v58 = vadd.f32 %v831_v49, %v783_v55 }
  0xcb   :  { %v926_v59 = vadd.f32 %v1810_v56, %v832_v58 }
  0xcc   :  { %v735_v61 = vpop.f32.mrf.mxu2 }
  0xcd   :  { %v942_v62 = vmax.f32 %v926_v59, 0.0  ;;  %v736_v63 = vadd.f32 %v735_v61, %v687_v60 }
  0xce   :  { %v784_v0 = vpop.f32.mrf.mxu3  ;;  %v689_v1 = vpop.f32.mrf.mxu1 }
  0xcf   :  { %958 = vst [vmem:[%s1891_s3] sm:$0xff] %v942_v62  ;;  %v785_v2 = vadd.f32 %v784_v0, %v736_v63  ;;  %v690_v6 = vadd.f32 %v689_v1, %v640_v41 }
  0xd0   :  { %v836_v3 = vpop.f32.mrf.mxu0 }
  0xd1   :  { %v834_v4 = vadd.f32 %v833_v57, %v785_v2 }
  0xd3   :  { %v927_v5 = vadd.f32 %v1810_v56, %v834_v4 }
  0xd4   :  { %v738_v7 = vpop.f32.mrf.mxu2 }
  0xd5   :  { %v943_v8 = vmax.f32 %v927_v5, 0.0  ;;  %v739_v9 = vadd.f32 %v738_v7, %v690_v6 }
  0xd6   :  { %v787_v10 = vpop.f32.mrf.mxu3  ;;  %v691_v11 = vpop.f32.mrf.mxu1 }
  0xd7   :  { %959 = vst [vmem:[%s1891_s3 + $0x8] sm:$0xff] %v943_v8  ;;  %v788_v12 = vadd.f32 %v787_v10, %v739_v9  ;;  %v692_v16 = vadd.f32 %v691_v11, %v642_v45 }
  0xd8   :  { %v838_v13 = vpop.f32.mrf.mxu0 }
  0xd9   :  { %v837_v14 = vadd.f32 %v836_v3, %v788_v12 }
  0xdb   :  { %v928_v15 = vadd.f32 %v1810_v56, %v837_v14 }
  0xdc   :  { %v740_v17 = vpop.f32.mrf.mxu2 }
  0xdd   :  { %v944_v19 = vmax.f32 %v928_v15, 0.0  ;;  %v741_v20 = vadd.f32 %v740_v17, %v692_v16 }
  0xde   :  { %v789_v21 = vpop.f32.mrf.mxu3  ;;  %v694_v25 = vpop.f32.mrf.mxu1 }
  0xdf   :  { %960 = vst [vmem:[%s1891_s3 + $0x10] sm:$0xff] %v944_v19  ;;  %v790_v26 = vadd.f32 %v789_v21, %v741_v20  ;;  %v695_v30 = vadd.f32 %v694_v25, %v1759_v18 }
  0xe0   :  { %v841_v27 = vpop.f32.mrf.mxu0 }
  0xe1   :  { %v839_v28 = vadd.f32 %v838_v13, %v790_v26 }
  0xe3   :  { %v929_v29 = vadd.f32 %v1810_v56, %v839_v28 }
  0xe4   :  { %v743_v31 = vpop.f32.mrf.mxu2 }
  0xe5   :  { %v945_v32 = vmax.f32 %v929_v29, 0.0  ;;  %v744_v33 = vadd.f32 %v743_v31, %v695_v30 }
  0xe6   :  { %v792_v36 = vpop.f32.mrf.mxu3  ;;  %v696_v37 = vpop.f32.mrf.mxu1 }
  0xe7   :  { %961 = vst [vmem:[%s1891_s3 + $0x18] sm:$0xff] %v945_v32  ;;  %v793_v39 = vadd.f32 %v792_v36, %v744_v33  ;;  %v697_v48 = vadd.f32 %v696_v37, %v1765_v24 }
  0xe8   :  { %v843_v40 = vpop.f32.mrf.mxu0 }
  0xe9   :  { %v842_v41 = vadd.f32 %v841_v27, %v793_v39 }
  0xeb   :  { %v930_v45 = vadd.f32 %v1810_v56, %v842_v41 }
  0xec   :  { %v745_v49 = vpop.f32.mrf.mxu2 }
  0xed   :  { %v946_v50 = vmax.f32 %v930_v45, 0.0  ;;  %v746_v51 = vadd.f32 %v745_v49, %v697_v48 }
  0xee   :  { %v794_v18 = vpop.f32.mrf.mxu3  ;;  %v699_v52 = vpop.f32.mrf.mxu1 }
  0xef   :  { %962 = vst [vmem:[%s1891_s3 + $0x20] sm:$0xff] %v946_v50  ;;  %v795_v53 = vadd.f32 %v794_v18, %v746_v51  ;;  %v700_v58 = vadd.f32 %v699_v52, %v1795_v38 }
  0xf0   :  { %v846_v54 = vpop.f32.mrf.mxu0 }
  0xf1   :  { %v844_v55 = vadd.f32 %v843_v40, %v795_v53 }
  0xf3   :  { %v931_v57 = vadd.f32 %v1810_v56, %v844_v55 }
  0xf4   :  { %v748_v59 = vpop.f32.mrf.mxu2 }
  0xf5   :  { %v947_v60 = vmax.f32 %v931_v57, 0.0  ;;  %v749_v61 = vadd.f32 %v748_v59, %v700_v58 }
  0xf6   :  { %v797_v24 = vpop.f32.mrf.mxu3  ;;  %v701_v62 = vpop.f32.mrf.mxu1 }
  0xf7   :  { %963 = vst [vmem:[%s1891_s3 + $0x28] sm:$0xff] %v947_v60  ;;  %v798_v63 = vadd.f32 %v797_v24, %v749_v61  ;;  %v702_v3 = vadd.f32 %v701_v62, %v1801_v44 }
  0xf8   :  { %v848_v0 = vpop.f32.mrf.mxu0 }
  0xf9   :  { %v847_v1 = vadd.f32 %v846_v54, %v798_v63 }
  0xfb   :  { %v932_v2 = vadd.f32 %v1810_v56, %v847_v1 }
  0xfc   :  { %v750_v4 = vpop.f32.mrf.mxu2 }
  0xfd   :  { %v948_v5 = vmax.f32 %v932_v2, 0.0  ;;  %v751_v6 = vadd.f32 %v750_v4, %v702_v3 }
  0xfe   :  { %v799_v38 = vpop.f32.mrf.mxu3  ;;  %v704_v7 = vpop.f32.mrf.mxu1 }
  0xff   :  { %964 = vst [vmem:[%s1891_s3 + $0x30] sm:$0xff] %v948_v5  ;;  %v800_v8 = vadd.f32 %v799_v38, %v751_v6  ;;  %v705_v12 = vadd.f32 %v704_v7, %v1761_v22 }
 0x100   :  { %v851_v9 = vpop.f32.mrf.mxu0 }
 0x101   :  { %v849_v10 = vadd.f32 %v848_v0, %v800_v8 }
 0x103   :  { %v933_v11 = vadd.f32 %v1810_v56, %v849_v10 }
 0x104   :  { %v753_v13 = vpop.f32.mrf.mxu2 }
 0x105   :  { %v949_v14 = vmax.f32 %v933_v11, 0.0  ;;  %v754_v15 = vadd.f32 %v753_v13, %v705_v12 }
 0x106   :  { %v802_v44 = vpop.f32.mrf.mxu3  ;;  %v706_v16 = vpop.f32.mrf.mxu1 }
 0x107   :  { %965 = vst [vmem:[%s1891_s3 + $0x38] sm:$0xff] %v949_v14  ;;  %v803_v17 = vadd.f32 %v802_v44, %v754_v15  ;;  %v707_v25 = vadd.f32 %v706_v16, %v1791_v34 }
 0x108   :  { %v853_v19 = vpop.f32.mrf.mxu0 }
 0x109   :  { %v852_v20 = vadd.f32 %v851_v9, %v803_v17 }
 0x10b   :  { %v934_v21 = vadd.f32 %v1810_v56, %v852_v20 }
 0x10c   :  { %v755_v26 = vpop.f32.mrf.mxu2 }
 0x10d   :  { %v950_v27 = vmax.f32 %v934_v21, 0.0  ;;  %v756_v28 = vadd.f32 %v755_v26, %v707_v25 }
 0x10e   :  { %v804_v22 = vpop.f32.mrf.mxu3  ;;  %v709_v29 = vpop.f32.mrf.mxu1 }
 0x10f   :  { %966 = vst [vmem:[%s1891_s3 + $0x40] sm:$0xff] %v950_v27  ;;  %v805_v30 = vadd.f32 %v804_v22, %v756_v28  ;;  %v710_v36 = vadd.f32 %v709_v29, %v1797_v42 }
 0x110   :  { %v856_v31 = vpop.f32.mrf.mxu0 }
 0x111   :  { %v854_v32 = vadd.f32 %v853_v19, %v805_v30 }
 0x113   :  { %v935_v33 = vadd.f32 %v1810_v56, %v854_v32 }
 0x114   :  { %v758_v37 = vpop.f32.mrf.mxu2 }
 0x115   :  { %v951_v39 = vmax.f32 %v935_v33, 0.0  ;;  %v759_v40 = vadd.f32 %v758_v37, %v710_v36 }
 0x116   :  { %v807_v34 = vpop.f32.mrf.mxu3  ;;  %v711_v41 = vpop.f32.mrf.mxu1 }
 0x117   :  { %967 = vst [vmem:[%s1891_s3 + $0x48] sm:$0xff] %v951_v39  ;;  %v808_v45 = vadd.f32 %v807_v34, %v759_v40  ;;  %v712_v51 = vadd.f32 %v711_v41, %v1803_v46 }
 0x118   :  { %v858_v48 = vpop.f32.mrf.mxu0 }
 0x119   :  { %v857_v49 = vadd.f32 %v856_v31, %v808_v45 }
 0x11b   :  { %v936_v50 = vadd.f32 %v1810_v56, %v857_v49 }
 0x11c   :  { %v760_v18 = vpop.f32.mrf.mxu2 }
 0x11d   :  { %v952_v52 = vmax.f32 %v936_v50, 0.0  ;;  %v761_v53 = vadd.f32 %v760_v18, %v712_v51 }
 0x11e   :  { %v809_v42 = vpop.f32.mrf.mxu3  ;;  %v714_v54 = vpop.f32.mrf.mxu1 }
 0x11f   :  { %968 = vst [vmem:[%s1891_s3 + $0x50] sm:$0xff] %v952_v52  ;;  %v810_v55 = vadd.f32 %v809_v42, %v761_v53  ;;  %v715_v60 = vadd.f32 %v714_v54, %v1763_v23 }
 0x120   :  { %v861_v58 = vpop.f32.mrf.mxu0 }
 0x121   :  { %v859_v57 = vadd.f32 %v858_v48, %v810_v55 }
 0x123   :  { %v937_v59 = vadd.f32 %v1810_v56, %v859_v57 }
 0x124   :  { %v763_v61 = vpop.f32.mrf.mxu2 }
 0x125   :  { %v953_v24 = vmax.f32 %v937_v59, 0.0  ;;  %v764_v62 = vadd.f32 %v763_v61, %v715_v60 }
 0x126   :  { %v812_v46 = vpop.f32.mrf.mxu3  ;;  %v716_v63 = vpop.f32.mrf.mxu1 }
 0x127   :  { %969 = vst [vmem:[%s1891_s3 + $0x58] sm:$0xff] %v953_v24  ;;  %v813_v0 = vadd.f32 %v812_v46, %v764_v62  ;;  %v717_v3 = vadd.f32 %v716_v63, %v1793_v35 }
 0x128   :  { %v863_v4 = vpop.f32.mrf.mxu0 }
 0x129   :  { %v862_v1 = vadd.f32 %v861_v58, %v813_v0 }
 0x12b   :  { %v938_v2 = vadd.f32 %v1810_v56, %v862_v1 }
 0x12c   :  { %v765_v5 = vpop.f32.mrf.mxu2 }
 0x12d   :  { %v954_v6 = vmax.f32 %v938_v2, 0.0  ;;  %v766_v38 = vadd.f32 %v765_v5, %v717_v3 }
 0x12e   :  { %v814_v23 = vpop.f32.mrf.mxu3  ;;  %v719_v7 = vpop.f32.mrf.mxu1 }
 0x12f   :  { %970 = vst [vmem:[%s1891_s3 + $0x60] sm:$0xff] %v954_v6  ;;  %v815_v8 = vadd.f32 %v814_v23, %v766_v38  ;;  %v720_v11 = vadd.f32 %v719_v7, %v1799_v43 }
 0x130   :  { %v866_v15 = vpop.f32.mrf.mxu0 }
 0x131   :  { %v864_v9 = vadd.f32 %v863_v4, %v815_v8 }
 0x133   :  { %v939_v10 = vadd.f32 %v1810_v56, %v864_v9 }
 0x134   :  { %v768_v12 = vpop.f32.mrf.mxu2 }
 0x135   :  { %v955_v13 = vmax.f32 %v939_v10, 0.0  ;;  %v769_v14 = vadd.f32 %v768_v12, %v720_v11 }
 0x136   :  { %v817_v35 = vpop.f32.mrf.mxu3  ;;  %v721_v16 = vpop.f32.mrf.mxu1 }
 0x137   :  { %971 = vst [vmem:[%s1891_s3 + $0x68] sm:$0xff] %v955_v13  ;;  %v818_v44 = vadd.f32 %v817_v35, %v769_v14  ;;  %v722_v20 = vadd.f32 %v721_v16, %v1805_v47 }
 0x138   :  { %v868_v28 = vpop.f32.mrf.mxu0 }
 0x139   :  { %v867_v17 = vadd.f32 %v866_v15, %v818_v44 }
 0x13b   :  { %v940_v19 = vadd.f32 %v1810_v56, %v867_v17 }
 0x13c   :  { %v770_v21 = vpop.f32.mrf.mxu2 }
 0x13d   :  { %v956_v25 = vmax.f32 %v940_v19, 0.0  ;;  %v771_v26 = vadd.f32 %v770_v21, %v722_v20 }
 0x13e   :  { %v819_v43 = vpop.f32.mrf.mxu3 }
 0x13f   :  { %972 = vst [vmem:[%s1891_s3 + $0x70] sm:$0xff] %v956_v25  ;;  %v820_v27 = vadd.f32 %v819_v43, %v771_v26 }
 0x141   :  { %v869_v22 = vadd.f32 %v868_v28, %v820_v27 }
 0x143   :  { %v941_v29 = vadd.f32 %v1810_v56, %v869_v22 }
 0x145   :  { %v957_v30 = vmax.f32 %v941_v29, 0.0 }
 0x147   :  { %973 = vst [vmem:[%s1891_s3 + $0x78] sm:$0xff] %v957_v30 }

// kernel: _lambda_.34
= control target key start
LH: loop header
LB: loop body
LE: loop exit
PB: predicated region body
PF: predicated region fallthrough
CT: control target
= control target key end

     0   :  { %s1872_s1 = inlined_call_operand.vmem [shape: bf16[640,128], index: 1, kind: input, shape index: {}]   ;;  %s1873_s0 = inlined_call_operand.vmem [shape: bf16[128,640], index: 0, kind: input, shape index: {}]   ;;  %s1874_s2 = inlined_call_operand.vmem [shape: f32[1,128], index: 2, kind: input, shape index: {}]   ;;  %s1875_s3 = inlined_call_operand.vmem [shape: f32[128,128], index: 3, kind: output, shape index: {}]  }
   0x1   :  { %v1329_v0 = vld [vmem:[%s1872_s1 + $0x38] sm:$0xff]  ;;  %v1328_v1 = vld [vmem:[%s1872_s1 + $0x30] sm:$0xff]  ;;  %v1327_v2 = vld [vmem:[%s1872_s1 + $0x28] sm:$0xff] }
   0x2   :  { %1362 = vmatpush.bf16.msra.mxu1 %v1329_v0  ;;  %1363 = vmatpush.bf16.msra.mxu2 %v1329_v0  ;;  %v1326_v3 = vld [vmem:[%s1872_s1 + $0x20] sm:$0xff]  ;;  %v1325_v4 = vld [vmem:[%s1872_s1 + $0x18] sm:$0xff]  ;;  %v1324_v5 = vld [vmem:[%s1872_s1 + $0x10] sm:$0xff] }
   0x3   :  { %1364 = vmatpush.bf16.msra.mxu3 %v1329_v0  ;;  %626 = vmatpush.bf16.msra.mxu0 %v1329_v0  ;;  %v1323_v6 = vld [vmem:[%s1872_s1 + $0x8] sm:$0xff]  ;;  %v1322_v7 = vld [vmem:[%s1872_s1] sm:$0xff]  ;;  %v1004_v8 = vld [vmem:[%s1873_s0 + $0x50] sm:$0xf] }
   0x4   :  { %v1294_v9 = vld [vmem:[%s1873_s0 + $0x60] sm:$0xf0]  ;;  %v1044_v10 = vld [vmem:[%s1873_s0 + $0xa0] sm:$0xf]  ;;  %v1304_v11 = vld [vmem:[%s1873_s0 + $0xb0] sm:$0xf0] }
   0x5   :  { %v1084_v12 = vld [vmem:[%s1873_s0 + $0xf0] sm:$0xf]  ;;  %v1314_v13 = vld [vmem:[%s1873_s0 + $0x100] sm:$0xf0]  ;;  %v964_v14 = vld [vmem:[%s1873_s0] sm:$0xf]  ;;  %v1005_v18 = vor.u32 %v1294_v9, %v1004_v8  ;;  %v1045_v19 = vor.u32 %v1304_v11, %v1044_v10 }
   0x6   :  { %1365 = vmatpush.bf16.msra.mxu1 %v1328_v1  ;;  %1366 = vmatpush.bf16.msra.mxu2 %v1328_v1  ;;  %v1284_v15 = vld [vmem:[%s1873_s0 + $0x10] sm:$0xf0]  ;;  %v1345_v16 = vld [vmem:[%s1872_s1 + $0xb8] sm:$0xff]  ;;  %v1085_v20 = vor.u32 %v1314_v13, %v1084_v12  ;;  %v1343_v28 = vld [vmem:[%s1872_s1 + $0xa8] sm:$0xff] }
   0x7   :  { %1367 = vmatpush.bf16.msra.mxu3 %v1328_v1  ;;  %627 = vmatpush.bf16.msra.mxu0 %v1328_v1  ;;  %v1337_v17 = vld [vmem:[%s1872_s1 + $0x78] sm:$0xff]  ;;  %v965_v21 = vor.u32 %v1284_v15, %v964_v14  ;;  %v1344_v24 = vld [vmem:[%s1872_s1 + $0xb0] sm:$0xff]  ;;  %v1335_v29 = vld [vmem:[%s1872_s1 + $0x68] sm:$0xff] }
   0x8   :  { %v1353_v22 = vld [vmem:[%s1872_s1 + $0xf8] sm:$0xff]  ;;  %v1336_v25 = vld [vmem:[%s1872_s1 + $0x70] sm:$0xff]  ;;  %v1351_v30 = vld [vmem:[%s1872_s1 + $0xe8] sm:$0xff] }
   0x9   :  { %v1361_v23 = vld [vmem:[%s1872_s1 + $0x138] sm:$0xff]  ;;  %v1352_v26 = vld [vmem:[%s1872_s1 + $0xf0] sm:$0xff]  ;;  %v1359_v31 = vld [vmem:[%s1872_s1 + $0x128] sm:$0xff] }
   0xa   :  { %1368 = vmatpush.bf16.msra.mxu1 %v1327_v2  ;;  %1369 = vmatpush.bf16.msra.mxu2 %v1327_v2  ;;  %v1360_v27 = vld [vmem:[%s1872_s1 + $0x130] sm:$0xff]  ;;  %v1342_v32 = vld [vmem:[%s1872_s1 + $0xa0] sm:$0xff]  ;;  %v1024_v36 = vld [vmem:[%s1873_s0 + $0x78] sm:$0xf] }
   0xb   :  { %1370 = vmatpush.bf16.msra.mxu3 %v1327_v2  ;;  %628 = vmatpush.bf16.msra.mxu0 %v1327_v2  ;;  %v1334_v33 = vld [vmem:[%s1872_s1 + $0x60] sm:$0xff]  ;;  %v1299_v37 = vld [vmem:[%s1873_s0 + $0x88] sm:$0xf0]  ;;  %v1064_v38 = vld [vmem:[%s1873_s0 + $0xc8] sm:$0xf] }
   0xc   :  { %v1350_v34 = vld [vmem:[%s1872_s1 + $0xe0] sm:$0xff]  ;;  %v1309_v39 = vld [vmem:[%s1873_s0 + $0xd8] sm:$0xf0]  ;;  %v1104_v40 = vld [vmem:[%s1873_s0 + $0x118] sm:$0xf]  ;;  %v1025_v46 = vor.u32 %v1299_v37, %v1024_v36 }
   0xd   :  { %v1358_v35 = vld [vmem:[%s1872_s1 + $0x120] sm:$0xff]  ;;  %v1319_v41 = vld [vmem:[%s1873_s0 + $0x128] sm:$0xf0]  ;;  %v984_v42 = vld [vmem:[%s1873_s0 + $0x28] sm:$0xf]  ;;  %v1065_v47 = vor.u32 %v1309_v39, %v1064_v38 }
   0xe   :  { %1371 = vmatpush.bf16.msra.mxu1 %v1326_v3  ;;  %1372 = vmatpush.bf16.msra.mxu2 %v1326_v3  ;;  %v1289_v43 = vld [vmem:[%s1873_s0 + $0x38] sm:$0xf0]  ;;  %v1105_v48 = vor.u32 %v1319_v41, %v1104_v40  ;;  %v1340_v52 = vld [vmem:[%s1872_s1 + $0x90] sm:$0xff]  ;;  %v1339_v56 = vld [vmem:[%s1872_s1 + $0x88] sm:$0xff] }
   0xf   :  { %1373 = vmatpush.bf16.msra.mxu3 %v1326_v3  ;;  %629 = vmatpush.bf16.msra.mxu0 %v1326_v3  ;;  %v1341_v44 = vld [vmem:[%s1872_s1 + $0x98] sm:$0xff]  ;;  %v985_v49 = vor.u32 %v1289_v43, %v984_v42  ;;  %v1332_v53 = vld [vmem:[%s1872_s1 + $0x50] sm:$0xff]  ;;  %v1331_v57 = vld [vmem:[%s1872_s1 + $0x48] sm:$0xff] }
  0x10   :  { %v1333_v45 = vld [vmem:[%s1872_s1 + $0x58] sm:$0xff]  ;;  %v1348_v54 = vld [vmem:[%s1872_s1 + $0xd0] sm:$0xff]  ;;  %v1347_v58 = vld [vmem:[%s1872_s1 + $0xc8] sm:$0xff] }
  0x11   :  { %v1349_v50 = vld [vmem:[%s1872_s1 + $0xd8] sm:$0xff]  ;;  %v1356_v55 = vld [vmem:[%s1872_s1 + $0x110] sm:$0xff]  ;;  %v1355_v59 = vld [vmem:[%s1872_s1 + $0x108] sm:$0xff] }
  0x12   :  { %1374 = vmatpush.bf16.msra.mxu1 %v1325_v4  ;;  %1375 = vmatpush.bf16.msra.mxu2 %v1325_v4  ;;  %v1357_v51 = vld [vmem:[%s1872_s1 + $0x118] sm:$0xff]  ;;  %v1338_v60 = vld [vmem:[%s1872_s1 + $0x80] sm:$0xff]  ;;  %v972_v2 = vld [vmem:[%s1873_s0 + $0x8] sm:$0xf] }
  0x13   :  { %1376 = vmatpush.bf16.msra.mxu3 %v1325_v4  ;;  %630 = vmatpush.bf16.msra.mxu0 %v1325_v4  ;;  %v1330_v61 = vld [vmem:[%s1872_s1 + $0x40] sm:$0xff]  ;;  %v966_v1 = vld [vmem:[%s1873_s0 + $0x14] sm:$0xf0]  ;;  %v1285_v3 = vld [vmem:[%s1873_s0 + $0x18] sm:$0xf0] }
  0x14   :  { %v1346_v62 = vld [vmem:[%s1872_s1 + $0xc0] sm:$0xff]  ;;  %v1283_v4 = vld [vmem:[%s1873_s0 + $0xc] sm:$0xf]  ;;  %v973_v9 = vor.u32 %v1285_v3, %v972_v2  ;;  %v992_v14 = vld [vmem:[%s1873_s0 + $0x30] sm:$0xf] }
  0x15   :  { %v1354_v63 = vld [vmem:[%s1872_s1 + $0x100] sm:$0xff]  ;;  %v1287_v12 = vld [vmem:[%s1873_s0 + $0x2c] sm:$0xf]  ;;  %v1297_v36 = vld [vmem:[%s1873_s0 + $0x7c] sm:$0xf] }
  0x16   :  { %1377 = vmatpush.bf16.msra.mxu1 %v1324_v5  ;;  %1378 = vmatpush.bf16.msra.mxu2 %v1324_v5  ;;  %v1282_v0 = vld [vmem:[%s1873_s0 + $0x4] sm:$0xf]  ;;  %v986_v13 = vld [vmem:[%s1873_s0 + $0x3c] sm:$0xf0]  ;;  %v1026_v37 = vld [vmem:[%s1873_s0 + $0x8c] sm:$0xf0] }
  0x17   :  { %1379 = vmatpush.bf16.msra.mxu3 %v1324_v5  ;;  %631 = vmatpush.bf16.msra.mxu0 %v1324_v5  ;;  %v974_v5 = vld [vmem:[%s1873_s0 + $0x1c] sm:$0xf0]  ;;  %v969_v8 = vor.u32 %v1282_v0, %v966_v1  ;;  %v1290_v15 = vld [vmem:[%s1873_s0 + $0x40] sm:$0xf0]  ;;  %v1300_v39 = vld [vmem:[%s1873_s0 + $0x90] sm:$0xf0] }
  0x18   :  { %v977_v10 = vor.u32 %v1283_v4, %v974_v5  ;;  %v1032_v38 = vld [vmem:[%s1873_s0 + $0x80] sm:$0xf]  ;;  %v1298_v40 = vld [vmem:[%s1873_s0 + $0x84] sm:$0xf]  ;;  %v1034_v41 = vld [vmem:[%s1873_s0 + $0x94] sm:$0xf0] }
  0x19   :  { %v1040_v42 = vld [vmem:[%s1873_s0 + $0x88] sm:$0xf]  ;;  %v1301_v43 = vld [vmem:[%s1873_s0 + $0x98] sm:$0xf0]  ;;  %v1308_v0 = vld [vmem:[%s1873_s0 + $0xd4] sm:$0xf] }
  0x1a   :  { %1380 = vmatpush.bf16.msra.mxu1 %v1323_v6  ;;  %1381 = vmatpush.bf16.msra.mxu2 %v1323_v6  ;;  %v1074_v1 = vld [vmem:[%s1873_s0 + $0xe4] sm:$0xf0]  ;;  %v1080_v2 = vld [vmem:[%s1873_s0 + $0xd8] sm:$0xf]  ;;  %v1311_v3 = vld [vmem:[%s1873_s0 + $0xe8] sm:$0xf0] }
  0x1b   :  { %1382 = vmatpush.bf16.msra.mxu3 %v1323_v6  ;;  %632 = vmatpush.bf16.msra.mxu0 %v1323_v6  ;;  %v980_v6 = vld [vmem:[%s1873_s0 + $0x10] sm:$0xf] }
  0x1e   :  { %1383 = vmatpush.bf16.msra.mxu1 %v1322_v7  ;;  %1384 = vmatpush.bf16.msra.mxu2 %v1322_v7 }
  0x1f   :  { %1385 = vmatpush.bf16.msra.mxu3 %v1322_v7  ;;  %633 = vmatpush.bf16.msra.mxu0 %v1322_v7  ;;  %v1286_v7 = vld [vmem:[%s1873_s0 + $0x20] sm:$0xf0] }
  0x20   :  { %v981_v11 = vor.u32 %v1286_v7, %v980_v6  ;;  %v1077_v6 = vor.u32 %v1308_v0, %v1074_v1  ;;  %v1081_v7 = vor.u32 %v1311_v3, %v1080_v2 }
  0x21   :  { %644 = vmatmul.bf16.vlgmr.msra.gmra.mxu1 %v1005_v18  ;;  %654 = vmatmul.bf16.vlgmr.msra.gmra.mxu2 %v1045_v19  ;;  %v1000_v18 = vld [vmem:[%s1873_s0 + $0x38] sm:$0xf]  ;;  %v1291_v19 = vld [vmem:[%s1873_s0 + $0x48] sm:$0xf0] }
  0x22   :  { %724 = vmatpush.bf16.msrb.mxu2 %v1345_v16  ;;  %675 = vmatpush.bf16.msrb.mxu1 %v1337_v17  ;;  %v1288_v16 = vld [vmem:[%s1873_s0 + $0x34] sm:$0xf]  ;;  %v994_v17 = vld [vmem:[%s1873_s0 + $0x44] sm:$0xf0] }
  0x23   :  { %664 = vmatmul.bf16.vlgmr.msra.gmra.mxu3 %v1085_v20  ;;  %634 = vmatmul.bf16.vlgmr.msra.gmra.mxu0 %v965_v21  ;;  %v989_v20 = vor.u32 %v1287_v12, %v986_v13  ;;  %v993_v21 = vor.u32 %v1290_v15, %v992_v14  ;;  %v1313_v12 = vld [vmem:[%s1873_s0 + $0xfc] sm:$0xf]  ;;  %v1094_v13 = vld [vmem:[%s1873_s0 + $0x10c] sm:$0xf0]  ;;  %v1100_v14 = vld [vmem:[%s1873_s0 + $0x100] sm:$0xf] }
  0x24   :  { %773 = vmatpush.bf16.msrb.mxu3 %v1353_v22  ;;  %822 = vmatpush.bf16.msrb.mxu0 %v1361_v23  ;;  %v997_v22 = vor.u32 %v1288_v16, %v994_v17  ;;  %v1001_v23 = vor.u32 %v1291_v19, %v1000_v18  ;;  %v1316_v15 = vld [vmem:[%s1873_s0 + $0x110] sm:$0xf0]  ;;  %v1097_v19 = vor.u32 %v1313_v12, %v1094_v13 }
  0x26   :  { %725 = vmatpush.bf16.msrb.mxu2 %v1344_v24  ;;  %676 = vmatpush.bf16.msrb.mxu1 %v1336_v25  ;;  %v1292_v24 = vld [vmem:[%s1873_s0 + $0x54] sm:$0xf]  ;;  %v1006_v25 = vld [vmem:[%s1873_s0 + $0x64] sm:$0xf0] }
  0x28   :  { %774 = vmatpush.bf16.msrb.mxu3 %v1352_v26  ;;  %823 = vmatpush.bf16.msrb.mxu0 %v1360_v27  ;;  %v1012_v26 = vld [vmem:[%s1873_s0 + $0x58] sm:$0xf]  ;;  %v1295_v27 = vld [vmem:[%s1873_s0 + $0x68] sm:$0xf0] }
  0x2a   :  { %726 = vmatpush.bf16.msrb.mxu2 %v1343_v28  ;;  %677 = vmatpush.bf16.msrb.mxu1 %v1335_v29  ;;  %v1293_v28 = vld [vmem:[%s1873_s0 + $0x5c] sm:$0xf]  ;;  %v1014_v29 = vld [vmem:[%s1873_s0 + $0x6c] sm:$0xf0] }
  0x2c   :  { %775 = vmatpush.bf16.msrb.mxu3 %v1351_v30  ;;  %824 = vmatpush.bf16.msrb.mxu0 %v1359_v31  ;;  %v1020_v30 = vld [vmem:[%s1873_s0 + $0x60] sm:$0xf]  ;;  %v1296_v31 = vld [vmem:[%s1873_s0 + $0x70] sm:$0xf0] }
  0x2e   :  { %727 = vmatpush.bf16.msrb.mxu2 %v1342_v32  ;;  %678 = vmatpush.bf16.msrb.mxu1 %v1334_v33  ;;  %v1009_v32 = vor.u32 %v1292_v24, %v1006_v25  ;;  %v1013_v33 = vor.u32 %v1295_v27, %v1012_v26  ;;  %v1317_v26 = vld [vmem:[%s1873_s0 + $0x11c] sm:$0xf]  ;;  %v1106_v27 = vld [vmem:[%s1873_s0 + $0x12c] sm:$0xf0] }
  0x30   :  { %776 = vmatpush.bf16.msrb.mxu3 %v1350_v34  ;;  %825 = vmatpush.bf16.msrb.mxu0 %v1358_v35  ;;  %v1017_v34 = vor.u32 %v1293_v28, %v1014_v29  ;;  %v1021_v35 = vor.u32 %v1296_v31, %v1020_v30  ;;  %v1112_v28 = vld [vmem:[%s1873_s0 + $0x120] sm:$0xf]  ;;  %v1320_v29 = vld [vmem:[%s1873_s0 + $0x130] sm:$0xf0]  ;;  %v1318_v30 = vld [vmem:[%s1873_s0 + $0x124] sm:$0xf] }
  0x31   :  { %649 = vmatmul.bf16.gmra.mxu1 %v1025_v46  ;;  %659 = vmatmul.bf16.gmra.mxu2 %v1065_v47  ;;  %v1037_v46 = vor.u32 %v1298_v40, %v1034_v41  ;;  %v1041_v47 = vor.u32 %v1301_v43, %v1040_v42  ;;  %v1114_v31 = vld [vmem:[%s1873_s0 + $0x134] sm:$0xf0] }
  0x32   :  { %728 = vmatpush.bf16.msrb.mxu2 %v1341_v44  ;;  %679 = vmatpush.bf16.msrb.mxu1 %v1333_v45  ;;  %v1029_v44 = vor.u32 %v1297_v36, %v1026_v37  ;;  %v1033_v45 = vor.u32 %v1300_v39, %v1032_v38  ;;  %v1109_v36 = vor.u32 %v1317_v26, %v1106_v27 }
  0x33   :  { %669 = vmatmul.bf16.gmra.mxu3 %v1105_v48  ;;  %639 = vmatmul.bf16.gmra.mxu0 %v985_v49  ;;  %v1302_v48 = vld [vmem:[%s1873_s0 + $0xa4] sm:$0xf]  ;;  %v1046_v49 = vld [vmem:[%s1873_s0 + $0xb4] sm:$0xf0]  ;;  %v1113_v37 = vor.u32 %v1320_v29, %v1112_v28  ;;  %v1117_v39 = vor.u32 %v1318_v30, %v1114_v31 }
  0x34   :  { %777 = vmatpush.bf16.msrb.mxu3 %v1349_v50  ;;  %826 = vmatpush.bf16.msrb.mxu0 %v1357_v51  ;;  %v1052_v50 = vld [vmem:[%s1873_s0 + $0xa8] sm:$0xf]  ;;  %v1305_v51 = vld [vmem:[%s1873_s0 + $0xb8] sm:$0xf0] }
  0x36   :  { %729 = vmatpush.bf16.msrb.mxu2 %v1340_v52  ;;  %680 = vmatpush.bf16.msrb.mxu1 %v1332_v53  ;;  %v1303_v52 = vld [vmem:[%s1873_s0 + $0xac] sm:$0xf]  ;;  %v1054_v53 = vld [vmem:[%s1873_s0 + $0xbc] sm:$0xf0] }
  0x38   :  { %778 = vmatpush.bf16.msrb.mxu3 %v1348_v54  ;;  %827 = vmatpush.bf16.msrb.mxu0 %v1356_v55  ;;  %v1060_v54 = vld [vmem:[%s1873_s0 + $0xb0] sm:$0xf]  ;;  %v1306_v55 = vld [vmem:[%s1873_s0 + $0xc0] sm:$0xf0] }
  0x3a   :  { %730 = vmatpush.bf16.msrb.mxu2 %v1339_v56  ;;  %681 = vmatpush.bf16.msrb.mxu1 %v1331_v57  ;;  %v1049_v56 = vor.u32 %v1302_v48, %v1046_v49  ;;  %v1053_v57 = vor.u32 %v1305_v51, %v1052_v50 }
  0x3c   :  { %779 = vmatpush.bf16.msrb.mxu3 %v1347_v58  ;;  %828 = vmatpush.bf16.msrb.mxu0 %v1355_v59  ;;  %v1057_v58 = vor.u32 %v1303_v52, %v1054_v53  ;;  %v1061_v59 = vor.u32 %v1306_v55, %v1060_v54 }
  0x3e   :  { %731 = vmatpush.bf16.msrb.mxu2 %v1338_v60  ;;  %682 = vmatpush.bf16.msrb.mxu1 %v1330_v61  ;;  %v1307_v60 = vld [vmem:[%s1873_s0 + $0xcc] sm:$0xf]  ;;  %v1066_v61 = vld [vmem:[%s1873_s0 + $0xdc] sm:$0xf0] }
  0x3f   :  { %v1069_v4 = vor.u32 %v1307_v60, %v1066_v61 }
  0x40   :  { %780 = vmatpush.bf16.msrb.mxu3 %v1346_v62  ;;  %829 = vmatpush.bf16.msrb.mxu0 %v1354_v63  ;;  %v1072_v62 = vld [vmem:[%s1873_s0 + $0xd0] sm:$0xf]  ;;  %v1310_v63 = vld [vmem:[%s1873_s0 + $0xe0] sm:$0xf0] }
  0x41   :  { %683 = vmatmul.bf16.vlgmr.msrb.gmra.mxu1 %v969_v8  ;;  %732 = vmatmul.bf16.vlgmr.msrb.gmra.mxu2 %v973_v9  ;;  %v1073_v5 = vor.u32 %v1310_v63, %v1072_v62  ;;  %v1312_v8 = vld [vmem:[%s1873_s0 + $0xf4] sm:$0xf]  ;;  %v1086_v9 = vld [vmem:[%s1873_s0 + $0x104] sm:$0xf0] }
  0x42   :  { %v1089_v16 = vor.u32 %v1312_v8, %v1086_v9 }
  0x43   :  { %781 = vmatmul.bf16.vlgmr.msrb.gmra.mxu3 %v977_v10  ;;  %830 = vmatmul.bf16.vlgmr.msrb.gmra.mxu0 %v981_v11  ;;  %v1092_v10 = vld [vmem:[%s1873_s0 + $0xf8] sm:$0xf]  ;;  %v1315_v11 = vld [vmem:[%s1873_s0 + $0x108] sm:$0xf0] }
  0x44   :  { %v1093_v17 = vor.u32 %v1315_v11, %v1092_v10 }
  0x51   :  { %688 = vmatmul.bf16.gmra.mxu1 %v989_v20  ;;  %737 = vmatmul.bf16.gmra.mxu2 %v993_v21  ;;  %v1101_v20 = vor.u32 %v1316_v15, %v1100_v14 }
  0x53   :  { %786 = vmatmul.bf16.gmra.mxu3 %v997_v22  ;;  %835 = vmatmul.bf16.gmra.mxu0 %v1001_v23 }
  0x61   :  { %693 = vmatmul.bf16.gmra.mxu1 %v1009_v32  ;;  %742 = vmatmul.bf16.gmra.mxu2 %v1013_v33  ;;  %v1120_v32 = vld [vmem:[%s1873_s0 + $0x128] sm:$0xf]  ;;  %v1321_v33 = vld [vmem:[%s1873_s0 + $0x138] sm:$0xf0] }
  0x62   :  { %v1121_v40 = vor.u32 %v1321_v33, %v1120_v32 }
  0x63   :  { %791 = vmatmul.bf16.gmra.mxu3 %v1017_v34  ;;  %840 = vmatmul.bf16.gmra.mxu0 %v1021_v35 }
  0x71   :  { %698 = vmatmul.bf16.gmra.mxu1 %v1029_v44  ;;  %747 = vmatmul.bf16.gmra.mxu2 %v1033_v45 }
  0x73   :  { %796 = vmatmul.bf16.gmra.mxu3 %v1037_v46  ;;  %845 = vmatmul.bf16.gmra.mxu0 %v1041_v47 }
  0x81   :  { %703 = vmatmul.bf16.gmra.mxu1 %v1049_v56  ;;  %752 = vmatmul.bf16.gmra.mxu2 %v1053_v57  ;;  %v1794_v56 = vld [vmem:[%s1874_s2] ss:$0 sm:$0xff] }
  0x83   :  { %801 = vmatmul.bf16.gmra.mxu3 %v1057_v58  ;;  %850 = vmatmul.bf16.gmra.mxu0 %v1061_v59 }
  0x91   :  { %708 = vmatmul.bf16.gmra.mxu1 %v1069_v4  ;;  %757 = vmatmul.bf16.gmra.mxu2 %v1073_v5 }
  0x93   :  { %806 = vmatmul.bf16.gmra.mxu3 %v1077_v6  ;;  %855 = vmatmul.bf16.gmra.mxu0 %v1081_v7 }
  0x9e   :  { %v1743_v18 = vpop.f32.mrf.mxu1 }
  0xa0   :  { %v635_v21 = vpop.f32.mrf.mxu0 }
  0xa1   :  { %713 = vmatmul.bf16.gmra.mxu1 %v1089_v16  ;;  %762 = vmatmul.bf16.gmra.mxu2 %v1093_v17 }
  0xa3   :  { %811 = vmatmul.bf16.gmra.mxu3 %v1097_v19  ;;  %860 = vmatmul.bf16.gmra.mxu0 %v1101_v20 }
  0xa4   :  { %v1745_v22 = vpop.f32.mrf.mxu2 }
  0xa6   :  { %v1747_v23 = vpop.f32.mrf.mxu3  ;;  %v1749_v24 = vpop.f32.mrf.mxu1 }
  0xa8   :  { %v637_v25 = vpop.f32.mrf.mxu0 }
  0xac   :  { %v1775_v34 = vpop.f32.mrf.mxu2 }
  0xae   :  { %v1777_v35 = vpop.f32.mrf.mxu3  ;;  %v1779_v38 = vpop.f32.mrf.mxu1 }
  0xb0   :  { %v640_v41 = vpop.f32.mrf.mxu0 }
  0xb1   :  { %718 = vmatmul.bf16.gmra.mxu1 %v1109_v36  ;;  %767 = vmatmul.bf16.gmra.mxu2 %v1113_v37 }
  0xb3   :  { %816 = vmatmul.bf16.gmra.mxu3 %v1117_v39  ;;  %865 = vmatmul.bf16.gmra.mxu0 %v1121_v40 }
  0xb4   :  { %v1781_v42 = vpop.f32.mrf.mxu2 }
  0xb6   :  { %v1783_v43 = vpop.f32.mrf.mxu3  ;;  %v1785_v44 = vpop.f32.mrf.mxu1 }
  0xb8   :  { %v642_v45 = vpop.f32.mrf.mxu0 }
  0xbc   :  { %v1787_v46 = vpop.f32.mrf.mxu2 }
  0xbe   :  { %v1789_v47 = vpop.f32.mrf.mxu3  ;;  %v684_v48 = vpop.f32.mrf.mxu1 }
  0xbf   :  { %v685_v50 = vadd.f32 %v684_v48, %v635_v21 }
  0xc0   :  { %v831_v49 = vpop.f32.mrf.mxu0 }
  0xc4   :  { %v733_v51 = vpop.f32.mrf.mxu2 }
  0xc5   :  { %v734_v52 = vadd.f32 %v733_v51, %v685_v50 }
  0xc6   :  { %v782_v53 = vpop.f32.mrf.mxu3  ;;  %v686_v54 = vpop.f32.mrf.mxu1 }
  0xc7   :  { %v783_v55 = vadd.f32 %v782_v53, %v734_v52  ;;  %v687_v60 = vadd.f32 %v686_v54, %v637_v25 }
  0xc8   :  { %v833_v57 = vpop.f32.mrf.mxu0 }
  0xc9   :  { %v832_v58 = vadd.f32 %v831_v49, %v783_v55 }
  0xcb   :  { %v926_v59 = vadd.f32 %v1794_v56, %v832_v58 }
  0xcc   :  { %v735_v61 = vpop.f32.mrf.mxu2 }
  0xcd   :  { %942 = vst [vmem:[%s1875_s3] sm:$0xff] %v926_v59  ;;  %v736_v62 = vadd.f32 %v735_v61, %v687_v60 }
  0xce   :  { %v784_v63 = vpop.f32.mrf.mxu3  ;;  %v689_v0 = vpop.f32.mrf.mxu1 }
  0xcf   :  { %v785_v1 = vadd.f32 %v784_v63, %v736_v62  ;;  %v690_v5 = vadd.f32 %v689_v0, %v640_v41 }
  0xd0   :  { %v836_v2 = vpop.f32.mrf.mxu0 }
  0xd1   :  { %v834_v3 = vadd.f32 %v833_v57, %v785_v1 }
  0xd3   :  { %v927_v4 = vadd.f32 %v1794_v56, %v834_v3 }
  0xd4   :  { %v738_v6 = vpop.f32.mrf.mxu2 }
  0xd5   :  { %943 = vst [vmem:[%s1875_s3 + $0x8] sm:$0xff] %v927_v4  ;;  %v739_v7 = vadd.f32 %v738_v6, %v690_v5 }
  0xd6   :  { %v787_v8 = vpop.f32.mrf.mxu3  ;;  %v691_v9 = vpop.f32.mrf.mxu1 }
  0xd7   :  { %v788_v10 = vadd.f32 %v787_v8, %v739_v7  ;;  %v692_v14 = vadd.f32 %v691_v9, %v642_v45 }
  0xd8   :  { %v838_v11 = vpop.f32.mrf.mxu0 }
  0xd9   :  { %v837_v12 = vadd.f32 %v836_v2, %v788_v10 }
  0xdb   :  { %v928_v13 = vadd.f32 %v1794_v56, %v837_v12 }
  0xdc   :  { %v740_v15 = vpop.f32.mrf.mxu2 }
  0xdd   :  { %944 = vst [vmem:[%s1875_s3 + $0x10] sm:$0xff] %v928_v13  ;;  %v741_v16 = vadd.f32 %v740_v15, %v692_v14 }
  0xde   :  { %v789_v17 = vpop.f32.mrf.mxu3  ;;  %v694_v19 = vpop.f32.mrf.mxu1 }
  0xdf   :  { %v790_v20 = vadd.f32 %v789_v17, %v741_v16  ;;  %v695_v27 = vadd.f32 %v694_v19, %v1743_v18 }
  0xe0   :  { %v841_v21 = vpop.f32.mrf.mxu0 }
  0xe1   :  { %v839_v25 = vadd.f32 %v838_v11, %v790_v20 }
  0xe3   :  { %v929_v26 = vadd.f32 %v1794_v56, %v839_v25 }
  0xe4   :  { %v743_v28 = vpop.f32.mrf.mxu2 }
  0xe5   :  { %945 = vst [vmem:[%s1875_s3 + $0x18] sm:$0xff] %v929_v26  ;;  %v744_v29 = vadd.f32 %v743_v28, %v695_v27 }
  0xe6   :  { %v792_v30 = vpop.f32.mrf.mxu3  ;;  %v696_v31 = vpop.f32.mrf.mxu1 }
  0xe7   :  { %v793_v32 = vadd.f32 %v792_v30, %v744_v29  ;;  %v697_v39 = vadd.f32 %v696_v31, %v1749_v24 }
  0xe8   :  { %v843_v33 = vpop.f32.mrf.mxu0 }
  0xe9   :  { %v842_v36 = vadd.f32 %v841_v21, %v793_v32 }
  0xeb   :  { %v930_v37 = vadd.f32 %v1794_v56, %v842_v36 }
  0xec   :  { %v745_v40 = vpop.f32.mrf.mxu2 }
  0xed   :  { %946 = vst [vmem:[%s1875_s3 + $0x20] sm:$0xff] %v930_v37  ;;  %v746_v18 = vadd.f32 %v745_v40, %v697_v39 }
  0xee   :  { %v794_v41 = vpop.f32.mrf.mxu3  ;;  %v699_v45 = vpop.f32.mrf.mxu1 }
  0xef   :  { %v795_v48 = vadd.f32 %v794_v41, %v746_v18  ;;  %v700_v52 = vadd.f32 %v699_v45, %v1779_v38 }
  0xf0   :  { %v846_v49 = vpop.f32.mrf.mxu0 }
  0xf1   :  { %v844_v50 = vadd.f32 %v843_v33, %v795_v48 }
  0xf3   :  { %v931_v51 = vadd.f32 %v1794_v56, %v844_v50 }
  0xf4   :  { %v748_v53 = vpop.f32.mrf.mxu2 }
  0xf5   :  { %947 = vst [vmem:[%s1875_s3 + $0x28] sm:$0xff] %v931_v51  ;;  %v749_v24 = vadd.f32 %v748_v53, %v700_v52 }
  0xf6   :  { %v797_v54 = vpop.f32.mrf.mxu3  ;;  %v701_v55 = vpop.f32.mrf.mxu1 }
  0xf7   :  { %v798_v57 = vadd.f32 %v797_v54, %v749_v24  ;;  %v702_v61 = vadd.f32 %v701_v55, %v1785_v44 }
  0xf8   :  { %v848_v58 = vpop.f32.mrf.mxu0 }
  0xf9   :  { %v847_v59 = vadd.f32 %v846_v49, %v798_v57 }
  0xfb   :  { %v932_v60 = vadd.f32 %v1794_v56, %v847_v59 }
  0xfc   :  { %v750_v62 = vpop.f32.mrf.mxu2 }
  0xfd   :  { %948 = vst [vmem:[%s1875_s3 + $0x30] sm:$0xff] %v932_v60  ;;  %v751_v38 = vadd.f32 %v750_v62, %v702_v61 }
  0xfe   :  { %v799_v63 = vpop.f32.mrf.mxu3  ;;  %v704_v0 = vpop.f32.mrf.mxu1 }
  0xff   :  { %v800_v1 = vadd.f32 %v799_v63, %v751_v38  ;;  %v705_v5 = vadd.f32 %v704_v0, %v1745_v22 }
 0x100   :  { %v851_v2 = vpop.f32.mrf.mxu0 }
 0x101   :  { %v849_v3 = vadd.f32 %v848_v58, %v800_v1 }
 0x103   :  { %v933_v4 = vadd.f32 %v1794_v56, %v849_v3 }
 0x104   :  { %v753_v6 = vpop.f32.mrf.mxu2 }
 0x105   :  { %949 = vst [vmem:[%s1875_s3 + $0x38] sm:$0xff] %v933_v4  ;;  %v754_v44 = vadd.f32 %v753_v6, %v705_v5 }
 0x106   :  { %v802_v7 = vpop.f32.mrf.mxu3  ;;  %v706_v8 = vpop.f32.mrf.mxu1 }
 0x107   :  { %v803_v9 = vadd.f32 %v802_v7, %v754_v44  ;;  %v707_v13 = vadd.f32 %v706_v8, %v1775_v34 }
 0x108   :  { %v853_v10 = vpop.f32.mrf.mxu0 }
 0x109   :  { %v852_v11 = vadd.f32 %v851_v2, %v803_v9 }
 0x10b   :  { %v934_v12 = vadd.f32 %v1794_v56, %v852_v11 }
 0x10c   :  { %v755_v14 = vpop.f32.mrf.mxu2 }
 0x10d   :  { %950 = vst [vmem:[%s1875_s3 + $0x40] sm:$0xff] %v934_v12  ;;  %v756_v22 = vadd.f32 %v755_v14, %v707_v13 }
 0x10e   :  { %v804_v15 = vpop.f32.mrf.mxu3  ;;  %v709_v16 = vpop.f32.mrf.mxu1 }
 0x10f   :  { %v805_v17 = vadd.f32 %v804_v15, %v756_v22  ;;  %v710_v25 = vadd.f32 %v709_v16, %v1781_v42 }
 0x110   :  { %v856_v19 = vpop.f32.mrf.mxu0 }
 0x111   :  { %v854_v20 = vadd.f32 %v853_v10, %v805_v17 }
 0x113   :  { %v935_v21 = vadd.f32 %v1794_v56, %v854_v20 }
 0x114   :  { %v758_v26 = vpop.f32.mrf.mxu2 }
 0x115   :  { %951 = vst [vmem:[%s1875_s3 + $0x48] sm:$0xff] %v935_v21  ;;  %v759_v34 = vadd.f32 %v758_v26, %v710_v25 }
 0x116   :  { %v807_v27 = vpop.f32.mrf.mxu3  ;;  %v711_v28 = vpop.f32.mrf.mxu1 }
 0x117   :  { %v808_v29 = vadd.f32 %v807_v27, %v759_v34  ;;  %v712_v33 = vadd.f32 %v711_v28, %v1787_v46 }
 0x118   :  { %v858_v30 = vpop.f32.mrf.mxu0 }
 0x119   :  { %v857_v31 = vadd.f32 %v856_v19, %v808_v29 }
 0x11b   :  { %v936_v32 = vadd.f32 %v1794_v56, %v857_v31 }
 0x11c   :  { %v760_v36 = vpop.f32.mrf.mxu2 }
 0x11d   :  { %952 = vst [vmem:[%s1875_s3 + $0x50] sm:$0xff] %v936_v32  ;;  %v761_v42 = vadd.f32 %v760_v36, %v712_v33 }
 0x11e   :  { %v809_v37 = vpop.f32.mrf.mxu3  ;;  %v714_v39 = vpop.f32.mrf.mxu1 }
 0x11f   :  { %v810_v40 = vadd.f32 %v809_v37, %v761_v42  ;;  %v715_v48 = vadd.f32 %v714_v39, %v1747_v23 }
 0x120   :  { %v861_v41 = vpop.f32.mrf.mxu0 }
 0x121   :  { %v859_v18 = vadd.f32 %v858_v30, %v810_v40 }
 0x123   :  { %v937_v45 = vadd.f32 %v1794_v56, %v859_v18 }
 0x124   :  { %v763_v49 = vpop.f32.mrf.mxu2 }
 0x125   :  { %953 = vst [vmem:[%s1875_s3 + $0x58] sm:$0xff] %v937_v45  ;;  %v764_v46 = vadd.f32 %v763_v49, %v715_v48 }
 0x126   :  { %v812_v50 = vpop.f32.mrf.mxu3  ;;  %v716_v51 = vpop.f32.mrf.mxu1 }
 0x127   :  { %v813_v52 = vadd.f32 %v812_v50, %v764_v46  ;;  %v717_v54 = vadd.f32 %v716_v51, %v1777_v35 }
 0x128   :  { %v863_v55 = vpop.f32.mrf.mxu0 }
 0x129   :  { %v862_v53 = vadd.f32 %v861_v41, %v813_v52 }
 0x12b   :  { %v938_v24 = vadd.f32 %v1794_v56, %v862_v53 }
 0x12c   :  { %v765_v57 = vpop.f32.mrf.mxu2 }
 0x12d   :  { %954 = vst [vmem:[%s1875_s3 + $0x60] sm:$0xff] %v938_v24  ;;  %v766_v23 = vadd.f32 %v765_v57, %v717_v54 }
 0x12e   :  { %v814_v58 = vpop.f32.mrf.mxu3  ;;  %v719_v59 = vpop.f32.mrf.mxu1 }
 0x12f   :  { %v815_v60 = vadd.f32 %v814_v58, %v766_v23  ;;  %v720_v38 = vadd.f32 %v719_v59, %v1783_v43 }
 0x130   :  { %v866_v1 = vpop.f32.mrf.mxu0 }
 0x131   :  { %v864_v61 = vadd.f32 %v863_v55, %v815_v60 }
 0x133   :  { %v939_v62 = vadd.f32 %v1794_v56, %v864_v61 }
 0x134   :  { %v768_v63 = vpop.f32.mrf.mxu2 }
 0x135   :  { %955 = vst [vmem:[%s1875_s3 + $0x68] sm:$0xff] %v939_v62  ;;  %v769_v35 = vadd.f32 %v768_v63, %v720_v38 }
 0x136   :  { %v817_v0 = vpop.f32.mrf.mxu3  ;;  %v721_v3 = vpop.f32.mrf.mxu1 }
 0x137   :  { %v818_v2 = vadd.f32 %v817_v0, %v769_v35  ;;  %v722_v6 = vadd.f32 %v721_v3, %v1789_v47 }
 0x138   :  { %v868_v9 = vpop.f32.mrf.mxu0 }
 0x139   :  { %v867_v4 = vadd.f32 %v866_v1, %v818_v2 }
 0x13b   :  { %v940_v5 = vadd.f32 %v1794_v56, %v867_v4 }
 0x13c   :  { %v770_v44 = vpop.f32.mrf.mxu2 }
 0x13d   :  { %956 = vst [vmem:[%s1875_s3 + $0x70] sm:$0xff] %v940_v5  ;;  %v771_v43 = vadd.f32 %v770_v44, %v722_v6 }
 0x13e   :  { %v819_v7 = vpop.f32.mrf.mxu3 }
 0x13f   :  { %v820_v8 = vadd.f32 %v819_v7, %v771_v43 }
 0x141   :  { %v869_v10 = vadd.f32 %v868_v9, %v820_v8 }
 0x143   :  { %v941_v11 = vadd.f32 %v1794_v56, %v869_v10 }
 0x145   :  { %957 = vst [vmem:[%s1875_s3 + $0x78] sm:$0xff] %v941_v11 }

// kernel: _lambda_.39
= control target key start
LH: loop header
LB: loop body
LE: loop exit
PB: predicated region body
PF: predicated region fallthrough
CT: control target
= control target key end

     0   :  { %s1014_s1 = inlined_call_operand.vmem [shape: bf16[640,128], index: 1, kind: input, shape index: {}]   ;;  %s1015_s0 = inlined_call_operand.vmem [shape: bf16[32,640], index: 0, kind: input, shape index: {}]   ;;  %s1016_s2 = inlined_call_operand.vmem [shape: f32[1,128], index: 2, kind: input, shape index: {}]   ;;  %s1017_s3 = inlined_call_operand.vmem [shape: f32[32,128], index: 3, kind: output, shape index: {}]  }
   0x1   :  { %v757_v0 = vld [vmem:[%s1014_s1 + $0x38] sm:$0xff]  ;;  %v756_v4 = vld [vmem:[%s1014_s1 + $0x30] sm:$0xff]  ;;  %v755_v8 = vld [vmem:[%s1014_s1 + $0x28] sm:$0xff] }
   0x2   :  { %v765_v1 = vld [vmem:[%s1014_s1 + $0x78] sm:$0xff]  ;;  %410 = vmatpush.bf16.msra.mxu0 %v757_v0  ;;  %v764_v5 = vld [vmem:[%s1014_s1 + $0x70] sm:$0xff]  ;;  %v763_v9 = vld [vmem:[%s1014_s1 + $0x68] sm:$0xff] }
   0x3   :  { %v773_v2 = vld [vmem:[%s1014_s1 + $0xb8] sm:$0xff]  ;;  %429 = vmatpush.bf16.msra.mxu1 %v765_v1  ;;  %v772_v6 = vld [vmem:[%s1014_s1 + $0xb0] sm:$0xff]  ;;  %v771_v10 = vld [vmem:[%s1014_s1 + $0xa8] sm:$0xff] }
   0x4   :  { %v781_v3 = vld [vmem:[%s1014_s1 + $0xf8] sm:$0xff]  ;;  %448 = vmatpush.bf16.msra.mxu2 %v773_v2  ;;  %v780_v7 = vld [vmem:[%s1014_s1 + $0xf0] sm:$0xff]  ;;  %v779_v11 = vld [vmem:[%s1014_s1 + $0xe8] sm:$0xff] }
   0x5   :  { %467 = vmatpush.bf16.msra.mxu3 %v781_v3  ;;  %v754_v12 = vld [vmem:[%s1014_s1 + $0x20] sm:$0xff]  ;;  %v753_v16 = vld [vmem:[%s1014_s1 + $0x18] sm:$0xff]  ;;  %v752_v20 = vld [vmem:[%s1014_s1 + $0x10] sm:$0xff] }
   0x6   :  { %411 = vmatpush.bf16.msra.mxu0 %v756_v4  ;;  %v762_v13 = vld [vmem:[%s1014_s1 + $0x60] sm:$0xff]  ;;  %v761_v17 = vld [vmem:[%s1014_s1 + $0x58] sm:$0xff]  ;;  %v760_v21 = vld [vmem:[%s1014_s1 + $0x50] sm:$0xff] }
   0x7   :  { %430 = vmatpush.bf16.msra.mxu1 %v764_v5  ;;  %v770_v14 = vld [vmem:[%s1014_s1 + $0xa0] sm:$0xff]  ;;  %v769_v18 = vld [vmem:[%s1014_s1 + $0x98] sm:$0xff]  ;;  %v768_v22 = vld [vmem:[%s1014_s1 + $0x90] sm:$0xff] }
   0x8   :  { %449 = vmatpush.bf16.msra.mxu2 %v772_v6  ;;  %v778_v15 = vld [vmem:[%s1014_s1 + $0xe0] sm:$0xff]  ;;  %v777_v19 = vld [vmem:[%s1014_s1 + $0xd8] sm:$0xff]  ;;  %v776_v23 = vld [vmem:[%s1014_s1 + $0xd0] sm:$0xff] }
   0x9   :  { %468 = vmatpush.bf16.msra.mxu3 %v780_v7  ;;  %v751_v24 = vld [vmem:[%s1014_s1 + $0x8] sm:$0xff]  ;;  %v750_v28 = vld [vmem:[%s1014_s1] sm:$0xff]  ;;  %v742_v33 = vld [vmem:[%s1015_s0 + $0x10] sm:$0xf0] }
   0xa   :  { %412 = vmatpush.bf16.msra.mxu0 %v755_v8  ;;  %v759_v25 = vld [vmem:[%s1014_s1 + $0x48] sm:$0xff]  ;;  %v758_v29 = vld [vmem:[%s1014_s1 + $0x40] sm:$0xff]  ;;  %v544_v35 = vld [vmem:[%s1015_s0 + $0x14] sm:$0xf0] }
   0xb   :  { %431 = vmatpush.bf16.msra.mxu1 %v763_v9  ;;  %v767_v26 = vld [vmem:[%s1014_s1 + $0x88] sm:$0xff]  ;;  %v766_v30 = vld [vmem:[%s1014_s1 + $0x80] sm:$0xff]  ;;  %v743_v37 = vld [vmem:[%s1015_s0 + $0x18] sm:$0xf0] }
   0xc   :  { %450 = vmatpush.bf16.msra.mxu2 %v771_v10  ;;  %v775_v27 = vld [vmem:[%s1014_s1 + $0xc8] sm:$0xff]  ;;  %v774_v31 = vld [vmem:[%s1014_s1 + $0xc0] sm:$0xff]  ;;  %v789_v40 = vld [vmem:[%s1014_s1 + $0x138] sm:$0xff] }
   0xd   :  { %469 = vmatpush.bf16.msra.mxu3 %v779_v11  ;;  %v542_v32 = vld [vmem:[%s1015_s0] sm:$0xf]  ;;  %v740_v34 = vld [vmem:[%s1015_s0 + $0x4] sm:$0xf]  ;;  %v550_v36 = vld [vmem:[%s1015_s0 + $0x8] sm:$0xf] }
   0xe   :  { %413 = vmatpush.bf16.msra.mxu0 %v754_v12  ;;  %v741_v38 = vld [vmem:[%s1015_s0 + $0xc] sm:$0xf]  ;;  %v552_v39 = vld [vmem:[%s1015_s0 + $0x1c] sm:$0xf0]  ;;  %v543_v41 = vor.u32 %v742_v33, %v542_v32  ;;  %v547_v42 = vor.u32 %v740_v34, %v544_v35  ;;  %v551_v43 = vor.u32 %v743_v37, %v550_v36  ;;  %v788_v45 = vld [vmem:[%s1014_s1 + $0x130] sm:$0xff] }
   0xf   :  { %432 = vmatpush.bf16.msra.mxu1 %v762_v13  ;;  %v555_v44 = vor.u32 %v741_v38, %v552_v39  ;;  %v787_v46 = vld [vmem:[%s1014_s1 + $0x128] sm:$0xff]  ;;  %v786_v47 = vld [vmem:[%s1014_s1 + $0x120] sm:$0xff]  ;;  %v747_v49 = vld [vmem:[%s1015_s0 + $0x38] sm:$0xf0] }
  0x10   :  { %451 = vmatpush.bf16.msra.mxu2 %v770_v14  ;;  %v562_v48 = vld [vmem:[%s1015_s0 + $0x28] sm:$0xf]  ;;  %v745_v50 = vld [vmem:[%s1015_s0 + $0x2c] sm:$0xf]  ;;  %v564_v51 = vld [vmem:[%s1015_s0 + $0x3c] sm:$0xf0] }
  0x11   :  { %470 = vmatpush.bf16.msra.mxu3 %v778_v15  ;;  %v570_v52 = vld [vmem:[%s1015_s0 + $0x30] sm:$0xf]  ;;  %v748_v53 = vld [vmem:[%s1015_s0 + $0x40] sm:$0xf0]  ;;  %v746_v54 = vld [vmem:[%s1015_s0 + $0x34] sm:$0xf]  ;;  %v563_v57 = vor.u32 %v747_v49, %v562_v48  ;;  %v567_v58 = vor.u32 %v745_v50, %v564_v51 }
  0x12   :  { %414 = vmatpush.bf16.msra.mxu0 %v753_v16  ;;  %v572_v55 = vld [vmem:[%s1015_s0 + $0x44] sm:$0xf0]  ;;  %v785_v56 = vld [vmem:[%s1014_s1 + $0x118] sm:$0xff]  ;;  %v571_v59 = vor.u32 %v748_v53, %v570_v52  ;;  %v784_v61 = vld [vmem:[%s1014_s1 + $0x110] sm:$0xff] }
  0x13   :  { %433 = vmatpush.bf16.msra.mxu1 %v761_v17  ;;  %v575_v60 = vor.u32 %v746_v54, %v572_v55  ;;  %v783_v62 = vld [vmem:[%s1014_s1 + $0x108] sm:$0xff]  ;;  %v782_v63 = vld [vmem:[%s1014_s1 + $0x100] sm:$0xff]  ;;  %v558_v0 = vld [vmem:[%s1015_s0 + $0x10] sm:$0xf] }
  0x14   :  { %452 = vmatpush.bf16.msra.mxu2 %v769_v18  ;;  %v744_v1 = vld [vmem:[%s1015_s0 + $0x20] sm:$0xf0]  ;;  %v578_v2 = vld [vmem:[%s1015_s0 + $0x38] sm:$0xf]  ;;  %v749_v3 = vld [vmem:[%s1015_s0 + $0x48] sm:$0xf0] }
  0x15   :  { %471 = vmatpush.bf16.msra.mxu3 %v777_v19  ;;  %v559_v4 = vor.u32 %v744_v1, %v558_v0  ;;  %v579_v5 = vor.u32 %v749_v3, %v578_v2 }
  0x16   :  { %415 = vmatpush.bf16.msra.mxu0 %v752_v20 }
  0x17   :  { %434 = vmatpush.bf16.msra.mxu1 %v760_v21 }
  0x18   :  { %453 = vmatpush.bf16.msra.mxu2 %v768_v22 }
  0x19   :  { %472 = vmatpush.bf16.msra.mxu3 %v776_v23 }
  0x1a   :  { %416 = vmatpush.bf16.msra.mxu0 %v751_v24 }
  0x1b   :  { %435 = vmatpush.bf16.msra.mxu1 %v759_v25 }
  0x1c   :  { %454 = vmatpush.bf16.msra.mxu2 %v767_v26 }
  0x1d   :  { %473 = vmatpush.bf16.msra.mxu3 %v775_v27  ;;  %v798_v27 = vld [vmem:[%s1016_s2] ss:$0 sm:$0xff] }
  0x1e   :  { %417 = vmatpush.bf16.msra.mxu0 %v750_v28 }
  0x1f   :  { %436 = vmatpush.bf16.msra.mxu1 %v758_v29 }
  0x20   :  { %455 = vmatpush.bf16.msra.mxu2 %v766_v30 }
  0x21   :  { %474 = vmatpush.bf16.msra.mxu3 %v774_v31  ;;  %418 = vmatmul.bf16.vlgmr.msra.gmra.mxu0 %v543_v41 }
  0x22   :  { %486 = vmatpush.bf16.msrb.mxu0 %v789_v40  ;;  %437 = vmatmul.bf16.vlgmr.msra.gmra.mxu1 %v547_v42 }
  0x23   :  { %790 = vmatpush.bf16.msrb.mxu1 %v789_v40  ;;  %456 = vmatmul.bf16.vlgmr.msra.gmra.mxu2 %v551_v43 }
  0x24   :  { %475 = vmatmul.bf16.vlgmr.msra.gmra.mxu3 %v555_v44 }
  0x26   :  { %487 = vmatpush.bf16.msrb.mxu0 %v788_v45 }
  0x27   :  { %791 = vmatpush.bf16.msrb.mxu1 %v788_v45 }
  0x2a   :  { %488 = vmatpush.bf16.msrb.mxu0 %v787_v46 }
  0x2b   :  { %792 = vmatpush.bf16.msrb.mxu1 %v787_v46 }
  0x2e   :  { %489 = vmatpush.bf16.msrb.mxu0 %v786_v47 }
  0x2f   :  { %793 = vmatpush.bf16.msrb.mxu1 %v786_v47 }
  0x31   :  { %423 = vmatmul.bf16.gmra.mxu0 %v563_v57 }
  0x32   :  { %490 = vmatpush.bf16.msrb.mxu0 %v785_v56  ;;  %442 = vmatmul.bf16.gmra.mxu1 %v567_v58 }
  0x33   :  { %794 = vmatpush.bf16.msrb.mxu1 %v785_v56  ;;  %461 = vmatmul.bf16.gmra.mxu2 %v571_v59 }
  0x34   :  { %480 = vmatmul.bf16.gmra.mxu3 %v575_v60 }
  0x36   :  { %491 = vmatpush.bf16.msrb.mxu0 %v784_v61 }
  0x37   :  { %795 = vmatpush.bf16.msrb.mxu1 %v784_v61 }
  0x3a   :  { %492 = vmatpush.bf16.msrb.mxu0 %v783_v62 }
  0x3b   :  { %796 = vmatpush.bf16.msrb.mxu1 %v783_v62 }
  0x3e   :  { %493 = vmatpush.bf16.msrb.mxu0 %v782_v63 }
  0x3f   :  { %797 = vmatpush.bf16.msrb.mxu1 %v782_v63 }
  0x41   :  { %494 = vmatmul.bf16.vlgmr.msrb.gmra.mxu0 %v559_v4 }
  0x42   :  { %499 = vmatmul.bf16.vlgmr.msrb.gmra.mxu1 %v579_v5 }
  0x9e   :  { %v419_v6 = vpop.f32.mrf.mxu0 }
  0x9f   :  { %v438_v7 = vpop.f32.mrf.mxu1 }
  0xa0   :  { %v439_v19 = vadd.f32 %v438_v7, %v419_v6 }
  0xa6   :  { %v457_v8 = vpop.f32.mrf.mxu2  ;;  %v421_v10 = vpop.f32.mrf.mxu0 }
  0xa7   :  { %v476_v9 = vpop.f32.mrf.mxu3  ;;  %v440_v11 = vpop.f32.mrf.mxu1  ;;  %v458_v21 = vadd.f32 %v457_v8, %v439_v19 }
  0xa8   :  { %v441_v30 = vadd.f32 %v440_v11, %v421_v10 }
  0xa9   :  { %v477_v24 = vadd.f32 %v476_v9, %v458_v21 }
  0xae   :  { %v459_v12 = vpop.f32.mrf.mxu2  ;;  %v424_v13 = vpop.f32.mrf.mxu0 }
  0xaf   :  { %v443_v14 = vpop.f32.mrf.mxu1  ;;  %v478_v15 = vpop.f32.mrf.mxu3  ;;  %v460_v34 = vadd.f32 %v459_v12, %v441_v30 }
  0xb0   :  { %v444_v20 = vadd.f32 %v443_v14, %v424_v13 }
  0xb1   :  { %v479_v41 = vadd.f32 %v478_v15, %v460_v34 }
  0xb6   :  { %v462_v16 = vpop.f32.mrf.mxu2  ;;  %v426_v17 = vpop.f32.mrf.mxu0 }
  0xb7   :  { %v445_v18 = vpop.f32.mrf.mxu1  ;;  %v463_v22 = vadd.f32 %v462_v16, %v444_v20  ;;  %v481_v23 = vpop.f32.mrf.mxu3 }
  0xb8   :  { %v446_v31 = vadd.f32 %v445_v18, %v426_v17 }
  0xb9   :  { %v482_v25 = vadd.f32 %v481_v23, %v463_v22 }
  0xbe   :  { %v464_v26 = vpop.f32.mrf.mxu2  ;;  %v495_v28 = vpop.f32.mrf.mxu0 }
  0xbf   :  { %v500_v29 = vpop.f32.mrf.mxu1  ;;  %v496_v32 = vadd.f32 %v495_v28, %v477_v24  ;;  %v465_v35 = vadd.f32 %v464_v26, %v446_v31  ;;  %v483_v40 = vpop.f32.mrf.mxu3 }
  0xc0   :  { %v501_v33 = vadd.f32 %v500_v29, %v482_v25 }
  0xc1   :  { %v524_v36 = vadd.f32 %v798_v27, %v496_v32  ;;  %v484_v42 = vadd.f32 %v483_v40, %v465_v35 }
  0xc2   :  { %v526_v37 = vadd.f32 %v798_v27, %v501_v33 }
  0xc3   :  { %v528_v38 = vmax.f32 %v524_v36, 0.0 }
  0xc4   :  { %v530_v39 = vmax.f32 %v526_v37, 0.0 }
  0xc5   :  { %532 = vst [vmem:[%s1017_s3] sm:$0xff] %v528_v38 }
  0xc6   :  { %534 = vst [vmem:[%s1017_s3 + $0x10] sm:$0xff] %v530_v39  ;;  %v497_v43 = vpop.f32.mrf.mxu0 }
  0xc7   :  { %v502_v44 = vpop.f32.mrf.mxu1  ;;  %v498_v45 = vadd.f32 %v497_v43, %v479_v41 }
  0xc8   :  { %v503_v46 = vadd.f32 %v502_v44, %v484_v42 }
  0xc9   :  { %v525_v47 = vadd.f32 %v798_v27, %v498_v45 }
  0xca   :  { %v527_v48 = vadd.f32 %v798_v27, %v503_v46 }
  0xcb   :  { %v529_v49 = vmax.f32 %v525_v47, 0.0 }
  0xcc   :  { %v531_v50 = vmax.f32 %v527_v48, 0.0 }
  0xcd   :  { %533 = vst [vmem:[%s1017_s3 + $0x8] sm:$0xff] %v529_v49 }
  0xce   :  { %535 = vst [vmem:[%s1017_s3 + $0x18] sm:$0xff] %v531_v50 }

// kernel: _lambda_.40
= control target key start
LH: loop header
LB: loop body
LE: loop exit
PB: predicated region body
PF: predicated region fallthrough
CT: control target
= control target key end

     0   :  { %s1026_s12 = smov 0   ;;  %s1028_s13 = smov 0   ;;  %s1148_s0 = inlined_call_operand.vmem [shape: bf16[32,1152], index: 0, kind: input, shape index: {}]   ;;  %s1149_s1 = inlined_call_operand.vmem [shape: bf16[1152,128], index: 1, kind: input, shape index: {}]   ;;  %s1150_s2 = inlined_call_operand.vmem [shape: f32[1,128], index: 2, kind: input, shape index: {}]   ;;  %s1151_s3 = inlined_call_operand.vmem [shape: f32[32,128], index: 3, kind: output, shape index: {}]  }
   0x1   :  { %s1030_s14 = smov 0   ;;  %s1032_s15 = smov 0  }
   0x2   :  { %s1034_s16 = smov 0  }
   0x3 LB: > { %s25_s17 = sadd.s32 1, %s999_s15  ;;  %p48_p1 = scmp.ne.s32.totalorder %s991_s13, %s987_s12  ;;  %s1003_s16 = sphi %s1034_s16, %s13_s16   ;;  %s999_s15 = sphi %s1032_s15, %s1155_s15   ;;  %s995_s14 = sphi %s1030_s14, %s1154_s14   ;;  %s991_s13 = sphi %s1028_s13, %s1153_s13   ;;  %s987_s12 = sphi %s1026_s12, %s1152_s12  }
   0x4   : > { %p26_p0 = scmp.ge.s32.totalorder %s25_s17, 3  ;;  %p49_p2 = scmp.eq.s32.totalorder %s1003_s16, 0 }
   0x5   : > { %s41_s19 = sadd.s32 1, %s991_s13  ;;  %p744_p5 = scmp.ge.s32.totalorder %s1003_s16, 3 }
   0x6   : > { %s1157_s17 = smov (%p26_p0, %s25_s17), 0  ;;  %p50_p3 = por %p49_p2, %p48_p1 }
   0x7   : > { %s37_s18 = ssub.s32 %s999_s15, %s1157_s17  ;;  %162 = sbr.rel (%p744_p5) target bundleno = 25 (0x19), region = 20 }
   0x8   : > { %p39_p4 = scmp.eq.s32.totalorder %s37_s18, 0 }
   0xa   : > { %s1061_s20 = scalar_select %p39_p4, %s991_s13, %s41_s19  }
   0xc   : > { %165 = sbr.rel (!%p50_p3) target bundleno = 25 (0x19), region = 24  ;;  %s167_s21 = sand.u32 (%p50_p3), 1, %s991_s13  }
   0xd   : > { %s882_s22 = smul.u32 (%p50_p3), 12, %s999_s15 }
   0xe   : > { %s921_s23 = smul.u32 (%p50_p3), 48, %s167_s21 }
   0xf   : > { %s175_s26 = scalar_lea.vmem (%p50_p3), %s1148_s0, %s882_s22 }
  0x10   : > { %v190_v0 = vld [vmem:[%s175_s26] sm:$0xff] (%p50_p3)  ;;  %v194_v2 = vld [vmem:[%s175_s26 + $0x48] sm:$0xff] (%p50_p3)  ;;  %s169_s27 = scalar_lea.vmem (%p50_p3), [#allocation3], %s921_s23  ;;  %v750_v6 = vld [vmem:[%s175_s26 + $0x50] sm:$0xf] (%p50_p3) }
  0x11   : > { %v192_v1 = vld [vmem:[%s175_s26 + $0x24] sm:$0xff]  ;;  %191 = vst [vmem:[%s169_s27] sm:$0xff] %v190_v0  ;;  %v196_v3 = vld [vmem:[%s175_s26 + $0x6c] sm:$0xff]  ;;  %v752_v7 = vld [vmem:[%s175_s26 + $0x74] sm:$0xf] }
  0x12   : > { %193 = vst [vmem:[%s169_s27 + $0xc] sm:$0xff] %v192_v1  ;;  %v746_v4 = vld [vmem:[%s175_s26 + $0x8] sm:$0xf]  ;;  %v748_v5 = vld [vmem:[%s175_s26 + $0x2c] sm:$0xf] }
  0x13   : > { %195 = vst [vmem:[%s169_s27 + $0x18] sm:$0xff] %v194_v2 }
  0x14   : > { %197 = vst [vmem:[%s169_s27 + $0x24] sm:$0xff] %v196_v3 }
  0x15   : > { %747 = vst [vmem:[%s169_s27 + $0x8] sm:$0xf] %v746_v4 }
  0x16   : > { %749 = vst [vmem:[%s169_s27 + $0x14] sm:$0xf] %v748_v5 }
  0x17   : > { %751 = vst [vmem:[%s169_s27 + $0x20] sm:$0xf] %v750_v6 }
  0x18   : > { %753 = vst [vmem:[%s169_s27 + $0x2c] sm:$0xf] %v752_v7 }
  0x19 PF: > { %p754_p6 = scmp.ge.s32.totalorder %s1003_s16, 1  ;;  %p230_p7 = scmp.lt.s32.totalorder %s1003_s16, 4 }
  0x1b   : > { %p231_p8 = pnand %p754_p6, %p230_p7 }
  0x1c   : > { %s237_s28 = sand.u32 (!%p231_p8), 1, %s987_s12   ;;  %s276_s29 = smul.u32 (!%p231_p8), 48, %s995_s14 }
  0x1d   : > { %234 = sbr.rel (%p231_p8) target bundleno = 249 (0xf9), region = 54  ;;  %p756_p10 = scmp.ne.s32.totalorder (!%p231_p8), %s995_s14, 0 }
  0x1e   : > { %s922_s30 = smul.u32 (!%p231_p8), 48, %s237_s28  ;;  %p277_p9 = scmp.lt.s32.totalorder (!%p231_p8), %s276_s29, 143 }
  0x20   : > { %s1078_s8 = scalar_lea.vmem (!%p231_p8), [#allocation3], %s922_s30 }
  0x22   : > { %s1159_s29 = smov (!%p277_p9, %s276_s29), 143  ;;  %300 = sbr.rel (%p756_p10) target bundleno = 44 (0x2c), region = 62 }
  0x23   : > { %s755_s4 = sshll.u32 %s1159_s29, 2 }
  0x24   : > { %s1076_s7 = scalar_lea.vmem %s1149_s1, %s755_s4 }
  0x27   : > { %v1005_v8 = vmov 0.0  }
  0x28   : > { %301 = vst [vmem:[#allocation2 + $0x10] sm:$0xff] %v1005_v8 }
  0x29   : > { %302 = vst [vmem:[#allocation2] sm:$0xff] %v1005_v8 }
  0x2a   : > { %303 = vst [vmem:[#allocation2 + $0x18] sm:$0xff] %v1005_v8 }
  0x2b   : > { %304 = vst [vmem:[#allocation2 + $0x8] sm:$0xff] %v1005_v8 }
  0x2c PF: > { %v896_v9 = vld [vmem:[%s1076_s7 + $0x38] sm:$0xff]  ;;  %v895_v12 = vld [vmem:[%s1076_s7 + $0x30] sm:$0xff]  ;;  %v894_v15 = vld [vmem:[%s1076_s7 + $0x28] sm:$0xff]  ;;  %p877_p11 = scmp.ne.s32.totalorder %s995_s14, 2 }
  0x2d   : > { %v904_v10 = vld [vmem:[%s1076_s7 + $0x78] sm:$0xff]  ;;  %541 = vmatpush.bf16.msra.mxu0 %v896_v9  ;;  %v903_v13 = vld [vmem:[%s1076_s7 + $0x70] sm:$0xff]  ;;  %913 = vmatpush.bf16.msra.mxu3 %v896_v9  ;;  %v902_v16 = vld [vmem:[%s1076_s7 + $0x68] sm:$0xff] }
  0x2e   : > { %v912_v11 = vld [vmem:[%s1076_s7 + $0xb8] sm:$0xff]  ;;  %560 = vmatpush.bf16.msra.mxu1 %v904_v10  ;;  %v911_v14 = vld [vmem:[%s1076_s7 + $0xb0] sm:$0xff]  ;;  %v910_v17 = vld [vmem:[%s1076_s7 + $0xa8] sm:$0xff] }
  0x2f   : > { %579 = vmatpush.bf16.msra.mxu2 %v912_v11  ;;  %v893_v18 = vld [vmem:[%s1076_s7 + $0x20] sm:$0xff]  ;;  %v892_v21 = vld [vmem:[%s1076_s7 + $0x18] sm:$0xff]  ;;  %v891_v24 = vld [vmem:[%s1076_s7 + $0x10] sm:$0xff] }
  0x30   : > { %v901_v19 = vld [vmem:[%s1076_s7 + $0x60] sm:$0xff]  ;;  %v900_v22 = vld [vmem:[%s1076_s7 + $0x58] sm:$0xff]  ;;  %v899_v25 = vld [vmem:[%s1076_s7 + $0x50] sm:$0xff] }
  0x31   : > { %542 = vmatpush.bf16.msra.mxu0 %v895_v12  ;;  %914 = vmatpush.bf16.msra.mxu3 %v895_v12  ;;  %v909_v20 = vld [vmem:[%s1076_s7 + $0xa0] sm:$0xff]  ;;  %v908_v23 = vld [vmem:[%s1076_s7 + $0x98] sm:$0xff]  ;;  %v907_v26 = vld [vmem:[%s1076_s7 + $0x90] sm:$0xff] }
  0x32   : > { %561 = vmatpush.bf16.msra.mxu1 %v903_v13  ;;  %v890_v27 = vld [vmem:[%s1076_s7 + $0x8] sm:$0xff]  ;;  %v889_v30 = vld [vmem:[%s1076_s7] sm:$0xff]  ;;  %v305_v54 = vld [vmem:[#allocation2 + $0x10] sm:$0xff] }
  0x33   : > { %580 = vmatpush.bf16.msra.mxu2 %v911_v14  ;;  %v898_v28 = vld [vmem:[%s1076_s7 + $0x48] sm:$0xff]  ;;  %v897_v31 = vld [vmem:[%s1076_s7 + $0x40] sm:$0xff]  ;;  %v307_v4 = vld [vmem:[#allocation2 + $0x18] sm:$0xff] }
  0x34   : > { %v906_v29 = vld [vmem:[%s1076_s7 + $0x88] sm:$0xff]  ;;  %v905_v32 = vld [vmem:[%s1076_s7 + $0x80] sm:$0xff] }
  0x35   : > { %543 = vmatpush.bf16.msra.mxu0 %v894_v15  ;;  %915 = vmatpush.bf16.msra.mxu3 %v894_v15  ;;  %v759_v33 = vld [vmem:[%s1078_s8] sm:$0xf]  ;;  %v884_v34 = vld [vmem:[%s1078_s8 + $0x8] sm:$0xf0]  ;;  %v883_v35 = vld [vmem:[%s1078_s8 + $0x4] sm:$0xf] }
  0x36   : > { %562 = vmatpush.bf16.msra.mxu1 %v902_v16  ;;  %v761_v36 = vld [vmem:[%s1078_s8 + $0xc] sm:$0xf0]  ;;  %v767_v37 = vld [vmem:[%s1078_s8 + $0x8] sm:$0xf]  ;;  %v885_v38 = vld [vmem:[%s1078_s8 + $0x10] sm:$0xf0]  ;;  %v760_v41 = vor.u32 %v884_v34, %v759_v33 }
  0x37   : > { %581 = vmatpush.bf16.msra.mxu2 %v910_v17  ;;  %v771_v39 = vld [vmem:[%s1078_s8 + $0x18] sm:$0xf]  ;;  %v887_v40 = vld [vmem:[%s1078_s8 + $0x20] sm:$0xf0]  ;;  %v764_v42 = vor.u32 %v883_v35, %v761_v36  ;;  %v768_v43 = vor.u32 %v885_v38, %v767_v37  ;;  %v886_v45 = vld [vmem:[%s1078_s8 + $0x1c] sm:$0xf] }
  0x38   : > { %v772_v44 = vor.u32 %v887_v40, %v771_v39  ;;  %v773_v46 = vld [vmem:[%s1078_s8 + $0x24] sm:$0xf0]  ;;  %v779_v47 = vld [vmem:[%s1078_s8 + $0x20] sm:$0xf]  ;;  %v888_v48 = vld [vmem:[%s1078_s8 + $0x28] sm:$0xf0] }
  0x39   : > { %544 = vmatpush.bf16.msra.mxu0 %v893_v18  ;;  %916 = vmatpush.bf16.msra.mxu3 %v893_v18  ;;  %v776_v49 = vor.u32 %v886_v45, %v773_v46  ;;  %v780_v50 = vor.u32 %v888_v48, %v779_v47  ;;  %v306_v61 = vld [vmem:[#allocation2] sm:$0xff]  ;;  %v308_v11 = vld [vmem:[#allocation2 + $0x8] sm:$0xff] }
  0x3a   : > { %563 = vmatpush.bf16.msra.mxu1 %v901_v19 }
  0x3b   : > { %582 = vmatpush.bf16.msra.mxu2 %v909_v20 }
  0x3d   : > { %545 = vmatpush.bf16.msra.mxu0 %v892_v21  ;;  %917 = vmatpush.bf16.msra.mxu3 %v892_v21 }
  0x3e   : > { %564 = vmatpush.bf16.msra.mxu1 %v900_v22 }
  0x3f   : > { %583 = vmatpush.bf16.msra.mxu2 %v908_v23 }
  0x41   : > { %546 = vmatpush.bf16.msra.mxu0 %v891_v24  ;;  %918 = vmatpush.bf16.msra.mxu3 %v891_v24 }
  0x42   : > { %565 = vmatpush.bf16.msra.mxu1 %v899_v25 }
  0x43   : > { %584 = vmatpush.bf16.msra.mxu2 %v907_v26 }
  0x45   : > { %547 = vmatpush.bf16.msra.mxu0 %v890_v27  ;;  %919 = vmatpush.bf16.msra.mxu3 %v890_v27 }
  0x46   : > { %566 = vmatpush.bf16.msra.mxu1 %v898_v28 }
  0x47   : > { %585 = vmatpush.bf16.msra.mxu2 %v906_v29 }
  0x49   : > { %548 = vmatpush.bf16.msra.mxu0 %v889_v30  ;;  %920 = vmatpush.bf16.msra.mxu3 %v889_v30 }
  0x4a   : > { %567 = vmatpush.bf16.msra.mxu1 %v897_v31 }
  0x4b   : > { %586 = vmatpush.bf16.msra.mxu2 %v905_v32 }
  0x4c   : > { %549 = vmatmul.bf16.vlgmr.msra.gmra.mxu0 %v760_v41  ;;  %554 = vmatmul.bf16.vlgmr.msra.gmra.mxu3 %v772_v44 }
  0x4d   : > { %568 = vmatmul.bf16.vlgmr.msra.gmra.mxu1 %v764_v42 }
  0x4e   : > { %587 = vmatmul.bf16.vlgmr.msra.gmra.mxu2 %v768_v43 }
  0x5d   : > { %573 = vmatmul.bf16.gmra.mxu1 %v776_v49 }
  0x5e   : > { %592 = vmatmul.bf16.gmra.mxu2 %v780_v50 }
  0xc9   : > { %v550_v52 = vpop.f32.mrf.mxu0 }
  0xca   : > { %v569_v51 = vpop.f32.mrf.mxu1 }
  0xcb   : > { %v570_v53 = vadd.f32 %v569_v51, %v550_v52 }
  0xcf   : > { %v555_v2 = vpop.f32.mrf.mxu3 }
  0xd1   : > { %v588_v55 = vpop.f32.mrf.mxu2  ;;  %v552_v59 = vpop.f32.mrf.mxu0 }
  0xd2   : > { %v589_v56 = vadd.f32 %v588_v55, %v570_v53  ;;  %v571_v57 = vpop.f32.mrf.mxu1 }
  0xd3   : > { %v572_v60 = vadd.f32 %v571_v57, %v552_v59 }
  0xd4   : > { %v598_v58 = vadd.f32 %v589_v56, %v305_v54 }
  0xd6   : > { %602 = vst [vmem:[#allocation2 + $0x10] sm:$0xff] %v598_v58 }
  0xd7   : > { %v557_v9 = vpop.f32.mrf.mxu3 }
  0xd9   : > { %v590_v62 = vpop.f32.mrf.mxu2 }
  0xda   : > { %v591_v63 = vadd.f32 %v590_v62, %v572_v60  ;;  %v574_v0 = vpop.f32.mrf.mxu1 }
  0xdb   : > { %v575_v3 = vadd.f32 %v574_v0, %v555_v2 }
  0xdc   : > { %v599_v1 = vadd.f32 %v591_v63, %v306_v61 }
  0xde   : > { %603 = vst [vmem:[#allocation2] sm:$0xff] %v599_v1 }
  0xe1   : > { %v593_v5 = vpop.f32.mrf.mxu2 }
  0xe2   : > { %v594_v6 = vadd.f32 %v593_v5, %v575_v3  ;;  %v576_v8 = vpop.f32.mrf.mxu1 }
  0xe3   : > { %v577_v10 = vadd.f32 %v576_v8, %v557_v9 }
  0xe4   : > { %v600_v7 = vadd.f32 %v594_v6, %v307_v4 }
  0xe6   : > { %604 = vst [vmem:[#allocation2 + $0x18] sm:$0xff] %v600_v7 }
  0xe9   : > { %v595_v12 = vpop.f32.mrf.mxu2 }
  0xea   : > { %v596_v13 = vadd.f32 %v595_v12, %v577_v10  ;;  %609 = sbr.rel (%p877_p11) target bundleno = 249 (0xf9), region = 66 }
  0xec   : > { %v601_v14 = vadd.f32 %v596_v13, %v308_v11 }
  0xee   : > { %605 = vst [vmem:[#allocation2 + $0x8] sm:$0xff] %v601_v14 }
  0xef   : > { %v610_v15 = vld [vmem:[#allocation2 + $0x10] sm:$0xff]  ;;  %v964_v16 = vld [vmem:[%s1150_s2] ss:$0 sm:$0xff]  ;;  %v612_v18 = vld [vmem:[#allocation2 + $0x18] sm:$0xff] }
  0xf0   : > { %v611_v17 = vld [vmem:[#allocation2] sm:$0xff]  ;;  %v618_v20 = vadd.f32 %v964_v16, %v610_v15  ;;  %v620_v22 = vadd.f32 %v964_v16, %v612_v18 }
  0xf1   : > { %v619_v21 = vadd.f32 %v964_v16, %v611_v17 }
  0xf2   : > { %622 = vst [vmem:[%s1151_s3] sm:$0xff] %v618_v20 }
  0xf3   : > { %623 = vst [vmem:[%s1151_s3 + $0x8] sm:$0xff] %v619_v21 }
  0xf4   : > { %624 = vst [vmem:[%s1151_s3 + $0x10] sm:$0xff] %v620_v22 }
  0xf5   : > { %v613_v19 = vld [vmem:[#allocation2 + $0x8] sm:$0xff] }
  0xf6   : > { %v621_v23 = vadd.f32 %v964_v16, %v613_v19 }
  0xf8   : > { %625 = vst [vmem:[%s1151_s3 + $0x18] sm:$0xff] %v621_v23 }
  0xf9 PF: > { %s13_s16 = sadd.s32 1, %s1003_s16   ;;  %s1152_s12 = smov %s991_s13 }
  0xfa   : > { %p10_p12 = scmp.ge.s32.totalorder %s13_s16, 5   ;;  %s1153_s13 = smov %s1061_s20 }
  0xfb   : > { %s1154_s14 = smov %s999_s15  ;;  %s1155_s15 = smov %s1157_s17 }
  0xfc   :  { %12 = sbr.rel (!%p10_p12) target bundleno = 3 (0x3), region = 113 }

// kernel: _lambda_.42
= control target key start
LH: loop header
LB: loop body
LE: loop exit
PB: predicated region body
PF: predicated region fallthrough
CT: control target
= control target key end

     0   :  { %s86_s0 = inlined_call_operand.vmem [shape: f32[32,128], index: 0, kind: input, shape index: {}]   ;;  %s87_s1 = inlined_call_operand.vmem [shape: f32[32,128], index: 1, kind: input, shape index: {}]   ;;  %s88_s2 = inlined_call_operand.vmem [shape: f32[32,128], index: 2, kind: output, shape index: {}]  }
   0x1   :  { %v11_v0 = vld [vmem:[%s86_s0] sm:$0xff]  ;;  %v12_v2 = vld [vmem:[%s86_s0 + $0x8] sm:$0xff]  ;;  %v13_v5 = vld [vmem:[%s86_s0 + $0x10] sm:$0xff] }
   0x2   :  { %v15_v1 = vld [vmem:[%s87_s1] sm:$0xff]  ;;  %v16_v4 = vld [vmem:[%s87_s1 + $0x8] sm:$0xff]  ;;  %v17_v6 = vld [vmem:[%s87_s1 + $0x10] sm:$0xff] }
   0x3   :  { %v19_v3 = vadd.f32 %v15_v1, %v11_v0  ;;  %v20_v7 = vadd.f32 %v16_v4, %v12_v2  ;;  %v21_v8 = vadd.f32 %v17_v6, %v13_v5  ;;  %v14_v9 = vld [vmem:[%s86_s0 + $0x18] sm:$0xff] }
   0x4   :  { %v18_v10 = vld [vmem:[%s87_s1 + $0x18] sm:$0xff] }
   0x5   :  { %v23_v11 = vmax.f32 %v19_v3, 0.0  ;;  %v22_v12 = vadd.f32 %v18_v10, %v14_v9  ;;  %v24_v13 = vmax.f32 %v20_v7, 0.0  ;;  %v25_v14 = vmax.f32 %v21_v8, 0.0 }
   0x7   :  { %27 = vst [vmem:[%s88_s2] sm:$0xff] %v23_v11  ;;  %v26_v15 = vmax.f32 %v22_v12, 0.0 }
   0x8   :  { %28 = vst [vmem:[%s88_s2 + $0x8] sm:$0xff] %v24_v13 }
   0x9   :  { %29 = vst [vmem:[%s88_s2 + $0x10] sm:$0xff] %v25_v14 }
   0xa   :  { %30 = vst [vmem:[%s88_s2 + $0x18] sm:$0xff] %v26_v15 }

// kernel: _lambda_.41
= control target key start
LH: loop header
LB: loop body
LE: loop exit
PB: predicated region body
PF: predicated region fallthrough
CT: control target
= control target key end

     0   :  { %s280_s1 = inlined_call_operand.vmem [shape: bf16[128,128], index: 1, kind: input, shape index: {}]   ;;  %s281_s2 = inlined_call_operand.vmem [shape: f32[1,128], index: 2, kind: input, shape index: {}]   ;;  %s282_s0 = inlined_call_operand.vmem [shape: bf16[32,128], index: 0, kind: input, shape index: {}]   ;;  %s283_s3 = inlined_call_operand.vmem [shape: f32[32,128], index: 3, kind: output, shape index: {}]  }
   0x1   :  { %v205_v0 = vld [vmem:[%s280_s1 + $0x38] sm:$0xff]  ;;  %v204_v1 = vld [vmem:[%s280_s1 + $0x30] sm:$0xff]  ;;  %v203_v2 = vld [vmem:[%s280_s1 + $0x28] sm:$0xff] }
   0x2   :  { %106 = vmatpush.bf16.msra.mxu0 %v205_v0  ;;  %206 = vmatpush.bf16.msra.mxu1 %v205_v0  ;;  %v202_v3 = vld [vmem:[%s280_s1 + $0x20] sm:$0xff]  ;;  %v201_v4 = vld [vmem:[%s280_s1 + $0x18] sm:$0xff]  ;;  %v200_v5 = vld [vmem:[%s280_s1 + $0x10] sm:$0xff] }
   0x3   :  { %v199_v6 = vld [vmem:[%s280_s1 + $0x8] sm:$0xff]  ;;  %v198_v7 = vld [vmem:[%s280_s1] sm:$0xff] }
   0x4   :  { %v196_v8 = vld [vmem:[%s282_s0] sm:$0xff]  ;;  %v197_v9 = vld [vmem:[%s282_s0 + $0x8] sm:$0xff] }
   0x5   :  { %v214_v10 = vld [vmem:[%s281_s2] ss:$0 sm:$0xff] }
   0x6   :  { %107 = vmatpush.bf16.msra.mxu0 %v204_v1  ;;  %207 = vmatpush.bf16.msra.mxu1 %v204_v1 }
   0xa   :  { %108 = vmatpush.bf16.msra.mxu0 %v203_v2  ;;  %208 = vmatpush.bf16.msra.mxu1 %v203_v2 }
   0xe   :  { %109 = vmatpush.bf16.msra.mxu0 %v202_v3  ;;  %209 = vmatpush.bf16.msra.mxu1 %v202_v3 }
  0x12   :  { %110 = vmatpush.bf16.msra.mxu0 %v201_v4  ;;  %210 = vmatpush.bf16.msra.mxu1 %v201_v4 }
  0x16   :  { %111 = vmatpush.bf16.msra.mxu0 %v200_v5  ;;  %211 = vmatpush.bf16.msra.mxu1 %v200_v5 }
  0x1a   :  { %112 = vmatpush.bf16.msra.mxu0 %v199_v6  ;;  %212 = vmatpush.bf16.msra.mxu1 %v199_v6 }
  0x1e   :  { %113 = vmatpush.bf16.msra.mxu0 %v198_v7  ;;  %213 = vmatpush.bf16.msra.mxu1 %v198_v7 }
  0x21   :  { %114 = vmatmul.bf16.vlgmr.msra.gmra.mxu0 %v196_v8  ;;  %119 = vmatmul.bf16.vlgmr.msra.gmra.mxu1 %v197_v9 }
  0x9e   :  { %v115_v11 = vpop.f32.mrf.mxu0  ;;  %v120_v12 = vpop.f32.mrf.mxu1 }
  0x9f   :  { %v144_v13 = vadd.f32 %v214_v10, %v115_v11  ;;  %v146_v14 = vadd.f32 %v214_v10, %v120_v12 }
  0xa1   :  { %148 = vst [vmem:[%s283_s3] sm:$0xff] %v144_v13 }
  0xa2   :  { %150 = vst [vmem:[%s283_s3 + $0x10] sm:$0xff] %v146_v14 }
  0xa6   :  { %v117_v15 = vpop.f32.mrf.mxu0  ;;  %v122_v16 = vpop.f32.mrf.mxu1 }
  0xa7   :  { %v145_v17 = vadd.f32 %v214_v10, %v117_v15  ;;  %v147_v18 = vadd.f32 %v214_v10, %v122_v16 }
  0xa9   :  { %149 = vst [vmem:[%s283_s3 + $0x8] sm:$0xff] %v145_v17 }
  0xaa   :  { %151 = vst [vmem:[%s283_s3 + $0x18] sm:$0xff] %v147_v18 }

// kernel: _lambda_.43
= control target key start
LH: loop header
LB: loop body
LE: loop exit
PB: predicated region body
PF: predicated region fallthrough
CT: control target
= control target key end

     0   :  { %s1030_s12 = smov 0   ;;  %s1032_s13 = smov 0   ;;  %s1152_s0 = inlined_call_operand.vmem [shape: bf16[32,1152], index: 0, kind: input, shape index: {}]   ;;  %s1153_s1 = inlined_call_operand.vmem [shape: bf16[1152,128], index: 1, kind: input, shape index: {}]   ;;  %s1154_s2 = inlined_call_operand.vmem [shape: f32[1,128], index: 2, kind: input, shape index: {}]   ;;  %s1155_s3 = inlined_call_operand.vmem [shape: f32[32,128], index: 3, kind: output, shape index: {}]  }
   0x1   :  { %s1034_s14 = smov 0   ;;  %s1036_s15 = smov 0  }
   0x2   :  { %s1038_s16 = smov 0  }
   0x3 LB: > { %s25_s17 = sadd.s32 1, %s1003_s15  ;;  %p48_p1 = scmp.ne.s32.totalorder %s995_s13, %s991_s12  ;;  %s1007_s16 = sphi %s1038_s16, %s13_s16   ;;  %s1003_s15 = sphi %s1036_s15, %s1159_s15   ;;  %s999_s14 = sphi %s1034_s14, %s1158_s14   ;;  %s995_s13 = sphi %s1032_s13, %s1157_s13   ;;  %s991_s12 = sphi %s1030_s12, %s1156_s12  }
   0x4   : > { %p26_p0 = scmp.ge.s32.totalorder %s25_s17, 3  ;;  %p49_p2 = scmp.eq.s32.totalorder %s1007_s16, 0 }
   0x5   : > { %s41_s19 = sadd.s32 1, %s995_s13  ;;  %p748_p5 = scmp.ge.s32.totalorder %s1007_s16, 3 }
   0x6   : > { %s1161_s17 = smov (%p26_p0, %s25_s17), 0  ;;  %p50_p3 = por %p49_p2, %p48_p1 }
   0x7   : > { %s37_s18 = ssub.s32 %s1003_s15, %s1161_s17  ;;  %162 = sbr.rel (%p748_p5) target bundleno = 25 (0x19), region = 20 }
   0x8   : > { %p39_p4 = scmp.eq.s32.totalorder %s37_s18, 0 }
   0xa   : > { %s1065_s20 = scalar_select %p39_p4, %s995_s13, %s41_s19  }
   0xc   : > { %165 = sbr.rel (!%p50_p3) target bundleno = 25 (0x19), region = 24  ;;  %s167_s21 = sand.u32 (%p50_p3), 1, %s995_s13  }
   0xd   : > { %s886_s22 = smul.u32 (%p50_p3), 12, %s1003_s15 }
   0xe   : > { %s925_s23 = smul.u32 (%p50_p3), 48, %s167_s21 }
   0xf   : > { %s175_s26 = scalar_lea.vmem (%p50_p3), %s1152_s0, %s886_s22 }
  0x10   : > { %v190_v0 = vld [vmem:[%s175_s26] sm:$0xff] (%p50_p3)  ;;  %v194_v2 = vld [vmem:[%s175_s26 + $0x48] sm:$0xff] (%p50_p3)  ;;  %s169_s27 = scalar_lea.vmem (%p50_p3), [#allocation3], %s925_s23  ;;  %v754_v6 = vld [vmem:[%s175_s26 + $0x50] sm:$0xf] (%p50_p3) }
  0x11   : > { %v192_v1 = vld [vmem:[%s175_s26 + $0x24] sm:$0xff]  ;;  %191 = vst [vmem:[%s169_s27] sm:$0xff] %v190_v0  ;;  %v196_v3 = vld [vmem:[%s175_s26 + $0x6c] sm:$0xff]  ;;  %v756_v7 = vld [vmem:[%s175_s26 + $0x74] sm:$0xf] }
  0x12   : > { %193 = vst [vmem:[%s169_s27 + $0xc] sm:$0xff] %v192_v1  ;;  %v750_v4 = vld [vmem:[%s175_s26 + $0x8] sm:$0xf]  ;;  %v752_v5 = vld [vmem:[%s175_s26 + $0x2c] sm:$0xf] }
  0x13   : > { %195 = vst [vmem:[%s169_s27 + $0x18] sm:$0xff] %v194_v2 }
  0x14   : > { %197 = vst [vmem:[%s169_s27 + $0x24] sm:$0xff] %v196_v3 }
  0x15   : > { %751 = vst [vmem:[%s169_s27 + $0x8] sm:$0xf] %v750_v4 }
  0x16   : > { %753 = vst [vmem:[%s169_s27 + $0x14] sm:$0xf] %v752_v5 }
  0x17   : > { %755 = vst [vmem:[%s169_s27 + $0x20] sm:$0xf] %v754_v6 }
  0x18   : > { %757 = vst [vmem:[%s169_s27 + $0x2c] sm:$0xf] %v756_v7 }
  0x19 PF: > { %p758_p6 = scmp.ge.s32.totalorder %s1007_s16, 1  ;;  %p230_p7 = scmp.lt.s32.totalorder %s1007_s16, 4 }
  0x1b   : > { %p231_p8 = pnand %p758_p6, %p230_p7 }
  0x1c   : > { %s237_s28 = sand.u32 (!%p231_p8), 1, %s991_s12   ;;  %s276_s29 = smul.u32 (!%p231_p8), 48, %s999_s14 }
  0x1d   : > { %234 = sbr.rel (%p231_p8) target bundleno = 251 (0xfb), region = 54  ;;  %p760_p10 = scmp.ne.s32.totalorder (!%p231_p8), %s999_s14, 0 }
  0x1e   : > { %s926_s30 = smul.u32 (!%p231_p8), 48, %s237_s28  ;;  %p277_p9 = scmp.lt.s32.totalorder (!%p231_p8), %s276_s29, 143 }
  0x20   : > { %s1082_s8 = scalar_lea.vmem (!%p231_p8), [#allocation3], %s926_s30 }
  0x22   : > { %s1163_s29 = smov (!%p277_p9, %s276_s29), 143  ;;  %300 = sbr.rel (%p760_p10) target bundleno = 44 (0x2c), region = 62 }
  0x23   : > { %s759_s4 = sshll.u32 %s1163_s29, 2 }
  0x24   : > { %s1080_s7 = scalar_lea.vmem %s1153_s1, %s759_s4 }
  0x27   : > { %v1009_v8 = vmov 0.0  }
  0x28   : > { %301 = vst [vmem:[#allocation2 + $0x10] sm:$0xff] %v1009_v8 }
  0x29   : > { %302 = vst [vmem:[#allocation2] sm:$0xff] %v1009_v8 }
  0x2a   : > { %303 = vst [vmem:[#allocation2 + $0x18] sm:$0xff] %v1009_v8 }
  0x2b   : > { %304 = vst [vmem:[#allocation2 + $0x8] sm:$0xff] %v1009_v8 }
  0x2c PF: > { %v900_v9 = vld [vmem:[%s1080_s7 + $0x38] sm:$0xff]  ;;  %v899_v12 = vld [vmem:[%s1080_s7 + $0x30] sm:$0xff]  ;;  %v898_v15 = vld [vmem:[%s1080_s7 + $0x28] sm:$0xff]  ;;  %p881_p11 = scmp.ne.s32.totalorder %s999_s14, 2 }
  0x2d   : > { %v908_v10 = vld [vmem:[%s1080_s7 + $0x78] sm:$0xff]  ;;  %541 = vmatpush.bf16.msra.mxu0 %v900_v9  ;;  %v907_v13 = vld [vmem:[%s1080_s7 + $0x70] sm:$0xff]  ;;  %917 = vmatpush.bf16.msra.mxu3 %v900_v9  ;;  %v906_v16 = vld [vmem:[%s1080_s7 + $0x68] sm:$0xff] }
  0x2e   : > { %v916_v11 = vld [vmem:[%s1080_s7 + $0xb8] sm:$0xff]  ;;  %560 = vmatpush.bf16.msra.mxu1 %v908_v10  ;;  %v915_v14 = vld [vmem:[%s1080_s7 + $0xb0] sm:$0xff]  ;;  %v914_v17 = vld [vmem:[%s1080_s7 + $0xa8] sm:$0xff] }
  0x2f   : > { %579 = vmatpush.bf16.msra.mxu2 %v916_v11  ;;  %v897_v18 = vld [vmem:[%s1080_s7 + $0x20] sm:$0xff]  ;;  %v896_v21 = vld [vmem:[%s1080_s7 + $0x18] sm:$0xff]  ;;  %v895_v24 = vld [vmem:[%s1080_s7 + $0x10] sm:$0xff] }
  0x30   : > { %v905_v19 = vld [vmem:[%s1080_s7 + $0x60] sm:$0xff]  ;;  %v904_v22 = vld [vmem:[%s1080_s7 + $0x58] sm:$0xff]  ;;  %v903_v25 = vld [vmem:[%s1080_s7 + $0x50] sm:$0xff] }
  0x31   : > { %542 = vmatpush.bf16.msra.mxu0 %v899_v12  ;;  %918 = vmatpush.bf16.msra.mxu3 %v899_v12  ;;  %v913_v20 = vld [vmem:[%s1080_s7 + $0xa0] sm:$0xff]  ;;  %v912_v23 = vld [vmem:[%s1080_s7 + $0x98] sm:$0xff]  ;;  %v911_v26 = vld [vmem:[%s1080_s7 + $0x90] sm:$0xff] }
  0x32   : > { %561 = vmatpush.bf16.msra.mxu1 %v907_v13  ;;  %v894_v27 = vld [vmem:[%s1080_s7 + $0x8] sm:$0xff]  ;;  %v893_v30 = vld [vmem:[%s1080_s7] sm:$0xff]  ;;  %v305_v54 = vld [vmem:[#allocation2 + $0x10] sm:$0xff] }
  0x33   : > { %580 = vmatpush.bf16.msra.mxu2 %v915_v14  ;;  %v902_v28 = vld [vmem:[%s1080_s7 + $0x48] sm:$0xff]  ;;  %v901_v31 = vld [vmem:[%s1080_s7 + $0x40] sm:$0xff]  ;;  %v307_v4 = vld [vmem:[#allocation2 + $0x18] sm:$0xff] }
  0x34   : > { %v910_v29 = vld [vmem:[%s1080_s7 + $0x88] sm:$0xff]  ;;  %v909_v32 = vld [vmem:[%s1080_s7 + $0x80] sm:$0xff] }
  0x35   : > { %543 = vmatpush.bf16.msra.mxu0 %v898_v15  ;;  %919 = vmatpush.bf16.msra.mxu3 %v898_v15  ;;  %v763_v33 = vld [vmem:[%s1082_s8] sm:$0xf]  ;;  %v888_v34 = vld [vmem:[%s1082_s8 + $0x8] sm:$0xf0]  ;;  %v887_v35 = vld [vmem:[%s1082_s8 + $0x4] sm:$0xf] }
  0x36   : > { %562 = vmatpush.bf16.msra.mxu1 %v906_v16  ;;  %v765_v36 = vld [vmem:[%s1082_s8 + $0xc] sm:$0xf0]  ;;  %v771_v37 = vld [vmem:[%s1082_s8 + $0x8] sm:$0xf]  ;;  %v889_v38 = vld [vmem:[%s1082_s8 + $0x10] sm:$0xf0]  ;;  %v764_v41 = vor.u32 %v888_v34, %v763_v33 }
  0x37   : > { %581 = vmatpush.bf16.msra.mxu2 %v914_v17  ;;  %v775_v39 = vld [vmem:[%s1082_s8 + $0x18] sm:$0xf]  ;;  %v891_v40 = vld [vmem:[%s1082_s8 + $0x20] sm:$0xf0]  ;;  %v768_v42 = vor.u32 %v887_v35, %v765_v36  ;;  %v772_v43 = vor.u32 %v889_v38, %v771_v37  ;;  %v890_v45 = vld [vmem:[%s1082_s8 + $0x1c] sm:$0xf] }
  0x38   : > { %v776_v44 = vor.u32 %v891_v40, %v775_v39  ;;  %v777_v46 = vld [vmem:[%s1082_s8 + $0x24] sm:$0xf0]  ;;  %v783_v47 = vld [vmem:[%s1082_s8 + $0x20] sm:$0xf]  ;;  %v892_v48 = vld [vmem:[%s1082_s8 + $0x28] sm:$0xf0] }
  0x39   : > { %544 = vmatpush.bf16.msra.mxu0 %v897_v18  ;;  %920 = vmatpush.bf16.msra.mxu3 %v897_v18  ;;  %v780_v49 = vor.u32 %v890_v45, %v777_v46  ;;  %v784_v50 = vor.u32 %v892_v48, %v783_v47  ;;  %v306_v61 = vld [vmem:[#allocation2] sm:$0xff]  ;;  %v308_v11 = vld [vmem:[#allocation2 + $0x8] sm:$0xff] }
  0x3a   : > { %563 = vmatpush.bf16.msra.mxu1 %v905_v19 }
  0x3b   : > { %582 = vmatpush.bf16.msra.mxu2 %v913_v20 }
  0x3d   : > { %545 = vmatpush.bf16.msra.mxu0 %v896_v21  ;;  %921 = vmatpush.bf16.msra.mxu3 %v896_v21 }
  0x3e   : > { %564 = vmatpush.bf16.msra.mxu1 %v904_v22 }
  0x3f   : > { %583 = vmatpush.bf16.msra.mxu2 %v912_v23 }
  0x41   : > { %546 = vmatpush.bf16.msra.mxu0 %v895_v24  ;;  %922 = vmatpush.bf16.msra.mxu3 %v895_v24 }
  0x42   : > { %565 = vmatpush.bf16.msra.mxu1 %v903_v25 }
  0x43   : > { %584 = vmatpush.bf16.msra.mxu2 %v911_v26 }
  0x45   : > { %547 = vmatpush.bf16.msra.mxu0 %v894_v27  ;;  %923 = vmatpush.bf16.msra.mxu3 %v894_v27 }
  0x46   : > { %566 = vmatpush.bf16.msra.mxu1 %v902_v28 }
  0x47   : > { %585 = vmatpush.bf16.msra.mxu2 %v910_v29 }
  0x49   : > { %548 = vmatpush.bf16.msra.mxu0 %v893_v30  ;;  %924 = vmatpush.bf16.msra.mxu3 %v893_v30 }
  0x4a   : > { %567 = vmatpush.bf16.msra.mxu1 %v901_v31 }
  0x4b   : > { %586 = vmatpush.bf16.msra.mxu2 %v909_v32 }
  0x4c   : > { %549 = vmatmul.bf16.vlgmr.msra.gmra.mxu0 %v764_v41  ;;  %554 = vmatmul.bf16.vlgmr.msra.gmra.mxu3 %v776_v44 }
  0x4d   : > { %568 = vmatmul.bf16.vlgmr.msra.gmra.mxu1 %v768_v42 }
  0x4e   : > { %587 = vmatmul.bf16.vlgmr.msra.gmra.mxu2 %v772_v43 }
  0x5d   : > { %573 = vmatmul.bf16.gmra.mxu1 %v780_v49 }
  0x5e   : > { %592 = vmatmul.bf16.gmra.mxu2 %v784_v50 }
  0xc9   : > { %v550_v52 = vpop.f32.mrf.mxu0 }
  0xca   : > { %v569_v51 = vpop.f32.mrf.mxu1 }
  0xcb   : > { %v570_v53 = vadd.f32 %v569_v51, %v550_v52 }
  0xcf   : > { %v555_v2 = vpop.f32.mrf.mxu3 }
  0xd1   : > { %v588_v55 = vpop.f32.mrf.mxu2  ;;  %v552_v59 = vpop.f32.mrf.mxu0 }
  0xd2   : > { %v589_v56 = vadd.f32 %v588_v55, %v570_v53  ;;  %v571_v57 = vpop.f32.mrf.mxu1 }
  0xd3   : > { %v572_v60 = vadd.f32 %v571_v57, %v552_v59 }
  0xd4   : > { %v598_v58 = vadd.f32 %v589_v56, %v305_v54 }
  0xd6   : > { %602 = vst [vmem:[#allocation2 + $0x10] sm:$0xff] %v598_v58 }
  0xd7   : > { %v557_v9 = vpop.f32.mrf.mxu3 }
  0xd9   : > { %v590_v62 = vpop.f32.mrf.mxu2 }
  0xda   : > { %v591_v63 = vadd.f32 %v590_v62, %v572_v60  ;;  %v574_v0 = vpop.f32.mrf.mxu1 }
  0xdb   : > { %v575_v3 = vadd.f32 %v574_v0, %v555_v2 }
  0xdc   : > { %v599_v1 = vadd.f32 %v591_v63, %v306_v61 }
  0xde   : > { %603 = vst [vmem:[#allocation2] sm:$0xff] %v599_v1 }
  0xe1   : > { %v593_v5 = vpop.f32.mrf.mxu2 }
  0xe2   : > { %v594_v6 = vadd.f32 %v593_v5, %v575_v3  ;;  %v576_v8 = vpop.f32.mrf.mxu1 }
  0xe3   : > { %v577_v10 = vadd.f32 %v576_v8, %v557_v9 }
  0xe4   : > { %v600_v7 = vadd.f32 %v594_v6, %v307_v4 }
  0xe6   : > { %604 = vst [vmem:[#allocation2 + $0x18] sm:$0xff] %v600_v7 }
  0xe9   : > { %v595_v12 = vpop.f32.mrf.mxu2 }
  0xea   : > { %v596_v13 = vadd.f32 %v595_v12, %v577_v10  ;;  %609 = sbr.rel (%p881_p11) target bundleno = 251 (0xfb), region = 66 }
  0xec   : > { %v601_v14 = vadd.f32 %v596_v13, %v308_v11 }
  0xee   : > { %605 = vst [vmem:[#allocation2 + $0x8] sm:$0xff] %v601_v14 }
  0xef   : > { %v610_v15 = vld [vmem:[#allocation2 + $0x10] sm:$0xff]  ;;  %v968_v16 = vld [vmem:[%s1154_s2] ss:$0 sm:$0xff]  ;;  %v612_v18 = vld [vmem:[#allocation2 + $0x18] sm:$0xff] }
  0xf0   : > { %v611_v17 = vld [vmem:[#allocation2] sm:$0xff]  ;;  %v618_v20 = vadd.f32 %v968_v16, %v610_v15  ;;  %v620_v22 = vadd.f32 %v968_v16, %v612_v18 }
  0xf1   : > { %v619_v21 = vadd.f32 %v968_v16, %v611_v17 }
  0xf2   : > { %v622_v24 = vmax.f32 %v618_v20, 0.0  ;;  %v624_v26 = vmax.f32 %v620_v22, 0.0 }
  0xf3   : > { %v623_v25 = vmax.f32 %v619_v21, 0.0 }
  0xf4   : > { %626 = vst [vmem:[%s1155_s3] sm:$0xff] %v622_v24 }
  0xf5   : > { %v613_v19 = vld [vmem:[#allocation2 + $0x8] sm:$0xff]  ;;  %627 = vst [vmem:[%s1155_s3 + $0x8] sm:$0xff] %v623_v25 }
  0xf6   : > { %v621_v23 = vadd.f32 %v968_v16, %v613_v19  ;;  %628 = vst [vmem:[%s1155_s3 + $0x10] sm:$0xff] %v624_v26 }
  0xf8   : > { %v625_v27 = vmax.f32 %v621_v23, 0.0 }
  0xfa   : > { %629 = vst [vmem:[%s1155_s3 + $0x18] sm:$0xff] %v625_v27 }
  0xfb PF: > { %s13_s16 = sadd.s32 1, %s1007_s16   ;;  %s1156_s12 = smov %s995_s13 }
  0xfc   : > { %p10_p12 = scmp.ge.s32.totalorder %s13_s16, 5   ;;  %s1157_s13 = smov %s1065_s20 }
  0xfd   : > { %s1158_s14 = smov %s1003_s15  ;;  %s1159_s15 = smov %s1161_s17 }
  0xfe   :  { %12 = sbr.rel (!%p10_p12) target bundleno = 3 (0x3), region = 113 }

// kernel: _lambda_.46
= control target key start
LH: loop header
LB: loop body
LE: loop exit
PB: predicated region body
PF: predicated region fallthrough
CT: control target
= control target key end

     0   :  { %s1251_s12 = smov 0   ;;  %s1253_s13 = smov 0   ;;  %s1447_s0 = inlined_call_operand.vmem [shape: bf16[16,1152], index: 0, kind: input, shape index: {}]   ;;  %s1448_s1 = inlined_call_operand.vmem [shape: bf16[1152,256], index: 1, kind: input, shape index: {}]   ;;  %s1449_s2 = inlined_call_operand.vmem [shape: f32[1,256], index: 2, kind: input, shape index: {}]   ;;  %s1450_s3 = inlined_call_operand.vmem [shape: f32[16,256], index: 3, kind: output, shape index: {}]  }
   0x1   :  { %s1255_s14 = smov 0   ;;  %s1257_s15 = smov 0  }
   0x2   :  { %s1259_s16 = smov 0  }
   0x3 LB: > { %s25_s17 = sadd.s32 1, %s1224_s15  ;;  %p48_p1 = scmp.ne.s32.totalorder %s1216_s13, %s1212_s12  ;;  %s1228_s16 = sphi %s1259_s16, %s13_s16   ;;  %s1224_s15 = sphi %s1257_s15, %s1454_s15   ;;  %s1220_s14 = sphi %s1255_s14, %s1453_s14   ;;  %s1216_s13 = sphi %s1253_s13, %s1452_s13   ;;  %s1212_s12 = sphi %s1251_s12, %s1451_s12  }
   0x4   : > { %p26_p0 = scmp.ge.s32.totalorder %s25_s17, 3  ;;  %p49_p2 = scmp.eq.s32.totalorder %s1228_s16, 0 }
   0x5   : > { %s41_s19 = sadd.s32 1, %s1216_s13  ;;  %p875_p5 = scmp.ge.s32.totalorder %s1228_s16, 3 }
   0x6   : > { %s1456_s17 = smov (%p26_p0, %s25_s17), 0  ;;  %p50_p3 = por %p49_p2, %p48_p1 }
   0x7   : > { %s37_s18 = ssub.s32 %s1224_s15, %s1456_s17  ;;  %164 = sbr.rel (%p875_p5) target bundleno = 21 (0x15), region = 20 }
   0x8   : > { %p39_p4 = scmp.eq.s32.totalorder %s37_s18, 0 }
   0xa   : > { %s1286_s20 = scalar_select %p39_p4, %s1216_s13, %s41_s19  }
   0xc   : > { %167 = sbr.rel (!%p50_p3) target bundleno = 21 (0x15), region = 24  ;;  %s169_s21 = sand.u32 (%p50_p3), 1, %s1216_s13  }
   0xd   : > { %s1094_s22 = smul.u32 (%p50_p3), 12, %s1224_s15 }
   0xe   : > { %s1147_s23 = smul.u32 (%p50_p3), 24, %s169_s21 }
   0xf   : > { %s177_s26 = scalar_lea.vmem (%p50_p3), %s1447_s0, %s1094_s22 }
  0x10   : > { %v192_v0 = vld [vmem:[%s177_s26] sm:$0xff] (%p50_p3)  ;;  %v877_v2 = vld [vmem:[%s177_s26 + $0x8] sm:$0xf] (%p50_p3)  ;;  %s171_s27 = scalar_lea.vmem (%p50_p3), [#allocation3], %s1147_s23  ;;  %v879_v3 = vld [vmem:[%s177_s26 + $0x2c] sm:$0xf] (%p50_p3) }
  0x11   : > { %v194_v1 = vld [vmem:[%s177_s26 + $0x24] sm:$0xff]  ;;  %193 = vst [vmem:[%s171_s27] sm:$0xff] %v192_v0 }
  0x12   : > { %195 = vst [vmem:[%s171_s27 + $0xc] sm:$0xff] %v194_v1 }
  0x13   : > { %878 = vst [vmem:[%s171_s27 + $0x8] sm:$0xf] %v877_v2 }
  0x14   : > { %880 = vst [vmem:[%s171_s27 + $0x14] sm:$0xf] %v879_v3 }
  0x15 PF: > { %p881_p6 = scmp.ge.s32.totalorder %s1228_s16, 1  ;;  %p227_p7 = scmp.lt.s32.totalorder %s1228_s16, 4 }
  0x17   : > { %p228_p8 = pnand %p881_p6, %p227_p7 }
  0x18   : > { %s234_s28 = sand.u32 (!%p228_p8), 1, %s1212_s12   ;;  %s278_s29 = smul.u32 (!%p228_p8), 48, %s1220_s14 }
  0x19   : > { %231 = sbr.rel (%p228_p8) target bundleno = 259 (0x103), region = 54  ;;  %p884_p10 = scmp.ne.s32.totalorder (!%p228_p8), %s1220_s14, 0 }
  0x1a   : > { %s1148_s30 = smul.u32 (!%p228_p8), 24, %s234_s28  ;;  %p280_p9 = scmp.lt.s32.totalorder (!%p228_p8), %s278_s29, 143 }
  0x1c   : > { %s1303_s8 = scalar_lea.vmem (!%p228_p8), [#allocation3], %s1148_s30 }
  0x1e   : > { %s1458_s29 = smov (!%p280_p9, %s278_s29), 143  ;;  %310 = sbr.rel (%p884_p10) target bundleno = 40 (0x28), region = 62 }
  0x1f   : > { %s1095_s4 = sshll.u32 %s1458_s29, 3 }
  0x20   : > { %s1301_s7 = scalar_lea.vmem %s1448_s1, %s1095_s4 }
  0x23   : > { %v1230_v4 = vmov 0.0  }
  0x24   : > { %311 = vst [vmem:[#allocation2 + $0x10] sm:$0xff] %v1230_v4 }
  0x25   : > { %312 = vst [vmem:[#allocation2] sm:$0xff] %v1230_v4 }
  0x26   : > { %313 = vst [vmem:[#allocation2 + $0x18] sm:$0xff] %v1230_v4 }
  0x27   : > { %314 = vst [vmem:[#allocation2 + $0x8] sm:$0xff] %v1230_v4 }
  0x28 PF: > { %v955_v5 = vld [vmem:[%s1301_s7 + $0x70] sm:$0xf]  ;;  %v1114_v6 = vld [vmem:[%s1301_s7 + $0x74] sm:$0xf0]  ;;  %v947_v14 = vld [vmem:[%s1301_s7 + $0x60] sm:$0xf] }
  0x29   : > { %v1019_v7 = vld [vmem:[%s1301_s7 + $0xf0] sm:$0xf]  ;;  %v956_v8 = vor.u32 %v1114_v6, %v955_v5  ;;  %v1130_v9 = vld [vmem:[%s1301_s7 + $0xf4] sm:$0xf0]  ;;  %v1112_v15 = vld [vmem:[%s1301_s7 + $0x64] sm:$0xf0] }
  0x2a   : > { %v1083_v10 = vld [vmem:[%s1301_s7 + $0x170] sm:$0xf]  ;;  %v1146_v11 = vld [vmem:[%s1301_s7 + $0x174] sm:$0xf0]  ;;  %v1020_v12 = vor.u32 %v1130_v9, %v1019_v7  ;;  %v1011_v16 = vld [vmem:[%s1301_s7 + $0xe0] sm:$0xf]  ;;  %v948_v17 = vor.u32 %v1112_v15, %v947_v14 }
  0x2b   : > { %v1084_v13 = vor.u32 %v1146_v11, %v1083_v10  ;;  %627 = vmatpush.bf16.msra.mxu0 %v956_v8  ;;  %v1128_v18 = vld [vmem:[%s1301_s7 + $0xe4] sm:$0xf0]  ;;  %v1075_v19 = vld [vmem:[%s1301_s7 + $0x160] sm:$0xf]  ;;  %v939_v23 = vld [vmem:[%s1301_s7 + $0x50] sm:$0xf] }
  0x2c   : > { %v1144_v20 = vld [vmem:[%s1301_s7 + $0x164] sm:$0xf0]  ;;  %641 = vmatpush.bf16.msra.mxu1 %v1020_v12  ;;  %v1012_v21 = vor.u32 %v1128_v18, %v1011_v16  ;;  %v1110_v24 = vld [vmem:[%s1301_s7 + $0x54] sm:$0xf0]  ;;  %v1003_v25 = vld [vmem:[%s1301_s7 + $0xd0] sm:$0xf] }
  0x2d   : > { %655 = vmatpush.bf16.msra.mxu2 %v1084_v13  ;;  %v1076_v22 = vor.u32 %v1144_v20, %v1075_v19  ;;  %v1126_v26 = vld [vmem:[%s1301_s7 + $0xd4] sm:$0xf0]  ;;  %v1067_v27 = vld [vmem:[%s1301_s7 + $0x150] sm:$0xf]  ;;  %v940_v29 = vor.u32 %v1110_v24, %v939_v23  ;;  %v931_v30 = vld [vmem:[%s1301_s7 + $0x40] sm:$0xf] }
  0x2e   : > { %v1142_v28 = vld [vmem:[%s1301_s7 + $0x154] sm:$0xf0]  ;;  %v1108_v31 = vld [vmem:[%s1301_s7 + $0x44] sm:$0xf0]  ;;  %v1004_v32 = vor.u32 %v1126_v26, %v1003_v25  ;;  %v995_v34 = vld [vmem:[%s1301_s7 + $0xc0] sm:$0xf] }
  0x2f   : > { %628 = vmatpush.bf16.msra.mxu0 %v948_v17  ;;  %v1068_v33 = vor.u32 %v1142_v28, %v1067_v27  ;;  %v1113_v35 = vld [vmem:[%s1301_s7 + $0x74] sm:$0xf]  ;;  %v957_v36 = vld [vmem:[%s1301_s7 + $0x78] sm:$0xf0]  ;;  %v1124_v37 = vld [vmem:[%s1301_s7 + $0xc4] sm:$0xf0]  ;;  %v932_v42 = vor.u32 %v1108_v31, %v931_v30 }
  0x30   : > { %642 = vmatpush.bf16.msra.mxu1 %v1012_v21  ;;  %v1059_v38 = vld [vmem:[%s1301_s7 + $0x140] sm:$0xf]  ;;  %v1140_v39 = vld [vmem:[%s1301_s7 + $0x144] sm:$0xf0]  ;;  %v960_v40 = vor.u32 %v1113_v35, %v957_v36  ;;  %v1111_v41 = vld [vmem:[%s1301_s7 + $0x64] sm:$0xf]  ;;  %v996_v46 = vor.u32 %v1124_v37, %v995_v34 }
  0x31   : > { %656 = vmatpush.bf16.msra.mxu2 %v1076_v22  ;;  %v923_v43 = vld [vmem:[%s1301_s7 + $0x30] sm:$0xf]  ;;  %v1106_v44 = vld [vmem:[%s1301_s7 + $0x34] sm:$0xf0]  ;;  %v949_v45 = vld [vmem:[%s1301_s7 + $0x68] sm:$0xf0]  ;;  %v1060_v47 = vor.u32 %v1140_v39, %v1059_v38 }
  0x32   : > { %669 = vmatpush.bf16.msra.mxu3 %v960_v40  ;;  %v987_v48 = vld [vmem:[%s1301_s7 + $0xb0] sm:$0xf]  ;;  %v1122_v49 = vld [vmem:[%s1301_s7 + $0xb4] sm:$0xf0]  ;;  %v952_v51 = vor.u32 %v1111_v41, %v949_v45  ;;  %v1109_v53 = vld [vmem:[%s1301_s7 + $0x54] sm:$0xf]  ;;  %v924_v55 = vor.u32 %v1106_v44, %v923_v43 }
  0x33   : > { %629 = vmatpush.bf16.msra.mxu0 %v940_v29  ;;  %v1051_v50 = vld [vmem:[%s1301_s7 + $0x130] sm:$0xf]  ;;  %v1138_v52 = vld [vmem:[%s1301_s7 + $0x134] sm:$0xf0]  ;;  %v941_v54 = vld [vmem:[%s1301_s7 + $0x58] sm:$0xf0]  ;;  %v988_v59 = vor.u32 %v1122_v49, %v987_v48 }
  0x34   : > { %643 = vmatpush.bf16.msra.mxu1 %v1004_v32  ;;  %v915_v56 = vld [vmem:[%s1301_s7 + $0x20] sm:$0xf]  ;;  %v1104_v57 = vld [vmem:[%s1301_s7 + $0x24] sm:$0xf0]  ;;  %v944_v58 = vor.u32 %v1109_v53, %v941_v54  ;;  %v1052_v60 = vor.u32 %v1138_v52, %v1051_v50  ;;  %v1107_v62 = vld [vmem:[%s1301_s7 + $0x44] sm:$0xf] }
  0x35   : > { %657 = vmatpush.bf16.msra.mxu2 %v1068_v33  ;;  %v979_v61 = vld [vmem:[%s1301_s7 + $0xa0] sm:$0xf]  ;;  %v933_v63 = vld [vmem:[%s1301_s7 + $0x48] sm:$0xf0]  ;;  %v1120_v0 = vld [vmem:[%s1301_s7 + $0xa4] sm:$0xf0]  ;;  %v916_v3 = vor.u32 %v1104_v57, %v915_v56 }
  0x36   : > { %670 = vmatpush.bf16.msra.mxu3 %v952_v51  ;;  %v1043_v1 = vld [vmem:[%s1301_s7 + $0x120] sm:$0xf]  ;;  %v1136_v2 = vld [vmem:[%s1301_s7 + $0x124] sm:$0xf0]  ;;  %v907_v4 = vld [vmem:[%s1301_s7 + $0x10] sm:$0xf]  ;;  %v936_v6 = vor.u32 %v1107_v62, %v933_v63  ;;  %v980_v7 = vor.u32 %v1120_v0, %v979_v61 }
  0x37   : > { %630 = vmatpush.bf16.msra.mxu0 %v932_v42  ;;  %v1102_v5 = vld [vmem:[%s1301_s7 + $0x14] sm:$0xf0]  ;;  %v1044_v8 = vor.u32 %v1136_v2, %v1043_v1  ;;  %v971_v9 = vld [vmem:[%s1301_s7 + $0x90] sm:$0xf]  ;;  %v1105_v10 = vld [vmem:[%s1301_s7 + $0x34] sm:$0xf] }
  0x38   : > { %644 = vmatpush.bf16.msra.mxu1 %v996_v46  ;;  %v925_v11 = vld [vmem:[%s1301_s7 + $0x38] sm:$0xf0]  ;;  %v1118_v12 = vld [vmem:[%s1301_s7 + $0x94] sm:$0xf0]  ;;  %v1035_v13 = vld [vmem:[%s1301_s7 + $0x110] sm:$0xf]  ;;  %v908_v15 = vor.u32 %v1102_v5, %v907_v4 }
  0x39   : > { %658 = vmatpush.bf16.msra.mxu2 %v1060_v47  ;;  %v1134_v14 = vld [vmem:[%s1301_s7 + $0x114] sm:$0xf0]  ;;  %v899_v16 = vld [vmem:[%s1301_s7] sm:$0xf]  ;;  %v1100_v17 = vld [vmem:[%s1301_s7 + $0x4] sm:$0xf0]  ;;  %v928_v19 = vor.u32 %v1105_v10, %v925_v11  ;;  %v972_v20 = vor.u32 %v1118_v12, %v971_v9 }
  0x3a   : > { %671 = vmatpush.bf16.msra.mxu3 %v944_v58  ;;  %v963_v18 = vld [vmem:[%s1301_s7 + $0x80] sm:$0xf]  ;;  %v1036_v21 = vor.u32 %v1134_v14, %v1035_v13  ;;  %v1116_v22 = vld [vmem:[%s1301_s7 + $0x84] sm:$0xf0]  ;;  %v1103_v23 = vld [vmem:[%s1301_s7 + $0x24] sm:$0xf]  ;;  %v900_v31 = vor.u32 %v1100_v17, %v899_v16 }
  0x3b   : > { %631 = vmatpush.bf16.msra.mxu0 %v924_v55  ;;  %v917_v24 = vld [vmem:[%s1301_s7 + $0x28] sm:$0xf0]  ;;  %v1027_v25 = vld [vmem:[%s1301_s7 + $0x100] sm:$0xf]  ;;  %v1132_v26 = vld [vmem:[%s1301_s7 + $0x104] sm:$0xf0]  ;;  %v964_v36 = vor.u32 %v1116_v22, %v963_v18 }
  0x3c   : > { %645 = vmatpush.bf16.msra.mxu1 %v988_v59  ;;  %v1129_v27 = vld [vmem:[%s1301_s7 + $0xf4] sm:$0xf]  ;;  %v1021_v28 = vld [vmem:[%s1301_s7 + $0xf8] sm:$0xf0]  ;;  %v895_v32 = vld [vmem:[%s1303_s8 + $0x8] sm:$0xf]  ;;  %v920_v33 = vor.u32 %v1103_v23, %v917_v24  ;;  %v1028_v37 = vor.u32 %v1132_v26, %v1027_v25 }
  0x3d   : > { %659 = vmatpush.bf16.msra.mxu2 %v1052_v60  ;;  %v1145_v29 = vld [vmem:[%s1301_s7 + $0x174] sm:$0xf]  ;;  %v1085_v30 = vld [vmem:[%s1301_s7 + $0x178] sm:$0xf0]  ;;  %v887_v34 = vld [vmem:[%s1303_s8] sm:$0xf]  ;;  %v1024_v41 = vor.u32 %v1129_v27, %v1021_v28 }
  0x3e   : > { %672 = vmatpush.bf16.msra.mxu3 %v936_v6  ;;  %v1097_v35 = vld [vmem:[%s1303_s8 + $0x8] sm:$0xf0]  ;;  %v1098_v38 = vld [vmem:[%s1303_s8 + $0x10] sm:$0xf0]  ;;  %v1096_v39 = vld [vmem:[%s1303_s8 + $0x4] sm:$0xf]  ;;  %v1088_v42 = vor.u32 %v1145_v29, %v1085_v30 }
  0x3f   : > { %632 = vmatpush.bf16.msra.mxu0 %v916_v3  ;;  %v889_v40 = vld [vmem:[%s1303_s8 + $0xc] sm:$0xf0]  ;;  %v1127_v43 = vld [vmem:[%s1301_s7 + $0xe4] sm:$0xf]  ;;  %v1101_v44 = vld [vmem:[%s1301_s7 + $0x14] sm:$0xf]  ;;  %v888_v49 = vor.u32 %v1097_v35, %v887_v34  ;;  %v1382_v50 = vor.u32 %v1098_v38, %v895_v32 }
  0x40   : > { %646 = vmatpush.bf16.msra.mxu1 %v980_v7  ;;  %v909_v45 = vld [vmem:[%s1301_s7 + $0x18] sm:$0xf0]  ;;  %v1013_v46 = vld [vmem:[%s1301_s7 + $0xe8] sm:$0xf0]  ;;  %v1143_v47 = vld [vmem:[%s1301_s7 + $0x164] sm:$0xf]  ;;  %v1384_v51 = vor.u32 %v1096_v39, %v889_v40 }
  0x41   : > { %660 = vmatpush.bf16.msra.mxu2 %v1044_v8  ;;  %v1077_v48 = vld [vmem:[%s1301_s7 + $0x168] sm:$0xf0]  ;;  %v912_v52 = vor.u32 %v1101_v44, %v909_v45  ;;  %v1016_v53 = vor.u32 %v1127_v43, %v1013_v46  ;;  %v1125_v55 = vld [vmem:[%s1301_s7 + $0xd4] sm:$0xf]  ;;  %v1099_v56 = vld [vmem:[%s1301_s7 + $0x4] sm:$0xf] }
  0x42   : > { %673 = vmatpush.bf16.msra.mxu3 %v928_v19  ;;  %v1080_v54 = vor.u32 %v1143_v47, %v1077_v48  ;;  %v901_v57 = vld [vmem:[%s1301_s7 + $0x8] sm:$0xf0]  ;;  %v1005_v58 = vld [vmem:[%s1301_s7 + $0xd8] sm:$0xf0]  ;;  %v1141_v59 = vld [vmem:[%s1301_s7 + $0x154] sm:$0xf] }
  0x43   : > { %633 = vmatpush.bf16.msra.mxu0 %v908_v15  ;;  %v1069_v60 = vld [vmem:[%s1301_s7 + $0x158] sm:$0xf0]  ;;  %v904_v61 = vor.u32 %v1099_v56, %v901_v57  ;;  %v1008_v62 = vor.u32 %v1125_v55, %v1005_v58  ;;  %v1123_v0 = vld [vmem:[%s1301_s7 + $0xc4] sm:$0xf]  ;;  %v997_v1 = vld [vmem:[%s1301_s7 + $0xc8] sm:$0xf0] }
  0x44   : > { %647 = vmatpush.bf16.msra.mxu1 %v972_v20  ;;  %v1072_v63 = vor.u32 %v1141_v59, %v1069_v60  ;;  %v1139_v2 = vld [vmem:[%s1301_s7 + $0x144] sm:$0xf]  ;;  %v1061_v3 = vld [vmem:[%s1301_s7 + $0x148] sm:$0xf0]  ;;  %v1000_v4 = vor.u32 %v1123_v0, %v997_v1  ;;  %v1121_v6 = vld [vmem:[%s1301_s7 + $0xb4] sm:$0xf] }
  0x45   : > { %661 = vmatpush.bf16.msra.mxu2 %v1036_v21  ;;  %v1064_v5 = vor.u32 %v1139_v2, %v1061_v3  ;;  %v989_v7 = vld [vmem:[%s1301_s7 + $0xb8] sm:$0xf0]  ;;  %v1137_v8 = vld [vmem:[%s1301_s7 + $0x134] sm:$0xf]  ;;  %v1119_v12 = vld [vmem:[%s1301_s7 + $0xa4] sm:$0xf] }
  0x46   : > { %674 = vmatpush.bf16.msra.mxu3 %v920_v33  ;;  %v1053_v9 = vld [vmem:[%s1301_s7 + $0x138] sm:$0xf0]  ;;  %v992_v10 = vor.u32 %v1121_v6, %v989_v7  ;;  %v981_v13 = vld [vmem:[%s1301_s7 + $0xa8] sm:$0xf0]  ;;  %v1135_v14 = vld [vmem:[%s1301_s7 + $0x124] sm:$0xf] }
  0x47   : > { %634 = vmatpush.bf16.msra.mxu0 %v900_v31  ;;  %v1056_v11 = vor.u32 %v1137_v8, %v1053_v9  ;;  %v1045_v15 = vld [vmem:[%s1301_s7 + $0x128] sm:$0xf0]  ;;  %v984_v16 = vor.u32 %v1119_v12, %v981_v13  ;;  %v1117_v18 = vld [vmem:[%s1301_s7 + $0x94] sm:$0xf]  ;;  %v973_v19 = vld [vmem:[%s1301_s7 + $0x98] sm:$0xf0] }
  0x48   : > { %648 = vmatpush.bf16.msra.mxu1 %v964_v36  ;;  %v1048_v17 = vor.u32 %v1135_v14, %v1045_v15  ;;  %v1133_v20 = vld [vmem:[%s1301_s7 + $0x114] sm:$0xf]  ;;  %v1037_v21 = vld [vmem:[%s1301_s7 + $0x118] sm:$0xf0]  ;;  %v976_v22 = vor.u32 %v1117_v18, %v973_v19  ;;  %v1115_v24 = vld [vmem:[%s1301_s7 + $0x84] sm:$0xf] }
  0x49   : > { %662 = vmatpush.bf16.msra.mxu2 %v1028_v37  ;;  %v1040_v23 = vor.u32 %v1133_v20, %v1037_v21  ;;  %v965_v25 = vld [vmem:[%s1301_s7 + $0x88] sm:$0xf0]  ;;  %v1131_v26 = vld [vmem:[%s1301_s7 + $0x104] sm:$0xf]  ;;  %v315_v33 = vld [vmem:[#allocation2 + $0x10] sm:$0xff]  ;;  %p1089_p11 = scmp.ne.s32.totalorder %s1220_s14, 2 }
  0x4a   : > { %635 = vmatmul.bf16.vlgmr.msra.gmra.mxu0 %v888_v49  ;;  %675 = vmatpush.bf16.msra.mxu3 %v912_v52  ;;  %v1029_v27 = vld [vmem:[%s1301_s7 + $0x108] sm:$0xf0]  ;;  %v968_v28 = vor.u32 %v1115_v24, %v965_v25  ;;  %v317_v40 = vld [vmem:[#allocation2 + $0x18] sm:$0xff]  ;;  %v316_v48 = vld [vmem:[#allocation2] sm:$0xff] }
  0x4b   : > { %683 = vmatpush.bf16.msrb.mxu0 %v1024_v41  ;;  %649 = vmatmul.bf16.vlgmr.msra.gmra.mxu1 %v1384_v51  ;;  %v1032_v29 = vor.u32 %v1131_v26, %v1029_v27 }
  0x4c   : > { %697 = vmatpush.bf16.msrb.mxu1 %v1088_v42  ;;  %663 = vmatmul.bf16.vlgmr.msra.gmra.mxu2 %v1382_v50 }
  0x4e   : > { %676 = vmatpush.bf16.msra.mxu3 %v904_v61 }
  0x4f   : > { %684 = vmatpush.bf16.msrb.mxu0 %v1016_v53 }
  0x50   : > { %698 = vmatpush.bf16.msrb.mxu1 %v1080_v54  ;;  %v318_v54 = vld [vmem:[#allocation2 + $0x8] sm:$0xff] }
  0x51   : > { %677 = vmatmul.bf16.vlgmr.msra.gmra.mxu3 %v888_v49 }
  0x53   : > { %685 = vmatpush.bf16.msrb.mxu0 %v1008_v62 }
  0x54   : > { %699 = vmatpush.bf16.msrb.mxu1 %v1072_v63 }
  0x57   : > { %686 = vmatpush.bf16.msrb.mxu0 %v1000_v4 }
  0x58   : > { %700 = vmatpush.bf16.msrb.mxu1 %v1064_v5 }
  0x5b   : > { %687 = vmatpush.bf16.msrb.mxu0 %v992_v10 }
  0x5c   : > { %701 = vmatpush.bf16.msrb.mxu1 %v1056_v11 }
  0x5f   : > { %688 = vmatpush.bf16.msrb.mxu0 %v984_v16 }
  0x60   : > { %702 = vmatpush.bf16.msrb.mxu1 %v1048_v17 }
  0x63   : > { %689 = vmatpush.bf16.msrb.mxu0 %v976_v22 }
  0x64   : > { %703 = vmatpush.bf16.msrb.mxu1 %v1040_v23 }
  0x67   : > { %690 = vmatpush.bf16.msrb.mxu0 %v968_v28 }
  0x68   : > { %704 = vmatpush.bf16.msrb.mxu1 %v1032_v29 }
  0x6a   : > { %691 = vmatmul.bf16.vlgmr.msrb.gmra.mxu0 %v1384_v51 }
  0x6b   : > { %705 = vmatmul.bf16.vlgmr.msrb.gmra.mxu1 %v1382_v50 }
  0xc7   : > { %v636_v30 = vpop.f32.mrf.mxu0 }
  0xc8   : > { %v650_v31 = vpop.f32.mrf.mxu1 }
  0xc9   : > { %v651_v32 = vadd.f32 %v650_v31, %v636_v30 }
  0xcf   : > { %v664_v34 = vpop.f32.mrf.mxu2  ;;  %v638_v36 = vpop.f32.mrf.mxu0 }
  0xd0   : > { %v665_v35 = vadd.f32 %v664_v34, %v651_v32  ;;  %v652_v37 = vpop.f32.mrf.mxu1 }
  0xd1   : > { %v653_v39 = vadd.f32 %v652_v37, %v638_v36 }
  0xd2   : > { %v711_v38 = vadd.f32 %v665_v35, %v315_v33 }
  0xd4   : > { %715 = vst [vmem:[#allocation2 + $0x10] sm:$0xff] %v711_v38  ;;  %v678_v44 = vpop.f32.mrf.mxu3 }
  0xd7   : > { %v666_v41 = vpop.f32.mrf.mxu2 }
  0xd8   : > { %v667_v42 = vadd.f32 %v666_v41, %v653_v39 }
  0xda   : > { %v713_v43 = vadd.f32 %v667_v42, %v317_v40 }
  0xdc   : > { %717 = vst [vmem:[#allocation2 + $0x18] sm:$0xff] %v713_v43  ;;  %v680_v51 = vpop.f32.mrf.mxu3 }
  0xe7   : > { %v692_v45 = vpop.f32.mrf.mxu0 }
  0xe8   : > { %v706_v46 = vpop.f32.mrf.mxu1  ;;  %v693_v47 = vadd.f32 %v692_v45, %v678_v44 }
  0xea   : > { %v707_v49 = vadd.f32 %v706_v46, %v693_v47 }
  0xec   : > { %v712_v50 = vadd.f32 %v707_v49, %v316_v48 }
  0xee   : > { %716 = vst [vmem:[#allocation2] sm:$0xff] %v712_v50 }
  0xef   : > { %v694_v52 = vpop.f32.mrf.mxu0 }
  0xf0   : > { %v695_v53 = vadd.f32 %v694_v52, %v680_v51  ;;  %v708_v55 = vpop.f32.mrf.mxu1 }
  0xf2   : > { %v709_v56 = vadd.f32 %v708_v55, %v695_v53  ;;  %722 = sbr.rel (%p1089_p11) target bundleno = 259 (0x103), region = 66 }
  0xf4   : > { %v714_v57 = vadd.f32 %v709_v56, %v318_v54 }
  0xf6   : > { %718 = vst [vmem:[#allocation2 + $0x8] sm:$0xff] %v714_v57 }
  0xf7   : > { %v723_v58 = vld [vmem:[#allocation2 + $0x10] sm:$0xff]  ;;  %v727_v59 = vld [vmem:[%s1449_s2] sm:$0x3]  ;;  %v725_v63 = vld [vmem:[#allocation2 + $0x18] sm:$0xff] }
  0xf8   : > { %v724_v60 = vld [vmem:[#allocation2] sm:$0xff]  ;;  %v729_v61 = vperm.slane %v727_v59, 0  ;;  %v730_v62 = vperm.slane %v727_v59, 1 }
  0xfa   : > { %v733_v1 = vadd.f32 %v729_v61, %v723_v58  ;;  %v734_v2 = vadd.f32 %v730_v62, %v724_v60  ;;  %v735_v3 = vadd.f32 %v729_v61, %v725_v63 }
  0xfc   : > { %v737_v5 = vmax.f32 %v733_v1, 0.0  ;;  %v738_v6 = vmax.f32 %v734_v2, 0.0  ;;  %v739_v7 = vmax.f32 %v735_v3, 0.0 }
  0xfd   : > { %v726_v0 = vld [vmem:[#allocation2 + $0x8] sm:$0xff] }
  0xfe   : > { %v736_v4 = vadd.f32 %v730_v62, %v726_v0  ;;  %741 = vst [vmem:[%s1450_s3] sm:$0xff] %v737_v5 }
  0xff   : > { %742 = vst [vmem:[%s1450_s3 + $0x8] sm:$0xff] %v738_v6 }
 0x100   : > { %v740_v8 = vmax.f32 %v736_v4, 0.0  ;;  %743 = vst [vmem:[%s1450_s3 + $0x10] sm:$0xff] %v739_v7 }
 0x102   : > { %744 = vst [vmem:[%s1450_s3 + $0x18] sm:$0xff] %v740_v8 }
 0x103 PF: > { %s13_s16 = sadd.s32 1, %s1228_s16   ;;  %s1451_s12 = smov %s1216_s13 }
 0x104   : > { %p10_p12 = scmp.ge.s32.totalorder %s13_s16, 5   ;;  %s1452_s13 = smov %s1286_s20 }
 0x105   : > { %s1453_s14 = smov %s1224_s15  ;;  %s1454_s15 = smov %s1456_s17 }
 0x106   :  { %12 = sbr.rel (!%p10_p12) target bundleno = 3 (0x3), region = 113 }

// kernel: _lambda_.47
= control target key start
LH: loop header
LB: loop body
LE: loop exit
PB: predicated region body
PF: predicated region fallthrough
CT: control target
= control target key end

     0   :  { %s1247_s12 = smov 0   ;;  %s1249_s13 = smov 0   ;;  %s1443_s0 = inlined_call_operand.vmem [shape: bf16[16,2304], index: 0, kind: input, shape index: {}]   ;;  %s1444_s1 = inlined_call_operand.vmem [shape: bf16[2304,256], index: 1, kind: input, shape index: {}]   ;;  %s1445_s2 = inlined_call_operand.vmem [shape: f32[1,256], index: 2, kind: input, shape index: {}]   ;;  %s1446_s3 = inlined_call_operand.vmem [shape: f32[16,256], index: 3, kind: output, shape index: {}]  }
   0x1   :  { %s1251_s14 = smov 0   ;;  %s1253_s15 = smov 0  }
   0x2   :  { %s1255_s16 = smov 0  }
   0x3 LB: > { %s25_s17 = sadd.s32 1, %s1220_s15  ;;  %p48_p1 = scmp.ne.s32.totalorder %s1212_s13, %s1208_s12  ;;  %s1224_s16 = sphi %s1255_s16, %s13_s16   ;;  %s1220_s15 = sphi %s1253_s15, %s1450_s15   ;;  %s1216_s14 = sphi %s1251_s14, %s1449_s14   ;;  %s1212_s13 = sphi %s1249_s13, %s1448_s13   ;;  %s1208_s12 = sphi %s1247_s12, %s1447_s12  }
   0x4   : > { %p26_p0 = scmp.ge.s32.totalorder %s25_s17, 6  ;;  %p49_p2 = scmp.eq.s32.totalorder %s1224_s16, 0 }
   0x5   : > { %s41_s19 = sadd.s32 1, %s1212_s13  ;;  %p871_p5 = scmp.ge.s32.totalorder %s1224_s16, 6 }
   0x6   : > { %s1452_s17 = smov (%p26_p0, %s25_s17), 0  ;;  %p50_p3 = por %p49_p2, %p48_p1 }
   0x7   : > { %s37_s18 = ssub.s32 %s1220_s15, %s1452_s17  ;;  %164 = sbr.rel (%p871_p5) target bundleno = 21 (0x15), region = 20 }
   0x8   : > { %p39_p4 = scmp.eq.s32.totalorder %s37_s18, 0 }
   0xa   : > { %s1282_s20 = scalar_select %p39_p4, %s1212_s13, %s41_s19  }
   0xc   : > { %167 = sbr.rel (!%p50_p3) target bundleno = 21 (0x15), region = 24  ;;  %s169_s21 = sand.u32 (%p50_p3), 1, %s1212_s13  }
   0xd   : > { %s1090_s22 = smul.u32 (%p50_p3), 12, %s1220_s15 }
   0xe   : > { %s1143_s23 = smul.u32 (%p50_p3), 24, %s169_s21 }
   0xf   : > { %s177_s26 = scalar_lea.vmem (%p50_p3), %s1443_s0, %s1090_s22 }
  0x10   : > { %v192_v0 = vld [vmem:[%s177_s26] sm:$0xff] (%p50_p3)  ;;  %v194_v1 = vld [vmem:[%s177_s26 + $0x48] sm:$0xff] (%p50_p3)  ;;  %s171_s27 = scalar_lea.vmem (%p50_p3), [#allocation3], %s1143_s23  ;;  %v875_v3 = vld [vmem:[%s177_s26 + $0x50] sm:$0xf] (%p50_p3) }
  0x11   : > { %v873_v2 = vld [vmem:[%s177_s26 + $0x8] sm:$0xf]  ;;  %193 = vst [vmem:[%s171_s27] sm:$0xff] %v192_v0 }
  0x12   : > { %195 = vst [vmem:[%s171_s27 + $0xc] sm:$0xff] %v194_v1 }
  0x13   : > { %874 = vst [vmem:[%s171_s27 + $0x8] sm:$0xf] %v873_v2 }
  0x14   : > { %876 = vst [vmem:[%s171_s27 + $0x14] sm:$0xf] %v875_v3 }
  0x15 PF: > { %p877_p6 = scmp.ge.s32.totalorder %s1224_s16, 1  ;;  %p227_p7 = scmp.lt.s32.totalorder %s1224_s16, 7 }
  0x17   : > { %p228_p8 = pnand %p877_p6, %p227_p7 }
  0x18   : > { %s234_s28 = sand.u32 (!%p228_p8), 1, %s1208_s12   ;;  %s278_s29 = smul.u32 (!%p228_p8), 48, %s1216_s14 }
  0x19   : > { %231 = sbr.rel (%p228_p8) target bundleno = 257 (0x101), region = 54  ;;  %p880_p10 = scmp.ne.s32.totalorder (!%p228_p8), %s1216_s14, 0 }
  0x1a   : > { %s1144_s30 = smul.u32 (!%p228_p8), 24, %s234_s28  ;;  %p280_p9 = scmp.lt.s32.totalorder (!%p228_p8), %s278_s29, 287 }
  0x1c   : > { %s1299_s8 = scalar_lea.vmem (!%p228_p8), [#allocation3], %s1144_s30 }
  0x1e   : > { %s1454_s29 = smov (!%p280_p9, %s278_s29), 287  ;;  %310 = sbr.rel (%p880_p10) target bundleno = 40 (0x28), region = 62 }
  0x1f   : > { %s1091_s4 = sshll.u32 %s1454_s29, 3 }
  0x20   : > { %s1297_s7 = scalar_lea.vmem %s1444_s1, %s1091_s4 }
  0x23   : > { %v1226_v4 = vmov 0.0  }
  0x24   : > { %311 = vst [vmem:[#allocation2 + $0x10] sm:$0xff] %v1226_v4 }
  0x25   : > { %312 = vst [vmem:[#allocation2] sm:$0xff] %v1226_v4 }
  0x26   : > { %313 = vst [vmem:[#allocation2 + $0x18] sm:$0xff] %v1226_v4 }
  0x27   : > { %314 = vst [vmem:[#allocation2 + $0x8] sm:$0xff] %v1226_v4 }
  0x28 PF: > { %v951_v5 = vld [vmem:[%s1297_s7 + $0x70] sm:$0xf]  ;;  %v1110_v6 = vld [vmem:[%s1297_s7 + $0x74] sm:$0xf0]  ;;  %v943_v14 = vld [vmem:[%s1297_s7 + $0x60] sm:$0xf] }
  0x29   : > { %v1015_v7 = vld [vmem:[%s1297_s7 + $0xf0] sm:$0xf]  ;;  %v952_v8 = vor.u32 %v1110_v6, %v951_v5  ;;  %v1126_v9 = vld [vmem:[%s1297_s7 + $0xf4] sm:$0xf0]  ;;  %v1108_v15 = vld [vmem:[%s1297_s7 + $0x64] sm:$0xf0] }
  0x2a   : > { %v1079_v10 = vld [vmem:[%s1297_s7 + $0x170] sm:$0xf]  ;;  %v1142_v11 = vld [vmem:[%s1297_s7 + $0x174] sm:$0xf0]  ;;  %v1016_v12 = vor.u32 %v1126_v9, %v1015_v7  ;;  %v1007_v16 = vld [vmem:[%s1297_s7 + $0xe0] sm:$0xf]  ;;  %v944_v17 = vor.u32 %v1108_v15, %v943_v14 }
  0x2b   : > { %v1080_v13 = vor.u32 %v1142_v11, %v1079_v10  ;;  %627 = vmatpush.bf16.msra.mxu0 %v952_v8  ;;  %v1124_v18 = vld [vmem:[%s1297_s7 + $0xe4] sm:$0xf0]  ;;  %v1071_v19 = vld [vmem:[%s1297_s7 + $0x160] sm:$0xf]  ;;  %v935_v23 = vld [vmem:[%s1297_s7 + $0x50] sm:$0xf] }
  0x2c   : > { %v1140_v20 = vld [vmem:[%s1297_s7 + $0x164] sm:$0xf0]  ;;  %641 = vmatpush.bf16.msra.mxu1 %v1016_v12  ;;  %v1008_v21 = vor.u32 %v1124_v18, %v1007_v16  ;;  %v1106_v24 = vld [vmem:[%s1297_s7 + $0x54] sm:$0xf0]  ;;  %v999_v25 = vld [vmem:[%s1297_s7 + $0xd0] sm:$0xf] }
  0x2d   : > { %655 = vmatpush.bf16.msra.mxu2 %v1080_v13  ;;  %v1072_v22 = vor.u32 %v1140_v20, %v1071_v19  ;;  %v1122_v26 = vld [vmem:[%s1297_s7 + $0xd4] sm:$0xf0]  ;;  %v1063_v27 = vld [vmem:[%s1297_s7 + $0x150] sm:$0xf]  ;;  %v936_v29 = vor.u32 %v1106_v24, %v935_v23  ;;  %v927_v30 = vld [vmem:[%s1297_s7 + $0x40] sm:$0xf] }
  0x2e   : > { %v1138_v28 = vld [vmem:[%s1297_s7 + $0x154] sm:$0xf0]  ;;  %v1104_v31 = vld [vmem:[%s1297_s7 + $0x44] sm:$0xf0]  ;;  %v1000_v32 = vor.u32 %v1122_v26, %v999_v25  ;;  %v991_v34 = vld [vmem:[%s1297_s7 + $0xc0] sm:$0xf] }
  0x2f   : > { %628 = vmatpush.bf16.msra.mxu0 %v944_v17  ;;  %v1064_v33 = vor.u32 %v1138_v28, %v1063_v27  ;;  %v1109_v35 = vld [vmem:[%s1297_s7 + $0x74] sm:$0xf]  ;;  %v953_v36 = vld [vmem:[%s1297_s7 + $0x78] sm:$0xf0]  ;;  %v1120_v37 = vld [vmem:[%s1297_s7 + $0xc4] sm:$0xf0]  ;;  %v928_v42 = vor.u32 %v1104_v31, %v927_v30 }
  0x30   : > { %642 = vmatpush.bf16.msra.mxu1 %v1008_v21  ;;  %v1055_v38 = vld [vmem:[%s1297_s7 + $0x140] sm:$0xf]  ;;  %v1136_v39 = vld [vmem:[%s1297_s7 + $0x144] sm:$0xf0]  ;;  %v956_v40 = vor.u32 %v1109_v35, %v953_v36  ;;  %v1107_v41 = vld [vmem:[%s1297_s7 + $0x64] sm:$0xf]  ;;  %v992_v46 = vor.u32 %v1120_v37, %v991_v34 }
  0x31   : > { %656 = vmatpush.bf16.msra.mxu2 %v1072_v22  ;;  %v919_v43 = vld [vmem:[%s1297_s7 + $0x30] sm:$0xf]  ;;  %v1102_v44 = vld [vmem:[%s1297_s7 + $0x34] sm:$0xf0]  ;;  %v945_v45 = vld [vmem:[%s1297_s7 + $0x68] sm:$0xf0]  ;;  %v1056_v47 = vor.u32 %v1136_v39, %v1055_v38 }
  0x32   : > { %669 = vmatpush.bf16.msra.mxu3 %v956_v40  ;;  %v983_v48 = vld [vmem:[%s1297_s7 + $0xb0] sm:$0xf]  ;;  %v1118_v49 = vld [vmem:[%s1297_s7 + $0xb4] sm:$0xf0]  ;;  %v948_v51 = vor.u32 %v1107_v41, %v945_v45  ;;  %v1105_v53 = vld [vmem:[%s1297_s7 + $0x54] sm:$0xf]  ;;  %v920_v55 = vor.u32 %v1102_v44, %v919_v43 }
  0x33   : > { %629 = vmatpush.bf16.msra.mxu0 %v936_v29  ;;  %v1047_v50 = vld [vmem:[%s1297_s7 + $0x130] sm:$0xf]  ;;  %v1134_v52 = vld [vmem:[%s1297_s7 + $0x134] sm:$0xf0]  ;;  %v937_v54 = vld [vmem:[%s1297_s7 + $0x58] sm:$0xf0]  ;;  %v984_v59 = vor.u32 %v1118_v49, %v983_v48 }
  0x34   : > { %643 = vmatpush.bf16.msra.mxu1 %v1000_v32  ;;  %v911_v56 = vld [vmem:[%s1297_s7 + $0x20] sm:$0xf]  ;;  %v1100_v57 = vld [vmem:[%s1297_s7 + $0x24] sm:$0xf0]  ;;  %v940_v58 = vor.u32 %v1105_v53, %v937_v54  ;;  %v1048_v60 = vor.u32 %v1134_v52, %v1047_v50  ;;  %v1103_v62 = vld [vmem:[%s1297_s7 + $0x44] sm:$0xf] }
  0x35   : > { %657 = vmatpush.bf16.msra.mxu2 %v1064_v33  ;;  %v975_v61 = vld [vmem:[%s1297_s7 + $0xa0] sm:$0xf]  ;;  %v929_v63 = vld [vmem:[%s1297_s7 + $0x48] sm:$0xf0]  ;;  %v1116_v0 = vld [vmem:[%s1297_s7 + $0xa4] sm:$0xf0]  ;;  %v912_v3 = vor.u32 %v1100_v57, %v911_v56 }
  0x36   : > { %670 = vmatpush.bf16.msra.mxu3 %v948_v51  ;;  %v1039_v1 = vld [vmem:[%s1297_s7 + $0x120] sm:$0xf]  ;;  %v1132_v2 = vld [vmem:[%s1297_s7 + $0x124] sm:$0xf0]  ;;  %v903_v4 = vld [vmem:[%s1297_s7 + $0x10] sm:$0xf]  ;;  %v932_v6 = vor.u32 %v1103_v62, %v929_v63  ;;  %v976_v7 = vor.u32 %v1116_v0, %v975_v61 }
  0x37   : > { %630 = vmatpush.bf16.msra.mxu0 %v928_v42  ;;  %v1098_v5 = vld [vmem:[%s1297_s7 + $0x14] sm:$0xf0]  ;;  %v1040_v8 = vor.u32 %v1132_v2, %v1039_v1  ;;  %v967_v9 = vld [vmem:[%s1297_s7 + $0x90] sm:$0xf]  ;;  %v1101_v10 = vld [vmem:[%s1297_s7 + $0x34] sm:$0xf] }
  0x38   : > { %644 = vmatpush.bf16.msra.mxu1 %v992_v46  ;;  %v921_v11 = vld [vmem:[%s1297_s7 + $0x38] sm:$0xf0]  ;;  %v1114_v12 = vld [vmem:[%s1297_s7 + $0x94] sm:$0xf0]  ;;  %v1031_v13 = vld [vmem:[%s1297_s7 + $0x110] sm:$0xf]  ;;  %v904_v15 = vor.u32 %v1098_v5, %v903_v4 }
  0x39   : > { %658 = vmatpush.bf16.msra.mxu2 %v1056_v47  ;;  %v1130_v14 = vld [vmem:[%s1297_s7 + $0x114] sm:$0xf0]  ;;  %v895_v16 = vld [vmem:[%s1297_s7] sm:$0xf]  ;;  %v1096_v17 = vld [vmem:[%s1297_s7 + $0x4] sm:$0xf0]  ;;  %v924_v19 = vor.u32 %v1101_v10, %v921_v11  ;;  %v968_v20 = vor.u32 %v1114_v12, %v967_v9 }
  0x3a   : > { %671 = vmatpush.bf16.msra.mxu3 %v940_v58  ;;  %v959_v18 = vld [vmem:[%s1297_s7 + $0x80] sm:$0xf]  ;;  %v1032_v21 = vor.u32 %v1130_v14, %v1031_v13  ;;  %v1112_v22 = vld [vmem:[%s1297_s7 + $0x84] sm:$0xf0]  ;;  %v1099_v23 = vld [vmem:[%s1297_s7 + $0x24] sm:$0xf]  ;;  %v896_v31 = vor.u32 %v1096_v17, %v895_v16 }
  0x3b   : > { %631 = vmatpush.bf16.msra.mxu0 %v920_v55  ;;  %v913_v24 = vld [vmem:[%s1297_s7 + $0x28] sm:$0xf0]  ;;  %v1023_v25 = vld [vmem:[%s1297_s7 + $0x100] sm:$0xf]  ;;  %v1128_v26 = vld [vmem:[%s1297_s7 + $0x104] sm:$0xf0]  ;;  %v960_v36 = vor.u32 %v1112_v22, %v959_v18 }
  0x3c   : > { %645 = vmatpush.bf16.msra.mxu1 %v984_v59  ;;  %v1125_v27 = vld [vmem:[%s1297_s7 + $0xf4] sm:$0xf]  ;;  %v1017_v28 = vld [vmem:[%s1297_s7 + $0xf8] sm:$0xf0]  ;;  %v891_v32 = vld [vmem:[%s1299_s8 + $0x8] sm:$0xf]  ;;  %v916_v33 = vor.u32 %v1099_v23, %v913_v24  ;;  %v1024_v37 = vor.u32 %v1128_v26, %v1023_v25 }
  0x3d   : > { %659 = vmatpush.bf16.msra.mxu2 %v1048_v60  ;;  %v1141_v29 = vld [vmem:[%s1297_s7 + $0x174] sm:$0xf]  ;;  %v1081_v30 = vld [vmem:[%s1297_s7 + $0x178] sm:$0xf0]  ;;  %v883_v34 = vld [vmem:[%s1299_s8] sm:$0xf]  ;;  %v1020_v41 = vor.u32 %v1125_v27, %v1017_v28 }
  0x3e   : > { %672 = vmatpush.bf16.msra.mxu3 %v932_v6  ;;  %v1093_v35 = vld [vmem:[%s1299_s8 + $0x8] sm:$0xf0]  ;;  %v1094_v38 = vld [vmem:[%s1299_s8 + $0x10] sm:$0xf0]  ;;  %v1092_v39 = vld [vmem:[%s1299_s8 + $0x4] sm:$0xf]  ;;  %v1084_v42 = vor.u32 %v1141_v29, %v1081_v30 }
  0x3f   : > { %632 = vmatpush.bf16.msra.mxu0 %v912_v3  ;;  %v885_v40 = vld [vmem:[%s1299_s8 + $0xc] sm:$0xf0]  ;;  %v1123_v43 = vld [vmem:[%s1297_s7 + $0xe4] sm:$0xf]  ;;  %v1097_v44 = vld [vmem:[%s1297_s7 + $0x14] sm:$0xf]  ;;  %v884_v49 = vor.u32 %v1093_v35, %v883_v34  ;;  %v1378_v50 = vor.u32 %v1094_v38, %v891_v32 }
  0x40   : > { %646 = vmatpush.bf16.msra.mxu1 %v976_v7  ;;  %v905_v45 = vld [vmem:[%s1297_s7 + $0x18] sm:$0xf0]  ;;  %v1009_v46 = vld [vmem:[%s1297_s7 + $0xe8] sm:$0xf0]  ;;  %v1139_v47 = vld [vmem:[%s1297_s7 + $0x164] sm:$0xf]  ;;  %v1380_v51 = vor.u32 %v1092_v39, %v885_v40 }
  0x41   : > { %660 = vmatpush.bf16.msra.mxu2 %v1040_v8  ;;  %v1073_v48 = vld [vmem:[%s1297_s7 + $0x168] sm:$0xf0]  ;;  %v908_v52 = vor.u32 %v1097_v44, %v905_v45  ;;  %v1012_v53 = vor.u32 %v1123_v43, %v1009_v46  ;;  %v1121_v55 = vld [vmem:[%s1297_s7 + $0xd4] sm:$0xf]  ;;  %v1095_v56 = vld [vmem:[%s1297_s7 + $0x4] sm:$0xf] }
  0x42   : > { %673 = vmatpush.bf16.msra.mxu3 %v924_v19  ;;  %v1076_v54 = vor.u32 %v1139_v47, %v1073_v48  ;;  %v897_v57 = vld [vmem:[%s1297_s7 + $0x8] sm:$0xf0]  ;;  %v1001_v58 = vld [vmem:[%s1297_s7 + $0xd8] sm:$0xf0]  ;;  %v1137_v59 = vld [vmem:[%s1297_s7 + $0x154] sm:$0xf] }
  0x43   : > { %633 = vmatpush.bf16.msra.mxu0 %v904_v15  ;;  %v1065_v60 = vld [vmem:[%s1297_s7 + $0x158] sm:$0xf0]  ;;  %v900_v61 = vor.u32 %v1095_v56, %v897_v57  ;;  %v1004_v62 = vor.u32 %v1121_v55, %v1001_v58  ;;  %v1119_v0 = vld [vmem:[%s1297_s7 + $0xc4] sm:$0xf]  ;;  %v993_v1 = vld [vmem:[%s1297_s7 + $0xc8] sm:$0xf0] }
  0x44   : > { %647 = vmatpush.bf16.msra.mxu1 %v968_v20  ;;  %v1068_v63 = vor.u32 %v1137_v59, %v1065_v60  ;;  %v1135_v2 = vld [vmem:[%s1297_s7 + $0x144] sm:$0xf]  ;;  %v1057_v3 = vld [vmem:[%s1297_s7 + $0x148] sm:$0xf0]  ;;  %v996_v4 = vor.u32 %v1119_v0, %v993_v1  ;;  %v1117_v6 = vld [vmem:[%s1297_s7 + $0xb4] sm:$0xf] }
  0x45   : > { %661 = vmatpush.bf16.msra.mxu2 %v1032_v21  ;;  %v1060_v5 = vor.u32 %v1135_v2, %v1057_v3  ;;  %v985_v7 = vld [vmem:[%s1297_s7 + $0xb8] sm:$0xf0]  ;;  %v1133_v8 = vld [vmem:[%s1297_s7 + $0x134] sm:$0xf]  ;;  %v1115_v12 = vld [vmem:[%s1297_s7 + $0xa4] sm:$0xf] }
  0x46   : > { %674 = vmatpush.bf16.msra.mxu3 %v916_v33  ;;  %v1049_v9 = vld [vmem:[%s1297_s7 + $0x138] sm:$0xf0]  ;;  %v988_v10 = vor.u32 %v1117_v6, %v985_v7  ;;  %v977_v13 = vld [vmem:[%s1297_s7 + $0xa8] sm:$0xf0]  ;;  %v1131_v14 = vld [vmem:[%s1297_s7 + $0x124] sm:$0xf] }
  0x47   : > { %634 = vmatpush.bf16.msra.mxu0 %v896_v31  ;;  %v1052_v11 = vor.u32 %v1133_v8, %v1049_v9  ;;  %v1041_v15 = vld [vmem:[%s1297_s7 + $0x128] sm:$0xf0]  ;;  %v980_v16 = vor.u32 %v1115_v12, %v977_v13  ;;  %v1113_v18 = vld [vmem:[%s1297_s7 + $0x94] sm:$0xf]  ;;  %v969_v19 = vld [vmem:[%s1297_s7 + $0x98] sm:$0xf0] }
  0x48   : > { %648 = vmatpush.bf16.msra.mxu1 %v960_v36  ;;  %v1044_v17 = vor.u32 %v1131_v14, %v1041_v15  ;;  %v1129_v20 = vld [vmem:[%s1297_s7 + $0x114] sm:$0xf]  ;;  %v1033_v21 = vld [vmem:[%s1297_s7 + $0x118] sm:$0xf0]  ;;  %v972_v22 = vor.u32 %v1113_v18, %v969_v19  ;;  %v1111_v24 = vld [vmem:[%s1297_s7 + $0x84] sm:$0xf] }
  0x49   : > { %662 = vmatpush.bf16.msra.mxu2 %v1024_v37  ;;  %v1036_v23 = vor.u32 %v1129_v20, %v1033_v21  ;;  %v961_v25 = vld [vmem:[%s1297_s7 + $0x88] sm:$0xf0]  ;;  %v1127_v26 = vld [vmem:[%s1297_s7 + $0x104] sm:$0xf]  ;;  %v315_v33 = vld [vmem:[#allocation2 + $0x10] sm:$0xff]  ;;  %p1085_p11 = scmp.ne.s32.totalorder %s1216_s14, 5 }
  0x4a   : > { %635 = vmatmul.bf16.vlgmr.msra.gmra.mxu0 %v884_v49  ;;  %675 = vmatpush.bf16.msra.mxu3 %v908_v52  ;;  %v1025_v27 = vld [vmem:[%s1297_s7 + $0x108] sm:$0xf0]  ;;  %v964_v28 = vor.u32 %v1111_v24, %v961_v25  ;;  %v317_v40 = vld [vmem:[#allocation2 + $0x18] sm:$0xff]  ;;  %v316_v48 = vld [vmem:[#allocation2] sm:$0xff] }
  0x4b   : > { %683 = vmatpush.bf16.msrb.mxu0 %v1020_v41  ;;  %649 = vmatmul.bf16.vlgmr.msra.gmra.mxu1 %v1380_v51  ;;  %v1028_v29 = vor.u32 %v1127_v26, %v1025_v27 }
  0x4c   : > { %697 = vmatpush.bf16.msrb.mxu1 %v1084_v42  ;;  %663 = vmatmul.bf16.vlgmr.msra.gmra.mxu2 %v1378_v50 }
  0x4e   : > { %676 = vmatpush.bf16.msra.mxu3 %v900_v61 }
  0x4f   : > { %684 = vmatpush.bf16.msrb.mxu0 %v1012_v53 }
  0x50   : > { %698 = vmatpush.bf16.msrb.mxu1 %v1076_v54  ;;  %v318_v54 = vld [vmem:[#allocation2 + $0x8] sm:$0xff] }
  0x51   : > { %677 = vmatmul.bf16.vlgmr.msra.gmra.mxu3 %v884_v49 }
  0x53   : > { %685 = vmatpush.bf16.msrb.mxu0 %v1004_v62 }
  0x54   : > { %699 = vmatpush.bf16.msrb.mxu1 %v1068_v63 }
  0x57   : > { %686 = vmatpush.bf16.msrb.mxu0 %v996_v4 }
  0x58   : > { %700 = vmatpush.bf16.msrb.mxu1 %v1060_v5 }
  0x5b   : > { %687 = vmatpush.bf16.msrb.mxu0 %v988_v10 }
  0x5c   : > { %701 = vmatpush.bf16.msrb.mxu1 %v1052_v11 }
  0x5f   : > { %688 = vmatpush.bf16.msrb.mxu0 %v980_v16 }
  0x60   : > { %702 = vmatpush.bf16.msrb.mxu1 %v1044_v17 }
  0x63   : > { %689 = vmatpush.bf16.msrb.mxu0 %v972_v22 }
  0x64   : > { %703 = vmatpush.bf16.msrb.mxu1 %v1036_v23 }
  0x67   : > { %690 = vmatpush.bf16.msrb.mxu0 %v964_v28 }
  0x68   : > { %704 = vmatpush.bf16.msrb.mxu1 %v1028_v29 }
  0x6a   : > { %691 = vmatmul.bf16.vlgmr.msrb.gmra.mxu0 %v1380_v51 }
  0x6b   : > { %705 = vmatmul.bf16.vlgmr.msrb.gmra.mxu1 %v1378_v50 }
  0xc7   : > { %v636_v30 = vpop.f32.mrf.mxu0 }
  0xc8   : > { %v650_v31 = vpop.f32.mrf.mxu1 }
  0xc9   : > { %v651_v32 = vadd.f32 %v650_v31, %v636_v30 }
  0xcf   : > { %v664_v34 = vpop.f32.mrf.mxu2  ;;  %v638_v36 = vpop.f32.mrf.mxu0 }
  0xd0   : > { %v665_v35 = vadd.f32 %v664_v34, %v651_v32  ;;  %v652_v37 = vpop.f32.mrf.mxu1 }
  0xd1   : > { %v653_v39 = vadd.f32 %v652_v37, %v638_v36 }
  0xd2   : > { %v711_v38 = vadd.f32 %v665_v35, %v315_v33 }
  0xd4   : > { %715 = vst [vmem:[#allocation2 + $0x10] sm:$0xff] %v711_v38  ;;  %v678_v44 = vpop.f32.mrf.mxu3 }
  0xd7   : > { %v666_v41 = vpop.f32.mrf.mxu2 }
  0xd8   : > { %v667_v42 = vadd.f32 %v666_v41, %v653_v39 }
  0xda   : > { %v713_v43 = vadd.f32 %v667_v42, %v317_v40 }
  0xdc   : > { %717 = vst [vmem:[#allocation2 + $0x18] sm:$0xff] %v713_v43  ;;  %v680_v51 = vpop.f32.mrf.mxu3 }
  0xe7   : > { %v692_v45 = vpop.f32.mrf.mxu0 }
  0xe8   : > { %v706_v46 = vpop.f32.mrf.mxu1  ;;  %v693_v47 = vadd.f32 %v692_v45, %v678_v44 }
  0xea   : > { %v707_v49 = vadd.f32 %v706_v46, %v693_v47 }
  0xec   : > { %v712_v50 = vadd.f32 %v707_v49, %v316_v48 }
  0xee   : > { %716 = vst [vmem:[#allocation2] sm:$0xff] %v712_v50 }
  0xef   : > { %v694_v52 = vpop.f32.mrf.mxu0 }
  0xf0   : > { %v695_v53 = vadd.f32 %v694_v52, %v680_v51  ;;  %v708_v55 = vpop.f32.mrf.mxu1 }
  0xf2   : > { %v709_v56 = vadd.f32 %v708_v55, %v695_v53  ;;  %722 = sbr.rel (%p1085_p11) target bundleno = 257 (0x101), region = 66 }
  0xf4   : > { %v714_v57 = vadd.f32 %v709_v56, %v318_v54 }
  0xf6   : > { %718 = vst [vmem:[#allocation2 + $0x8] sm:$0xff] %v714_v57 }
  0xf7   : > { %v723_v58 = vld [vmem:[#allocation2 + $0x10] sm:$0xff]  ;;  %v727_v59 = vld [vmem:[%s1445_s2] sm:$0x3]  ;;  %v725_v63 = vld [vmem:[#allocation2 + $0x18] sm:$0xff] }
  0xf8   : > { %v724_v60 = vld [vmem:[#allocation2] sm:$0xff]  ;;  %v729_v61 = vperm.slane %v727_v59, 0  ;;  %v730_v62 = vperm.slane %v727_v59, 1 }
  0xfa   : > { %v733_v1 = vadd.f32 %v729_v61, %v723_v58  ;;  %v734_v2 = vadd.f32 %v730_v62, %v724_v60  ;;  %v735_v3 = vadd.f32 %v729_v61, %v725_v63 }
  0xfc   : > { %737 = vst [vmem:[%s1446_s3] sm:$0xff] %v733_v1 }
  0xfd   : > { %v726_v0 = vld [vmem:[#allocation2 + $0x8] sm:$0xff]  ;;  %738 = vst [vmem:[%s1446_s3 + $0x8] sm:$0xff] %v734_v2 }
  0xfe   : > { %v736_v4 = vadd.f32 %v730_v62, %v726_v0  ;;  %739 = vst [vmem:[%s1446_s3 + $0x10] sm:$0xff] %v735_v3 }
 0x100   : > { %740 = vst [vmem:[%s1446_s3 + $0x18] sm:$0xff] %v736_v4 }
 0x101 PF: > { %s13_s16 = sadd.s32 1, %s1224_s16   ;;  %s1447_s12 = smov %s1212_s13 }
 0x102   : > { %p10_p12 = scmp.ge.s32.totalorder %s13_s16, 8   ;;  %s1448_s13 = smov %s1282_s20 }
 0x103   : > { %s1449_s14 = smov %s1220_s15  ;;  %s1450_s15 = smov %s1452_s17 }
 0x104   :  { %12 = sbr.rel (!%p10_p12) target bundleno = 3 (0x3), region = 113 }

// kernel: _lambda_.48
= control target key start
LH: loop header
LB: loop body
LE: loop exit
PB: predicated region body
PF: predicated region fallthrough
CT: control target
= control target key end

     0   :  { %s410_s1 = inlined_call_operand.vmem [shape: bf16[128,256], index: 1, kind: input, shape index: {}]   ;;  %s411_s0 = inlined_call_operand.vmem [shape: bf16[16,128], index: 0, kind: input, shape index: {}]   ;;  %s412_s2 = inlined_call_operand.vmem [shape: f32[1,256], index: 2, kind: input, shape index: {}]   ;;  %s413_s3 = inlined_call_operand.vmem [shape: f32[16,256], index: 3, kind: output, shape index: {}]  }
   0x1   :  { %v253_v0 = vld [vmem:[%s410_s1 + $0x70] sm:$0xf]  ;;  %v275_v1 = vld [vmem:[%s410_s1 + $0x74] sm:$0xf0]  ;;  %v274_v2 = vld [vmem:[%s410_s1 + $0x74] sm:$0xf] }
   0x2   :  { %v254_v3 = vor.u32 %v275_v1, %v253_v0  ;;  %v255_v4 = vld [vmem:[%s410_s1 + $0x78] sm:$0xf0]  ;;  %v245_v5 = vld [vmem:[%s410_s1 + $0x60] sm:$0xf]  ;;  %v273_v6 = vld [vmem:[%s410_s1 + $0x64] sm:$0xf0] }
   0x3   :  { %v258_v7 = vor.u32 %v274_v2, %v255_v4  ;;  %v272_v8 = vld [vmem:[%s410_s1 + $0x64] sm:$0xf]  ;;  %v247_v9 = vld [vmem:[%s410_s1 + $0x68] sm:$0xf0]  ;;  %v246_v10 = vor.u32 %v273_v6, %v245_v5  ;;  %v237_v12 = vld [vmem:[%s410_s1 + $0x50] sm:$0xf] }
   0x4   :  { %130 = vmatpush.bf16.msra.mxu0 %v254_v3  ;;  %v250_v11 = vor.u32 %v272_v8, %v247_v9  ;;  %v271_v13 = vld [vmem:[%s410_s1 + $0x54] sm:$0xf0]  ;;  %v270_v14 = vld [vmem:[%s410_s1 + $0x54] sm:$0xf]  ;;  %v239_v15 = vld [vmem:[%s410_s1 + $0x58] sm:$0xf0] }
   0x5   :  { %144 = vmatpush.bf16.msra.mxu1 %v258_v7  ;;  %v238_v16 = vor.u32 %v271_v13, %v237_v12  ;;  %v242_v17 = vor.u32 %v270_v14, %v239_v15  ;;  %v229_v18 = vld [vmem:[%s410_s1 + $0x40] sm:$0xf]  ;;  %v269_v19 = vld [vmem:[%s410_s1 + $0x44] sm:$0xf0]  ;;  %v268_v20 = vld [vmem:[%s410_s1 + $0x44] sm:$0xf] }
   0x6   :  { %v231_v21 = vld [vmem:[%s410_s1 + $0x48] sm:$0xf0]  ;;  %v230_v22 = vor.u32 %v269_v19, %v229_v18  ;;  %v221_v24 = vld [vmem:[%s410_s1 + $0x30] sm:$0xf]  ;;  %v267_v25 = vld [vmem:[%s410_s1 + $0x34] sm:$0xf0] }
   0x7   :  { %v234_v23 = vor.u32 %v268_v20, %v231_v21  ;;  %v266_v26 = vld [vmem:[%s410_s1 + $0x34] sm:$0xf]  ;;  %v223_v27 = vld [vmem:[%s410_s1 + $0x38] sm:$0xf0]  ;;  %v222_v28 = vor.u32 %v267_v25, %v221_v24  ;;  %v213_v30 = vld [vmem:[%s410_s1 + $0x20] sm:$0xf] }
   0x8   :  { %131 = vmatpush.bf16.msra.mxu0 %v246_v10  ;;  %v226_v29 = vor.u32 %v266_v26, %v223_v27  ;;  %v265_v31 = vld [vmem:[%s410_s1 + $0x24] sm:$0xf0]  ;;  %v264_v32 = vld [vmem:[%s410_s1 + $0x24] sm:$0xf]  ;;  %v215_v33 = vld [vmem:[%s410_s1 + $0x28] sm:$0xf0] }
   0x9   :  { %145 = vmatpush.bf16.msra.mxu1 %v250_v11  ;;  %v214_v34 = vor.u32 %v265_v31, %v213_v30  ;;  %v218_v35 = vor.u32 %v264_v32, %v215_v33  ;;  %v205_v36 = vld [vmem:[%s410_s1 + $0x10] sm:$0xf]  ;;  %v263_v37 = vld [vmem:[%s410_s1 + $0x14] sm:$0xf0]  ;;  %v262_v38 = vld [vmem:[%s410_s1 + $0x14] sm:$0xf] }
   0xa   :  { %v207_v39 = vld [vmem:[%s410_s1 + $0x18] sm:$0xf0]  ;;  %v206_v40 = vor.u32 %v263_v37, %v205_v36  ;;  %v197_v42 = vld [vmem:[%s410_s1] sm:$0xf]  ;;  %v261_v43 = vld [vmem:[%s410_s1 + $0x4] sm:$0xf0] }
   0xb   :  { %v210_v41 = vor.u32 %v262_v38, %v207_v39  ;;  %v260_v44 = vld [vmem:[%s410_s1 + $0x4] sm:$0xf]  ;;  %v199_v45 = vld [vmem:[%s410_s1 + $0x8] sm:$0xf0]  ;;  %v198_v46 = vor.u32 %v261_v43, %v197_v42  ;;  %v173_v49 = vld [vmem:[%s412_s2] sm:$0x3] }
   0xc   :  { %132 = vmatpush.bf16.msra.mxu0 %v238_v16  ;;  %v202_v47 = vor.u32 %v260_v44, %v199_v45  ;;  %v259_v48 = vld [vmem:[%s411_s0] sm:$0xff]  ;;  %v175_v50 = vperm.slane %v173_v49, 0  ;;  %v176_v51 = vperm.slane %v173_v49, 1 }
   0xd   :  { %146 = vmatpush.bf16.msra.mxu1 %v242_v17 }
  0x10   :  { %133 = vmatpush.bf16.msra.mxu0 %v230_v22 }
  0x11   :  { %147 = vmatpush.bf16.msra.mxu1 %v234_v23 }
  0x14   :  { %134 = vmatpush.bf16.msra.mxu0 %v222_v28 }
  0x15   :  { %148 = vmatpush.bf16.msra.mxu1 %v226_v29 }
  0x18   :  { %135 = vmatpush.bf16.msra.mxu0 %v214_v34 }
  0x19   :  { %149 = vmatpush.bf16.msra.mxu1 %v218_v35 }
  0x1c   :  { %136 = vmatpush.bf16.msra.mxu0 %v206_v40 }
  0x1d   :  { %150 = vmatpush.bf16.msra.mxu1 %v210_v41 }
  0x20   :  { %137 = vmatpush.bf16.msra.mxu0 %v198_v46 }
  0x21   :  { %151 = vmatpush.bf16.msra.mxu1 %v202_v47 }
  0x23   :  { %138 = vmatmul.bf16.vlgmr.msra.gmra.mxu0 %v259_v48 }
  0x24   :  { %152 = vmatmul.bf16.vlgmr.msra.gmra.mxu1 %v259_v48 }
  0xa0   :  { %v139_v52 = vpop.f32.mrf.mxu0 }
  0xa1   :  { %v179_v53 = vadd.f32 %v175_v50, %v139_v52  ;;  %v153_v54 = vpop.f32.mrf.mxu1 }
  0xa2   :  { %v180_v55 = vadd.f32 %v176_v51, %v153_v54 }
  0xa3   :  { %183 = vst [vmem:[%s413_s3] sm:$0xff] %v179_v53 }
  0xa4   :  { %184 = vst [vmem:[%s413_s3 + $0x8] sm:$0xff] %v180_v55 }
  0xa8   :  { %v141_v56 = vpop.f32.mrf.mxu0 }
  0xa9   :  { %v181_v57 = vadd.f32 %v175_v50, %v141_v56  ;;  %v155_v58 = vpop.f32.mrf.mxu1 }
  0xaa   :  { %v182_v59 = vadd.f32 %v176_v51, %v155_v58 }
  0xab   :  { %185 = vst [vmem:[%s413_s3 + $0x10] sm:$0xff] %v181_v57 }
  0xac   :  { %186 = vst [vmem:[%s413_s3 + $0x18] sm:$0xff] %v182_v59 }

// kernel: _lambda_.49
= control target key start
LH: loop header
LB: loop body
LE: loop exit
PB: predicated region body
PF: predicated region fallthrough
CT: control target
= control target key end

     0   :  { %s58_s0 = inlined_call_operand.vmem [shape: f32[16,128], index: 0, kind: input, shape index: {}]   ;;  %s59_s1 = inlined_call_operand.vmem [shape: f32[16,128], index: 1, kind: input, shape index: {}]   ;;  %s60_s2 = inlined_call_operand.vmem [shape: f32[16,128], index: 2, kind: output, shape index: {}]  }
   0x1   :  { %v11_v0 = vld [vmem:[%s58_s0] sm:$0xff]  ;;  %v12_v2 = vld [vmem:[%s58_s0 + $0x8] sm:$0xff] }
   0x2   :  { %v13_v1 = vld [vmem:[%s59_s1] sm:$0xff]  ;;  %v14_v4 = vld [vmem:[%s59_s1 + $0x8] sm:$0xff] }
   0x3   :  { %v15_v3 = vadd.f32 %v13_v1, %v11_v0  ;;  %v16_v5 = vadd.f32 %v14_v4, %v12_v2 }
   0x5   :  { %v17_v6 = vmax.f32 %v15_v3, 0.0  ;;  %v18_v7 = vmax.f32 %v16_v5, 0.0 }
   0x7   :  { %19 = vst [vmem:[%s60_s2] sm:$0xff] %v17_v6 }
   0x8   :  { %20 = vst [vmem:[%s60_s2 + $0x8] sm:$0xff] %v18_v7 }

// kernel: _lambda_.50
= control target key start
LH: loop header
LB: loop body
LE: loop exit
PB: predicated region body
PF: predicated region fallthrough
CT: control target
= control target key end

     0   :  { %s1251_s12 = smov 0   ;;  %s1253_s13 = smov 0   ;;  %s1447_s0 = inlined_call_operand.vmem [shape: bf16[16,2304], index: 0, kind: input, shape index: {}]   ;;  %s1448_s1 = inlined_call_operand.vmem [shape: bf16[2304,256], index: 1, kind: input, shape index: {}]   ;;  %s1449_s2 = inlined_call_operand.vmem [shape: f32[1,256], index: 2, kind: input, shape index: {}]   ;;  %s1450_s3 = inlined_call_operand.vmem [shape: f32[16,256], index: 3, kind: output, shape index: {}]  }
   0x1   :  { %s1255_s14 = smov 0   ;;  %s1257_s15 = smov 0  }
   0x2   :  { %s1259_s16 = smov 0  }
   0x3 LB: > { %s25_s17 = sadd.s32 1, %s1224_s15  ;;  %p48_p1 = scmp.ne.s32.totalorder %s1216_s13, %s1212_s12  ;;  %s1228_s16 = sphi %s1259_s16, %s13_s16   ;;  %s1224_s15 = sphi %s1257_s15, %s1454_s15   ;;  %s1220_s14 = sphi %s1255_s14, %s1453_s14   ;;  %s1216_s13 = sphi %s1253_s13, %s1452_s13   ;;  %s1212_s12 = sphi %s1251_s12, %s1451_s12  }
   0x4   : > { %p26_p0 = scmp.ge.s32.totalorder %s25_s17, 6  ;;  %p49_p2 = scmp.eq.s32.totalorder %s1228_s16, 0 }
   0x5   : > { %s41_s19 = sadd.s32 1, %s1216_s13  ;;  %p875_p5 = scmp.ge.s32.totalorder %s1228_s16, 6 }
   0x6   : > { %s1456_s17 = smov (%p26_p0, %s25_s17), 0  ;;  %p50_p3 = por %p49_p2, %p48_p1 }
   0x7   : > { %s37_s18 = ssub.s32 %s1224_s15, %s1456_s17  ;;  %164 = sbr.rel (%p875_p5) target bundleno = 21 (0x15), region = 20 }
   0x8   : > { %p39_p4 = scmp.eq.s32.totalorder %s37_s18, 0 }
   0xa   : > { %s1286_s20 = scalar_select %p39_p4, %s1216_s13, %s41_s19  }
   0xc   : > { %167 = sbr.rel (!%p50_p3) target bundleno = 21 (0x15), region = 24  ;;  %s169_s21 = sand.u32 (%p50_p3), 1, %s1216_s13  }
   0xd   : > { %s1094_s22 = smul.u32 (%p50_p3), 12, %s1224_s15 }
   0xe   : > { %s1147_s23 = smul.u32 (%p50_p3), 24, %s169_s21 }
   0xf   : > { %s177_s26 = scalar_lea.vmem (%p50_p3), %s1447_s0, %s1094_s22 }
  0x10   : > { %v192_v0 = vld [vmem:[%s177_s26] sm:$0xff] (%p50_p3)  ;;  %v194_v1 = vld [vmem:[%s177_s26 + $0x48] sm:$0xff] (%p50_p3)  ;;  %s171_s27 = scalar_lea.vmem (%p50_p3), [#allocation3], %s1147_s23  ;;  %v879_v3 = vld [vmem:[%s177_s26 + $0x50] sm:$0xf] (%p50_p3) }
  0x11   : > { %v877_v2 = vld [vmem:[%s177_s26 + $0x8] sm:$0xf]  ;;  %193 = vst [vmem:[%s171_s27] sm:$0xff] %v192_v0 }
  0x12   : > { %195 = vst [vmem:[%s171_s27 + $0xc] sm:$0xff] %v194_v1 }
  0x13   : > { %878 = vst [vmem:[%s171_s27 + $0x8] sm:$0xf] %v877_v2 }
  0x14   : > { %880 = vst [vmem:[%s171_s27 + $0x14] sm:$0xf] %v879_v3 }
  0x15 PF: > { %p881_p6 = scmp.ge.s32.totalorder %s1228_s16, 1  ;;  %p227_p7 = scmp.lt.s32.totalorder %s1228_s16, 7 }
  0x17   : > { %p228_p8 = pnand %p881_p6, %p227_p7 }
  0x18   : > { %s234_s28 = sand.u32 (!%p228_p8), 1, %s1212_s12   ;;  %s278_s29 = smul.u32 (!%p228_p8), 48, %s1220_s14 }
  0x19   : > { %231 = sbr.rel (%p228_p8) target bundleno = 259 (0x103), region = 54  ;;  %p884_p10 = scmp.ne.s32.totalorder (!%p228_p8), %s1220_s14, 0 }
  0x1a   : > { %s1148_s30 = smul.u32 (!%p228_p8), 24, %s234_s28  ;;  %p280_p9 = scmp.lt.s32.totalorder (!%p228_p8), %s278_s29, 287 }
  0x1c   : > { %s1303_s8 = scalar_lea.vmem (!%p228_p8), [#allocation3], %s1148_s30 }
  0x1e   : > { %s1458_s29 = smov (!%p280_p9, %s278_s29), 287  ;;  %310 = sbr.rel (%p884_p10) target bundleno = 40 (0x28), region = 62 }
  0x1f   : > { %s1095_s4 = sshll.u32 %s1458_s29, 3 }
  0x20   : > { %s1301_s7 = scalar_lea.vmem %s1448_s1, %s1095_s4 }
  0x23   : > { %v1230_v4 = vmov 0.0  }
  0x24   : > { %311 = vst [vmem:[#allocation2 + $0x10] sm:$0xff] %v1230_v4 }
  0x25   : > { %312 = vst [vmem:[#allocation2] sm:$0xff] %v1230_v4 }
  0x26   : > { %313 = vst [vmem:[#allocation2 + $0x18] sm:$0xff] %v1230_v4 }
  0x27   : > { %314 = vst [vmem:[#allocation2 + $0x8] sm:$0xff] %v1230_v4 }
  0x28 PF: > { %v955_v5 = vld [vmem:[%s1301_s7 + $0x70] sm:$0xf]  ;;  %v1114_v6 = vld [vmem:[%s1301_s7 + $0x74] sm:$0xf0]  ;;  %v947_v14 = vld [vmem:[%s1301_s7 + $0x60] sm:$0xf] }
  0x29   : > { %v1019_v7 = vld [vmem:[%s1301_s7 + $0xf0] sm:$0xf]  ;;  %v956_v8 = vor.u32 %v1114_v6, %v955_v5  ;;  %v1130_v9 = vld [vmem:[%s1301_s7 + $0xf4] sm:$0xf0]  ;;  %v1112_v15 = vld [vmem:[%s1301_s7 + $0x64] sm:$0xf0] }
  0x2a   : > { %v1083_v10 = vld [vmem:[%s1301_s7 + $0x170] sm:$0xf]  ;;  %v1146_v11 = vld [vmem:[%s1301_s7 + $0x174] sm:$0xf0]  ;;  %v1020_v12 = vor.u32 %v1130_v9, %v1019_v7  ;;  %v1011_v16 = vld [vmem:[%s1301_s7 + $0xe0] sm:$0xf]  ;;  %v948_v17 = vor.u32 %v1112_v15, %v947_v14 }
  0x2b   : > { %v1084_v13 = vor.u32 %v1146_v11, %v1083_v10  ;;  %627 = vmatpush.bf16.msra.mxu0 %v956_v8  ;;  %v1128_v18 = vld [vmem:[%s1301_s7 + $0xe4] sm:$0xf0]  ;;  %v1075_v19 = vld [vmem:[%s1301_s7 + $0x160] sm:$0xf]  ;;  %v939_v23 = vld [vmem:[%s1301_s7 + $0x50] sm:$0xf] }
  0x2c   : > { %v1144_v20 = vld [vmem:[%s1301_s7 + $0x164] sm:$0xf0]  ;;  %641 = vmatpush.bf16.msra.mxu1 %v1020_v12  ;;  %v1012_v21 = vor.u32 %v1128_v18, %v1011_v16  ;;  %v1110_v24 = vld [vmem:[%s1301_s7 + $0x54] sm:$0xf0]  ;;  %v1003_v25 = vld [vmem:[%s1301_s7 + $0xd0] sm:$0xf] }
  0x2d   : > { %655 = vmatpush.bf16.msra.mxu2 %v1084_v13  ;;  %v1076_v22 = vor.u32 %v1144_v20, %v1075_v19  ;;  %v1126_v26 = vld [vmem:[%s1301_s7 + $0xd4] sm:$0xf0]  ;;  %v1067_v27 = vld [vmem:[%s1301_s7 + $0x150] sm:$0xf]  ;;  %v940_v29 = vor.u32 %v1110_v24, %v939_v23  ;;  %v931_v30 = vld [vmem:[%s1301_s7 + $0x40] sm:$0xf] }
  0x2e   : > { %v1142_v28 = vld [vmem:[%s1301_s7 + $0x154] sm:$0xf0]  ;;  %v1108_v31 = vld [vmem:[%s1301_s7 + $0x44] sm:$0xf0]  ;;  %v1004_v32 = vor.u32 %v1126_v26, %v1003_v25  ;;  %v995_v34 = vld [vmem:[%s1301_s7 + $0xc0] sm:$0xf] }
  0x2f   : > { %628 = vmatpush.bf16.msra.mxu0 %v948_v17  ;;  %v1068_v33 = vor.u32 %v1142_v28, %v1067_v27  ;;  %v1113_v35 = vld [vmem:[%s1301_s7 + $0x74] sm:$0xf]  ;;  %v957_v36 = vld [vmem:[%s1301_s7 + $0x78] sm:$0xf0]  ;;  %v1124_v37 = vld [vmem:[%s1301_s7 + $0xc4] sm:$0xf0]  ;;  %v932_v42 = vor.u32 %v1108_v31, %v931_v30 }
  0x30   : > { %642 = vmatpush.bf16.msra.mxu1 %v1012_v21  ;;  %v1059_v38 = vld [vmem:[%s1301_s7 + $0x140] sm:$0xf]  ;;  %v1140_v39 = vld [vmem:[%s1301_s7 + $0x144] sm:$0xf0]  ;;  %v960_v40 = vor.u32 %v1113_v35, %v957_v36  ;;  %v1111_v41 = vld [vmem:[%s1301_s7 + $0x64] sm:$0xf]  ;;  %v996_v46 = vor.u32 %v1124_v37, %v995_v34 }
  0x31   : > { %656 = vmatpush.bf16.msra.mxu2 %v1076_v22  ;;  %v923_v43 = vld [vmem:[%s1301_s7 + $0x30] sm:$0xf]  ;;  %v1106_v44 = vld [vmem:[%s1301_s7 + $0x34] sm:$0xf0]  ;;  %v949_v45 = vld [vmem:[%s1301_s7 + $0x68] sm:$0xf0]  ;;  %v1060_v47 = vor.u32 %v1140_v39, %v1059_v38 }
  0x32   : > { %669 = vmatpush.bf16.msra.mxu3 %v960_v40  ;;  %v987_v48 = vld [vmem:[%s1301_s7 + $0xb0] sm:$0xf]  ;;  %v1122_v49 = vld [vmem:[%s1301_s7 + $0xb4] sm:$0xf0]  ;;  %v952_v51 = vor.u32 %v1111_v41, %v949_v45  ;;  %v1109_v53 = vld [vmem:[%s1301_s7 + $0x54] sm:$0xf]  ;;  %v924_v55 = vor.u32 %v1106_v44, %v923_v43 }
  0x33   : > { %629 = vmatpush.bf16.msra.mxu0 %v940_v29  ;;  %v1051_v50 = vld [vmem:[%s1301_s7 + $0x130] sm:$0xf]  ;;  %v1138_v52 = vld [vmem:[%s1301_s7 + $0x134] sm:$0xf0]  ;;  %v941_v54 = vld [vmem:[%s1301_s7 + $0x58] sm:$0xf0]  ;;  %v988_v59 = vor.u32 %v1122_v49, %v987_v48 }
  0x34   : > { %643 = vmatpush.bf16.msra.mxu1 %v1004_v32  ;;  %v915_v56 = vld [vmem:[%s1301_s7 + $0x20] sm:$0xf]  ;;  %v1104_v57 = vld [vmem:[%s1301_s7 + $0x24] sm:$0xf0]  ;;  %v944_v58 = vor.u32 %v1109_v53, %v941_v54  ;;  %v1052_v60 = vor.u32 %v1138_v52, %v1051_v50  ;;  %v1107_v62 = vld [vmem:[%s1301_s7 + $0x44] sm:$0xf] }
  0x35   : > { %657 = vmatpush.bf16.msra.mxu2 %v1068_v33  ;;  %v979_v61 = vld [vmem:[%s1301_s7 + $0xa0] sm:$0xf]  ;;  %v933_v63 = vld [vmem:[%s1301_s7 + $0x48] sm:$0xf0]  ;;  %v1120_v0 = vld [vmem:[%s1301_s7 + $0xa4] sm:$0xf0]  ;;  %v916_v3 = vor.u32 %v1104_v57, %v915_v56 }
  0x36   : > { %670 = vmatpush.bf16.msra.mxu3 %v952_v51  ;;  %v1043_v1 = vld [vmem:[%s1301_s7 + $0x120] sm:$0xf]  ;;  %v1136_v2 = vld [vmem:[%s1301_s7 + $0x124] sm:$0xf0]  ;;  %v907_v4 = vld [vmem:[%s1301_s7 + $0x10] sm:$0xf]  ;;  %v936_v6 = vor.u32 %v1107_v62, %v933_v63  ;;  %v980_v7 = vor.u32 %v1120_v0, %v979_v61 }
  0x37   : > { %630 = vmatpush.bf16.msra.mxu0 %v932_v42  ;;  %v1102_v5 = vld [vmem:[%s1301_s7 + $0x14] sm:$0xf0]  ;;  %v1044_v8 = vor.u32 %v1136_v2, %v1043_v1  ;;  %v971_v9 = vld [vmem:[%s1301_s7 + $0x90] sm:$0xf]  ;;  %v1105_v10 = vld [vmem:[%s1301_s7 + $0x34] sm:$0xf] }
  0x38   : > { %644 = vmatpush.bf16.msra.mxu1 %v996_v46  ;;  %v925_v11 = vld [vmem:[%s1301_s7 + $0x38] sm:$0xf0]  ;;  %v1118_v12 = vld [vmem:[%s1301_s7 + $0x94] sm:$0xf0]  ;;  %v1035_v13 = vld [vmem:[%s1301_s7 + $0x110] sm:$0xf]  ;;  %v908_v15 = vor.u32 %v1102_v5, %v907_v4 }
  0x39   : > { %658 = vmatpush.bf16.msra.mxu2 %v1060_v47  ;;  %v1134_v14 = vld [vmem:[%s1301_s7 + $0x114] sm:$0xf0]  ;;  %v899_v16 = vld [vmem:[%s1301_s7] sm:$0xf]  ;;  %v1100_v17 = vld [vmem:[%s1301_s7 + $0x4] sm:$0xf0]  ;;  %v928_v19 = vor.u32 %v1105_v10, %v925_v11  ;;  %v972_v20 = vor.u32 %v1118_v12, %v971_v9 }
  0x3a   : > { %671 = vmatpush.bf16.msra.mxu3 %v944_v58  ;;  %v963_v18 = vld [vmem:[%s1301_s7 + $0x80] sm:$0xf]  ;;  %v1036_v21 = vor.u32 %v1134_v14, %v1035_v13  ;;  %v1116_v22 = vld [vmem:[%s1301_s7 + $0x84] sm:$0xf0]  ;;  %v1103_v23 = vld [vmem:[%s1301_s7 + $0x24] sm:$0xf]  ;;  %v900_v31 = vor.u32 %v1100_v17, %v899_v16 }
  0x3b   : > { %631 = vmatpush.bf16.msra.mxu0 %v924_v55  ;;  %v917_v24 = vld [vmem:[%s1301_s7 + $0x28] sm:$0xf0]  ;;  %v1027_v25 = vld [vmem:[%s1301_s7 + $0x100] sm:$0xf]  ;;  %v1132_v26 = vld [vmem:[%s1301_s7 + $0x104] sm:$0xf0]  ;;  %v964_v36 = vor.u32 %v1116_v22, %v963_v18 }
  0x3c   : > { %645 = vmatpush.bf16.msra.mxu1 %v988_v59  ;;  %v1129_v27 = vld [vmem:[%s1301_s7 + $0xf4] sm:$0xf]  ;;  %v1021_v28 = vld [vmem:[%s1301_s7 + $0xf8] sm:$0xf0]  ;;  %v895_v32 = vld [vmem:[%s1303_s8 + $0x8] sm:$0xf]  ;;  %v920_v33 = vor.u32 %v1103_v23, %v917_v24  ;;  %v1028_v37 = vor.u32 %v1132_v26, %v1027_v25 }
  0x3d   : > { %659 = vmatpush.bf16.msra.mxu2 %v1052_v60  ;;  %v1145_v29 = vld [vmem:[%s1301_s7 + $0x174] sm:$0xf]  ;;  %v1085_v30 = vld [vmem:[%s1301_s7 + $0x178] sm:$0xf0]  ;;  %v887_v34 = vld [vmem:[%s1303_s8] sm:$0xf]  ;;  %v1024_v41 = vor.u32 %v1129_v27, %v1021_v28 }
  0x3e   : > { %672 = vmatpush.bf16.msra.mxu3 %v936_v6  ;;  %v1097_v35 = vld [vmem:[%s1303_s8 + $0x8] sm:$0xf0]  ;;  %v1098_v38 = vld [vmem:[%s1303_s8 + $0x10] sm:$0xf0]  ;;  %v1096_v39 = vld [vmem:[%s1303_s8 + $0x4] sm:$0xf]  ;;  %v1088_v42 = vor.u32 %v1145_v29, %v1085_v30 }
  0x3f   : > { %632 = vmatpush.bf16.msra.mxu0 %v916_v3  ;;  %v889_v40 = vld [vmem:[%s1303_s8 + $0xc] sm:$0xf0]  ;;  %v1127_v43 = vld [vmem:[%s1301_s7 + $0xe4] sm:$0xf]  ;;  %v1101_v44 = vld [vmem:[%s1301_s7 + $0x14] sm:$0xf]  ;;  %v888_v49 = vor.u32 %v1097_v35, %v887_v34  ;;  %v1382_v50 = vor.u32 %v1098_v38, %v895_v32 }
  0x40   : > { %646 = vmatpush.bf16.msra.mxu1 %v980_v7  ;;  %v909_v45 = vld [vmem:[%s1301_s7 + $0x18] sm:$0xf0]  ;;  %v1013_v46 = vld [vmem:[%s1301_s7 + $0xe8] sm:$0xf0]  ;;  %v1143_v47 = vld [vmem:[%s1301_s7 + $0x164] sm:$0xf]  ;;  %v1384_v51 = vor.u32 %v1096_v39, %v889_v40 }
  0x41   : > { %660 = vmatpush.bf16.msra.mxu2 %v1044_v8  ;;  %v1077_v48 = vld [vmem:[%s1301_s7 + $0x168] sm:$0xf0]  ;;  %v912_v52 = vor.u32 %v1101_v44, %v909_v45  ;;  %v1016_v53 = vor.u32 %v1127_v43, %v1013_v46  ;;  %v1125_v55 = vld [vmem:[%s1301_s7 + $0xd4] sm:$0xf]  ;;  %v1099_v56 = vld [vmem:[%s1301_s7 + $0x4] sm:$0xf] }
  0x42   : > { %673 = vmatpush.bf16.msra.mxu3 %v928_v19  ;;  %v1080_v54 = vor.u32 %v1143_v47, %v1077_v48  ;;  %v901_v57 = vld [vmem:[%s1301_s7 + $0x8] sm:$0xf0]  ;;  %v1005_v58 = vld [vmem:[%s1301_s7 + $0xd8] sm:$0xf0]  ;;  %v1141_v59 = vld [vmem:[%s1301_s7 + $0x154] sm:$0xf] }
  0x43   : > { %633 = vmatpush.bf16.msra.mxu0 %v908_v15  ;;  %v1069_v60 = vld [vmem:[%s1301_s7 + $0x158] sm:$0xf0]  ;;  %v904_v61 = vor.u32 %v1099_v56, %v901_v57  ;;  %v1008_v62 = vor.u32 %v1125_v55, %v1005_v58  ;;  %v1123_v0 = vld [vmem:[%s1301_s7 + $0xc4] sm:$0xf]  ;;  %v997_v1 = vld [vmem:[%s1301_s7 + $0xc8] sm:$0xf0] }
  0x44   : > { %647 = vmatpush.bf16.msra.mxu1 %v972_v20  ;;  %v1072_v63 = vor.u32 %v1141_v59, %v1069_v60  ;;  %v1139_v2 = vld [vmem:[%s1301_s7 + $0x144] sm:$0xf]  ;;  %v1061_v3 = vld [vmem:[%s1301_s7 + $0x148] sm:$0xf0]  ;;  %v1000_v4 = vor.u32 %v1123_v0, %v997_v1  ;;  %v1121_v6 = vld [vmem:[%s1301_s7 + $0xb4] sm:$0xf] }
  0x45   : > { %661 = vmatpush.bf16.msra.mxu2 %v1036_v21  ;;  %v1064_v5 = vor.u32 %v1139_v2, %v1061_v3  ;;  %v989_v7 = vld [vmem:[%s1301_s7 + $0xb8] sm:$0xf0]  ;;  %v1137_v8 = vld [vmem:[%s1301_s7 + $0x134] sm:$0xf]  ;;  %v1119_v12 = vld [vmem:[%s1301_s7 + $0xa4] sm:$0xf] }
  0x46   : > { %674 = vmatpush.bf16.msra.mxu3 %v920_v33  ;;  %v1053_v9 = vld [vmem:[%s1301_s7 + $0x138] sm:$0xf0]  ;;  %v992_v10 = vor.u32 %v1121_v6, %v989_v7  ;;  %v981_v13 = vld [vmem:[%s1301_s7 + $0xa8] sm:$0xf0]  ;;  %v1135_v14 = vld [vmem:[%s1301_s7 + $0x124] sm:$0xf] }
  0x47   : > { %634 = vmatpush.bf16.msra.mxu0 %v900_v31  ;;  %v1056_v11 = vor.u32 %v1137_v8, %v1053_v9  ;;  %v1045_v15 = vld [vmem:[%s1301_s7 + $0x128] sm:$0xf0]  ;;  %v984_v16 = vor.u32 %v1119_v12, %v981_v13  ;;  %v1117_v18 = vld [vmem:[%s1301_s7 + $0x94] sm:$0xf]  ;;  %v973_v19 = vld [vmem:[%s1301_s7 + $0x98] sm:$0xf0] }
  0x48   : > { %648 = vmatpush.bf16.msra.mxu1 %v964_v36  ;;  %v1048_v17 = vor.u32 %v1135_v14, %v1045_v15  ;;  %v1133_v20 = vld [vmem:[%s1301_s7 + $0x114] sm:$0xf]  ;;  %v1037_v21 = vld [vmem:[%s1301_s7 + $0x118] sm:$0xf0]  ;;  %v976_v22 = vor.u32 %v1117_v18, %v973_v19  ;;  %v1115_v24 = vld [vmem:[%s1301_s7 + $0x84] sm:$0xf] }
  0x49   : > { %662 = vmatpush.bf16.msra.mxu2 %v1028_v37  ;;  %v1040_v23 = vor.u32 %v1133_v20, %v1037_v21  ;;  %v965_v25 = vld [vmem:[%s1301_s7 + $0x88] sm:$0xf0]  ;;  %v1131_v26 = vld [vmem:[%s1301_s7 + $0x104] sm:$0xf]  ;;  %v315_v33 = vld [vmem:[#allocation2 + $0x10] sm:$0xff]  ;;  %p1089_p11 = scmp.ne.s32.totalorder %s1220_s14, 5 }
  0x4a   : > { %635 = vmatmul.bf16.vlgmr.msra.gmra.mxu0 %v888_v49  ;;  %675 = vmatpush.bf16.msra.mxu3 %v912_v52  ;;  %v1029_v27 = vld [vmem:[%s1301_s7 + $0x108] sm:$0xf0]  ;;  %v968_v28 = vor.u32 %v1115_v24, %v965_v25  ;;  %v317_v40 = vld [vmem:[#allocation2 + $0x18] sm:$0xff]  ;;  %v316_v48 = vld [vmem:[#allocation2] sm:$0xff] }
  0x4b   : > { %683 = vmatpush.bf16.msrb.mxu0 %v1024_v41  ;;  %649 = vmatmul.bf16.vlgmr.msra.gmra.mxu1 %v1384_v51  ;;  %v1032_v29 = vor.u32 %v1131_v26, %v1029_v27 }
  0x4c   : > { %697 = vmatpush.bf16.msrb.mxu1 %v1088_v42  ;;  %663 = vmatmul.bf16.vlgmr.msra.gmra.mxu2 %v1382_v50 }
  0x4e   : > { %676 = vmatpush.bf16.msra.mxu3 %v904_v61 }
  0x4f   : > { %684 = vmatpush.bf16.msrb.mxu0 %v1016_v53 }
  0x50   : > { %698 = vmatpush.bf16.msrb.mxu1 %v1080_v54  ;;  %v318_v54 = vld [vmem:[#allocation2 + $0x8] sm:$0xff] }
  0x51   : > { %677 = vmatmul.bf16.vlgmr.msra.gmra.mxu3 %v888_v49 }
  0x53   : > { %685 = vmatpush.bf16.msrb.mxu0 %v1008_v62 }
  0x54   : > { %699 = vmatpush.bf16.msrb.mxu1 %v1072_v63 }
  0x57   : > { %686 = vmatpush.bf16.msrb.mxu0 %v1000_v4 }
  0x58   : > { %700 = vmatpush.bf16.msrb.mxu1 %v1064_v5 }
  0x5b   : > { %687 = vmatpush.bf16.msrb.mxu0 %v992_v10 }
  0x5c   : > { %701 = vmatpush.bf16.msrb.mxu1 %v1056_v11 }
  0x5f   : > { %688 = vmatpush.bf16.msrb.mxu0 %v984_v16 }
  0x60   : > { %702 = vmatpush.bf16.msrb.mxu1 %v1048_v17 }
  0x63   : > { %689 = vmatpush.bf16.msrb.mxu0 %v976_v22 }
  0x64   : > { %703 = vmatpush.bf16.msrb.mxu1 %v1040_v23 }
  0x67   : > { %690 = vmatpush.bf16.msrb.mxu0 %v968_v28 }
  0x68   : > { %704 = vmatpush.bf16.msrb.mxu1 %v1032_v29 }
  0x6a   : > { %691 = vmatmul.bf16.vlgmr.msrb.gmra.mxu0 %v1384_v51 }
  0x6b   : > { %705 = vmatmul.bf16.vlgmr.msrb.gmra.mxu1 %v1382_v50 }
  0xc7   : > { %v636_v30 = vpop.f32.mrf.mxu0 }
  0xc8   : > { %v650_v31 = vpop.f32.mrf.mxu1 }
  0xc9   : > { %v651_v32 = vadd.f32 %v650_v31, %v636_v30 }
  0xcf   : > { %v664_v34 = vpop.f32.mrf.mxu2  ;;  %v638_v36 = vpop.f32.mrf.mxu0 }
  0xd0   : > { %v665_v35 = vadd.f32 %v664_v34, %v651_v32  ;;  %v652_v37 = vpop.f32.mrf.mxu1 }
  0xd1   : > { %v653_v39 = vadd.f32 %v652_v37, %v638_v36 }
  0xd2   : > { %v711_v38 = vadd.f32 %v665_v35, %v315_v33 }
  0xd4   : > { %715 = vst [vmem:[#allocation2 + $0x10] sm:$0xff] %v711_v38  ;;  %v678_v44 = vpop.f32.mrf.mxu3 }
  0xd7   : > { %v666_v41 = vpop.f32.mrf.mxu2 }
  0xd8   : > { %v667_v42 = vadd.f32 %v666_v41, %v653_v39 }
  0xda   : > { %v713_v43 = vadd.f32 %v667_v42, %v317_v40 }
  0xdc   : > { %717 = vst [vmem:[#allocation2 + $0x18] sm:$0xff] %v713_v43  ;;  %v680_v51 = vpop.f32.mrf.mxu3 }
  0xe7   : > { %v692_v45 = vpop.f32.mrf.mxu0 }
  0xe8   : > { %v706_v46 = vpop.f32.mrf.mxu1  ;;  %v693_v47 = vadd.f32 %v692_v45, %v678_v44 }
  0xea   : > { %v707_v49 = vadd.f32 %v706_v46, %v693_v47 }
  0xec   : > { %v712_v50 = vadd.f32 %v707_v49, %v316_v48 }
  0xee   : > { %716 = vst [vmem:[#allocation2] sm:$0xff] %v712_v50 }
  0xef   : > { %v694_v52 = vpop.f32.mrf.mxu0 }
  0xf0   : > { %v695_v53 = vadd.f32 %v694_v52, %v680_v51  ;;  %v708_v55 = vpop.f32.mrf.mxu1 }
  0xf2   : > { %v709_v56 = vadd.f32 %v708_v55, %v695_v53  ;;  %722 = sbr.rel (%p1089_p11) target bundleno = 259 (0x103), region = 66 }
  0xf4   : > { %v714_v57 = vadd.f32 %v709_v56, %v318_v54 }
  0xf6   : > { %718 = vst [vmem:[#allocation2 + $0x8] sm:$0xff] %v714_v57 }
  0xf7   : > { %v723_v58 = vld [vmem:[#allocation2 + $0x10] sm:$0xff]  ;;  %v727_v59 = vld [vmem:[%s1449_s2] sm:$0x3]  ;;  %v725_v63 = vld [vmem:[#allocation2 + $0x18] sm:$0xff] }
  0xf8   : > { %v724_v60 = vld [vmem:[#allocation2] sm:$0xff]  ;;  %v729_v61 = vperm.slane %v727_v59, 0  ;;  %v730_v62 = vperm.slane %v727_v59, 1 }
  0xfa   : > { %v733_v1 = vadd.f32 %v729_v61, %v723_v58  ;;  %v734_v2 = vadd.f32 %v730_v62, %v724_v60  ;;  %v735_v3 = vadd.f32 %v729_v61, %v725_v63 }
  0xfc   : > { %v737_v5 = vmax.f32 %v733_v1, 0.0  ;;  %v738_v6 = vmax.f32 %v734_v2, 0.0  ;;  %v739_v7 = vmax.f32 %v735_v3, 0.0 }
  0xfd   : > { %v726_v0 = vld [vmem:[#allocation2 + $0x8] sm:$0xff] }
  0xfe   : > { %v736_v4 = vadd.f32 %v730_v62, %v726_v0  ;;  %741 = vst [vmem:[%s1450_s3] sm:$0xff] %v737_v5 }
  0xff   : > { %742 = vst [vmem:[%s1450_s3 + $0x8] sm:$0xff] %v738_v6 }
 0x100   : > { %v740_v8 = vmax.f32 %v736_v4, 0.0  ;;  %743 = vst [vmem:[%s1450_s3 + $0x10] sm:$0xff] %v739_v7 }
 0x102   : > { %744 = vst [vmem:[%s1450_s3 + $0x18] sm:$0xff] %v740_v8 }
 0x103 PF: > { %s13_s16 = sadd.s32 1, %s1228_s16   ;;  %s1451_s12 = smov %s1216_s13 }
 0x104   : > { %p10_p12 = scmp.ge.s32.totalorder %s13_s16, 8   ;;  %s1452_s13 = smov %s1286_s20 }
 0x105   : > { %s1453_s14 = smov %s1224_s15  ;;  %s1454_s15 = smov %s1456_s17 }
 0x106   :  { %12 = sbr.rel (!%p10_p12) target bundleno = 3 (0x3), region = 113 }

// kernel: _lambda_.53
= control target key start
LH: loop header
LB: loop body
LE: loop exit
PB: predicated region body
PF: predicated region fallthrough
CT: control target
= control target key end

     0   :  { %s1964_s0 = inlined_call_operand.vmem [shape: bf16[16,2304], index: 0, kind: input, shape index: {}]   ;;  %s1965_s1 = inlined_call_operand.vmem [shape: bf16[2304,512], index: 1, kind: input, shape index: {}]   ;;  %s1966_s2 = inlined_call_operand.vmem [shape: f32[1,512], index: 2, kind: input, shape index: {}]   ;;  %s1967_s3 = inlined_call_operand.vmem [shape: f32[16,512], index: 3, kind: output, shape index: {}]  }
   0x1   :  { %1969 = sst [smem:[#allocation7_spill]] %s1964_s0 }
   0x2   :  { %1970 = sst [smem:[#allocation8_spill]] %s1965_s1 }
   0x3   :  { %s1568_s12 = smov 0   ;;  %s1570_s13 = smov 0  }
   0x4   :  { %s1572_s14 = smov 0   ;;  %s1574_s15 = smov 0  }
   0x5   :  { %s1576_s16 = smov 0   ;;  %s1578_s17 = smov 0  }
   0x6   :  { %s1580_s18 = smov 0   ;;  %s1582_s19 = smov 0  }
   0x7   :  { %s1584_s20 = smov 0   ;;  %s1586_s21 = smov 0  }
   0x8   :  { %s1588_s22 = smov 0  }
   0x9 LB: > { %s1086_s23 = sadd.s32 4294967295, %s1545_s22   ;;  %s25_s24 = sadd.s32 1, %s1537_s20  ;;  %s1545_s22 = sphi %s1588_s22, %s13_s22   ;;  %s1541_s21 = sphi %s1586_s21, %s1987_s21   ;;  %s1537_s20 = sphi %s1584_s20, %s1986_s20   ;;  %s1533_s19 = sphi %s1582_s19, %s1985_s19   ;;  %s1529_s18 = sphi %s1580_s18, %s1984_s18   ;;  %s1525_s17 = sphi %s1578_s17, %s1983_s17   ;;  %s1521_s16 = sphi %s1576_s16, %s1982_s16   ;;  %s1517_s15 = sphi %s1574_s15, %s1981_s15   ;;  %s1513_s14 = sphi %s1572_s14, %s1980_s14   ;;  %s1509_s13 = sphi %s1570_s13, %s1979_s13   ;;  %s1505_s12 = sphi %s1568_s12, %s1978_s12  }
   0xa   : > { %p26_p0 = scmp.ge.s32.totalorder %s25_s24, 6  ;;  %s28_s25 = sadd.s32 1, %s1541_s21 }
   0xb   : > { %s41_s26 = sadd.s32 1, %s1525_s17  ;;  %p48_p1 = scmp.ne.s32.totalorder %s1525_s17, %s1521_s16 }
   0xc   : > { %s1989_s24 = smov (%p26_p0, %s25_s24), 0  ;;  %s1991_s25 = smov (!%p26_p0, %s28_s25), %s1541_s21 }
   0xd   : > { %s37_s27 = ssub.s32 %s1537_s20, %s1989_s24  ;;  %p49_p2 = scmp.eq.s32.totalorder %s1545_s22, 0 }
   0xe   : > { %p30_p3 = scmp.ge.s32.totalorder %s1991_s25, 2  ;;  %p39_p4 = scmp.eq.s32.totalorder %s37_s27, 0 }
   0xf   : > { %p1635_p5 = por %p49_p2, %p48_p1  ;;  %s69_s29 = sadd.s32 1, %s1517_s15 }
  0x10   : > { %s1993_s25 = smov (%p30_p3, %s1991_s25), 0  ;;  %p76_p6 = scmp.ne.s32.totalorder %s1517_s15, %s1513_s14 }
  0x11   : > { %1972 = sst [smem:[#allocation6_spill]] %s1993_s25  ;;  %s65_s4 = ssub.s32 %s1541_s21, %s1993_s25 }
  0x12   : > { %s1643_s30 = scalar_select %p39_p4, %s1525_s17, %s41_s26  }
  0x13   : > { %s66_s5 = sor.u32 %s65_s4, %s37_s27  ;;  %p121_p7 = scmp.eq.s32.totalorder %s65_s4, 0 }
  0x14   : > { %p67_p8 = scmp.eq.s32.totalorder %s66_s5, 0  ;;  %p1649_p9 = por %p76_p6, %p49_p2 }
  0x15   : > { %s123_s7 = sadd.s32 1, %s1509_s13  ;;  %p133_p10 = scmp.ne.s32.totalorder %s1509_s13, %s1505_s12 }
  0x16   : > { %s1657_s8 = scalar_select %p67_p8, %s1517_s15, %s69_s29  }
  0x17   : > { %s1660_s9 = scalar_select %p121_p7, %s1509_s13, %s123_s7  }
  0x18   : > { %p134_p11 = scmp.eq.s32.totalorder %s1086_s23, 11  ;;  %p1089_p13 = scmp.ge.s32.totalorder %s1545_s22, 12 }
  0x1a   : > { %p1662_p12 = por %p134_p11, %p133_p10  ;;  %156 = sbr.rel (%p1089_p13) target bundleno = 102 (0x66), region = 16 }
  0x1f   : > { %159 = sbr.rel (!%p1635_p5) target bundleno = 44 (0x2c), region = 20  ;;  %s161_s11 = sand.u32 (%p1635_p5), 1, %s1525_s17  }
  0x20   : > { %s1312_s26 = smul.u32 (%p1635_p5), 12, %s1537_s20  ;;  %s1975_s0 = sld [smem:[#allocation7_spill]] (%p1635_p5) }
  0x21   : > { %s1366_s27 = smul.u32 (%p1635_p5), 24, %s161_s11 }
  0x23   : > { %s163_s23 = scalar_lea.vmem (%p1635_p5), [#allocation3], %s1366_s27 }
  0x26   : > { %s169_s5 = scalar_lea.vmem %s1975_s0, %s1312_s26 }
  0x27   : > { %v184_v0 = vld [vmem:[%s169_s5] sm:$0xff]  ;;  %v186_v1 = vld [vmem:[%s169_s5 + $0x48] sm:$0xff]  ;;  %v1093_v3 = vld [vmem:[%s169_s5 + $0x50] sm:$0xf] }
  0x28   : > { %v1091_v2 = vld [vmem:[%s169_s5 + $0x8] sm:$0xf]  ;;  %185 = vst [vmem:[%s163_s23] sm:$0xff] %v184_v0 }
  0x29   : > { %187 = vst [vmem:[%s163_s23 + $0xc] sm:$0xff] %v186_v1 }
  0x2a   : > { %1092 = vst [vmem:[%s163_s23 + $0x8] sm:$0xf] %v1091_v2 }
  0x2b   : > { %1094 = vst [vmem:[%s163_s23 + $0x14] sm:$0xf] %v1093_v3 }
  0x2c PF: > { %205 = sbr.rel (!%p1649_p9) target bundleno = 102 (0x66), region = 46  ;;  %s207_s28 = sand.u32 (%p1649_p9), 1, %s1517_s15  }
  0x2d   : > { %s1367_s7 = smul.u32 (%p1649_p9), 384, %s207_s28  ;;  %s1095_s11 = sshll.u32 (%p1649_p9), %s1541_s21, 1 }
  0x2e   : > { %s1313_s26 = smul.u32 (%p1649_p9), 192, %s1537_s20  ;;  %s1976_s1 = sld [smem:[#allocation8_spill]] (%p1649_p9) }
  0x2f   : > { %s1687_s6 = scalar_lea.vmem (%p1649_p9), [#allocation4], %s1367_s7 }
  0x30   : > { %s213_s29 = sadd.s32 (%p1649_p9), %s1313_s26, %s1095_s11 }
  0x31   : > { %s1097_s4 = sshll.u32 %s213_s29, 2 }
  0x34   : > { %s1682_s5 = scalar_lea.vmem %s1976_s1, %s1097_s4 }
  0x35   : > { %v338_v4 = vld [vmem:[%s1682_s5] sm:$0xff]  ;;  %v340_v5 = vld [vmem:[%s1682_s5 + $0x10] sm:$0xff] }
  0x36   : > { %v342_v6 = vld [vmem:[%s1682_s5 + $0x20] sm:$0xff]  ;;  %339 = vst [vmem:[%s1687_s6] sm:$0xff] %v338_v4  ;;  %v344_v7 = vld [vmem:[%s1682_s5 + $0x30] sm:$0xff] }
  0x37   : > { %341 = vst [vmem:[%s1687_s6 + $0x8] sm:$0xff] %v340_v5  ;;  %v346_v8 = vld [vmem:[%s1682_s5 + $0x40] sm:$0xff]  ;;  %v348_v9 = vld [vmem:[%s1682_s5 + $0x50] sm:$0xff] }
  0x38   : > { %343 = vst [vmem:[%s1687_s6 + $0x10] sm:$0xff] %v342_v6  ;;  %v350_v10 = vld [vmem:[%s1682_s5 + $0x60] sm:$0xff]  ;;  %v352_v11 = vld [vmem:[%s1682_s5 + $0x70] sm:$0xff] }
  0x39   : > { %345 = vst [vmem:[%s1687_s6 + $0x18] sm:$0xff] %v344_v7  ;;  %v354_v12 = vld [vmem:[%s1682_s5 + $0x80] sm:$0xff]  ;;  %v356_v13 = vld [vmem:[%s1682_s5 + $0x90] sm:$0xff] }
  0x3a   : > { %347 = vst [vmem:[%s1687_s6 + $0x20] sm:$0xff] %v346_v8  ;;  %v358_v14 = vld [vmem:[%s1682_s5 + $0xa0] sm:$0xff]  ;;  %v360_v15 = vld [vmem:[%s1682_s5 + $0xb0] sm:$0xff] }
  0x3b   : > { %349 = vst [vmem:[%s1687_s6 + $0x28] sm:$0xff] %v348_v9  ;;  %v362_v16 = vld [vmem:[%s1682_s5 + $0xc0] sm:$0xff]  ;;  %v364_v17 = vld [vmem:[%s1682_s5 + $0xd0] sm:$0xff] }
  0x3c   : > { %351 = vst [vmem:[%s1687_s6 + $0x30] sm:$0xff] %v350_v10  ;;  %v366_v18 = vld [vmem:[%s1682_s5 + $0xe0] sm:$0xff]  ;;  %v368_v19 = vld [vmem:[%s1682_s5 + $0xf0] sm:$0xff] }
  0x3d   : > { %353 = vst [vmem:[%s1687_s6 + $0x38] sm:$0xff] %v352_v11  ;;  %v370_v20 = vld [vmem:[%s1682_s5 + $0x100] sm:$0xff]  ;;  %v372_v21 = vld [vmem:[%s1682_s5 + $0x110] sm:$0xff] }
  0x3e   : > { %355 = vst [vmem:[%s1687_s6 + $0x40] sm:$0xff] %v354_v12  ;;  %v374_v22 = vld [vmem:[%s1682_s5 + $0x120] sm:$0xff]  ;;  %v376_v23 = vld [vmem:[%s1682_s5 + $0x130] sm:$0xff] }
  0x3f   : > { %357 = vst [vmem:[%s1687_s6 + $0x48] sm:$0xff] %v356_v13  ;;  %v378_v24 = vld [vmem:[%s1682_s5 + $0x140] sm:$0xff]  ;;  %v380_v25 = vld [vmem:[%s1682_s5 + $0x150] sm:$0xff] }
  0x40   : > { %359 = vst [vmem:[%s1687_s6 + $0x50] sm:$0xff] %v358_v14  ;;  %v382_v26 = vld [vmem:[%s1682_s5 + $0x160] sm:$0xff]  ;;  %v384_v27 = vld [vmem:[%s1682_s5 + $0x170] sm:$0xff] }
  0x41   : > { %361 = vst [vmem:[%s1687_s6 + $0x58] sm:$0xff] %v360_v15  ;;  %v386_v28 = vld [vmem:[%s1682_s5 + $0x180] sm:$0xff]  ;;  %v388_v29 = vld [vmem:[%s1682_s5 + $0x190] sm:$0xff] }
  0x42   : > { %363 = vst [vmem:[%s1687_s6 + $0x60] sm:$0xff] %v362_v16  ;;  %v390_v30 = vld [vmem:[%s1682_s5 + $0x1a0] sm:$0xff]  ;;  %v392_v31 = vld [vmem:[%s1682_s5 + $0x1b0] sm:$0xff] }
  0x43   : > { %365 = vst [vmem:[%s1687_s6 + $0x68] sm:$0xff] %v364_v17  ;;  %v394_v32 = vld [vmem:[%s1682_s5 + $0x1c0] sm:$0xff]  ;;  %v396_v33 = vld [vmem:[%s1682_s5 + $0x1d0] sm:$0xff] }
  0x44   : > { %367 = vst [vmem:[%s1687_s6 + $0x70] sm:$0xff] %v366_v18  ;;  %v398_v34 = vld [vmem:[%s1682_s5 + $0x1e0] sm:$0xff]  ;;  %v400_v35 = vld [vmem:[%s1682_s5 + $0x1f0] sm:$0xff] }
  0x45   : > { %369 = vst [vmem:[%s1687_s6 + $0x78] sm:$0xff] %v368_v19  ;;  %v402_v36 = vld [vmem:[%s1682_s5 + $0x200] sm:$0xff]  ;;  %v404_v37 = vld [vmem:[%s1682_s5 + $0x210] sm:$0xff] }
  0x46   : > { %371 = vst [vmem:[%s1687_s6 + $0x80] sm:$0xff] %v370_v20  ;;  %v406_v38 = vld [vmem:[%s1682_s5 + $0x220] sm:$0xff]  ;;  %v408_v39 = vld [vmem:[%s1682_s5 + $0x230] sm:$0xff] }
  0x47   : > { %373 = vst [vmem:[%s1687_s6 + $0x88] sm:$0xff] %v372_v21  ;;  %v410_v40 = vld [vmem:[%s1682_s5 + $0x240] sm:$0xff]  ;;  %v412_v41 = vld [vmem:[%s1682_s5 + $0x250] sm:$0xff] }
  0x48   : > { %375 = vst [vmem:[%s1687_s6 + $0x90] sm:$0xff] %v374_v22  ;;  %v414_v42 = vld [vmem:[%s1682_s5 + $0x260] sm:$0xff]  ;;  %v416_v43 = vld [vmem:[%s1682_s5 + $0x270] sm:$0xff] }
  0x49   : > { %377 = vst [vmem:[%s1687_s6 + $0x98] sm:$0xff] %v376_v23  ;;  %v418_v44 = vld [vmem:[%s1682_s5 + $0x280] sm:$0xff]  ;;  %v420_v45 = vld [vmem:[%s1682_s5 + $0x290] sm:$0xff] }
  0x4a   : > { %379 = vst [vmem:[%s1687_s6 + $0xa0] sm:$0xff] %v378_v24  ;;  %v422_v46 = vld [vmem:[%s1682_s5 + $0x2a0] sm:$0xff]  ;;  %v424_v47 = vld [vmem:[%s1682_s5 + $0x2b0] sm:$0xff] }
  0x4b   : > { %381 = vst [vmem:[%s1687_s6 + $0xa8] sm:$0xff] %v380_v25  ;;  %v426_v48 = vld [vmem:[%s1682_s5 + $0x2c0] sm:$0xff]  ;;  %v428_v49 = vld [vmem:[%s1682_s5 + $0x2d0] sm:$0xff] }
  0x4c   : > { %383 = vst [vmem:[%s1687_s6 + $0xb0] sm:$0xff] %v382_v26  ;;  %v430_v50 = vld [vmem:[%s1682_s5 + $0x2e0] sm:$0xff]  ;;  %v432_v51 = vld [vmem:[%s1682_s5 + $0x2f0] sm:$0xff] }
  0x4d   : > { %385 = vst [vmem:[%s1687_s6 + $0xb8] sm:$0xff] %v384_v27 }
  0x4e   : > { %387 = vst [vmem:[%s1687_s6 + $0xc0] sm:$0xff] %v386_v28 }
  0x4f   : > { %389 = vst [vmem:[%s1687_s6 + $0xc8] sm:$0xff] %v388_v29 }
  0x50   : > { %391 = vst [vmem:[%s1687_s6 + $0xd0] sm:$0xff] %v390_v30 }
  0x51   : > { %393 = vst [vmem:[%s1687_s6 + $0xd8] sm:$0xff] %v392_v31 }
  0x52   : > { %395 = vst [vmem:[%s1687_s6 + $0xe0] sm:$0xff] %v394_v32 }
  0x53   : > { %397 = vst [vmem:[%s1687_s6 + $0xe8] sm:$0xff] %v396_v33 }
  0x54   : > { %399 = vst [vmem:[%s1687_s6 + $0xf0] sm:$0xff] %v398_v34 }
  0x55   : > { %401 = vst [vmem:[%s1687_s6 + $0xf8] sm:$0xff] %v400_v35 }
  0x56   : > { %403 = vst [vmem:[%s1687_s6 + $0x100] sm:$0xff] %v402_v36 }
  0x57   : > { %405 = vst [vmem:[%s1687_s6 + $0x108] sm:$0xff] %v404_v37 }
  0x58   : > { %407 = vst [vmem:[%s1687_s6 + $0x110] sm:$0xff] %v406_v38 }
  0x59   : > { %409 = vst [vmem:[%s1687_s6 + $0x118] sm:$0xff] %v408_v39 }
  0x5a   : > { %411 = vst [vmem:[%s1687_s6 + $0x120] sm:$0xff] %v410_v40 }
  0x5b   : > { %413 = vst [vmem:[%s1687_s6 + $0x128] sm:$0xff] %v412_v41 }
  0x5c   : > { %415 = vst [vmem:[%s1687_s6 + $0x130] sm:$0xff] %v414_v42 }
  0x5d   : > { %417 = vst [vmem:[%s1687_s6 + $0x138] sm:$0xff] %v416_v43 }
  0x5e   : > { %419 = vst [vmem:[%s1687_s6 + $0x140] sm:$0xff] %v418_v44 }
  0x5f   : > { %421 = vst [vmem:[%s1687_s6 + $0x148] sm:$0xff] %v420_v45 }
  0x60   : > { %423 = vst [vmem:[%s1687_s6 + $0x150] sm:$0xff] %v422_v46 }
  0x61   : > { %425 = vst [vmem:[%s1687_s6 + $0x158] sm:$0xff] %v424_v47 }
  0x62   : > { %427 = vst [vmem:[%s1687_s6 + $0x160] sm:$0xff] %v426_v48 }
  0x63   : > { %429 = vst [vmem:[%s1687_s6 + $0x168] sm:$0xff] %v428_v49 }
  0x64   : > { %431 = vst [vmem:[%s1687_s6 + $0x170] sm:$0xff] %v430_v50 }
  0x65   : > { %433 = vst [vmem:[%s1687_s6 + $0x178] sm:$0xff] %v432_v51 }
  0x66 PF: > { %p1098_p0 = scmp.ge.s32.totalorder %s1545_s22, 1  ;;  %p446_p1 = scmp.lt.s32.totalorder %s1545_s22, 13 }
  0x68   : > { %p447_p2 = pnand %p1098_p0, %p446_p1 }
  0x69   : > { %s453_s0 = sand.u32 (!%p447_p2), 1, %s1521_s16   ;;  %s460_s23 = sand.u32 (!%p447_p2), 1, %s1513_s14  }
  0x6a   : > { %450 = sbr.rel (%p447_p2) target bundleno = 350 (0x15e), region = 88  ;;  %s487_s7 = sand.u32 (!%p447_p2), 1, %s1505_s12  }
  0x6b   : > { %s1368_s28 = smul.u32 (!%p447_p2), 24, %s453_s0  ;;  %s1099_s26 = sshll.u32 (!%p447_p2), %s487_s7, 5 }
  0x6c   : > { %s1369_s11 = smul.u32 (!%p447_p2), 384, %s460_s23  ;;  %s1100_s29 = sshll.u32 (!%p447_p2), %s1533_s19, 1 }
  0x6d   : > { %p495_p3 = scmp.lt.s32.totalorder (!%p447_p2), %s1100_s29, 3  ;;  %s1794_s6 = scalar_lea.vmem (!%p447_p2), [#allocation3], %s1368_s28 }
  0x6e   : > { %s1796_s1 = scalar_lea.vmem (!%p447_p2), [#allocation4], %s1369_s11  ;;  %s1798_s25 = scalar_lea.vmem (!%p447_p2), [#allocation5], %s1099_s26 }
  0x6f   : > { %s1995_s29 = smov (!%p495_p3, %s1100_s29), 3  ;;  %p1101_p4 = scmp.ne.s32.totalorder %s1529_s18, 0 }
  0x70   : > { %s497_s5 = scalar_lea.vmem %s1966_s2, %s1995_s29 }
  0x71   : > { %504 = sbr.rel (%p1101_p4) target bundleno = 123 (0x7b), region = 100 }
  0x76   : > { %v1547_v52 = vmov 0.0  }
  0x77   : > { %505 = vst [vmem:[#allocation2 + $0x10] sm:$0xff] %v1547_v52 }
  0x78   : > { %506 = vst [vmem:[#allocation2] sm:$0xff] %v1547_v52 }
  0x79   : > { %507 = vst [vmem:[#allocation2 + $0x18] sm:$0xff] %v1547_v52 }
  0x7a   : > { %508 = vst [vmem:[#allocation2 + $0x8] sm:$0xff] %v1547_v52 }
  0x7b PF: > { %v1172_v53 = vld [vmem:[%s1796_s1 + $0x70] sm:$0xf]  ;;  %v1332_v54 = vld [vmem:[%s1796_s1 + $0x74] sm:$0xf0]  ;;  %v1164_v62 = vld [vmem:[%s1796_s1 + $0x60] sm:$0xf] }
  0x7c   : > { %v1236_v55 = vld [vmem:[%s1796_s1 + $0xf0] sm:$0xf]  ;;  %v1173_v56 = vor.u32 %v1332_v54, %v1172_v53  ;;  %v1348_v57 = vld [vmem:[%s1796_s1 + $0xf4] sm:$0xf0]  ;;  %v1330_v63 = vld [vmem:[%s1796_s1 + $0x64] sm:$0xf0] }
  0x7d   : > { %v1300_v58 = vld [vmem:[%s1796_s1 + $0x170] sm:$0xf]  ;;  %v1364_v59 = vld [vmem:[%s1796_s1 + $0x174] sm:$0xf0]  ;;  %v1237_v60 = vor.u32 %v1348_v57, %v1236_v55  ;;  %v1228_v0 = vld [vmem:[%s1796_s1 + $0xe0] sm:$0xf]  ;;  %v1165_v1 = vor.u32 %v1330_v63, %v1164_v62 }
  0x7e   : > { %v1301_v61 = vor.u32 %v1364_v59, %v1300_v58  ;;  %821 = vmatpush.bf16.msra.mxu0 %v1173_v56  ;;  %v1346_v2 = vld [vmem:[%s1796_s1 + $0xe4] sm:$0xf0]  ;;  %v1292_v3 = vld [vmem:[%s1796_s1 + $0x160] sm:$0xf]  ;;  %v1156_v7 = vld [vmem:[%s1796_s1 + $0x50] sm:$0xf] }
  0x7f   : > { %v1362_v4 = vld [vmem:[%s1796_s1 + $0x164] sm:$0xf0]  ;;  %835 = vmatpush.bf16.msra.mxu1 %v1237_v60  ;;  %v1229_v5 = vor.u32 %v1346_v2, %v1228_v0  ;;  %v1328_v8 = vld [vmem:[%s1796_s1 + $0x54] sm:$0xf0]  ;;  %v1220_v9 = vld [vmem:[%s1796_s1 + $0xd0] sm:$0xf] }
  0x80   : > { %849 = vmatpush.bf16.msra.mxu2 %v1301_v61  ;;  %v1293_v6 = vor.u32 %v1362_v4, %v1292_v3  ;;  %v1344_v10 = vld [vmem:[%s1796_s1 + $0xd4] sm:$0xf0]  ;;  %v1284_v11 = vld [vmem:[%s1796_s1 + $0x150] sm:$0xf]  ;;  %v1157_v13 = vor.u32 %v1328_v8, %v1156_v7  ;;  %v1148_v14 = vld [vmem:[%s1796_s1 + $0x40] sm:$0xf] }
  0x81   : > { %v1360_v12 = vld [vmem:[%s1796_s1 + $0x154] sm:$0xf0]  ;;  %v1326_v15 = vld [vmem:[%s1796_s1 + $0x44] sm:$0xf0]  ;;  %v1221_v16 = vor.u32 %v1344_v10, %v1220_v9  ;;  %v1212_v18 = vld [vmem:[%s1796_s1 + $0xc0] sm:$0xf] }
  0x82   : > { %822 = vmatpush.bf16.msra.mxu0 %v1165_v1  ;;  %v1285_v17 = vor.u32 %v1360_v12, %v1284_v11  ;;  %v1331_v19 = vld [vmem:[%s1796_s1 + $0x74] sm:$0xf]  ;;  %v1174_v20 = vld [vmem:[%s1796_s1 + $0x78] sm:$0xf0]  ;;  %v1342_v21 = vld [vmem:[%s1796_s1 + $0xc4] sm:$0xf0]  ;;  %v1149_v26 = vor.u32 %v1326_v15, %v1148_v14 }
  0x83   : > { %836 = vmatpush.bf16.msra.mxu1 %v1229_v5  ;;  %v1276_v22 = vld [vmem:[%s1796_s1 + $0x140] sm:$0xf]  ;;  %v1358_v23 = vld [vmem:[%s1796_s1 + $0x144] sm:$0xf0]  ;;  %v1177_v24 = vor.u32 %v1331_v19, %v1174_v20  ;;  %v1329_v25 = vld [vmem:[%s1796_s1 + $0x64] sm:$0xf]  ;;  %v1213_v30 = vor.u32 %v1342_v21, %v1212_v18 }
  0x84   : > { %850 = vmatpush.bf16.msra.mxu2 %v1293_v6  ;;  %v1140_v27 = vld [vmem:[%s1796_s1 + $0x30] sm:$0xf]  ;;  %v1324_v28 = vld [vmem:[%s1796_s1 + $0x34] sm:$0xf0]  ;;  %v1166_v29 = vld [vmem:[%s1796_s1 + $0x68] sm:$0xf0]  ;;  %v1277_v31 = vor.u32 %v1358_v23, %v1276_v22 }
  0x85   : > { %863 = vmatpush.bf16.msra.mxu3 %v1177_v24  ;;  %v1204_v32 = vld [vmem:[%s1796_s1 + $0xb0] sm:$0xf]  ;;  %v1340_v33 = vld [vmem:[%s1796_s1 + $0xb4] sm:$0xf0]  ;;  %v1169_v35 = vor.u32 %v1329_v25, %v1166_v29  ;;  %v1327_v37 = vld [vmem:[%s1796_s1 + $0x54] sm:$0xf]  ;;  %v1141_v39 = vor.u32 %v1324_v28, %v1140_v27 }
  0x86   : > { %823 = vmatpush.bf16.msra.mxu0 %v1157_v13  ;;  %v1268_v34 = vld [vmem:[%s1796_s1 + $0x130] sm:$0xf]  ;;  %v1356_v36 = vld [vmem:[%s1796_s1 + $0x134] sm:$0xf0]  ;;  %v1158_v38 = vld [vmem:[%s1796_s1 + $0x58] sm:$0xf0]  ;;  %v1205_v43 = vor.u32 %v1340_v33, %v1204_v32 }
  0x87   : > { %837 = vmatpush.bf16.msra.mxu1 %v1221_v16  ;;  %v1132_v40 = vld [vmem:[%s1796_s1 + $0x20] sm:$0xf]  ;;  %v1322_v41 = vld [vmem:[%s1796_s1 + $0x24] sm:$0xf0]  ;;  %v1161_v42 = vor.u32 %v1327_v37, %v1158_v38  ;;  %v1269_v44 = vor.u32 %v1356_v36, %v1268_v34  ;;  %v1325_v46 = vld [vmem:[%s1796_s1 + $0x44] sm:$0xf] }
  0x88   : > { %851 = vmatpush.bf16.msra.mxu2 %v1285_v17  ;;  %v1196_v45 = vld [vmem:[%s1796_s1 + $0xa0] sm:$0xf]  ;;  %v1150_v47 = vld [vmem:[%s1796_s1 + $0x48] sm:$0xf0]  ;;  %v1338_v48 = vld [vmem:[%s1796_s1 + $0xa4] sm:$0xf0]  ;;  %v1133_v51 = vor.u32 %v1322_v41, %v1132_v40 }
  0x89   : > { %864 = vmatpush.bf16.msra.mxu3 %v1169_v35  ;;  %v1260_v49 = vld [vmem:[%s1796_s1 + $0x120] sm:$0xf]  ;;  %v1354_v50 = vld [vmem:[%s1796_s1 + $0x124] sm:$0xf0]  ;;  %v1124_v52 = vld [vmem:[%s1796_s1 + $0x10] sm:$0xf]  ;;  %v1153_v54 = vor.u32 %v1325_v46, %v1150_v47  ;;  %v1197_v55 = vor.u32 %v1338_v48, %v1196_v45 }
  0x8a   : > { %824 = vmatpush.bf16.msra.mxu0 %v1149_v26  ;;  %v1320_v53 = vld [vmem:[%s1796_s1 + $0x14] sm:$0xf0]  ;;  %v1261_v56 = vor.u32 %v1354_v50, %v1260_v49  ;;  %v1188_v57 = vld [vmem:[%s1796_s1 + $0x90] sm:$0xf]  ;;  %v1323_v58 = vld [vmem:[%s1796_s1 + $0x34] sm:$0xf] }
  0x8b   : > { %838 = vmatpush.bf16.msra.mxu1 %v1213_v30  ;;  %v1142_v59 = vld [vmem:[%s1796_s1 + $0x38] sm:$0xf0]  ;;  %v1336_v60 = vld [vmem:[%s1796_s1 + $0x94] sm:$0xf0]  ;;  %v1252_v61 = vld [vmem:[%s1796_s1 + $0x110] sm:$0xf]  ;;  %v1125_v63 = vor.u32 %v1320_v53, %v1124_v52 }
  0x8c   : > { %852 = vmatpush.bf16.msra.mxu2 %v1277_v31  ;;  %v1352_v62 = vld [vmem:[%s1796_s1 + $0x114] sm:$0xf0]  ;;  %v1116_v0 = vld [vmem:[%s1796_s1] sm:$0xf]  ;;  %v1318_v1 = vld [vmem:[%s1796_s1 + $0x4] sm:$0xf0]  ;;  %v1145_v3 = vor.u32 %v1323_v58, %v1142_v59  ;;  %v1189_v4 = vor.u32 %v1336_v60, %v1188_v57 }
  0x8d   : > { %865 = vmatpush.bf16.msra.mxu3 %v1161_v42  ;;  %v1180_v2 = vld [vmem:[%s1796_s1 + $0x80] sm:$0xf]  ;;  %v1253_v5 = vor.u32 %v1352_v62, %v1252_v61  ;;  %v1334_v6 = vld [vmem:[%s1796_s1 + $0x84] sm:$0xf0]  ;;  %v1321_v7 = vld [vmem:[%s1796_s1 + $0x24] sm:$0xf]  ;;  %v1117_v15 = vor.u32 %v1318_v1, %v1116_v0 }
  0x8e   : > { %825 = vmatpush.bf16.msra.mxu0 %v1141_v39  ;;  %v1134_v8 = vld [vmem:[%s1796_s1 + $0x28] sm:$0xf0]  ;;  %v1244_v9 = vld [vmem:[%s1796_s1 + $0x100] sm:$0xf]  ;;  %v1350_v10 = vld [vmem:[%s1796_s1 + $0x104] sm:$0xf0]  ;;  %v1181_v20 = vor.u32 %v1334_v6, %v1180_v2 }
  0x8f   : > { %839 = vmatpush.bf16.msra.mxu1 %v1205_v43  ;;  %v1347_v11 = vld [vmem:[%s1796_s1 + $0xf4] sm:$0xf]  ;;  %v1238_v12 = vld [vmem:[%s1796_s1 + $0xf8] sm:$0xf0]  ;;  %v1112_v16 = vld [vmem:[%s1794_s6 + $0x8] sm:$0xf]  ;;  %v1137_v17 = vor.u32 %v1321_v7, %v1134_v8  ;;  %v1245_v21 = vor.u32 %v1350_v10, %v1244_v9 }
  0x90   : > { %853 = vmatpush.bf16.msra.mxu2 %v1269_v44  ;;  %v1363_v13 = vld [vmem:[%s1796_s1 + $0x174] sm:$0xf]  ;;  %v1302_v14 = vld [vmem:[%s1796_s1 + $0x178] sm:$0xf0]  ;;  %v1104_v18 = vld [vmem:[%s1794_s6] sm:$0xf]  ;;  %v1241_v25 = vor.u32 %v1347_v11, %v1238_v12 }
  0x91   : > { %866 = vmatpush.bf16.msra.mxu3 %v1153_v54  ;;  %v1315_v19 = vld [vmem:[%s1794_s6 + $0x8] sm:$0xf0]  ;;  %v1316_v22 = vld [vmem:[%s1794_s6 + $0x10] sm:$0xf0]  ;;  %v1314_v23 = vld [vmem:[%s1794_s6 + $0x4] sm:$0xf]  ;;  %v1305_v26 = vor.u32 %v1363_v13, %v1302_v14 }
  0x92   : > { %826 = vmatpush.bf16.msra.mxu0 %v1133_v51  ;;  %v1106_v24 = vld [vmem:[%s1794_s6 + $0xc] sm:$0xf0]  ;;  %v1345_v27 = vld [vmem:[%s1796_s1 + $0xe4] sm:$0xf]  ;;  %v1319_v28 = vld [vmem:[%s1796_s1 + $0x14] sm:$0xf]  ;;  %v1105_v33 = vor.u32 %v1315_v19, %v1104_v18  ;;  %v1877_v34 = vor.u32 %v1316_v22, %v1112_v16 }
  0x93   : > { %840 = vmatpush.bf16.msra.mxu1 %v1197_v55  ;;  %v1126_v29 = vld [vmem:[%s1796_s1 + $0x18] sm:$0xf0]  ;;  %v1230_v30 = vld [vmem:[%s1796_s1 + $0xe8] sm:$0xf0]  ;;  %v1361_v31 = vld [vmem:[%s1796_s1 + $0x164] sm:$0xf]  ;;  %v1879_v35 = vor.u32 %v1314_v23, %v1106_v24 }
  0x94   : > { %854 = vmatpush.bf16.msra.mxu2 %v1261_v56  ;;  %v1294_v32 = vld [vmem:[%s1796_s1 + $0x168] sm:$0xf0]  ;;  %v1129_v36 = vor.u32 %v1319_v28, %v1126_v29  ;;  %v1233_v37 = vor.u32 %v1345_v27, %v1230_v30  ;;  %v1343_v39 = vld [vmem:[%s1796_s1 + $0xd4] sm:$0xf]  ;;  %v1317_v40 = vld [vmem:[%s1796_s1 + $0x4] sm:$0xf] }
  0x95   : > { %867 = vmatpush.bf16.msra.mxu3 %v1145_v3  ;;  %v1297_v38 = vor.u32 %v1361_v31, %v1294_v32  ;;  %v1118_v41 = vld [vmem:[%s1796_s1 + $0x8] sm:$0xf0]  ;;  %v1222_v42 = vld [vmem:[%s1796_s1 + $0xd8] sm:$0xf0]  ;;  %v1359_v43 = vld [vmem:[%s1796_s1 + $0x154] sm:$0xf] }
  0x96   : > { %827 = vmatpush.bf16.msra.mxu0 %v1125_v63  ;;  %v1286_v44 = vld [vmem:[%s1796_s1 + $0x158] sm:$0xf0]  ;;  %v1121_v45 = vor.u32 %v1317_v40, %v1118_v41  ;;  %v1225_v46 = vor.u32 %v1343_v39, %v1222_v42  ;;  %v1341_v48 = vld [vmem:[%s1796_s1 + $0xc4] sm:$0xf]  ;;  %v1214_v49 = vld [vmem:[%s1796_s1 + $0xc8] sm:$0xf0] }
  0x97   : > { %841 = vmatpush.bf16.msra.mxu1 %v1189_v4  ;;  %v1289_v47 = vor.u32 %v1359_v43, %v1286_v44  ;;  %v1357_v50 = vld [vmem:[%s1796_s1 + $0x144] sm:$0xf]  ;;  %v1278_v51 = vld [vmem:[%s1796_s1 + $0x148] sm:$0xf0]  ;;  %v1217_v52 = vor.u32 %v1341_v48, %v1214_v49  ;;  %v1339_v54 = vld [vmem:[%s1796_s1 + $0xb4] sm:$0xf] }
  0x98   : > { %855 = vmatpush.bf16.msra.mxu2 %v1253_v5  ;;  %v1281_v53 = vor.u32 %v1357_v50, %v1278_v51  ;;  %v1206_v55 = vld [vmem:[%s1796_s1 + $0xb8] sm:$0xf0]  ;;  %v1355_v56 = vld [vmem:[%s1796_s1 + $0x134] sm:$0xf]  ;;  %v1337_v60 = vld [vmem:[%s1796_s1 + $0xa4] sm:$0xf] }
  0x99   : > { %868 = vmatpush.bf16.msra.mxu3 %v1137_v17  ;;  %v1270_v57 = vld [vmem:[%s1796_s1 + $0x138] sm:$0xf0]  ;;  %v1209_v58 = vor.u32 %v1339_v54, %v1206_v55  ;;  %v1198_v61 = vld [vmem:[%s1796_s1 + $0xa8] sm:$0xf0]  ;;  %v1353_v62 = vld [vmem:[%s1796_s1 + $0x124] sm:$0xf] }
  0x9a   : > { %828 = vmatpush.bf16.msra.mxu0 %v1117_v15  ;;  %v1273_v59 = vor.u32 %v1355_v56, %v1270_v57  ;;  %v1262_v63 = vld [vmem:[%s1796_s1 + $0x128] sm:$0xf0]  ;;  %v1201_v0 = vor.u32 %v1337_v60, %v1198_v61  ;;  %v1335_v2 = vld [vmem:[%s1796_s1 + $0x94] sm:$0xf]  ;;  %v1190_v3 = vld [vmem:[%s1796_s1 + $0x98] sm:$0xf0] }
  0x9b   : > { %842 = vmatpush.bf16.msra.mxu1 %v1181_v20  ;;  %v1265_v1 = vor.u32 %v1353_v62, %v1262_v63  ;;  %v1351_v4 = vld [vmem:[%s1796_s1 + $0x114] sm:$0xf]  ;;  %v1254_v5 = vld [vmem:[%s1796_s1 + $0x118] sm:$0xf0]  ;;  %v1193_v6 = vor.u32 %v1335_v2, %v1190_v3  ;;  %v1333_v8 = vld [vmem:[%s1796_s1 + $0x84] sm:$0xf] }
  0x9c   : > { %856 = vmatpush.bf16.msra.mxu2 %v1245_v21  ;;  %v1257_v7 = vor.u32 %v1351_v4, %v1254_v5  ;;  %v1182_v9 = vld [vmem:[%s1796_s1 + $0x88] sm:$0xf0]  ;;  %v1349_v10 = vld [vmem:[%s1796_s1 + $0x104] sm:$0xf]  ;;  %v510_v32 = vld [vmem:[#allocation2] sm:$0xff]  ;;  %p1306_p5 = scmp.ne.s32.totalorder %s1529_s18, 5 }
  0x9d   : > { %829 = vmatmul.bf16.vlgmr.msra.gmra.mxu0 %v1105_v33  ;;  %869 = vmatpush.bf16.msra.mxu3 %v1129_v36  ;;  %v1246_v11 = vld [vmem:[%s1796_s1 + $0x108] sm:$0xf0]  ;;  %v1185_v12 = vor.u32 %v1333_v8, %v1182_v9  ;;  %v509_v17 = vld [vmem:[#allocation2 + $0x10] sm:$0xff] }
  0x9e   : > { %877 = vmatpush.bf16.msrb.mxu0 %v1241_v25  ;;  %843 = vmatmul.bf16.vlgmr.msra.gmra.mxu1 %v1879_v35  ;;  %v1249_v13 = vor.u32 %v1349_v10, %v1246_v11  ;;  %v511_v24 = vld [vmem:[#allocation2 + $0x18] sm:$0xff] }
  0x9f   : > { %891 = vmatpush.bf16.msrb.mxu1 %v1305_v26  ;;  %857 = vmatmul.bf16.vlgmr.msra.gmra.mxu2 %v1877_v34 }
  0xa1   : > { %870 = vmatpush.bf16.msra.mxu3 %v1121_v45 }
  0xa2   : > { %878 = vmatpush.bf16.msrb.mxu0 %v1233_v37 }
  0xa3   : > { %892 = vmatpush.bf16.msrb.mxu1 %v1297_v38  ;;  %v512_v38 = vld [vmem:[#allocation2 + $0x8] sm:$0xff] }
  0xa4   : > { %871 = vmatmul.bf16.vlgmr.msra.gmra.mxu3 %v1105_v33 }
  0xa6   : > { %879 = vmatpush.bf16.msrb.mxu0 %v1225_v46 }
  0xa7   : > { %893 = vmatpush.bf16.msrb.mxu1 %v1289_v47 }
  0xaa   : > { %880 = vmatpush.bf16.msrb.mxu0 %v1217_v52 }
  0xab   : > { %894 = vmatpush.bf16.msrb.mxu1 %v1281_v53 }
  0xae   : > { %881 = vmatpush.bf16.msrb.mxu0 %v1209_v58 }
  0xaf   : > { %895 = vmatpush.bf16.msrb.mxu1 %v1273_v59 }
  0xb2   : > { %882 = vmatpush.bf16.msrb.mxu0 %v1201_v0 }
  0xb3   : > { %896 = vmatpush.bf16.msrb.mxu1 %v1265_v1 }
  0xb6   : > { %883 = vmatpush.bf16.msrb.mxu0 %v1193_v6 }
  0xb7   : > { %897 = vmatpush.bf16.msrb.mxu1 %v1257_v7 }
  0xba   : > { %884 = vmatpush.bf16.msrb.mxu0 %v1185_v12 }
  0xbb   : > { %898 = vmatpush.bf16.msrb.mxu1 %v1249_v13 }
  0xbd   : > { %885 = vmatmul.bf16.vlgmr.msrb.gmra.mxu0 %v1879_v35 }
  0xbe   : > { %899 = vmatmul.bf16.vlgmr.msrb.gmra.mxu1 %v1877_v34 }
 0x11a   : > { %v830_v14 = vpop.f32.mrf.mxu0 }
 0x11b   : > { %v844_v15 = vpop.f32.mrf.mxu1 }
 0x11c   : > { %v845_v16 = vadd.f32 %v844_v15, %v830_v14 }
 0x122   : > { %v858_v18 = vpop.f32.mrf.mxu2  ;;  %v832_v20 = vpop.f32.mrf.mxu0 }
 0x123   : > { %v859_v19 = vadd.f32 %v858_v18, %v845_v16  ;;  %v846_v21 = vpop.f32.mrf.mxu1 }
 0x124   : > { %v847_v23 = vadd.f32 %v846_v21, %v832_v20 }
 0x125   : > { %v905_v22 = vadd.f32 %v859_v19, %v509_v17 }
 0x127   : > { %909 = vst [vmem:[#allocation2 + $0x10] sm:$0xff] %v905_v22  ;;  %v872_v28 = vpop.f32.mrf.mxu3 }
 0x12a   : > { %v860_v25 = vpop.f32.mrf.mxu2 }
 0x12b   : > { %v861_v26 = vadd.f32 %v860_v25, %v847_v23 }
 0x12d   : > { %v907_v27 = vadd.f32 %v861_v26, %v511_v24 }
 0x12f   : > { %911 = vst [vmem:[#allocation2 + $0x18] sm:$0xff] %v907_v27  ;;  %v874_v35 = vpop.f32.mrf.mxu3 }
 0x13a   : > { %v886_v29 = vpop.f32.mrf.mxu0 }
 0x13b   : > { %v900_v30 = vpop.f32.mrf.mxu1  ;;  %v887_v31 = vadd.f32 %v886_v29, %v872_v28 }
 0x13d   : > { %v901_v33 = vadd.f32 %v900_v30, %v887_v31 }
 0x13f   : > { %v906_v34 = vadd.f32 %v901_v33, %v510_v32 }
 0x141   : > { %910 = vst [vmem:[#allocation2] sm:$0xff] %v906_v34 }
 0x142   : > { %v888_v36 = vpop.f32.mrf.mxu0 }
 0x143   : > { %v889_v37 = vadd.f32 %v888_v36, %v874_v35  ;;  %v902_v39 = vpop.f32.mrf.mxu1 }
 0x145   : > { %v903_v40 = vadd.f32 %v902_v39, %v889_v37  ;;  %916 = sbr.rel (%p1306_p5) target bundleno = 342 (0x156), region = 104 }
 0x147   : > { %v908_v41 = vadd.f32 %v903_v40, %v512_v38 }
 0x149   : > { %912 = vst [vmem:[#allocation2 + $0x8] sm:$0xff] %v908_v41 }
 0x14a   : > { %v917_v42 = vld [vmem:[#allocation2 + $0x10] sm:$0xff]  ;;  %v921_v43 = vld [vmem:[%s497_s5] sm:$0x3]  ;;  %v919_v47 = vld [vmem:[#allocation2 + $0x18] sm:$0xff] }
 0x14b   : > { %v918_v44 = vld [vmem:[#allocation2] sm:$0xff]  ;;  %v923_v45 = vperm.slane %v921_v43, 0  ;;  %v924_v46 = vperm.slane %v921_v43, 1 }
 0x14d   : > { %v927_v49 = vadd.f32 %v923_v45, %v917_v42  ;;  %v928_v50 = vadd.f32 %v924_v46, %v918_v44  ;;  %v929_v51 = vadd.f32 %v923_v45, %v919_v47 }
 0x14f   : > { %v931_v53 = vmax.f32 %v927_v49, 0.0  ;;  %v932_v54 = vmax.f32 %v928_v50, 0.0  ;;  %v933_v55 = vmax.f32 %v929_v51, 0.0 }
 0x150   : > { %v920_v48 = vld [vmem:[#allocation2 + $0x8] sm:$0xff] }
 0x151   : > { %v930_v52 = vadd.f32 %v924_v46, %v920_v48  ;;  %935 = vst [vmem:[%s1798_s25] sm:$0xff] %v931_v53 }
 0x152   : > { %936 = vst [vmem:[%s1798_s25 + $0x8] sm:$0xff] %v932_v54 }
 0x153   : > { %v934_v56 = vmax.f32 %v930_v52, 0.0  ;;  %937 = vst [vmem:[%s1798_s25 + $0x10] sm:$0xff] %v933_v55 }
 0x155   : > { %938 = vst [vmem:[%s1798_s25 + $0x18] sm:$0xff] %v934_v56 }
 0x156 PF: > { %945 = sbr.rel (!%p1662_p12) target bundleno = 350 (0x15e), region = 108  ;;  %s1365_s14 = sshll.u32 (%p1662_p12), %s1533_s19, 4 }
 0x157   : > { %s951_s0 = scalar_lea.vmem (%p1662_p12), %s1967_s3, %s1365_s14 }
 0x158   : > { %v964_v57 = vld [vmem:[%s1798_s25] sm:$0xff] (%p1662_p12) }
 0x159   : > { %v966_v58 = vld [vmem:[%s1798_s25 + $0x8] sm:$0xff] (%p1662_p12)  ;;  %965 = vst [vmem:[%s951_s0] sm:$0xff] (%p1662_p12), %v964_v57 }
 0x15a   : > { %v968_v59 = vld [vmem:[%s1798_s25 + $0x10] sm:$0xff] (%p1662_p12)  ;;  %967 = vst [vmem:[%s951_s0 + $0x8] sm:$0xff] (%p1662_p12), %v966_v58 }
 0x15b   : > { %969 = vst [vmem:[%s951_s0 + $0x20] sm:$0xff] %v968_v59 }
 0x15c   : > { %v970_v60 = vld [vmem:[%s1798_s25 + $0x18] sm:$0xff] }
 0x15d   : > { %971 = vst [vmem:[%s951_s0 + $0x28] sm:$0xff] %v970_v60 }
 0x15e PF: > { %s13_s22 = sadd.s32 1, %s1545_s22   ;;  %s1977_s10 = sld [smem:[#allocation6_spill]] }
 0x15f   : > { %p10_p6 = scmp.ge.s32.totalorder %s13_s22, 14   ;;  %s1978_s12 = smov %s1509_s13 }
 0x160   : > { %s1979_s13 = smov %s1660_s9  ;;  %s1980_s14 = smov %s1517_s15 }
 0x161   : > { %s1981_s15 = smov %s1657_s8  ;;  %s1982_s16 = smov %s1525_s17 }
 0x162   : > { %s1983_s17 = smov %s1643_s30  ;;  %s1984_s18 = smov %s1537_s20 }
 0x163   : > { %s1985_s19 = smov %s1541_s21  ;;  %s1986_s20 = smov %s1989_s24 }
 0x164   : > { %s1987_s21 = smov %s1977_s10  ;;  %12 = sbr.rel (!%p10_p6) target bundleno = 9 (0x9), region = 179 }

// kernel: _lambda_.54
= control target key start
LH: loop header
LB: loop body
LE: loop exit
PB: predicated region body
PF: predicated region fallthrough
CT: control target
= control target key end

     0   :  { %s2295_s0 = inlined_call_operand.vmem [shape: bf16[16,4608], index: 0, kind: input, shape index: {}]   ;;  %s2296_s1 = inlined_call_operand.vmem [shape: bf16[4608,512], index: 1, kind: input, shape index: {}]   ;;  %s2297_s2 = inlined_call_operand.vmem [shape: f32[1,512], index: 2, kind: input, shape index: {}]   ;;  %s2298_s3 = inlined_call_operand.vmem [shape: f32[16,512], index: 3, kind: output, shape index: {}]  }
   0x1   :  { %2300 = sst [smem:[#allocation7_spill]] %s2295_s0 }
   0x2   :  { %2301 = sst [smem:[#allocation8_spill]] %s2296_s1 }
   0x3   :  { %s1825_s12 = smov 0   ;;  %s1827_s13 = smov 0  }
   0x4   :  { %s1829_s14 = smov 0   ;;  %s1831_s15 = smov 0  }
   0x5   :  { %s1833_s16 = smov 0   ;;  %s1835_s17 = smov 0  }
   0x6   :  { %s1837_s18 = smov 0   ;;  %s1839_s19 = smov 0  }
   0x7   :  { %s1841_s20 = smov 0   ;;  %s1843_s21 = smov 0  }
   0x8   :  { %s1845_s22 = smov 0  }
   0x9 LB: > { %s1260_s23 = sadd.s32 4294967295, %s1802_s22   ;;  %s25_s24 = sadd.s32 1, %s1794_s20  ;;  %s1802_s22 = sphi %s1845_s22, %s13_s22   ;;  %s1798_s21 = sphi %s1843_s21, %s2318_s21   ;;  %s1794_s20 = sphi %s1841_s20, %s2317_s20   ;;  %s1790_s19 = sphi %s1839_s19, %s2316_s19   ;;  %s1786_s18 = sphi %s1837_s18, %s2315_s18   ;;  %s1782_s17 = sphi %s1835_s17, %s2314_s17   ;;  %s1778_s16 = sphi %s1833_s16, %s2313_s16   ;;  %s1774_s15 = sphi %s1831_s15, %s2312_s15   ;;  %s1770_s14 = sphi %s1829_s14, %s2311_s14   ;;  %s1766_s13 = sphi %s1827_s13, %s2310_s13   ;;  %s1762_s12 = sphi %s1825_s12, %s2309_s12  }
   0xa   : > { %p26_p0 = scmp.ge.s32.totalorder %s25_s24, 9  ;;  %s28_s25 = sadd.s32 1, %s1798_s21 }
   0xb   : > { %s41_s26 = sadd.s32 1, %s1782_s17  ;;  %p48_p1 = scmp.ne.s32.totalorder %s1782_s17, %s1778_s16 }
   0xc   : > { %s2320_s24 = smov (%p26_p0, %s25_s24), 0  ;;  %s2322_s25 = smov (!%p26_p0, %s28_s25), %s1798_s21 }
   0xd   : > { %s37_s27 = ssub.s32 %s1794_s20, %s2320_s24  ;;  %p49_p2 = scmp.eq.s32.totalorder %s1802_s22, 0 }
   0xe   : > { %p30_p3 = scmp.ge.s32.totalorder %s2322_s25, 2  ;;  %p39_p4 = scmp.eq.s32.totalorder %s37_s27, 0 }
   0xf   : > { %p1892_p5 = por %p49_p2, %p48_p1  ;;  %s69_s29 = sadd.s32 1, %s1774_s15 }
  0x10   : > { %s2324_s25 = smov (%p30_p3, %s2322_s25), 0  ;;  %p76_p6 = scmp.ne.s32.totalorder %s1774_s15, %s1770_s14 }
  0x11   : > { %2303 = sst [smem:[#allocation6_spill]] %s2324_s25  ;;  %s65_s4 = ssub.s32 %s1798_s21, %s2324_s25 }
  0x12   : > { %s1900_s30 = scalar_select %p39_p4, %s1782_s17, %s41_s26  }
  0x13   : > { %s66_s5 = sor.u32 %s65_s4, %s37_s27  ;;  %p121_p7 = scmp.eq.s32.totalorder %s65_s4, 0 }
  0x14   : > { %p67_p8 = scmp.eq.s32.totalorder %s66_s5, 0  ;;  %p1906_p9 = por %p76_p6, %p49_p2 }
  0x15   : > { %s123_s7 = sadd.s32 1, %s1766_s13  ;;  %p133_p10 = scmp.ne.s32.totalorder %s1766_s13, %s1762_s12 }
  0x16   : > { %s1914_s8 = scalar_select %p67_p8, %s1774_s15, %s69_s29  }
  0x17   : > { %s1917_s9 = scalar_select %p121_p7, %s1766_s13, %s123_s7  }
  0x18   : > { %p134_p11 = scmp.eq.s32.totalorder %s1260_s23, 17  ;;  %p1263_p13 = scmp.ge.s32.totalorder %s1802_s22, 18 }
  0x1a   : > { %p1919_p12 = por %p134_p11, %p133_p10  ;;  %156 = sbr.rel (%p1263_p13) target bundleno = 119 (0x77), region = 16 }
  0x1f   : > { %159 = sbr.rel (!%p1892_p5) target bundleno = 45 (0x2d), region = 20  ;;  %s161_s11 = sand.u32 (%p1892_p5), 1, %s1782_s17  }
  0x20   : > { %s1556_s26 = sshll.u32 (%p1892_p5), %s1794_s20, 4  ;;  %s1264_s27 = sshll.u32 (%p1892_p5), %s161_s11, 5 }
  0x21   : > { %s2306_s0 = sld [smem:[#allocation7_spill]] (%p1892_p5)  ;;  %s163_s23 = scalar_lea.vmem (%p1892_p5), [#allocation3], %s1264_s27 }
  0x27   : > { %s169_s5 = scalar_lea.vmem %s2306_s0, %s1556_s26 }
  0x28   : > { %v182_v0 = vld [vmem:[%s169_s5] sm:$0xff]  ;;  %v184_v1 = vld [vmem:[%s169_s5 + $0x8] sm:$0xff]  ;;  %v186_v2 = vld [vmem:[%s169_s5 + $0x90] sm:$0xff] }
  0x29   : > { %183 = vst [vmem:[%s163_s23] sm:$0xff] %v182_v0  ;;  %v188_v3 = vld [vmem:[%s169_s5 + $0x98] sm:$0xff] }
  0x2a   : > { %185 = vst [vmem:[%s163_s23 + $0x8] sm:$0xff] %v184_v1 }
  0x2b   : > { %187 = vst [vmem:[%s163_s23 + $0x10] sm:$0xff] %v186_v2 }
  0x2c   : > { %189 = vst [vmem:[%s163_s23 + $0x18] sm:$0xff] %v188_v3 }
  0x2d PF: > { %195 = sbr.rel (!%p1906_p9) target bundleno = 119 (0x77), region = 43  ;;  %s197_s28 = sand.u32 (%p1906_p9), 1, %s1774_s15  }
  0x2e   : > { %s1269_s7 = sshll.u32 (%p1906_p9), %s1798_s21, 1  ;;  %s1267_s11 = sshll.u32 (%p1906_p9), %s197_s28, 9 }
  0x2f   : > { %s1557_s26 = sshll.u32 (%p1906_p9), %s1794_s20, 8  ;;  %s2307_s1 = sld [smem:[#allocation8_spill]] (%p1906_p9) }
  0x30   : > { %s203_s29 = sadd.s32 (%p1906_p9), %s1557_s26, %s1269_s7  ;;  %s1944_s6 = scalar_lea.vmem (%p1906_p9), [#allocation4], %s1267_s11 }
  0x31   : > { %s1271_s4 = sshll.u32 (%p1906_p9), %s203_s29, 2 }
  0x35   : > { %s1939_s5 = scalar_lea.vmem %s2307_s1, %s1271_s4 }
  0x36   : > { %v360_v4 = vld [vmem:[%s1939_s5] sm:$0xff]  ;;  %v362_v5 = vld [vmem:[%s1939_s5 + $0x10] sm:$0xff] }
  0x37   : > { %v364_v6 = vld [vmem:[%s1939_s5 + $0x20] sm:$0xff]  ;;  %361 = vst [vmem:[%s1944_s6] sm:$0xff] %v360_v4  ;;  %v366_v7 = vld [vmem:[%s1939_s5 + $0x30] sm:$0xff] }
  0x38   : > { %363 = vst [vmem:[%s1944_s6 + $0x8] sm:$0xff] %v362_v5  ;;  %v368_v8 = vld [vmem:[%s1939_s5 + $0x40] sm:$0xff]  ;;  %v370_v9 = vld [vmem:[%s1939_s5 + $0x50] sm:$0xff] }
  0x39   : > { %365 = vst [vmem:[%s1944_s6 + $0x10] sm:$0xff] %v364_v6  ;;  %v372_v10 = vld [vmem:[%s1939_s5 + $0x60] sm:$0xff]  ;;  %v374_v11 = vld [vmem:[%s1939_s5 + $0x70] sm:$0xff] }
  0x3a   : > { %367 = vst [vmem:[%s1944_s6 + $0x18] sm:$0xff] %v366_v7  ;;  %v376_v12 = vld [vmem:[%s1939_s5 + $0x80] sm:$0xff]  ;;  %v378_v13 = vld [vmem:[%s1939_s5 + $0x90] sm:$0xff] }
  0x3b   : > { %369 = vst [vmem:[%s1944_s6 + $0x20] sm:$0xff] %v368_v8  ;;  %v380_v14 = vld [vmem:[%s1939_s5 + $0xa0] sm:$0xff]  ;;  %v382_v15 = vld [vmem:[%s1939_s5 + $0xb0] sm:$0xff] }
  0x3c   : > { %371 = vst [vmem:[%s1944_s6 + $0x28] sm:$0xff] %v370_v9  ;;  %v384_v16 = vld [vmem:[%s1939_s5 + $0xc0] sm:$0xff]  ;;  %v386_v17 = vld [vmem:[%s1939_s5 + $0xd0] sm:$0xff] }
  0x3d   : > { %373 = vst [vmem:[%s1944_s6 + $0x30] sm:$0xff] %v372_v10  ;;  %v388_v18 = vld [vmem:[%s1939_s5 + $0xe0] sm:$0xff]  ;;  %v390_v19 = vld [vmem:[%s1939_s5 + $0xf0] sm:$0xff] }
  0x3e   : > { %375 = vst [vmem:[%s1944_s6 + $0x38] sm:$0xff] %v374_v11  ;;  %v392_v20 = vld [vmem:[%s1939_s5 + $0x100] sm:$0xff]  ;;  %v394_v21 = vld [vmem:[%s1939_s5 + $0x110] sm:$0xff] }
  0x3f   : > { %377 = vst [vmem:[%s1944_s6 + $0x40] sm:$0xff] %v376_v12  ;;  %v396_v22 = vld [vmem:[%s1939_s5 + $0x120] sm:$0xff]  ;;  %v398_v23 = vld [vmem:[%s1939_s5 + $0x130] sm:$0xff] }
  0x40   : > { %379 = vst [vmem:[%s1944_s6 + $0x48] sm:$0xff] %v378_v13  ;;  %v400_v24 = vld [vmem:[%s1939_s5 + $0x140] sm:$0xff]  ;;  %v402_v25 = vld [vmem:[%s1939_s5 + $0x150] sm:$0xff] }
  0x41   : > { %381 = vst [vmem:[%s1944_s6 + $0x50] sm:$0xff] %v380_v14  ;;  %v404_v26 = vld [vmem:[%s1939_s5 + $0x160] sm:$0xff]  ;;  %v406_v27 = vld [vmem:[%s1939_s5 + $0x170] sm:$0xff] }
  0x42   : > { %383 = vst [vmem:[%s1944_s6 + $0x58] sm:$0xff] %v382_v15  ;;  %v408_v28 = vld [vmem:[%s1939_s5 + $0x180] sm:$0xff]  ;;  %v410_v29 = vld [vmem:[%s1939_s5 + $0x190] sm:$0xff] }
  0x43   : > { %385 = vst [vmem:[%s1944_s6 + $0x60] sm:$0xff] %v384_v16  ;;  %v412_v30 = vld [vmem:[%s1939_s5 + $0x1a0] sm:$0xff]  ;;  %v414_v31 = vld [vmem:[%s1939_s5 + $0x1b0] sm:$0xff] }
  0x44   : > { %387 = vst [vmem:[%s1944_s6 + $0x68] sm:$0xff] %v386_v17  ;;  %v416_v32 = vld [vmem:[%s1939_s5 + $0x1c0] sm:$0xff]  ;;  %v418_v33 = vld [vmem:[%s1939_s5 + $0x1d0] sm:$0xff] }
  0x45   : > { %389 = vst [vmem:[%s1944_s6 + $0x70] sm:$0xff] %v388_v18  ;;  %v420_v34 = vld [vmem:[%s1939_s5 + $0x1e0] sm:$0xff]  ;;  %v422_v35 = vld [vmem:[%s1939_s5 + $0x1f0] sm:$0xff] }
  0x46   : > { %391 = vst [vmem:[%s1944_s6 + $0x78] sm:$0xff] %v390_v19  ;;  %v424_v36 = vld [vmem:[%s1939_s5 + $0x200] sm:$0xff]  ;;  %v426_v37 = vld [vmem:[%s1939_s5 + $0x210] sm:$0xff] }
  0x47   : > { %393 = vst [vmem:[%s1944_s6 + $0x80] sm:$0xff] %v392_v20  ;;  %v428_v38 = vld [vmem:[%s1939_s5 + $0x220] sm:$0xff]  ;;  %v430_v39 = vld [vmem:[%s1939_s5 + $0x230] sm:$0xff] }
  0x48   : > { %395 = vst [vmem:[%s1944_s6 + $0x88] sm:$0xff] %v394_v21  ;;  %v432_v40 = vld [vmem:[%s1939_s5 + $0x240] sm:$0xff]  ;;  %v434_v41 = vld [vmem:[%s1939_s5 + $0x250] sm:$0xff] }
  0x49   : > { %397 = vst [vmem:[%s1944_s6 + $0x90] sm:$0xff] %v396_v22  ;;  %v436_v42 = vld [vmem:[%s1939_s5 + $0x260] sm:$0xff]  ;;  %v438_v43 = vld [vmem:[%s1939_s5 + $0x270] sm:$0xff] }
  0x4a   : > { %399 = vst [vmem:[%s1944_s6 + $0x98] sm:$0xff] %v398_v23  ;;  %v440_v44 = vld [vmem:[%s1939_s5 + $0x280] sm:$0xff]  ;;  %v442_v45 = vld [vmem:[%s1939_s5 + $0x290] sm:$0xff] }
  0x4b   : > { %401 = vst [vmem:[%s1944_s6 + $0xa0] sm:$0xff] %v400_v24  ;;  %v444_v46 = vld [vmem:[%s1939_s5 + $0x2a0] sm:$0xff]  ;;  %v446_v47 = vld [vmem:[%s1939_s5 + $0x2b0] sm:$0xff] }
  0x4c   : > { %403 = vst [vmem:[%s1944_s6 + $0xa8] sm:$0xff] %v402_v25  ;;  %v448_v48 = vld [vmem:[%s1939_s5 + $0x2c0] sm:$0xff]  ;;  %v450_v49 = vld [vmem:[%s1939_s5 + $0x2d0] sm:$0xff] }
  0x4d   : > { %405 = vst [vmem:[%s1944_s6 + $0xb0] sm:$0xff] %v404_v26  ;;  %v452_v50 = vld [vmem:[%s1939_s5 + $0x2e0] sm:$0xff]  ;;  %v454_v51 = vld [vmem:[%s1939_s5 + $0x2f0] sm:$0xff] }
  0x4e   : > { %407 = vst [vmem:[%s1944_s6 + $0xb8] sm:$0xff] %v406_v27  ;;  %v456_v52 = vld [vmem:[%s1939_s5 + $0x300] sm:$0xff]  ;;  %v458_v53 = vld [vmem:[%s1939_s5 + $0x310] sm:$0xff] }
  0x4f   : > { %409 = vst [vmem:[%s1944_s6 + $0xc0] sm:$0xff] %v408_v28  ;;  %v460_v54 = vld [vmem:[%s1939_s5 + $0x320] sm:$0xff]  ;;  %v462_v55 = vld [vmem:[%s1939_s5 + $0x330] sm:$0xff] }
  0x50   : > { %411 = vst [vmem:[%s1944_s6 + $0xc8] sm:$0xff] %v410_v29  ;;  %v464_v56 = vld [vmem:[%s1939_s5 + $0x340] sm:$0xff]  ;;  %v466_v57 = vld [vmem:[%s1939_s5 + $0x350] sm:$0xff] }
  0x51   : > { %413 = vst [vmem:[%s1944_s6 + $0xd0] sm:$0xff] %v412_v30  ;;  %v468_v58 = vld [vmem:[%s1939_s5 + $0x360] sm:$0xff]  ;;  %v470_v59 = vld [vmem:[%s1939_s5 + $0x370] sm:$0xff] }
  0x52   : > { %415 = vst [vmem:[%s1944_s6 + $0xd8] sm:$0xff] %v414_v31  ;;  %v472_v60 = vld [vmem:[%s1939_s5 + $0x380] sm:$0xff]  ;;  %v474_v61 = vld [vmem:[%s1939_s5 + $0x390] sm:$0xff] }
  0x53   : > { %417 = vst [vmem:[%s1944_s6 + $0xe0] sm:$0xff] %v416_v32  ;;  %v476_v62 = vld [vmem:[%s1939_s5 + $0x3a0] sm:$0xff]  ;;  %v478_v63 = vld [vmem:[%s1939_s5 + $0x3b0] sm:$0xff] }
  0x54   : > { %419 = vst [vmem:[%s1944_s6 + $0xe8] sm:$0xff] %v418_v33  ;;  %v480_v0 = vld [vmem:[%s1939_s5 + $0x3c0] sm:$0xff]  ;;  %v482_v1 = vld [vmem:[%s1939_s5 + $0x3d0] sm:$0xff] }
  0x55   : > { %421 = vst [vmem:[%s1944_s6 + $0xf0] sm:$0xff] %v420_v34  ;;  %v484_v2 = vld [vmem:[%s1939_s5 + $0x3e0] sm:$0xff]  ;;  %v486_v3 = vld [vmem:[%s1939_s5 + $0x3f0] sm:$0xff] }
  0x56   : > { %423 = vst [vmem:[%s1944_s6 + $0xf8] sm:$0xff] %v422_v35 }
  0x57   : > { %425 = vst [vmem:[%s1944_s6 + $0x100] sm:$0xff] %v424_v36 }
  0x58   : > { %427 = vst [vmem:[%s1944_s6 + $0x108] sm:$0xff] %v426_v37 }
  0x59   : > { %429 = vst [vmem:[%s1944_s6 + $0x110] sm:$0xff] %v428_v38 }
  0x5a   : > { %431 = vst [vmem:[%s1944_s6 + $0x118] sm:$0xff] %v430_v39 }
  0x5b   : > { %433 = vst [vmem:[%s1944_s6 + $0x120] sm:$0xff] %v432_v40 }
  0x5c   : > { %435 = vst [vmem:[%s1944_s6 + $0x128] sm:$0xff] %v434_v41 }
  0x5d   : > { %437 = vst [vmem:[%s1944_s6 + $0x130] sm:$0xff] %v436_v42 }
  0x5e   : > { %439 = vst [vmem:[%s1944_s6 + $0x138] sm:$0xff] %v438_v43 }
  0x5f   : > { %441 = vst [vmem:[%s1944_s6 + $0x140] sm:$0xff] %v440_v44 }
  0x60   : > { %443 = vst [vmem:[%s1944_s6 + $0x148] sm:$0xff] %v442_v45 }
  0x61   : > { %445 = vst [vmem:[%s1944_s6 + $0x150] sm:$0xff] %v444_v46 }
  0x62   : > { %447 = vst [vmem:[%s1944_s6 + $0x158] sm:$0xff] %v446_v47 }
  0x63   : > { %449 = vst [vmem:[%s1944_s6 + $0x160] sm:$0xff] %v448_v48 }
  0x64   : > { %451 = vst [vmem:[%s1944_s6 + $0x168] sm:$0xff] %v450_v49 }
  0x65   : > { %453 = vst [vmem:[%s1944_s6 + $0x170] sm:$0xff] %v452_v50 }
  0x66   : > { %455 = vst [vmem:[%s1944_s6 + $0x178] sm:$0xff] %v454_v51 }
  0x67   : > { %457 = vst [vmem:[%s1944_s6 + $0x180] sm:$0xff] %v456_v52 }
  0x68   : > { %459 = vst [vmem:[%s1944_s6 + $0x188] sm:$0xff] %v458_v53 }
  0x69   : > { %461 = vst [vmem:[%s1944_s6 + $0x190] sm:$0xff] %v460_v54 }
  0x6a   : > { %463 = vst [vmem:[%s1944_s6 + $0x198] sm:$0xff] %v462_v55 }
  0x6b   : > { %465 = vst [vmem:[%s1944_s6 + $0x1a0] sm:$0xff] %v464_v56 }
  0x6c   : > { %467 = vst [vmem:[%s1944_s6 + $0x1a8] sm:$0xff] %v466_v57 }
  0x6d   : > { %469 = vst [vmem:[%s1944_s6 + $0x1b0] sm:$0xff] %v468_v58 }
  0x6e   : > { %471 = vst [vmem:[%s1944_s6 + $0x1b8] sm:$0xff] %v470_v59 }
  0x6f   : > { %473 = vst [vmem:[%s1944_s6 + $0x1c0] sm:$0xff] %v472_v60 }
  0x70   : > { %475 = vst [vmem:[%s1944_s6 + $0x1c8] sm:$0xff] %v474_v61 }
  0x71   : > { %477 = vst [vmem:[%s1944_s6 + $0x1d0] sm:$0xff] %v476_v62 }
  0x72   : > { %479 = vst [vmem:[%s1944_s6 + $0x1d8] sm:$0xff] %v478_v63 }
  0x73   : > { %481 = vst [vmem:[%s1944_s6 + $0x1e0] sm:$0xff] %v480_v0 }
  0x74   : > { %483 = vst [vmem:[%s1944_s6 + $0x1e8] sm:$0xff] %v482_v1 }
  0x75   : > { %485 = vst [vmem:[%s1944_s6 + $0x1f0] sm:$0xff] %v484_v2 }
  0x76   : > { %487 = vst [vmem:[%s1944_s6 + $0x1f8] sm:$0xff] %v486_v3 }
  0x77 PF: > { %p1272_p0 = scmp.ge.s32.totalorder %s1802_s22, 1  ;;  %p500_p1 = scmp.lt.s32.totalorder %s1802_s22, 19 }
  0x79   : > { %p501_p2 = pnand %p1272_p0, %p500_p1 }
  0x7a   : > { %s507_s0 = sand.u32 (!%p501_p2), 1, %s1778_s16   ;;  %s514_s23 = sand.u32 (!%p501_p2), 1, %s1770_s14  }
  0x7b   : > { %504 = sbr.rel (%p501_p2) target bundleno = 373 (0x175), region = 85  ;;  %s1273_s28 = sshll.u32 (!%p501_p2), %s507_s0, 5 }
  0x7c   : > { %s1274_s7 = sshll.u32 (!%p501_p2), %s514_s23, 9  ;;  %s541_s11 = sand.u32 (!%p501_p2), 1, %s1762_s12  }
  0x7d   : > { %s1276_s26 = sshll.u32 (!%p501_p2), %s1790_s19, 1  ;;  %s1275_s29 = sshll.u32 (!%p501_p2), %s541_s11, 5 }
  0x7e   : > { %p549_p3 = scmp.lt.s32.totalorder (!%p501_p2), %s1276_s26, 3  ;;  %s2083_s6 = scalar_lea.vmem (!%p501_p2), [#allocation3], %s1273_s28 }
  0x7f   : > { %s2085_s1 = scalar_lea.vmem (!%p501_p2), [#allocation4], %s1274_s7  ;;  %s2087_s25 = scalar_lea.vmem (!%p501_p2), [#allocation5], %s1275_s29 }
  0x80   : > { %s2326_s26 = smov (!%p549_p3, %s1276_s26), 3  ;;  %p1277_p4 = scmp.ne.s32.totalorder %s1786_s18, 0 }
  0x81   : > { %s551_s5 = scalar_lea.vmem %s2297_s2, %s2326_s26 }
  0x82   : > { %558 = sbr.rel (%p1277_p4) target bundleno = 140 (0x8c), region = 97 }
  0x87   : > { %v1804_v4 = vmov 0.0  }
  0x88   : > { %559 = vst [vmem:[#allocation2 + $0x10] sm:$0xff] %v1804_v4 }
  0x89   : > { %560 = vst [vmem:[#allocation2] sm:$0xff] %v1804_v4 }
  0x8a   : > { %561 = vst [vmem:[#allocation2 + $0x18] sm:$0xff] %v1804_v4 }
  0x8b   : > { %562 = vst [vmem:[#allocation2 + $0x8] sm:$0xff] %v1804_v4 }
  0x8c PF: > { %v1352_v5 = vld [vmem:[%s2085_s1 + $0x70] sm:$0xf]  ;;  %v1577_v6 = vld [vmem:[%s2085_s1 + $0x74] sm:$0xf0]  ;;  %v1344_v16 = vld [vmem:[%s2085_s1 + $0x60] sm:$0xf] }
  0x8d   : > { %v1416_v7 = vld [vmem:[%s2085_s1 + $0xf0] sm:$0xf]  ;;  %v1353_v8 = vor.u32 %v1577_v6, %v1352_v5  ;;  %v1593_v9 = vld [vmem:[%s2085_s1 + $0xf4] sm:$0xf0]  ;;  %v1575_v18 = vld [vmem:[%s2085_s1 + $0x64] sm:$0xf0] }
  0x8e   : > { %v1480_v10 = vld [vmem:[%s2085_s1 + $0x170] sm:$0xf]  ;;  %v1609_v11 = vld [vmem:[%s2085_s1 + $0x174] sm:$0xf0]  ;;  %v1417_v12 = vor.u32 %v1593_v9, %v1416_v7  ;;  %v1408_v19 = vld [vmem:[%s2085_s1 + $0xe0] sm:$0xf]  ;;  %v1345_v21 = vor.u32 %v1575_v18, %v1344_v16 }
  0x8f   : > { %v1481_v13 = vor.u32 %v1609_v11, %v1480_v10  ;;  %v1544_v14 = vld [vmem:[%s2085_s1 + $0x1f0] sm:$0xf]  ;;  %v1625_v15 = vld [vmem:[%s2085_s1 + $0x1f4] sm:$0xf0]  ;;  %975 = vmatpush.bf16.msra.mxu0 %v1353_v8  ;;  %v1591_v20 = vld [vmem:[%s2085_s1 + $0xe4] sm:$0xf0] }
  0x90   : > { %v1545_v17 = vor.u32 %v1625_v15, %v1544_v14  ;;  %989 = vmatpush.bf16.msra.mxu1 %v1417_v12  ;;  %v1409_v22 = vor.u32 %v1591_v20, %v1408_v19  ;;  %v1472_v23 = vld [vmem:[%s2085_s1 + $0x160] sm:$0xf]  ;;  %v1607_v24 = vld [vmem:[%s2085_s1 + $0x164] sm:$0xf0]  ;;  %v1336_v28 = vld [vmem:[%s2085_s1 + $0x50] sm:$0xf] }
  0x91   : > { %1003 = vmatpush.bf16.msra.mxu2 %v1481_v13  ;;  %v1536_v25 = vld [vmem:[%s2085_s1 + $0x1e0] sm:$0xf]  ;;  %v1473_v26 = vor.u32 %v1607_v24, %v1472_v23  ;;  %v1623_v27 = vld [vmem:[%s2085_s1 + $0x1e4] sm:$0xf0]  ;;  %v1573_v29 = vld [vmem:[%s2085_s1 + $0x54] sm:$0xf0] }
  0x92   : > { %1017 = vmatpush.bf16.msra.mxu3 %v1545_v17  ;;  %v1537_v30 = vor.u32 %v1623_v27, %v1536_v25  ;;  %v1400_v31 = vld [vmem:[%s2085_s1 + $0xd0] sm:$0xf]  ;;  %v1589_v32 = vld [vmem:[%s2085_s1 + $0xd4] sm:$0xf0]  ;;  %v1337_v34 = vor.u32 %v1573_v29, %v1336_v28  ;;  %v1328_v40 = vld [vmem:[%s2085_s1 + $0x40] sm:$0xf] }
  0x93   : > { %v1464_v33 = vld [vmem:[%s2085_s1 + $0x150] sm:$0xf]  ;;  %976 = vmatpush.bf16.msra.mxu0 %v1345_v21  ;;  %v1605_v35 = vld [vmem:[%s2085_s1 + $0x154] sm:$0xf0]  ;;  %v1401_v38 = vor.u32 %v1589_v32, %v1400_v31  ;;  %v1571_v41 = vld [vmem:[%s2085_s1 + $0x44] sm:$0xf0] }
  0x94   : > { %v1528_v36 = vld [vmem:[%s2085_s1 + $0x1d0] sm:$0xf]  ;;  %v1621_v37 = vld [vmem:[%s2085_s1 + $0x1d4] sm:$0xf0]  ;;  %990 = vmatpush.bf16.msra.mxu1 %v1409_v22  ;;  %v1465_v39 = vor.u32 %v1605_v35, %v1464_v33  ;;  %v1392_v42 = vld [vmem:[%s2085_s1 + $0xc0] sm:$0xf]  ;;  %v1329_v49 = vor.u32 %v1571_v41, %v1328_v40 }
  0x95   : > { %1004 = vmatpush.bf16.msra.mxu2 %v1473_v26  ;;  %v1529_v43 = vor.u32 %v1621_v37, %v1528_v36  ;;  %v1587_v44 = vld [vmem:[%s2085_s1 + $0xc4] sm:$0xf0]  ;;  %v1456_v45 = vld [vmem:[%s2085_s1 + $0x140] sm:$0xf]  ;;  %v1320_v52 = vld [vmem:[%s2085_s1 + $0x30] sm:$0xf] }
  0x96   : > { %1018 = vmatpush.bf16.msra.mxu3 %v1537_v30  ;;  %v1603_v46 = vld [vmem:[%s2085_s1 + $0x144] sm:$0xf0]  ;;  %v1520_v47 = vld [vmem:[%s2085_s1 + $0x1c0] sm:$0xf]  ;;  %v1393_v50 = vor.u32 %v1587_v44, %v1392_v42  ;;  %v1569_v53 = vld [vmem:[%s2085_s1 + $0x34] sm:$0xf0] }
  0x97   : > { %v1619_v48 = vld [vmem:[%s2085_s1 + $0x1c4] sm:$0xf0]  ;;  %977 = vmatpush.bf16.msra.mxu0 %v1337_v34  ;;  %v1457_v51 = vor.u32 %v1603_v46, %v1456_v45  ;;  %v1384_v54 = vld [vmem:[%s2085_s1 + $0xb0] sm:$0xf]  ;;  %v1585_v56 = vld [vmem:[%s2085_s1 + $0xb4] sm:$0xf0]  ;;  %v1321_v61 = vor.u32 %v1569_v53, %v1320_v52 }
  0x98   : > { %991 = vmatpush.bf16.msra.mxu1 %v1401_v38  ;;  %v1521_v55 = vor.u32 %v1619_v48, %v1520_v47  ;;  %v1448_v57 = vld [vmem:[%s2085_s1 + $0x130] sm:$0xf]  ;;  %v1601_v58 = vld [vmem:[%s2085_s1 + $0x134] sm:$0xf0]  ;;  %v1385_v62 = vor.u32 %v1585_v56, %v1384_v54  ;;  %v1312_v0 = vld [vmem:[%s2085_s1 + $0x20] sm:$0xf] }
  0x99   : > { %1005 = vmatpush.bf16.msra.mxu2 %v1465_v39  ;;  %v1512_v59 = vld [vmem:[%s2085_s1 + $0x1b0] sm:$0xf]  ;;  %v1617_v60 = vld [vmem:[%s2085_s1 + $0x1b4] sm:$0xf0]  ;;  %v1449_v63 = vor.u32 %v1601_v58, %v1448_v57  ;;  %v1567_v1 = vld [vmem:[%s2085_s1 + $0x24] sm:$0xf0] }
  0x9a   : > { %1019 = vmatpush.bf16.msra.mxu3 %v1529_v43  ;;  %v1376_v2 = vld [vmem:[%s2085_s1 + $0xa0] sm:$0xf]  ;;  %v1513_v3 = vor.u32 %v1617_v60, %v1512_v59  ;;  %v1583_v4 = vld [vmem:[%s2085_s1 + $0xa4] sm:$0xf0]  ;;  %v1313_v9 = vor.u32 %v1567_v1, %v1312_v0  ;;  %v1304_v12 = vld [vmem:[%s2085_s1 + $0x10] sm:$0xf] }
  0x9b   : > { %978 = vmatpush.bf16.msra.mxu0 %v1329_v49  ;;  %v1440_v5 = vld [vmem:[%s2085_s1 + $0x120] sm:$0xf]  ;;  %v1599_v6 = vld [vmem:[%s2085_s1 + $0x124] sm:$0xf0]  ;;  %v1377_v10 = vor.u32 %v1583_v4, %v1376_v2  ;;  %v1565_v13 = vld [vmem:[%s2085_s1 + $0x14] sm:$0xf0] }
  0x9c   : > { %992 = vmatpush.bf16.msra.mxu1 %v1393_v50  ;;  %v1504_v7 = vld [vmem:[%s2085_s1 + $0x1a0] sm:$0xf]  ;;  %v1615_v8 = vld [vmem:[%s2085_s1 + $0x1a4] sm:$0xf0]  ;;  %v1441_v11 = vor.u32 %v1599_v6, %v1440_v5  ;;  %v1368_v14 = vld [vmem:[%s2085_s1 + $0x90] sm:$0xf]  ;;  %v1305_v22 = vor.u32 %v1565_v13, %v1304_v12 }
  0x9d   : > { %1006 = vmatpush.bf16.msra.mxu2 %v1457_v51  ;;  %v1505_v15 = vor.u32 %v1615_v8, %v1504_v7  ;;  %v1581_v16 = vld [vmem:[%s2085_s1 + $0x94] sm:$0xf0]  ;;  %v1432_v17 = vld [vmem:[%s2085_s1 + $0x110] sm:$0xf]  ;;  %v1296_v21 = vld [vmem:[%s2085_s1] sm:$0xf] }
  0x9e   : > { %1020 = vmatpush.bf16.msra.mxu3 %v1521_v55  ;;  %v1597_v18 = vld [vmem:[%s2085_s1 + $0x114] sm:$0xf0]  ;;  %v1496_v19 = vld [vmem:[%s2085_s1 + $0x190] sm:$0xf]  ;;  %v1563_v23 = vld [vmem:[%s2085_s1 + $0x4] sm:$0xf0]  ;;  %v1369_v26 = vor.u32 %v1581_v16, %v1368_v14 }
  0x9f   : > { %979 = vmatpush.bf16.msra.mxu0 %v1321_v61  ;;  %v1613_v20 = vld [vmem:[%s2085_s1 + $0x194] sm:$0xf0]  ;;  %v1360_v24 = vld [vmem:[%s2085_s1 + $0x80] sm:$0xf]  ;;  %v1579_v25 = vld [vmem:[%s2085_s1 + $0x84] sm:$0xf0]  ;;  %v1433_v27 = vor.u32 %v1597_v18, %v1432_v17  ;;  %v1297_v38 = vor.u32 %v1563_v23, %v1296_v21 }
  0xa0   : > { %993 = vmatpush.bf16.msra.mxu1 %v1385_v62  ;;  %v1424_v28 = vld [vmem:[%s2085_s1 + $0x100] sm:$0xf]  ;;  %v1595_v29 = vld [vmem:[%s2085_s1 + $0x104] sm:$0xf0]  ;;  %v1497_v31 = vor.u32 %v1613_v20, %v1496_v19  ;;  %v1576_v33 = vld [vmem:[%s2085_s1 + $0x74] sm:$0xf]  ;;  %v1361_v42 = vor.u32 %v1579_v25, %v1360_v24 }
  0xa1   : > { %1007 = vmatpush.bf16.msra.mxu2 %v1449_v63  ;;  %v1488_v30 = vld [vmem:[%s2085_s1 + $0x180] sm:$0xf]  ;;  %v1611_v32 = vld [vmem:[%s2085_s1 + $0x184] sm:$0xf0]  ;;  %v1354_v34 = vld [vmem:[%s2085_s1 + $0x78] sm:$0xf0]  ;;  %v1425_v43 = vor.u32 %v1595_v29, %v1424_v28 }
  0xa2   : > { %1021 = vmatpush.bf16.msra.mxu3 %v1513_v3  ;;  %v1592_v35 = vld [vmem:[%s2085_s1 + $0xf4] sm:$0xf]  ;;  %v1418_v36 = vld [vmem:[%s2085_s1 + $0xf8] sm:$0xf0]  ;;  %v1574_v44 = vld [vmem:[%s2085_s1 + $0x64] sm:$0xf]  ;;  %v1489_v48 = vor.u32 %v1611_v32, %v1488_v30  ;;  %v1357_v49 = vor.u32 %v1576_v33, %v1354_v34 }
  0xa3   : > { %980 = vmatpush.bf16.msra.mxu0 %v1313_v9  ;;  %v1608_v37 = vld [vmem:[%s2085_s1 + $0x174] sm:$0xf]  ;;  %v1482_v39 = vld [vmem:[%s2085_s1 + $0x178] sm:$0xf0]  ;;  %v1346_v45 = vld [vmem:[%s2085_s1 + $0x68] sm:$0xf0]  ;;  %v1421_v54 = vor.u32 %v1592_v35, %v1418_v36 }
  0xa4   : > { %994 = vmatpush.bf16.msra.mxu1 %v1377_v10  ;;  %v1624_v40 = vld [vmem:[%s2085_s1 + $0x1f4] sm:$0xf]  ;;  %v1546_v41 = vld [vmem:[%s2085_s1 + $0x1f8] sm:$0xf0]  ;;  %v1288_v46 = vld [vmem:[%s2083_s6 + $0x8] sm:$0xf]  ;;  %v1485_v55 = vor.u32 %v1608_v37, %v1482_v39  ;;  %v1349_v4 = vor.u32 %v1574_v44, %v1346_v45 }
  0xa5   : > { %1008 = vmatpush.bf16.msra.mxu2 %v1441_v11  ;;  %v1561_v47 = vld [vmem:[%s2083_s6 + $0x14] sm:$0xf0]  ;;  %v1590_v50 = vld [vmem:[%s2085_s1 + $0xe4] sm:$0xf]  ;;  %v1410_v51 = vld [vmem:[%s2085_s1 + $0xe8] sm:$0xf0]  ;;  %v1549_v59 = vor.u32 %v1624_v40, %v1546_v41 }
  0xa6   : > { %1022 = vmatpush.bf16.msra.mxu3 %v1505_v15  ;;  %v1606_v52 = vld [vmem:[%s2085_s1 + $0x164] sm:$0xf]  ;;  %v1474_v53 = vld [vmem:[%s2085_s1 + $0x168] sm:$0xf0]  ;;  %v1290_v57 = vld [vmem:[%s2083_s6 + $0x18] sm:$0xf0]  ;;  %v2173_v60 = vor.u32 %v1561_v47, %v1288_v46  ;;  %v1413_v6 = vor.u32 %v1590_v50, %v1410_v51 }
  0xa7   : > { %981 = vmatpush.bf16.msra.mxu0 %v1305_v22  ;;  %v1559_v56 = vld [vmem:[%s2083_s6 + $0xc] sm:$0xf]  ;;  %v1280_v58 = vld [vmem:[%s2083_s6] sm:$0xf]  ;;  %v1560_v61 = vld [vmem:[%s2083_s6 + $0xc] sm:$0xf0]  ;;  %v1477_v7 = vor.u32 %v1606_v52, %v1474_v53 }
  0xa8   : > { %995 = vmatpush.bf16.msra.mxu1 %v1369_v26  ;;  %v1558_v62 = vld [vmem:[%s2083_s6 + $0x4] sm:$0xf]  ;;  %v1282_v63 = vld [vmem:[%s2083_s6 + $0x10] sm:$0xf0]  ;;  %v1538_v1 = vld [vmem:[%s2085_s1 + $0x1e8] sm:$0xf0]  ;;  %v2180_v2 = vor.u32 %v1559_v56, %v1290_v57  ;;  %v2182_v3 = vor.u32 %v1560_v61, %v1280_v58 }
  0xa9   : > { %1009 = vmatpush.bf16.msra.mxu2 %v1433_v27  ;;  %v1622_v0 = vld [vmem:[%s2085_s1 + $0x1e4] sm:$0xf]  ;;  %v2184_v5 = vor.u32 %v1558_v62, %v1282_v63  ;;  %v1572_v8 = vld [vmem:[%s2085_s1 + $0x54] sm:$0xf]  ;;  %v1338_v9 = vld [vmem:[%s2085_s1 + $0x58] sm:$0xf0] }
  0xaa   : > { %1023 = vmatpush.bf16.msra.mxu3 %v1497_v31  ;;  %v1588_v10 = vld [vmem:[%s2085_s1 + $0xd4] sm:$0xf]  ;;  %v1541_v11 = vor.u32 %v1622_v0, %v1538_v1  ;;  %v1402_v12 = vld [vmem:[%s2085_s1 + $0xd8] sm:$0xf0]  ;;  %v1341_v17 = vor.u32 %v1572_v8, %v1338_v9  ;;  %v1570_v20 = vld [vmem:[%s2085_s1 + $0x44] sm:$0xf] }
  0xab   : > { %982 = vmatpush.bf16.msra.mxu0 %v1297_v38  ;;  %v1604_v13 = vld [vmem:[%s2085_s1 + $0x154] sm:$0xf]  ;;  %v1466_v14 = vld [vmem:[%s2085_s1 + $0x158] sm:$0xf0]  ;;  %v1405_v18 = vor.u32 %v1588_v10, %v1402_v12  ;;  %v1330_v21 = vld [vmem:[%s2085_s1 + $0x48] sm:$0xf0] }
  0xac   : > { %996 = vmatpush.bf16.msra.mxu1 %v1361_v42  ;;  %v1620_v15 = vld [vmem:[%s2085_s1 + $0x1d4] sm:$0xf]  ;;  %v1530_v16 = vld [vmem:[%s2085_s1 + $0x1d8] sm:$0xf0]  ;;  %v1469_v19 = vor.u32 %v1604_v13, %v1466_v14  ;;  %v1586_v22 = vld [vmem:[%s2085_s1 + $0xc4] sm:$0xf]  ;;  %v1333_v29 = vor.u32 %v1570_v20, %v1330_v21 }
  0xad   : > { %1010 = vmatpush.bf16.msra.mxu2 %v1425_v43  ;;  %v1533_v23 = vor.u32 %v1620_v15, %v1530_v16  ;;  %v1394_v24 = vld [vmem:[%s2085_s1 + $0xc8] sm:$0xf0]  ;;  %v1602_v25 = vld [vmem:[%s2085_s1 + $0x144] sm:$0xf]  ;;  %v1568_v32 = vld [vmem:[%s2085_s1 + $0x34] sm:$0xf] }
  0xae   : > { %1024 = vmatpush.bf16.msra.mxu3 %v1489_v48  ;;  %983 = vmatmul.bf16.vlgmr.msra.gmra.mxu0 %v2182_v3  ;;  %v1458_v26 = vld [vmem:[%s2085_s1 + $0x148] sm:$0xf0]  ;;  %v1618_v27 = vld [vmem:[%s2085_s1 + $0x1c4] sm:$0xf]  ;;  %v1397_v30 = vor.u32 %v1586_v22, %v1394_v24  ;;  %v1322_v33 = vld [vmem:[%s2085_s1 + $0x38] sm:$0xf0] }
  0xaf   : > { %1031 = vmatpush.bf16.msrb.mxu0 %v1357_v49  ;;  %997 = vmatmul.bf16.vlgmr.msra.gmra.mxu1 %v2184_v5  ;;  %v1522_v28 = vld [vmem:[%s2085_s1 + $0x1c8] sm:$0xf0]  ;;  %v1461_v31 = vor.u32 %v1602_v25, %v1458_v26  ;;  %v1584_v34 = vld [vmem:[%s2085_s1 + $0xb4] sm:$0xf]  ;;  %v1386_v36 = vld [vmem:[%s2085_s1 + $0xb8] sm:$0xf0]  ;;  %v1325_v41 = vor.u32 %v1568_v32, %v1322_v33 }
  0xb0   : > { %1045 = vmatpush.bf16.msrb.mxu1 %v1421_v54  ;;  %1011 = vmatmul.bf16.vlgmr.msra.gmra.mxu2 %v2173_v60  ;;  %v1525_v35 = vor.u32 %v1618_v27, %v1522_v28  ;;  %v1600_v37 = vld [vmem:[%s2085_s1 + $0x134] sm:$0xf]  ;;  %v1450_v38 = vld [vmem:[%s2085_s1 + $0x138] sm:$0xf0]  ;;  %v1389_v42 = vor.u32 %v1584_v34, %v1386_v36  ;;  %v1566_v44 = vld [vmem:[%s2085_s1 + $0x24] sm:$0xf] }
  0xb1   : > { %1059 = vmatpush.bf16.msrb.mxu2 %v1485_v55  ;;  %1025 = vmatmul.bf16.vlgmr.msra.gmra.mxu3 %v2180_v2  ;;  %v1616_v39 = vld [vmem:[%s2085_s1 + $0x1b4] sm:$0xf]  ;;  %v1514_v40 = vld [vmem:[%s2085_s1 + $0x1b8] sm:$0xf0]  ;;  %v1453_v43 = vor.u32 %v1600_v37, %v1450_v38  ;;  %v1314_v45 = vld [vmem:[%s2085_s1 + $0x28] sm:$0xf0] }
  0xb2   : > { %1073 = vmatpush.bf16.msrb.mxu3 %v1549_v59  ;;  %v1582_v46 = vld [vmem:[%s2085_s1 + $0xa4] sm:$0xf]  ;;  %v1517_v47 = vor.u32 %v1616_v39, %v1514_v40  ;;  %v1378_v48 = vld [vmem:[%s2085_s1 + $0xa8] sm:$0xf0]  ;;  %v1317_v53 = vor.u32 %v1566_v44, %v1314_v45  ;;  %v1564_v56 = vld [vmem:[%s2085_s1 + $0x14] sm:$0xf] }
  0xb3   : > { %1032 = vmatpush.bf16.msrb.mxu0 %v1349_v4  ;;  %v1598_v49 = vld [vmem:[%s2085_s1 + $0x124] sm:$0xf]  ;;  %v1442_v50 = vld [vmem:[%s2085_s1 + $0x128] sm:$0xf0]  ;;  %v1381_v54 = vor.u32 %v1582_v46, %v1378_v48  ;;  %v1306_v57 = vld [vmem:[%s2085_s1 + $0x18] sm:$0xf0] }
  0xb4   : > { %1046 = vmatpush.bf16.msrb.mxu1 %v1413_v6  ;;  %v1614_v51 = vld [vmem:[%s2085_s1 + $0x1a4] sm:$0xf]  ;;  %v1506_v52 = vld [vmem:[%s2085_s1 + $0x1a8] sm:$0xf0]  ;;  %v1445_v55 = vor.u32 %v1598_v49, %v1442_v50  ;;  %v1580_v58 = vld [vmem:[%s2085_s1 + $0x94] sm:$0xf]  ;;  %v1309_v4 = vor.u32 %v1564_v56, %v1306_v57 }
  0xb5   : > { %1060 = vmatpush.bf16.msrb.mxu2 %v1477_v7  ;;  %v1509_v59 = vor.u32 %v1614_v51, %v1506_v52  ;;  %v1370_v61 = vld [vmem:[%s2085_s1 + $0x98] sm:$0xf0]  ;;  %v1596_v62 = vld [vmem:[%s2085_s1 + $0x114] sm:$0xf]  ;;  %v1562_v8 = vld [vmem:[%s2085_s1 + $0x4] sm:$0xf] }
  0xb6   : > { %1074 = vmatpush.bf16.msrb.mxu3 %v1541_v11  ;;  %v1434_v63 = vld [vmem:[%s2085_s1 + $0x118] sm:$0xf0]  ;;  %v1612_v0 = vld [vmem:[%s2085_s1 + $0x194] sm:$0xf]  ;;  %v1373_v6 = vor.u32 %v1580_v58, %v1370_v61  ;;  %v1298_v9 = vld [vmem:[%s2085_s1 + $0x8] sm:$0xf0] }
  0xb7   : > { %1033 = vmatpush.bf16.msrb.mxu0 %v1341_v17  ;;  %v1498_v1 = vld [vmem:[%s2085_s1 + $0x198] sm:$0xf0]  ;;  %v1437_v7 = vor.u32 %v1596_v62, %v1434_v63  ;;  %v1578_v10 = vld [vmem:[%s2085_s1 + $0x84] sm:$0xf]  ;;  %v1362_v12 = vld [vmem:[%s2085_s1 + $0x88] sm:$0xf0]  ;;  %v1301_v17 = vor.u32 %v1562_v8, %v1298_v9 }
  0xb8   : > { %1047 = vmatpush.bf16.msrb.mxu1 %v1405_v18  ;;  %v1501_v11 = vor.u32 %v1612_v0, %v1498_v1  ;;  %v1594_v13 = vld [vmem:[%s2085_s1 + $0x104] sm:$0xf]  ;;  %v1426_v14 = vld [vmem:[%s2085_s1 + $0x108] sm:$0xf0]  ;;  %v1365_v18 = vor.u32 %v1578_v10, %v1362_v12  ;;  %v563_v27 = vld [vmem:[#allocation2 + $0x10] sm:$0xff]  ;;  %p1550_p5 = scmp.ne.s32.totalorder %s1786_s18, 8 }
  0xb9   : > { %1061 = vmatpush.bf16.msrb.mxu2 %v1469_v19  ;;  %v1610_v15 = vld [vmem:[%s2085_s1 + $0x184] sm:$0xf]  ;;  %v1490_v16 = vld [vmem:[%s2085_s1 + $0x188] sm:$0xf0]  ;;  %v1429_v19 = vor.u32 %v1594_v13, %v1426_v14  ;;  %v565_v34 = vld [vmem:[#allocation2 + $0x18] sm:$0xff] }
  0xba   : > { %1075 = vmatpush.bf16.msrb.mxu3 %v1533_v23  ;;  %v1493_v20 = vor.u32 %v1610_v15, %v1490_v16  ;;  %v566_v49 = vld [vmem:[#allocation2 + $0x8] sm:$0xff] }
  0xbb   : > { %1034 = vmatpush.bf16.msrb.mxu0 %v1333_v29 }
  0xbc   : > { %1048 = vmatpush.bf16.msrb.mxu1 %v1397_v30 }
  0xbd   : > { %1062 = vmatpush.bf16.msrb.mxu2 %v1461_v31 }
  0xbe   : > { %1076 = vmatpush.bf16.msrb.mxu3 %v1525_v35 }
  0xbf   : > { %1035 = vmatpush.bf16.msrb.mxu0 %v1325_v41  ;;  %v564_v41 = vld [vmem:[#allocation2] sm:$0xff] }
  0xc0   : > { %1049 = vmatpush.bf16.msrb.mxu1 %v1389_v42 }
  0xc1   : > { %1063 = vmatpush.bf16.msrb.mxu2 %v1453_v43 }
  0xc2   : > { %1077 = vmatpush.bf16.msrb.mxu3 %v1517_v47 }
  0xc3   : > { %1036 = vmatpush.bf16.msrb.mxu0 %v1317_v53 }
  0xc4   : > { %1050 = vmatpush.bf16.msrb.mxu1 %v1381_v54 }
  0xc5   : > { %1064 = vmatpush.bf16.msrb.mxu2 %v1445_v55 }
  0xc6   : > { %1078 = vmatpush.bf16.msrb.mxu3 %v1509_v59 }
  0xc7   : > { %1037 = vmatpush.bf16.msrb.mxu0 %v1309_v4 }
  0xc8   : > { %1051 = vmatpush.bf16.msrb.mxu1 %v1373_v6 }
  0xc9   : > { %1065 = vmatpush.bf16.msrb.mxu2 %v1437_v7 }
  0xca   : > { %1079 = vmatpush.bf16.msrb.mxu3 %v1501_v11 }
  0xcb   : > { %1038 = vmatpush.bf16.msrb.mxu0 %v1301_v17 }
  0xcc   : > { %1052 = vmatpush.bf16.msrb.mxu1 %v1365_v18 }
  0xcd   : > { %1066 = vmatpush.bf16.msrb.mxu2 %v1429_v19 }
  0xce   : > { %1080 = vmatpush.bf16.msrb.mxu3 %v1493_v20  ;;  %1039 = vmatmul.bf16.vlgmr.msrb.gmra.mxu0 %v2182_v3 }
  0xcf   : > { %1053 = vmatmul.bf16.vlgmr.msrb.gmra.mxu1 %v2184_v5 }
  0xd0   : > { %1067 = vmatmul.bf16.vlgmr.msrb.gmra.mxu2 %v2173_v60 }
  0xd1   : > { %1081 = vmatmul.bf16.vlgmr.msrb.gmra.mxu3 %v2180_v2 }
 0x12b   : > { %v984_v21 = vpop.f32.mrf.mxu0 }
 0x12c   : > { %v998_v22 = vpop.f32.mrf.mxu1 }
 0x12d   : > { %v999_v23 = vadd.f32 %v998_v22, %v984_v21 }
 0x133   : > { %v1012_v24 = vpop.f32.mrf.mxu2  ;;  %v986_v29 = vpop.f32.mrf.mxu0 }
 0x134   : > { %v1013_v25 = vadd.f32 %v1012_v24, %v999_v23  ;;  %v1026_v26 = vpop.f32.mrf.mxu3  ;;  %v1000_v30 = vpop.f32.mrf.mxu1 }
 0x135   : > { %v1001_v32 = vadd.f32 %v1000_v30, %v986_v29 }
 0x136   : > { %v1027_v28 = vadd.f32 %v1026_v26, %v1013_v25 }
 0x138   : > { %v1087_v31 = vadd.f32 %v1027_v28, %v563_v27 }
 0x13a   : > { %1091 = vst [vmem:[#allocation2 + $0x10] sm:$0xff] %v1087_v31 }
 0x13b   : > { %v1014_v3 = vpop.f32.mrf.mxu2 }
 0x13c   : > { %v1015_v33 = vadd.f32 %v1014_v3, %v1001_v32  ;;  %v1028_v5 = vpop.f32.mrf.mxu3 }
 0x13e   : > { %v1029_v60 = vadd.f32 %v1028_v5, %v1015_v33 }
 0x140   : > { %v1089_v35 = vadd.f32 %v1029_v60, %v565_v34 }
 0x142   : > { %1093 = vst [vmem:[#allocation2 + $0x18] sm:$0xff] %v1089_v35 }
 0x14b   : > { %v1040_v2 = vpop.f32.mrf.mxu0 }
 0x14c   : > { %v1054_v36 = vpop.f32.mrf.mxu1 }
 0x14d   : > { %v1055_v37 = vadd.f32 %v1054_v36, %v1040_v2 }
 0x153   : > { %v1068_v38 = vpop.f32.mrf.mxu2  ;;  %v1042_v43 = vpop.f32.mrf.mxu0 }
 0x154   : > { %v1069_v39 = vadd.f32 %v1068_v38, %v1055_v37  ;;  %v1082_v40 = vpop.f32.mrf.mxu3  ;;  %v1056_v44 = vpop.f32.mrf.mxu1 }
 0x155   : > { %v1057_v46 = vadd.f32 %v1056_v44, %v1042_v43 }
 0x156   : > { %v1083_v42 = vadd.f32 %v1082_v40, %v1069_v39 }
 0x158   : > { %v1088_v45 = vadd.f32 %v1083_v42, %v564_v41 }
 0x15a   : > { %1092 = vst [vmem:[#allocation2] sm:$0xff] %v1088_v45 }
 0x15b   : > { %v1070_v47 = vpop.f32.mrf.mxu2 }
 0x15c   : > { %v1071_v48 = vadd.f32 %v1070_v47, %v1057_v46  ;;  %v1084_v50 = vpop.f32.mrf.mxu3 }
 0x15e   : > { %v1085_v51 = vadd.f32 %v1084_v50, %v1071_v48  ;;  %1098 = sbr.rel (%p1550_p5) target bundleno = 365 (0x16d), region = 101 }
 0x160   : > { %v1090_v52 = vadd.f32 %v1085_v51, %v566_v49 }
 0x162   : > { %1094 = vst [vmem:[#allocation2 + $0x8] sm:$0xff] %v1090_v52 }
 0x163   : > { %v1099_v53 = vld [vmem:[#allocation2 + $0x10] sm:$0xff]  ;;  %v1103_v54 = vld [vmem:[%s551_s5] sm:$0x3]  ;;  %v1101_v58 = vld [vmem:[#allocation2 + $0x18] sm:$0xff] }
 0x164   : > { %v1100_v55 = vld [vmem:[#allocation2] sm:$0xff]  ;;  %v1105_v56 = vperm.slane %v1103_v54, 0  ;;  %v1106_v57 = vperm.slane %v1103_v54, 1 }
 0x166   : > { %v1109_v61 = vadd.f32 %v1105_v56, %v1099_v53  ;;  %v1110_v62 = vadd.f32 %v1106_v57, %v1100_v55  ;;  %v1111_v63 = vadd.f32 %v1105_v56, %v1101_v58 }
 0x168   : > { %1113 = vst [vmem:[%s2087_s25] sm:$0xff] %v1109_v61 }
 0x169   : > { %v1102_v59 = vld [vmem:[#allocation2 + $0x8] sm:$0xff]  ;;  %1114 = vst [vmem:[%s2087_s25 + $0x8] sm:$0xff] %v1110_v62 }
 0x16a   : > { %v1112_v0 = vadd.f32 %v1106_v57, %v1102_v59  ;;  %1115 = vst [vmem:[%s2087_s25 + $0x10] sm:$0xff] %v1111_v63 }
 0x16c   : > { %1116 = vst [vmem:[%s2087_s25 + $0x18] sm:$0xff] %v1112_v0 }
 0x16d PF: > { %1123 = sbr.rel (!%p1919_p12) target bundleno = 373 (0x175), region = 105  ;;  %s1626_s14 = sshll.u32 (%p1919_p12), %s1790_s19, 4 }
 0x16e   : > { %s1129_s0 = scalar_lea.vmem (%p1919_p12), %s2298_s3, %s1626_s14 }
 0x16f   : > { %v1142_v1 = vld [vmem:[%s2087_s25] sm:$0xff] (%p1919_p12) }
 0x170   : > { %v1144_v4 = vld [vmem:[%s2087_s25 + $0x8] sm:$0xff] (%p1919_p12)  ;;  %1143 = vst [vmem:[%s1129_s0] sm:$0xff] (%p1919_p12), %v1142_v1 }
 0x171   : > { %v1146_v6 = vld [vmem:[%s2087_s25 + $0x10] sm:$0xff] (%p1919_p12)  ;;  %1145 = vst [vmem:[%s1129_s0 + $0x8] sm:$0xff] (%p1919_p12), %v1144_v4 }
 0x172   : > { %1147 = vst [vmem:[%s1129_s0 + $0x20] sm:$0xff] %v1146_v6 }
 0x173   : > { %v1148_v7 = vld [vmem:[%s2087_s25 + $0x18] sm:$0xff] }
 0x174   : > { %1149 = vst [vmem:[%s1129_s0 + $0x28] sm:$0xff] %v1148_v7 }
 0x175 PF: > { %s13_s22 = sadd.s32 1, %s1802_s22   ;;  %s2308_s10 = sld [smem:[#allocation6_spill]] }
 0x176   : > { %p10_p6 = scmp.ge.s32.totalorder %s13_s22, 20   ;;  %s2309_s12 = smov %s1766_s13 }
 0x177   : > { %s2310_s13 = smov %s1917_s9  ;;  %s2311_s14 = smov %s1774_s15 }
 0x178   : > { %s2312_s15 = smov %s1914_s8  ;;  %s2313_s16 = smov %s1782_s17 }
 0x179   : > { %s2314_s17 = smov %s1900_s30  ;;  %s2315_s18 = smov %s1794_s20 }
 0x17a   : > { %s2316_s19 = smov %s1798_s21  ;;  %s2317_s20 = smov %s2320_s24 }
 0x17b   : > { %s2318_s21 = smov %s2308_s10  ;;  %12 = sbr.rel (!%p10_p6) target bundleno = 9 (0x9), region = 170 }

// kernel: _lambda_.56
= control target key start
LH: loop header
LB: loop body
LE: loop exit
PB: predicated region body
PF: predicated region fallthrough
CT: control target
= control target key end

     0   :  { %s44_s0 = inlined_call_operand.vmem [shape: f32[8,128], index: 0, kind: input, shape index: {}]   ;;  %s45_s1 = inlined_call_operand.vmem [shape: f32[8,128], index: 1, kind: input, shape index: {}]   ;;  %s46_s2 = inlined_call_operand.vmem [shape: f32[8,128], index: 2, kind: output, shape index: {}]  }
   0x1   :  { %v11_v0 = vld [vmem:[%s44_s0] sm:$0xff] }
   0x2   :  { %v12_v1 = vld [vmem:[%s45_s1] sm:$0xff] }
   0x3   :  { %v13_v2 = vadd.f32 %v12_v1, %v11_v0 }
   0x5   :  { %v14_v3 = vmax.f32 %v13_v2, 0.0 }
   0x7   :  { %15 = vst [vmem:[%s46_s2] sm:$0xff] %v14_v3 }

// kernel: _lambda_.55
= control target key start
LH: loop header
LB: loop body
LE: loop exit
PB: predicated region body
PF: predicated region fallthrough
CT: control target
= control target key end

     0   :  { %s1145_s12 = smov 0   ;;  %s1147_s13 = smov 0   ;;  %s1371_s0 = inlined_call_operand.vmem [shape: bf16[16,256], index: 0, kind: input, shape index: {}]   ;;  %s1372_s1 = inlined_call_operand.vmem [shape: bf16[256,512], index: 1, kind: input, shape index: {}]   ;;  %s1373_s2 = inlined_call_operand.vmem [shape: f32[1,512], index: 2, kind: input, shape index: {}]   ;;  %s1374_s3 = inlined_call_operand.vmem [shape: f32[16,512], index: 3, kind: output, shape index: {}]  }
   0x1   :  { %s1149_s14 = smov 0   ;;  %s1151_s15 = smov 0  }
   0x2   :  { %s1153_s16 = smov 0  }
   0x3 LB: > { %s28_s17 = sadd.s32 1, %s1119_s15  ;;  %s856_s18 = sadd.s32 4294967295, %s1123_s16   ;;  %s1123_s16 = sphi %s1153_s16, %s13_s16   ;;  %s1119_s15 = sphi %s1151_s15, %s1379_s15   ;;  %s1115_s14 = sphi %s1149_s14, %s1378_s14   ;;  %s1111_s13 = sphi %s1147_s13, %s1377_s13   ;;  %s1107_s12 = sphi %s1145_s12, %s1376_s12  }
   0x4   : > { %p30_p0 = scmp.ge.s32.totalorder %s28_s17, 2  ;;  %p76_p1 = scmp.ne.s32.totalorder %s1111_s13, %s1107_s12 }
   0x5   : > { %p77_p2 = scmp.eq.s32.totalorder %s1123_s16, 0  ;;  %p134_p4 = scmp.eq.s32.totalorder %s856_s18, 1 }
   0x6   : > { %s1381_s17 = smov (%p30_p0, %s28_s17), 0  ;;  %s69_s20 = sadd.s32 1, %s1111_s13 }
   0x7   : > { %p78_p3 = por %p77_p2, %p76_p1  ;;  %s65_s19 = ssub.s32 %s1119_s15, %s1381_s17 }
   0x8   : > { %p67_p5 = scmp.eq.s32.totalorder %s65_s19, 0  ;;  %p1180_p6 = por %p134_p4, %p76_p1 }
   0x9   : > { %p860_p7 = scmp.ge.s32.totalorder %s1123_s16, 2 }
   0xa   : > { %s1185_s22 = scalar_select %p67_p5, %s1111_s13, %s69_s20  }
   0xb   : > { %171 = sbr.rel (%p860_p7) target bundleno = 52 (0x34), region = 20 }
  0x10   : > { %174 = sbr.rel (!%p78_p3) target bundleno = 52 (0x34), region = 24  ;;  %s176_s23 = sand.u32 (%p78_p3), 1, %s1111_s13  }
  0x11   : > { %s1009_s24 = sshll.u32 (%p78_p3), %s1119_s15, 3  ;;  %s861_s25 = sshll.u32 (%p78_p3), %s176_s23, 8 }
  0x12   : > { %s1193_s28 = scalar_lea.vmem (%p78_p3), %s1372_s1, %s1009_s24  ;;  %s1198_s29 = scalar_lea.vmem (%p78_p3), [#allocation3], %s861_s25 }
  0x13   : > { %v275_v0 = vld [vmem:[%s1193_s28] sm:$0xff] (%p78_p3)  ;;  %v277_v1 = vld [vmem:[%s1193_s28 + $0x10] sm:$0xff] (%p78_p3) }
  0x14   : > { %v279_v2 = vld [vmem:[%s1193_s28 + $0x20] sm:$0xff] (%p78_p3)  ;;  %276 = vst [vmem:[%s1198_s29] sm:$0xff] (%p78_p3), %v275_v0  ;;  %v281_v3 = vld [vmem:[%s1193_s28 + $0x30] sm:$0xff] (%p78_p3) }
  0x15   : > { %278 = vst [vmem:[%s1198_s29 + $0x8] sm:$0xff] %v277_v1  ;;  %v283_v4 = vld [vmem:[%s1193_s28 + $0x40] sm:$0xff]  ;;  %v285_v5 = vld [vmem:[%s1193_s28 + $0x50] sm:$0xff] }
  0x16   : > { %280 = vst [vmem:[%s1198_s29 + $0x10] sm:$0xff] %v279_v2  ;;  %v287_v6 = vld [vmem:[%s1193_s28 + $0x60] sm:$0xff]  ;;  %v289_v7 = vld [vmem:[%s1193_s28 + $0x70] sm:$0xff] }
  0x17   : > { %282 = vst [vmem:[%s1198_s29 + $0x18] sm:$0xff] %v281_v3  ;;  %v291_v8 = vld [vmem:[%s1193_s28 + $0x80] sm:$0xff]  ;;  %v293_v9 = vld [vmem:[%s1193_s28 + $0x90] sm:$0xff] }
  0x18   : > { %284 = vst [vmem:[%s1198_s29 + $0x20] sm:$0xff] %v283_v4  ;;  %v295_v10 = vld [vmem:[%s1193_s28 + $0xa0] sm:$0xff]  ;;  %v297_v11 = vld [vmem:[%s1193_s28 + $0xb0] sm:$0xff] }
  0x19   : > { %286 = vst [vmem:[%s1198_s29 + $0x28] sm:$0xff] %v285_v5  ;;  %v299_v12 = vld [vmem:[%s1193_s28 + $0xc0] sm:$0xff]  ;;  %v301_v13 = vld [vmem:[%s1193_s28 + $0xd0] sm:$0xff] }
  0x1a   : > { %288 = vst [vmem:[%s1198_s29 + $0x30] sm:$0xff] %v287_v6  ;;  %v303_v14 = vld [vmem:[%s1193_s28 + $0xe0] sm:$0xff]  ;;  %v305_v15 = vld [vmem:[%s1193_s28 + $0xf0] sm:$0xff] }
  0x1b   : > { %290 = vst [vmem:[%s1198_s29 + $0x38] sm:$0xff] %v289_v7  ;;  %v307_v16 = vld [vmem:[%s1193_s28 + $0x100] sm:$0xff]  ;;  %v309_v17 = vld [vmem:[%s1193_s28 + $0x110] sm:$0xff] }
  0x1c   : > { %292 = vst [vmem:[%s1198_s29 + $0x40] sm:$0xff] %v291_v8  ;;  %v311_v18 = vld [vmem:[%s1193_s28 + $0x120] sm:$0xff]  ;;  %v313_v19 = vld [vmem:[%s1193_s28 + $0x130] sm:$0xff] }
  0x1d   : > { %294 = vst [vmem:[%s1198_s29 + $0x48] sm:$0xff] %v293_v9  ;;  %v315_v20 = vld [vmem:[%s1193_s28 + $0x140] sm:$0xff]  ;;  %v317_v21 = vld [vmem:[%s1193_s28 + $0x150] sm:$0xff] }
  0x1e   : > { %296 = vst [vmem:[%s1198_s29 + $0x50] sm:$0xff] %v295_v10  ;;  %v319_v22 = vld [vmem:[%s1193_s28 + $0x160] sm:$0xff]  ;;  %v321_v23 = vld [vmem:[%s1193_s28 + $0x170] sm:$0xff] }
  0x1f   : > { %298 = vst [vmem:[%s1198_s29 + $0x58] sm:$0xff] %v297_v11  ;;  %v323_v24 = vld [vmem:[%s1193_s28 + $0x180] sm:$0xff]  ;;  %v325_v25 = vld [vmem:[%s1193_s28 + $0x190] sm:$0xff] }
  0x20   : > { %300 = vst [vmem:[%s1198_s29 + $0x60] sm:$0xff] %v299_v12  ;;  %v327_v26 = vld [vmem:[%s1193_s28 + $0x1a0] sm:$0xff]  ;;  %v329_v27 = vld [vmem:[%s1193_s28 + $0x1b0] sm:$0xff] }
  0x21   : > { %302 = vst [vmem:[%s1198_s29 + $0x68] sm:$0xff] %v301_v13  ;;  %v331_v28 = vld [vmem:[%s1193_s28 + $0x1c0] sm:$0xff]  ;;  %v333_v29 = vld [vmem:[%s1193_s28 + $0x1d0] sm:$0xff] }
  0x22   : > { %304 = vst [vmem:[%s1198_s29 + $0x70] sm:$0xff] %v303_v14  ;;  %v335_v30 = vld [vmem:[%s1193_s28 + $0x1e0] sm:$0xff]  ;;  %v337_v31 = vld [vmem:[%s1193_s28 + $0x1f0] sm:$0xff] }
  0x23   : > { %306 = vst [vmem:[%s1198_s29 + $0x78] sm:$0xff] %v305_v15 }
  0x24   : > { %308 = vst [vmem:[%s1198_s29 + $0x80] sm:$0xff] %v307_v16 }
  0x25   : > { %310 = vst [vmem:[%s1198_s29 + $0x88] sm:$0xff] %v309_v17 }
  0x26   : > { %312 = vst [vmem:[%s1198_s29 + $0x90] sm:$0xff] %v311_v18 }
  0x27   : > { %314 = vst [vmem:[%s1198_s29 + $0x98] sm:$0xff] %v313_v19 }
  0x28   : > { %316 = vst [vmem:[%s1198_s29 + $0xa0] sm:$0xff] %v315_v20 }
  0x29   : > { %318 = vst [vmem:[%s1198_s29 + $0xa8] sm:$0xff] %v317_v21 }
  0x2a   : > { %320 = vst [vmem:[%s1198_s29 + $0xb0] sm:$0xff] %v319_v22 }
  0x2b   : > { %322 = vst [vmem:[%s1198_s29 + $0xb8] sm:$0xff] %v321_v23 }
  0x2c   : > { %324 = vst [vmem:[%s1198_s29 + $0xc0] sm:$0xff] %v323_v24 }
  0x2d   : > { %326 = vst [vmem:[%s1198_s29 + $0xc8] sm:$0xff] %v325_v25 }
  0x2e   : > { %328 = vst [vmem:[%s1198_s29 + $0xd0] sm:$0xff] %v327_v26 }
  0x2f   : > { %330 = vst [vmem:[%s1198_s29 + $0xd8] sm:$0xff] %v329_v27 }
  0x30   : > { %332 = vst [vmem:[%s1198_s29 + $0xe0] sm:$0xff] %v331_v28 }
  0x31   : > { %334 = vst [vmem:[%s1198_s29 + $0xe8] sm:$0xff] %v333_v29 }
  0x32   : > { %336 = vst [vmem:[%s1198_s29 + $0xf0] sm:$0xff] %v335_v30 }
  0x33   : > { %338 = vst [vmem:[%s1198_s29 + $0xf8] sm:$0xff] %v337_v31 }
  0x34 PF: > { %p864_p8 = scmp.ge.s32.totalorder %s1123_s16, 1  ;;  %p351_p9 = scmp.lt.s32.totalorder %s1123_s16, 3 }
  0x36   : > { %p352_p10 = pnand %p864_p8, %p351_p9 }
  0x37   : > { %s358_s30 = sand.u32 (!%p352_p10), 1, %s1107_s12   ;;  %s867_s20 = sshll.u32 (!%p352_p10), %s1115_s14, 1 }
  0x38   : > { %355 = sbr.rel (%p352_p10) target bundleno = 250 (0xfa), region = 66  ;;  %s865_s4 = sshll.u32 (!%p352_p10), %s358_s30, 8 }
  0x39   : > { %s1266_s5 = scalar_lea.vmem (!%p352_p10), [#allocation3], %s865_s4  ;;  %p409_p11 = scmp.lt.s32.totalorder (!%p352_p10), %s867_s20, 3 }
  0x3a   : > { %s866_s26 = sshll.u32 (!%p352_p10), %s358_s30, 5 }
  0x3b   : > { %s393_s27 = scalar_lea.vmem (!%p352_p10), [#allocation4], %s866_s26 }
  0x3d   : > { %v934_v32 = vld [vmem:[%s1266_s5 + $0x70] sm:$0xf]  ;;  %v1027_v33 = vld [vmem:[%s1266_s5 + $0x74] sm:$0xf0]  ;;  %v1026_v37 = vld [vmem:[%s1266_s5 + $0x74] sm:$0xf] }
  0x3e   : > { %v998_v34 = vld [vmem:[%s1266_s5 + $0xf0] sm:$0xf]  ;;  %v935_v35 = vor.u32 %v1027_v33, %v934_v32  ;;  %v1043_v36 = vld [vmem:[%s1266_s5 + $0xf4] sm:$0xf0]  ;;  %v936_v38 = vld [vmem:[%s1266_s5 + $0x78] sm:$0xf0] }
  0x3f   : > { %v999_v39 = vor.u32 %v1043_v36, %v998_v34  ;;  %v939_v40 = vor.u32 %v1026_v37, %v936_v38  ;;  %v1042_v41 = vld [vmem:[%s1266_s5 + $0xf4] sm:$0xf]  ;;  %v1000_v42 = vld [vmem:[%s1266_s5 + $0xf8] sm:$0xf0]  ;;  %v926_v43 = vld [vmem:[%s1266_s5 + $0x60] sm:$0xf] }
  0x40   : > { %631 = vmatpush.bf16.msra.mxu0 %v935_v35  ;;  %v1003_v44 = vor.u32 %v1042_v41, %v1000_v42  ;;  %v1025_v45 = vld [vmem:[%s1266_s5 + $0x64] sm:$0xf0]  ;;  %v990_v46 = vld [vmem:[%s1266_s5 + $0xe0] sm:$0xf]  ;;  %v1024_v50 = vld [vmem:[%s1266_s5 + $0x64] sm:$0xf] }
  0x41   : > { %v1041_v47 = vld [vmem:[%s1266_s5 + $0xe4] sm:$0xf0]  ;;  %645 = vmatpush.bf16.msra.mxu1 %v999_v39  ;;  %659 = vmatpush.bf16.msra.mxu2 %v939_v40  ;;  %v927_v48 = vor.u32 %v1025_v45, %v926_v43  ;;  %v928_v51 = vld [vmem:[%s1266_s5 + $0x68] sm:$0xf0]  ;;  %v1040_v52 = vld [vmem:[%s1266_s5 + $0xe4] sm:$0xf] }
  0x42   : > { %v991_v49 = vor.u32 %v1041_v47, %v990_v46  ;;  %673 = vmatpush.bf16.msra.mxu3 %v1003_v44  ;;  %v931_v53 = vor.u32 %v1024_v50, %v928_v51  ;;  %v992_v54 = vld [vmem:[%s1266_s5 + $0xe8] sm:$0xf0]  ;;  %v918_v55 = vld [vmem:[%s1266_s5 + $0x50] sm:$0xf]  ;;  %v1023_v56 = vld [vmem:[%s1266_s5 + $0x54] sm:$0xf0] }
  0x43   : > { %v995_v57 = vor.u32 %v1040_v52, %v992_v54  ;;  %v982_v58 = vld [vmem:[%s1266_s5 + $0xd0] sm:$0xf]  ;;  %v1039_v59 = vld [vmem:[%s1266_s5 + $0xd4] sm:$0xf0]  ;;  %v1022_v60 = vld [vmem:[%s1266_s5 + $0x54] sm:$0xf]  ;;  %v919_v61 = vor.u32 %v1023_v56, %v918_v55 }
  0x44   : > { %632 = vmatpush.bf16.msra.mxu0 %v927_v48  ;;  %v920_v62 = vld [vmem:[%s1266_s5 + $0x58] sm:$0xf0]  ;;  %v1038_v63 = vld [vmem:[%s1266_s5 + $0xd4] sm:$0xf]  ;;  %v983_v1 = vor.u32 %v1039_v59, %v982_v58  ;;  %v910_v3 = vld [vmem:[%s1266_s5 + $0x40] sm:$0xf] }
  0x45   : > { %v984_v0 = vld [vmem:[%s1266_s5 + $0xd8] sm:$0xf0]  ;;  %646 = vmatpush.bf16.msra.mxu1 %v991_v49  ;;  %660 = vmatpush.bf16.msra.mxu2 %v931_v53  ;;  %v923_v2 = vor.u32 %v1022_v60, %v920_v62  ;;  %v1021_v4 = vld [vmem:[%s1266_s5 + $0x44] sm:$0xf0]  ;;  %v974_v5 = vld [vmem:[%s1266_s5 + $0xc0] sm:$0xf] }
  0x46   : > { %674 = vmatpush.bf16.msra.mxu3 %v995_v57  ;;  %v987_v6 = vor.u32 %v1038_v63, %v984_v0  ;;  %v1037_v7 = vld [vmem:[%s1266_s5 + $0xc4] sm:$0xf0]  ;;  %v1020_v8 = vld [vmem:[%s1266_s5 + $0x44] sm:$0xf]  ;;  %v912_v9 = vld [vmem:[%s1266_s5 + $0x48] sm:$0xf0]  ;;  %v911_v12 = vor.u32 %v1021_v4, %v910_v3 }
  0x47   : > { %v1036_v10 = vld [vmem:[%s1266_s5 + $0xc4] sm:$0xf]  ;;  %v976_v11 = vld [vmem:[%s1266_s5 + $0xc8] sm:$0xf0]  ;;  %v975_v13 = vor.u32 %v1037_v7, %v974_v5  ;;  %v915_v14 = vor.u32 %v1020_v8, %v912_v9  ;;  %v902_v15 = vld [vmem:[%s1266_s5 + $0x30] sm:$0xf] }
  0x48   : > { %633 = vmatpush.bf16.msra.mxu0 %v919_v61  ;;  %v1019_v16 = vld [vmem:[%s1266_s5 + $0x34] sm:$0xf0]  ;;  %v966_v17 = vld [vmem:[%s1266_s5 + $0xb0] sm:$0xf]  ;;  %v979_v18 = vor.u32 %v1036_v10, %v976_v11  ;;  %v1018_v20 = vld [vmem:[%s1266_s5 + $0x34] sm:$0xf] }
  0x49   : > { %647 = vmatpush.bf16.msra.mxu1 %v983_v1  ;;  %661 = vmatpush.bf16.msra.mxu2 %v923_v2  ;;  %v1035_v19 = vld [vmem:[%s1266_s5 + $0xb4] sm:$0xf0]  ;;  %v904_v21 = vld [vmem:[%s1266_s5 + $0x38] sm:$0xf0]  ;;  %v1034_v22 = vld [vmem:[%s1266_s5 + $0xb4] sm:$0xf]  ;;  %v903_v24 = vor.u32 %v1019_v16, %v902_v15 }
  0x4a   : > { %675 = vmatpush.bf16.msra.mxu3 %v987_v6  ;;  %v968_v23 = vld [vmem:[%s1266_s5 + $0xb8] sm:$0xf0]  ;;  %v967_v25 = vor.u32 %v1035_v19, %v966_v17  ;;  %v907_v26 = vor.u32 %v1018_v20, %v904_v21  ;;  %v894_v27 = vld [vmem:[%s1266_s5 + $0x20] sm:$0xf]  ;;  %v1017_v28 = vld [vmem:[%s1266_s5 + $0x24] sm:$0xf0] }
  0x4b   : > { %v958_v29 = vld [vmem:[%s1266_s5 + $0xa0] sm:$0xf]  ;;  %v971_v30 = vor.u32 %v1034_v22, %v968_v23  ;;  %v1033_v31 = vld [vmem:[%s1266_s5 + $0xa4] sm:$0xf0]  ;;  %v1016_v32 = vld [vmem:[%s1266_s5 + $0x24] sm:$0xf]  ;;  %v895_v36 = vor.u32 %v1017_v28, %v894_v27 }
  0x4c   : > { %634 = vmatpush.bf16.msra.mxu0 %v911_v12  ;;  %v896_v33 = vld [vmem:[%s1266_s5 + $0x28] sm:$0xf0]  ;;  %v1032_v34 = vld [vmem:[%s1266_s5 + $0xa4] sm:$0xf]  ;;  %v959_v37 = vor.u32 %v1033_v31, %v958_v29  ;;  %v886_v39 = vld [vmem:[%s1266_s5 + $0x10] sm:$0xf] }
  0x4d   : > { %648 = vmatpush.bf16.msra.mxu1 %v975_v13  ;;  %662 = vmatpush.bf16.msra.mxu2 %v915_v14  ;;  %v960_v35 = vld [vmem:[%s1266_s5 + $0xa8] sm:$0xf0]  ;;  %v899_v38 = vor.u32 %v1016_v32, %v896_v33  ;;  %v1015_v40 = vld [vmem:[%s1266_s5 + $0x14] sm:$0xf0]  ;;  %v950_v41 = vld [vmem:[%s1266_s5 + $0x90] sm:$0xf] }
  0x4e   : > { %676 = vmatpush.bf16.msra.mxu3 %v979_v18  ;;  %v963_v42 = vor.u32 %v1032_v34, %v960_v35  ;;  %v1031_v43 = vld [vmem:[%s1266_s5 + $0x94] sm:$0xf0]  ;;  %v1014_v44 = vld [vmem:[%s1266_s5 + $0x14] sm:$0xf]  ;;  %v888_v45 = vld [vmem:[%s1266_s5 + $0x18] sm:$0xf0]  ;;  %v887_v48 = vor.u32 %v1015_v40, %v886_v39 }
  0x4f   : > { %v1030_v46 = vld [vmem:[%s1266_s5 + $0x94] sm:$0xf]  ;;  %v952_v47 = vld [vmem:[%s1266_s5 + $0x98] sm:$0xf0]  ;;  %v951_v49 = vor.u32 %v1031_v43, %v950_v41  ;;  %v891_v50 = vor.u32 %v1014_v44, %v888_v45  ;;  %v878_v51 = vld [vmem:[%s1266_s5] sm:$0xf] }
  0x50   : > { %635 = vmatpush.bf16.msra.mxu0 %v903_v24  ;;  %v1013_v52 = vld [vmem:[%s1266_s5 + $0x4] sm:$0xf0]  ;;  %v942_v53 = vld [vmem:[%s1266_s5 + $0x80] sm:$0xf]  ;;  %v955_v54 = vor.u32 %v1030_v46, %v952_v47  ;;  %v1012_v56 = vld [vmem:[%s1266_s5 + $0x4] sm:$0xf] }
  0x51   : > { %649 = vmatpush.bf16.msra.mxu1 %v967_v25  ;;  %663 = vmatpush.bf16.msra.mxu2 %v907_v26  ;;  %v1029_v55 = vld [vmem:[%s1266_s5 + $0x84] sm:$0xf0]  ;;  %v880_v57 = vld [vmem:[%s1266_s5 + $0x8] sm:$0xf0]  ;;  %v1028_v58 = vld [vmem:[%s1266_s5 + $0x84] sm:$0xf]  ;;  %v879_v60 = vor.u32 %v1013_v52, %v878_v51 }
  0x52   : > { %677 = vmatpush.bf16.msra.mxu3 %v971_v30  ;;  %v944_v59 = vld [vmem:[%s1266_s5 + $0x88] sm:$0xf0]  ;;  %v870_v61 = vld [vmem:[%s1371_s0] sm:$0xf]  ;;  %v1011_v62 = vld [vmem:[%s1371_s0 + $0x4] sm:$0xf0]  ;;  %v943_v63 = vor.u32 %v1029_v55, %v942_v53  ;;  %v883_v0 = vor.u32 %v1012_v56, %v880_v57 }
  0x53   : > { %v1010_v1 = vld [vmem:[%s1371_s0 + $0x4] sm:$0xf]  ;;  %v872_v2 = vld [vmem:[%s1371_s0 + $0x8] sm:$0xf0]  ;;  %v947_v3 = vor.u32 %v1028_v58, %v944_v59  ;;  %v871_v4 = vor.u32 %v1011_v62, %v870_v61  ;;  %s1383_s20 = smov (!%p409_p11, %s867_s20), 3  ;;  %s1044_s12 = sshll.u32 (%p1180_p6), %s1115_s14, 4 }
  0x54   : > { %636 = vmatpush.bf16.msra.mxu0 %v895_v36  ;;  %v875_v5 = vor.u32 %v1010_v1, %v872_v2  ;;  %s411_s25 = scalar_lea.vmem %s1373_s2, %s1383_s20  ;;  %s728_s30 = scalar_lea.vmem (%p1180_p6), %s1374_s3, %s1044_s12 }
  0x55   : > { %650 = vmatpush.bf16.msra.mxu1 %v959_v37  ;;  %664 = vmatpush.bf16.msra.mxu2 %v899_v38  ;;  %v702_v6 = vld [vmem:[%s411_s25] sm:$0x3] }
  0x56   : > { %678 = vmatpush.bf16.msra.mxu3 %v963_v42  ;;  %v704_v8 = vperm.slane %v702_v6, 0  ;;  %v705_v13 = vperm.slane %v702_v6, 1 }
  0x58   : > { %637 = vmatpush.bf16.msra.mxu0 %v887_v48 }
  0x59   : > { %651 = vmatpush.bf16.msra.mxu1 %v951_v49  ;;  %665 = vmatpush.bf16.msra.mxu2 %v891_v50 }
  0x5a   : > { %679 = vmatpush.bf16.msra.mxu3 %v955_v54 }
  0x5c   : > { %638 = vmatpush.bf16.msra.mxu0 %v879_v60 }
  0x5d   : > { %652 = vmatpush.bf16.msra.mxu1 %v943_v63  ;;  %666 = vmatpush.bf16.msra.mxu2 %v883_v0 }
  0x5e   : > { %680 = vmatpush.bf16.msra.mxu3 %v947_v3 }
  0x5f   : > { %639 = vmatmul.bf16.vlgmr.msra.gmra.mxu0 %v871_v4 }
  0x60   : > { %653 = vmatmul.bf16.vlgmr.msra.gmra.mxu1 %v875_v5  ;;  %667 = vmatmul.bf16.vlgmr.msra.gmra.mxu2 %v871_v4 }
  0x61   : > { %681 = vmatmul.bf16.vlgmr.msra.gmra.mxu3 %v875_v5 }
  0xdc   : > { %v640_v7 = vpop.f32.mrf.mxu0 }
  0xdd   : > { %v654_v9 = vpop.f32.mrf.mxu1 }
  0xde   : > { %v655_v10 = vadd.f32 %v654_v9, %v640_v7 }
  0xe0   : > { %v708_v11 = vadd.f32 %v704_v8, %v655_v10 }
  0xe2   : > { %712 = vst [vmem:[%s393_s27] sm:$0xff] %v708_v11 }
  0xe3   : > { %v668_v12 = vpop.f32.mrf.mxu2 }
  0xe4   : > { %v682_v14 = vpop.f32.mrf.mxu3  ;;  %v642_v15 = vpop.f32.mrf.mxu0 }
  0xe5   : > { %v683_v16 = vadd.f32 %v682_v14, %v668_v12  ;;  %v656_v17 = vpop.f32.mrf.mxu1 }
  0xe6   : > { %v657_v18 = vadd.f32 %v656_v17, %v642_v15 }
  0xe7   : > { %v709_v19 = vadd.f32 %v705_v13, %v683_v16 }
  0xe8   : > { %v710_v20 = vadd.f32 %v704_v8, %v657_v18 }
  0xe9   : > { %713 = vst [vmem:[%s393_s27 + $0x8] sm:$0xff] %v709_v19  ;;  %v741_v25 = vld [vmem:[%s393_s27] sm:$0xff] (%p1180_p6) }
  0xea   : > { %714 = vst [vmem:[%s393_s27 + $0x10] sm:$0xff] %v710_v20 }
  0xeb   : > { %v670_v21 = vpop.f32.mrf.mxu2  ;;  %742 = vst [vmem:[%s728_s30] sm:$0xff] (%p1180_p6), %v741_v25 }
  0xec   : > { %v684_v22 = vpop.f32.mrf.mxu3 }
  0xed   : > { %v685_v23 = vadd.f32 %v684_v22, %v670_v21  ;;  %722 = sbr.rel (!%p1180_p6) target bundleno = 250 (0xfa), region = 82 }
  0xef   : > { %v711_v24 = vadd.f32 %v705_v13, %v685_v23 }
  0xf0   : > { %v743_v26 = vld [vmem:[%s393_s27 + $0x8] sm:$0xff] (%p1180_p6) }
  0xf1   : > { %715 = vst [vmem:[%s393_s27 + $0x18] sm:$0xff] %v711_v24  ;;  %v745_v27 = vld [vmem:[%s393_s27 + $0x10] sm:$0xff] (%p1180_p6) }
  0xf2   : > { %744 = vst [vmem:[%s728_s30 + $0x8] sm:$0xff] %v743_v26 }
  0xf3   : > { %746 = vst [vmem:[%s728_s30 + $0x20] sm:$0xff] %v745_v27 }
  0xf8   : > { %v747_v28 = vld [vmem:[%s393_s27 + $0x18] sm:$0xff] }
  0xf9   : > { %748 = vst [vmem:[%s728_s30 + $0x28] sm:$0xff] %v747_v28 }
  0xfa PF: > { %s13_s16 = sadd.s32 1, %s1123_s16   ;;  %s1376_s12 = smov %s1111_s13 }
  0xfb   : > { %p10_p12 = scmp.ge.s32.totalorder %s13_s16, 4   ;;  %s1377_s13 = smov %s1185_s22 }
  0xfc   : > { %s1378_s14 = smov %s1119_s15  ;;  %s1379_s15 = smov %s1381_s17 }
  0xfd   :  { %12 = sbr.rel (!%p10_p12) target bundleno = 3 (0x3), region = 142 }

// kernel: _lambda_.60
= control target key start
LH: loop header
LB: loop body
LE: loop exit
PB: predicated region body
PF: predicated region fallthrough
CT: control target
= control target key end

     0   :  { %s109_s0 = inlined_call_operand.vmem [shape: f32[8,1,512], index: 0, kind: input, shape index: {}]   ;;  %s110_s1 = inlined_call_operand.vmem [shape: f32[8,512], index: 1, kind: output, shape index: {}]  }
   0x1   :  { %v8_v0 = vld [vmem:[%s109_s0] sm:$0xf]  ;;  %v9_v1 = vld [vmem:[%s109_s0 + $0x4] sm:$0xf]  ;;  %v10_v2 = vld [vmem:[%s109_s0 + $0x8] sm:$0xf] }
   0x2   :  { %32 = vst [vmem:[#allocation1] ss:$9 sm:$0xff] %v8_v0  ;;  %v11_v3 = vld [vmem:[%s109_s0 + $0xc] sm:$0xf]  ;;  %v12_v4 = vld [vmem:[%s109_s0 + $0x10] sm:$0xf] }
   0x3   :  { %34 = vst [vmem:[#allocation1 + $0x1] ss:$9 sm:$0xff] %v9_v1  ;;  %v13_v5 = vld [vmem:[%s109_s0 + $0x14] sm:$0xf]  ;;  %v14_v6 = vld [vmem:[%s109_s0 + $0x18] sm:$0xf] }
   0x4   :  { %36 = vst [vmem:[#allocation1 + $0x2] ss:$9 sm:$0xff] %v10_v2  ;;  %v15_v7 = vld [vmem:[%s109_s0 + $0x1c] sm:$0xf] }
   0x5   :  { %38 = vst [vmem:[#allocation1 + $0x3] ss:$9 sm:$0xff] %v11_v3 }
   0x6   :  { %40 = vst [vmem:[#allocation1 + $0x4] ss:$9 sm:$0xff] %v12_v4 }
   0x7   :  { %42 = vst [vmem:[#allocation1 + $0x5] ss:$9 sm:$0xff] %v13_v5 }
   0x8   :  { %44 = vst [vmem:[#allocation1 + $0x6] ss:$9 sm:$0xff] %v14_v6 }
   0x9   :  { %46 = vst [vmem:[#allocation1 + $0x7] ss:$9 sm:$0xff] %v15_v7 }
  0x10   :  { %v47_v8 = vld [vmem:[#allocation1] sm:$0xff]  ;;  %v48_v9 = vld [vmem:[#allocation1 + $0x9] sm:$0xff]  ;;  %v49_v10 = vld [vmem:[#allocation1 + $0x12] sm:$0xff] }
  0x11   :  { %55 = vst [vmem:[%s110_s1] sm:$0xff] %v47_v8  ;;  %v50_v11 = vld [vmem:[#allocation1 + $0x1b] sm:$0xff] }
  0x12   :  { %56 = vst [vmem:[%s110_s1 + $0x8] sm:$0xff] %v48_v9 }
  0x13   :  { %57 = vst [vmem:[%s110_s1 + $0x10] sm:$0xff] %v49_v10 }
  0x14   :  { %58 = vst [vmem:[%s110_s1 + $0x18] sm:$0xff] %v50_v11 }

// kernel: _lambda_.57
= control target key start
LH: loop header
LB: loop body
LE: loop exit
PB: predicated region body
PF: predicated region fallthrough
CT: control target
= control target key end

     0   :  { %s2299_s0 = inlined_call_operand.vmem [shape: bf16[16,4608], index: 0, kind: input, shape index: {}]   ;;  %s2300_s1 = inlined_call_operand.vmem [shape: bf16[4608,512], index: 1, kind: input, shape index: {}]   ;;  %s2301_s2 = inlined_call_operand.vmem [shape: f32[1,512], index: 2, kind: input, shape index: {}]   ;;  %s2302_s3 = inlined_call_operand.vmem [shape: f32[16,512], index: 3, kind: output, shape index: {}]  }
   0x1   :  { %2304 = sst [smem:[#allocation7_spill]] %s2299_s0 }
   0x2   :  { %2305 = sst [smem:[#allocation8_spill]] %s2300_s1 }
   0x3   :  { %s1829_s12 = smov 0   ;;  %s1831_s13 = smov 0  }
   0x4   :  { %s1833_s14 = smov 0   ;;  %s1835_s15 = smov 0  }
   0x5   :  { %s1837_s16 = smov 0   ;;  %s1839_s17 = smov 0  }
   0x6   :  { %s1841_s18 = smov 0   ;;  %s1843_s19 = smov 0  }
   0x7   :  { %s1845_s20 = smov 0   ;;  %s1847_s21 = smov 0  }
   0x8   :  { %s1849_s22 = smov 0  }
   0x9 LB: > { %s1264_s23 = sadd.s32 4294967295, %s1806_s22   ;;  %s25_s24 = sadd.s32 1, %s1798_s20  ;;  %s1806_s22 = sphi %s1849_s22, %s13_s22   ;;  %s1802_s21 = sphi %s1847_s21, %s2322_s21   ;;  %s1798_s20 = sphi %s1845_s20, %s2321_s20   ;;  %s1794_s19 = sphi %s1843_s19, %s2320_s19   ;;  %s1790_s18 = sphi %s1841_s18, %s2319_s18   ;;  %s1786_s17 = sphi %s1839_s17, %s2318_s17   ;;  %s1782_s16 = sphi %s1837_s16, %s2317_s16   ;;  %s1778_s15 = sphi %s1835_s15, %s2316_s15   ;;  %s1774_s14 = sphi %s1833_s14, %s2315_s14   ;;  %s1770_s13 = sphi %s1831_s13, %s2314_s13   ;;  %s1766_s12 = sphi %s1829_s12, %s2313_s12  }
   0xa   : > { %p26_p0 = scmp.ge.s32.totalorder %s25_s24, 9  ;;  %s28_s25 = sadd.s32 1, %s1802_s21 }
   0xb   : > { %s41_s26 = sadd.s32 1, %s1786_s17  ;;  %p48_p1 = scmp.ne.s32.totalorder %s1786_s17, %s1782_s16 }
   0xc   : > { %s2324_s24 = smov (%p26_p0, %s25_s24), 0  ;;  %s2326_s25 = smov (!%p26_p0, %s28_s25), %s1802_s21 }
   0xd   : > { %s37_s27 = ssub.s32 %s1798_s20, %s2324_s24  ;;  %p49_p2 = scmp.eq.s32.totalorder %s1806_s22, 0 }
   0xe   : > { %p30_p3 = scmp.ge.s32.totalorder %s2326_s25, 2  ;;  %p39_p4 = scmp.eq.s32.totalorder %s37_s27, 0 }
   0xf   : > { %p1896_p5 = por %p49_p2, %p48_p1  ;;  %s69_s29 = sadd.s32 1, %s1778_s15 }
  0x10   : > { %s2328_s25 = smov (%p30_p3, %s2326_s25), 0  ;;  %p76_p6 = scmp.ne.s32.totalorder %s1778_s15, %s1774_s14 }
  0x11   : > { %2307 = sst [smem:[#allocation6_spill]] %s2328_s25  ;;  %s65_s4 = ssub.s32 %s1802_s21, %s2328_s25 }
  0x12   : > { %s1904_s30 = scalar_select %p39_p4, %s1786_s17, %s41_s26  }
  0x13   : > { %s66_s5 = sor.u32 %s65_s4, %s37_s27  ;;  %p121_p7 = scmp.eq.s32.totalorder %s65_s4, 0 }
  0x14   : > { %p67_p8 = scmp.eq.s32.totalorder %s66_s5, 0  ;;  %p1910_p9 = por %p76_p6, %p49_p2 }
  0x15   : > { %s123_s7 = sadd.s32 1, %s1770_s13  ;;  %p133_p10 = scmp.ne.s32.totalorder %s1770_s13, %s1766_s12 }
  0x16   : > { %s1918_s8 = scalar_select %p67_p8, %s1778_s15, %s69_s29  }
  0x17   : > { %s1921_s9 = scalar_select %p121_p7, %s1770_s13, %s123_s7  }
  0x18   : > { %p134_p11 = scmp.eq.s32.totalorder %s1264_s23, 17  ;;  %p1267_p13 = scmp.ge.s32.totalorder %s1806_s22, 18 }
  0x1a   : > { %p1923_p12 = por %p134_p11, %p133_p10  ;;  %156 = sbr.rel (%p1267_p13) target bundleno = 119 (0x77), region = 16 }
  0x1f   : > { %159 = sbr.rel (!%p1896_p5) target bundleno = 45 (0x2d), region = 20  ;;  %s161_s11 = sand.u32 (%p1896_p5), 1, %s1786_s17  }
  0x20   : > { %s1560_s26 = sshll.u32 (%p1896_p5), %s1798_s20, 4  ;;  %s1268_s27 = sshll.u32 (%p1896_p5), %s161_s11, 5 }
  0x21   : > { %s2310_s0 = sld [smem:[#allocation7_spill]] (%p1896_p5)  ;;  %s163_s23 = scalar_lea.vmem (%p1896_p5), [#allocation3], %s1268_s27 }
  0x27   : > { %s169_s5 = scalar_lea.vmem %s2310_s0, %s1560_s26 }
  0x28   : > { %v182_v0 = vld [vmem:[%s169_s5] sm:$0xff]  ;;  %v184_v1 = vld [vmem:[%s169_s5 + $0x8] sm:$0xff]  ;;  %v186_v2 = vld [vmem:[%s169_s5 + $0x90] sm:$0xff] }
  0x29   : > { %183 = vst [vmem:[%s163_s23] sm:$0xff] %v182_v0  ;;  %v188_v3 = vld [vmem:[%s169_s5 + $0x98] sm:$0xff] }
  0x2a   : > { %185 = vst [vmem:[%s163_s23 + $0x8] sm:$0xff] %v184_v1 }
  0x2b   : > { %187 = vst [vmem:[%s163_s23 + $0x10] sm:$0xff] %v186_v2 }
  0x2c   : > { %189 = vst [vmem:[%s163_s23 + $0x18] sm:$0xff] %v188_v3 }
  0x2d PF: > { %195 = sbr.rel (!%p1910_p9) target bundleno = 119 (0x77), region = 43  ;;  %s197_s28 = sand.u32 (%p1910_p9), 1, %s1778_s15  }
  0x2e   : > { %s1273_s7 = sshll.u32 (%p1910_p9), %s1802_s21, 1  ;;  %s1271_s11 = sshll.u32 (%p1910_p9), %s197_s28, 9 }
  0x2f   : > { %s1561_s26 = sshll.u32 (%p1910_p9), %s1798_s20, 8  ;;  %s2311_s1 = sld [smem:[#allocation8_spill]] (%p1910_p9) }
  0x30   : > { %s203_s29 = sadd.s32 (%p1910_p9), %s1561_s26, %s1273_s7  ;;  %s1948_s6 = scalar_lea.vmem (%p1910_p9), [#allocation4], %s1271_s11 }
  0x31   : > { %s1275_s4 = sshll.u32 (%p1910_p9), %s203_s29, 2 }
  0x35   : > { %s1943_s5 = scalar_lea.vmem %s2311_s1, %s1275_s4 }
  0x36   : > { %v360_v4 = vld [vmem:[%s1943_s5] sm:$0xff]  ;;  %v362_v5 = vld [vmem:[%s1943_s5 + $0x10] sm:$0xff] }
  0x37   : > { %v364_v6 = vld [vmem:[%s1943_s5 + $0x20] sm:$0xff]  ;;  %361 = vst [vmem:[%s1948_s6] sm:$0xff] %v360_v4  ;;  %v366_v7 = vld [vmem:[%s1943_s5 + $0x30] sm:$0xff] }
  0x38   : > { %363 = vst [vmem:[%s1948_s6 + $0x8] sm:$0xff] %v362_v5  ;;  %v368_v8 = vld [vmem:[%s1943_s5 + $0x40] sm:$0xff]  ;;  %v370_v9 = vld [vmem:[%s1943_s5 + $0x50] sm:$0xff] }
  0x39   : > { %365 = vst [vmem:[%s1948_s6 + $0x10] sm:$0xff] %v364_v6  ;;  %v372_v10 = vld [vmem:[%s1943_s5 + $0x60] sm:$0xff]  ;;  %v374_v11 = vld [vmem:[%s1943_s5 + $0x70] sm:$0xff] }
  0x3a   : > { %367 = vst [vmem:[%s1948_s6 + $0x18] sm:$0xff] %v366_v7  ;;  %v376_v12 = vld [vmem:[%s1943_s5 + $0x80] sm:$0xff]  ;;  %v378_v13 = vld [vmem:[%s1943_s5 + $0x90] sm:$0xff] }
  0x3b   : > { %369 = vst [vmem:[%s1948_s6 + $0x20] sm:$0xff] %v368_v8  ;;  %v380_v14 = vld [vmem:[%s1943_s5 + $0xa0] sm:$0xff]  ;;  %v382_v15 = vld [vmem:[%s1943_s5 + $0xb0] sm:$0xff] }
  0x3c   : > { %371 = vst [vmem:[%s1948_s6 + $0x28] sm:$0xff] %v370_v9  ;;  %v384_v16 = vld [vmem:[%s1943_s5 + $0xc0] sm:$0xff]  ;;  %v386_v17 = vld [vmem:[%s1943_s5 + $0xd0] sm:$0xff] }
  0x3d   : > { %373 = vst [vmem:[%s1948_s6 + $0x30] sm:$0xff] %v372_v10  ;;  %v388_v18 = vld [vmem:[%s1943_s5 + $0xe0] sm:$0xff]  ;;  %v390_v19 = vld [vmem:[%s1943_s5 + $0xf0] sm:$0xff] }
  0x3e   : > { %375 = vst [vmem:[%s1948_s6 + $0x38] sm:$0xff] %v374_v11  ;;  %v392_v20 = vld [vmem:[%s1943_s5 + $0x100] sm:$0xff]  ;;  %v394_v21 = vld [vmem:[%s1943_s5 + $0x110] sm:$0xff] }
  0x3f   : > { %377 = vst [vmem:[%s1948_s6 + $0x40] sm:$0xff] %v376_v12  ;;  %v396_v22 = vld [vmem:[%s1943_s5 + $0x120] sm:$0xff]  ;;  %v398_v23 = vld [vmem:[%s1943_s5 + $0x130] sm:$0xff] }
  0x40   : > { %379 = vst [vmem:[%s1948_s6 + $0x48] sm:$0xff] %v378_v13  ;;  %v400_v24 = vld [vmem:[%s1943_s5 + $0x140] sm:$0xff]  ;;  %v402_v25 = vld [vmem:[%s1943_s5 + $0x150] sm:$0xff] }
  0x41   : > { %381 = vst [vmem:[%s1948_s6 + $0x50] sm:$0xff] %v380_v14  ;;  %v404_v26 = vld [vmem:[%s1943_s5 + $0x160] sm:$0xff]  ;;  %v406_v27 = vld [vmem:[%s1943_s5 + $0x170] sm:$0xff] }
  0x42   : > { %383 = vst [vmem:[%s1948_s6 + $0x58] sm:$0xff] %v382_v15  ;;  %v408_v28 = vld [vmem:[%s1943_s5 + $0x180] sm:$0xff]  ;;  %v410_v29 = vld [vmem:[%s1943_s5 + $0x190] sm:$0xff] }
  0x43   : > { %385 = vst [vmem:[%s1948_s6 + $0x60] sm:$0xff] %v384_v16  ;;  %v412_v30 = vld [vmem:[%s1943_s5 + $0x1a0] sm:$0xff]  ;;  %v414_v31 = vld [vmem:[%s1943_s5 + $0x1b0] sm:$0xff] }
  0x44   : > { %387 = vst [vmem:[%s1948_s6 + $0x68] sm:$0xff] %v386_v17  ;;  %v416_v32 = vld [vmem:[%s1943_s5 + $0x1c0] sm:$0xff]  ;;  %v418_v33 = vld [vmem:[%s1943_s5 + $0x1d0] sm:$0xff] }
  0x45   : > { %389 = vst [vmem:[%s1948_s6 + $0x70] sm:$0xff] %v388_v18  ;;  %v420_v34 = vld [vmem:[%s1943_s5 + $0x1e0] sm:$0xff]  ;;  %v422_v35 = vld [vmem:[%s1943_s5 + $0x1f0] sm:$0xff] }
  0x46   : > { %391 = vst [vmem:[%s1948_s6 + $0x78] sm:$0xff] %v390_v19  ;;  %v424_v36 = vld [vmem:[%s1943_s5 + $0x200] sm:$0xff]  ;;  %v426_v37 = vld [vmem:[%s1943_s5 + $0x210] sm:$0xff] }
  0x47   : > { %393 = vst [vmem:[%s1948_s6 + $0x80] sm:$0xff] %v392_v20  ;;  %v428_v38 = vld [vmem:[%s1943_s5 + $0x220] sm:$0xff]  ;;  %v430_v39 = vld [vmem:[%s1943_s5 + $0x230] sm:$0xff] }
  0x48   : > { %395 = vst [vmem:[%s1948_s6 + $0x88] sm:$0xff] %v394_v21  ;;  %v432_v40 = vld [vmem:[%s1943_s5 + $0x240] sm:$0xff]  ;;  %v434_v41 = vld [vmem:[%s1943_s5 + $0x250] sm:$0xff] }
  0x49   : > { %397 = vst [vmem:[%s1948_s6 + $0x90] sm:$0xff] %v396_v22  ;;  %v436_v42 = vld [vmem:[%s1943_s5 + $0x260] sm:$0xff]  ;;  %v438_v43 = vld [vmem:[%s1943_s5 + $0x270] sm:$0xff] }
  0x4a   : > { %399 = vst [vmem:[%s1948_s6 + $0x98] sm:$0xff] %v398_v23  ;;  %v440_v44 = vld [vmem:[%s1943_s5 + $0x280] sm:$0xff]  ;;  %v442_v45 = vld [vmem:[%s1943_s5 + $0x290] sm:$0xff] }
  0x4b   : > { %401 = vst [vmem:[%s1948_s6 + $0xa0] sm:$0xff] %v400_v24  ;;  %v444_v46 = vld [vmem:[%s1943_s5 + $0x2a0] sm:$0xff]  ;;  %v446_v47 = vld [vmem:[%s1943_s5 + $0x2b0] sm:$0xff] }
  0x4c   : > { %403 = vst [vmem:[%s1948_s6 + $0xa8] sm:$0xff] %v402_v25  ;;  %v448_v48 = vld [vmem:[%s1943_s5 + $0x2c0] sm:$0xff]  ;;  %v450_v49 = vld [vmem:[%s1943_s5 + $0x2d0] sm:$0xff] }
  0x4d   : > { %405 = vst [vmem:[%s1948_s6 + $0xb0] sm:$0xff] %v404_v26  ;;  %v452_v50 = vld [vmem:[%s1943_s5 + $0x2e0] sm:$0xff]  ;;  %v454_v51 = vld [vmem:[%s1943_s5 + $0x2f0] sm:$0xff] }
  0x4e   : > { %407 = vst [vmem:[%s1948_s6 + $0xb8] sm:$0xff] %v406_v27  ;;  %v456_v52 = vld [vmem:[%s1943_s5 + $0x300] sm:$0xff]  ;;  %v458_v53 = vld [vmem:[%s1943_s5 + $0x310] sm:$0xff] }
  0x4f   : > { %409 = vst [vmem:[%s1948_s6 + $0xc0] sm:$0xff] %v408_v28  ;;  %v460_v54 = vld [vmem:[%s1943_s5 + $0x320] sm:$0xff]  ;;  %v462_v55 = vld [vmem:[%s1943_s5 + $0x330] sm:$0xff] }
  0x50   : > { %411 = vst [vmem:[%s1948_s6 + $0xc8] sm:$0xff] %v410_v29  ;;  %v464_v56 = vld [vmem:[%s1943_s5 + $0x340] sm:$0xff]  ;;  %v466_v57 = vld [vmem:[%s1943_s5 + $0x350] sm:$0xff] }
  0x51   : > { %413 = vst [vmem:[%s1948_s6 + $0xd0] sm:$0xff] %v412_v30  ;;  %v468_v58 = vld [vmem:[%s1943_s5 + $0x360] sm:$0xff]  ;;  %v470_v59 = vld [vmem:[%s1943_s5 + $0x370] sm:$0xff] }
  0x52   : > { %415 = vst [vmem:[%s1948_s6 + $0xd8] sm:$0xff] %v414_v31  ;;  %v472_v60 = vld [vmem:[%s1943_s5 + $0x380] sm:$0xff]  ;;  %v474_v61 = vld [vmem:[%s1943_s5 + $0x390] sm:$0xff] }
  0x53   : > { %417 = vst [vmem:[%s1948_s6 + $0xe0] sm:$0xff] %v416_v32  ;;  %v476_v62 = vld [vmem:[%s1943_s5 + $0x3a0] sm:$0xff]  ;;  %v478_v63 = vld [vmem:[%s1943_s5 + $0x3b0] sm:$0xff] }
  0x54   : > { %419 = vst [vmem:[%s1948_s6 + $0xe8] sm:$0xff] %v418_v33  ;;  %v480_v0 = vld [vmem:[%s1943_s5 + $0x3c0] sm:$0xff]  ;;  %v482_v1 = vld [vmem:[%s1943_s5 + $0x3d0] sm:$0xff] }
  0x55   : > { %421 = vst [vmem:[%s1948_s6 + $0xf0] sm:$0xff] %v420_v34  ;;  %v484_v2 = vld [vmem:[%s1943_s5 + $0x3e0] sm:$0xff]  ;;  %v486_v3 = vld [vmem:[%s1943_s5 + $0x3f0] sm:$0xff] }
  0x56   : > { %423 = vst [vmem:[%s1948_s6 + $0xf8] sm:$0xff] %v422_v35 }
  0x57   : > { %425 = vst [vmem:[%s1948_s6 + $0x100] sm:$0xff] %v424_v36 }
  0x58   : > { %427 = vst [vmem:[%s1948_s6 + $0x108] sm:$0xff] %v426_v37 }
  0x59   : > { %429 = vst [vmem:[%s1948_s6 + $0x110] sm:$0xff] %v428_v38 }
  0x5a   : > { %431 = vst [vmem:[%s1948_s6 + $0x118] sm:$0xff] %v430_v39 }
  0x5b   : > { %433 = vst [vmem:[%s1948_s6 + $0x120] sm:$0xff] %v432_v40 }
  0x5c   : > { %435 = vst [vmem:[%s1948_s6 + $0x128] sm:$0xff] %v434_v41 }
  0x5d   : > { %437 = vst [vmem:[%s1948_s6 + $0x130] sm:$0xff] %v436_v42 }
  0x5e   : > { %439 = vst [vmem:[%s1948_s6 + $0x138] sm:$0xff] %v438_v43 }
  0x5f   : > { %441 = vst [vmem:[%s1948_s6 + $0x140] sm:$0xff] %v440_v44 }
  0x60   : > { %443 = vst [vmem:[%s1948_s6 + $0x148] sm:$0xff] %v442_v45 }
  0x61   : > { %445 = vst [vmem:[%s1948_s6 + $0x150] sm:$0xff] %v444_v46 }
  0x62   : > { %447 = vst [vmem:[%s1948_s6 + $0x158] sm:$0xff] %v446_v47 }
  0x63   : > { %449 = vst [vmem:[%s1948_s6 + $0x160] sm:$0xff] %v448_v48 }
  0x64   : > { %451 = vst [vmem:[%s1948_s6 + $0x168] sm:$0xff] %v450_v49 }
  0x65   : > { %453 = vst [vmem:[%s1948_s6 + $0x170] sm:$0xff] %v452_v50 }
  0x66   : > { %455 = vst [vmem:[%s1948_s6 + $0x178] sm:$0xff] %v454_v51 }
  0x67   : > { %457 = vst [vmem:[%s1948_s6 + $0x180] sm:$0xff] %v456_v52 }
  0x68   : > { %459 = vst [vmem:[%s1948_s6 + $0x188] sm:$0xff] %v458_v53 }
  0x69   : > { %461 = vst [vmem:[%s1948_s6 + $0x190] sm:$0xff] %v460_v54 }
  0x6a   : > { %463 = vst [vmem:[%s1948_s6 + $0x198] sm:$0xff] %v462_v55 }
  0x6b   : > { %465 = vst [vmem:[%s1948_s6 + $0x1a0] sm:$0xff] %v464_v56 }
  0x6c   : > { %467 = vst [vmem:[%s1948_s6 + $0x1a8] sm:$0xff] %v466_v57 }
  0x6d   : > { %469 = vst [vmem:[%s1948_s6 + $0x1b0] sm:$0xff] %v468_v58 }
  0x6e   : > { %471 = vst [vmem:[%s1948_s6 + $0x1b8] sm:$0xff] %v470_v59 }
  0x6f   : > { %473 = vst [vmem:[%s1948_s6 + $0x1c0] sm:$0xff] %v472_v60 }
  0x70   : > { %475 = vst [vmem:[%s1948_s6 + $0x1c8] sm:$0xff] %v474_v61 }
  0x71   : > { %477 = vst [vmem:[%s1948_s6 + $0x1d0] sm:$0xff] %v476_v62 }
  0x72   : > { %479 = vst [vmem:[%s1948_s6 + $0x1d8] sm:$0xff] %v478_v63 }
  0x73   : > { %481 = vst [vmem:[%s1948_s6 + $0x1e0] sm:$0xff] %v480_v0 }
  0x74   : > { %483 = vst [vmem:[%s1948_s6 + $0x1e8] sm:$0xff] %v482_v1 }
  0x75   : > { %485 = vst [vmem:[%s1948_s6 + $0x1f0] sm:$0xff] %v484_v2 }
  0x76   : > { %487 = vst [vmem:[%s1948_s6 + $0x1f8] sm:$0xff] %v486_v3 }
  0x77 PF: > { %p1276_p0 = scmp.ge.s32.totalorder %s1806_s22, 1  ;;  %p500_p1 = scmp.lt.s32.totalorder %s1806_s22, 19 }
  0x79   : > { %p501_p2 = pnand %p1276_p0, %p500_p1 }
  0x7a   : > { %s507_s0 = sand.u32 (!%p501_p2), 1, %s1782_s16   ;;  %s514_s23 = sand.u32 (!%p501_p2), 1, %s1774_s14  }
  0x7b   : > { %504 = sbr.rel (%p501_p2) target bundleno = 375 (0x177), region = 85  ;;  %s1277_s28 = sshll.u32 (!%p501_p2), %s507_s0, 5 }
  0x7c   : > { %s1278_s7 = sshll.u32 (!%p501_p2), %s514_s23, 9  ;;  %s541_s11 = sand.u32 (!%p501_p2), 1, %s1766_s12  }
  0x7d   : > { %s1280_s26 = sshll.u32 (!%p501_p2), %s1794_s19, 1  ;;  %s1279_s29 = sshll.u32 (!%p501_p2), %s541_s11, 5 }
  0x7e   : > { %p549_p3 = scmp.lt.s32.totalorder (!%p501_p2), %s1280_s26, 3  ;;  %s2087_s6 = scalar_lea.vmem (!%p501_p2), [#allocation3], %s1277_s28 }
  0x7f   : > { %s2089_s1 = scalar_lea.vmem (!%p501_p2), [#allocation4], %s1278_s7  ;;  %s2091_s25 = scalar_lea.vmem (!%p501_p2), [#allocation5], %s1279_s29 }
  0x80   : > { %s2330_s26 = smov (!%p549_p3, %s1280_s26), 3  ;;  %p1281_p4 = scmp.ne.s32.totalorder %s1790_s18, 0 }
  0x81   : > { %s551_s5 = scalar_lea.vmem %s2301_s2, %s2330_s26 }
  0x82   : > { %558 = sbr.rel (%p1281_p4) target bundleno = 140 (0x8c), region = 97 }
  0x87   : > { %v1808_v4 = vmov 0.0  }
  0x88   : > { %559 = vst [vmem:[#allocation2 + $0x10] sm:$0xff] %v1808_v4 }
  0x89   : > { %560 = vst [vmem:[#allocation2] sm:$0xff] %v1808_v4 }
  0x8a   : > { %561 = vst [vmem:[#allocation2 + $0x18] sm:$0xff] %v1808_v4 }
  0x8b   : > { %562 = vst [vmem:[#allocation2 + $0x8] sm:$0xff] %v1808_v4 }
  0x8c PF: > { %v1356_v5 = vld [vmem:[%s2089_s1 + $0x70] sm:$0xf]  ;;  %v1581_v6 = vld [vmem:[%s2089_s1 + $0x74] sm:$0xf0]  ;;  %v1348_v16 = vld [vmem:[%s2089_s1 + $0x60] sm:$0xf] }
  0x8d   : > { %v1420_v7 = vld [vmem:[%s2089_s1 + $0xf0] sm:$0xf]  ;;  %v1357_v8 = vor.u32 %v1581_v6, %v1356_v5  ;;  %v1597_v9 = vld [vmem:[%s2089_s1 + $0xf4] sm:$0xf0]  ;;  %v1579_v18 = vld [vmem:[%s2089_s1 + $0x64] sm:$0xf0] }
  0x8e   : > { %v1484_v10 = vld [vmem:[%s2089_s1 + $0x170] sm:$0xf]  ;;  %v1613_v11 = vld [vmem:[%s2089_s1 + $0x174] sm:$0xf0]  ;;  %v1421_v12 = vor.u32 %v1597_v9, %v1420_v7  ;;  %v1412_v19 = vld [vmem:[%s2089_s1 + $0xe0] sm:$0xf]  ;;  %v1349_v21 = vor.u32 %v1579_v18, %v1348_v16 }
  0x8f   : > { %v1485_v13 = vor.u32 %v1613_v11, %v1484_v10  ;;  %v1548_v14 = vld [vmem:[%s2089_s1 + $0x1f0] sm:$0xf]  ;;  %v1629_v15 = vld [vmem:[%s2089_s1 + $0x1f4] sm:$0xf0]  ;;  %975 = vmatpush.bf16.msra.mxu0 %v1357_v8  ;;  %v1595_v20 = vld [vmem:[%s2089_s1 + $0xe4] sm:$0xf0] }
  0x90   : > { %v1549_v17 = vor.u32 %v1629_v15, %v1548_v14  ;;  %989 = vmatpush.bf16.msra.mxu1 %v1421_v12  ;;  %v1413_v22 = vor.u32 %v1595_v20, %v1412_v19  ;;  %v1476_v23 = vld [vmem:[%s2089_s1 + $0x160] sm:$0xf]  ;;  %v1611_v24 = vld [vmem:[%s2089_s1 + $0x164] sm:$0xf0]  ;;  %v1340_v28 = vld [vmem:[%s2089_s1 + $0x50] sm:$0xf] }
  0x91   : > { %1003 = vmatpush.bf16.msra.mxu2 %v1485_v13  ;;  %v1540_v25 = vld [vmem:[%s2089_s1 + $0x1e0] sm:$0xf]  ;;  %v1477_v26 = vor.u32 %v1611_v24, %v1476_v23  ;;  %v1627_v27 = vld [vmem:[%s2089_s1 + $0x1e4] sm:$0xf0]  ;;  %v1577_v29 = vld [vmem:[%s2089_s1 + $0x54] sm:$0xf0] }
  0x92   : > { %1017 = vmatpush.bf16.msra.mxu3 %v1549_v17  ;;  %v1541_v30 = vor.u32 %v1627_v27, %v1540_v25  ;;  %v1404_v31 = vld [vmem:[%s2089_s1 + $0xd0] sm:$0xf]  ;;  %v1593_v32 = vld [vmem:[%s2089_s1 + $0xd4] sm:$0xf0]  ;;  %v1341_v34 = vor.u32 %v1577_v29, %v1340_v28  ;;  %v1332_v40 = vld [vmem:[%s2089_s1 + $0x40] sm:$0xf] }
  0x93   : > { %v1468_v33 = vld [vmem:[%s2089_s1 + $0x150] sm:$0xf]  ;;  %976 = vmatpush.bf16.msra.mxu0 %v1349_v21  ;;  %v1609_v35 = vld [vmem:[%s2089_s1 + $0x154] sm:$0xf0]  ;;  %v1405_v38 = vor.u32 %v1593_v32, %v1404_v31  ;;  %v1575_v41 = vld [vmem:[%s2089_s1 + $0x44] sm:$0xf0] }
  0x94   : > { %v1532_v36 = vld [vmem:[%s2089_s1 + $0x1d0] sm:$0xf]  ;;  %v1625_v37 = vld [vmem:[%s2089_s1 + $0x1d4] sm:$0xf0]  ;;  %990 = vmatpush.bf16.msra.mxu1 %v1413_v22  ;;  %v1469_v39 = vor.u32 %v1609_v35, %v1468_v33  ;;  %v1396_v42 = vld [vmem:[%s2089_s1 + $0xc0] sm:$0xf]  ;;  %v1333_v49 = vor.u32 %v1575_v41, %v1332_v40 }
  0x95   : > { %1004 = vmatpush.bf16.msra.mxu2 %v1477_v26  ;;  %v1533_v43 = vor.u32 %v1625_v37, %v1532_v36  ;;  %v1591_v44 = vld [vmem:[%s2089_s1 + $0xc4] sm:$0xf0]  ;;  %v1460_v45 = vld [vmem:[%s2089_s1 + $0x140] sm:$0xf]  ;;  %v1324_v52 = vld [vmem:[%s2089_s1 + $0x30] sm:$0xf] }
  0x96   : > { %1018 = vmatpush.bf16.msra.mxu3 %v1541_v30  ;;  %v1607_v46 = vld [vmem:[%s2089_s1 + $0x144] sm:$0xf0]  ;;  %v1524_v47 = vld [vmem:[%s2089_s1 + $0x1c0] sm:$0xf]  ;;  %v1397_v50 = vor.u32 %v1591_v44, %v1396_v42  ;;  %v1573_v53 = vld [vmem:[%s2089_s1 + $0x34] sm:$0xf0] }
  0x97   : > { %v1623_v48 = vld [vmem:[%s2089_s1 + $0x1c4] sm:$0xf0]  ;;  %977 = vmatpush.bf16.msra.mxu0 %v1341_v34  ;;  %v1461_v51 = vor.u32 %v1607_v46, %v1460_v45  ;;  %v1388_v54 = vld [vmem:[%s2089_s1 + $0xb0] sm:$0xf]  ;;  %v1589_v56 = vld [vmem:[%s2089_s1 + $0xb4] sm:$0xf0]  ;;  %v1325_v61 = vor.u32 %v1573_v53, %v1324_v52 }
  0x98   : > { %991 = vmatpush.bf16.msra.mxu1 %v1405_v38  ;;  %v1525_v55 = vor.u32 %v1623_v48, %v1524_v47  ;;  %v1452_v57 = vld [vmem:[%s2089_s1 + $0x130] sm:$0xf]  ;;  %v1605_v58 = vld [vmem:[%s2089_s1 + $0x134] sm:$0xf0]  ;;  %v1389_v62 = vor.u32 %v1589_v56, %v1388_v54  ;;  %v1316_v0 = vld [vmem:[%s2089_s1 + $0x20] sm:$0xf] }
  0x99   : > { %1005 = vmatpush.bf16.msra.mxu2 %v1469_v39  ;;  %v1516_v59 = vld [vmem:[%s2089_s1 + $0x1b0] sm:$0xf]  ;;  %v1621_v60 = vld [vmem:[%s2089_s1 + $0x1b4] sm:$0xf0]  ;;  %v1453_v63 = vor.u32 %v1605_v58, %v1452_v57  ;;  %v1571_v1 = vld [vmem:[%s2089_s1 + $0x24] sm:$0xf0] }
  0x9a   : > { %1019 = vmatpush.bf16.msra.mxu3 %v1533_v43  ;;  %v1380_v2 = vld [vmem:[%s2089_s1 + $0xa0] sm:$0xf]  ;;  %v1517_v3 = vor.u32 %v1621_v60, %v1516_v59  ;;  %v1587_v4 = vld [vmem:[%s2089_s1 + $0xa4] sm:$0xf0]  ;;  %v1317_v9 = vor.u32 %v1571_v1, %v1316_v0  ;;  %v1308_v12 = vld [vmem:[%s2089_s1 + $0x10] sm:$0xf] }
  0x9b   : > { %978 = vmatpush.bf16.msra.mxu0 %v1333_v49  ;;  %v1444_v5 = vld [vmem:[%s2089_s1 + $0x120] sm:$0xf]  ;;  %v1603_v6 = vld [vmem:[%s2089_s1 + $0x124] sm:$0xf0]  ;;  %v1381_v10 = vor.u32 %v1587_v4, %v1380_v2  ;;  %v1569_v13 = vld [vmem:[%s2089_s1 + $0x14] sm:$0xf0] }
  0x9c   : > { %992 = vmatpush.bf16.msra.mxu1 %v1397_v50  ;;  %v1508_v7 = vld [vmem:[%s2089_s1 + $0x1a0] sm:$0xf]  ;;  %v1619_v8 = vld [vmem:[%s2089_s1 + $0x1a4] sm:$0xf0]  ;;  %v1445_v11 = vor.u32 %v1603_v6, %v1444_v5  ;;  %v1372_v14 = vld [vmem:[%s2089_s1 + $0x90] sm:$0xf]  ;;  %v1309_v22 = vor.u32 %v1569_v13, %v1308_v12 }
  0x9d   : > { %1006 = vmatpush.bf16.msra.mxu2 %v1461_v51  ;;  %v1509_v15 = vor.u32 %v1619_v8, %v1508_v7  ;;  %v1585_v16 = vld [vmem:[%s2089_s1 + $0x94] sm:$0xf0]  ;;  %v1436_v17 = vld [vmem:[%s2089_s1 + $0x110] sm:$0xf]  ;;  %v1300_v21 = vld [vmem:[%s2089_s1] sm:$0xf] }
  0x9e   : > { %1020 = vmatpush.bf16.msra.mxu3 %v1525_v55  ;;  %v1601_v18 = vld [vmem:[%s2089_s1 + $0x114] sm:$0xf0]  ;;  %v1500_v19 = vld [vmem:[%s2089_s1 + $0x190] sm:$0xf]  ;;  %v1567_v23 = vld [vmem:[%s2089_s1 + $0x4] sm:$0xf0]  ;;  %v1373_v26 = vor.u32 %v1585_v16, %v1372_v14 }
  0x9f   : > { %979 = vmatpush.bf16.msra.mxu0 %v1325_v61  ;;  %v1617_v20 = vld [vmem:[%s2089_s1 + $0x194] sm:$0xf0]  ;;  %v1364_v24 = vld [vmem:[%s2089_s1 + $0x80] sm:$0xf]  ;;  %v1583_v25 = vld [vmem:[%s2089_s1 + $0x84] sm:$0xf0]  ;;  %v1437_v27 = vor.u32 %v1601_v18, %v1436_v17  ;;  %v1301_v38 = vor.u32 %v1567_v23, %v1300_v21 }
  0xa0   : > { %993 = vmatpush.bf16.msra.mxu1 %v1389_v62  ;;  %v1428_v28 = vld [vmem:[%s2089_s1 + $0x100] sm:$0xf]  ;;  %v1599_v29 = vld [vmem:[%s2089_s1 + $0x104] sm:$0xf0]  ;;  %v1501_v31 = vor.u32 %v1617_v20, %v1500_v19  ;;  %v1580_v33 = vld [vmem:[%s2089_s1 + $0x74] sm:$0xf]  ;;  %v1365_v42 = vor.u32 %v1583_v25, %v1364_v24 }
  0xa1   : > { %1007 = vmatpush.bf16.msra.mxu2 %v1453_v63  ;;  %v1492_v30 = vld [vmem:[%s2089_s1 + $0x180] sm:$0xf]  ;;  %v1615_v32 = vld [vmem:[%s2089_s1 + $0x184] sm:$0xf0]  ;;  %v1358_v34 = vld [vmem:[%s2089_s1 + $0x78] sm:$0xf0]  ;;  %v1429_v43 = vor.u32 %v1599_v29, %v1428_v28 }
  0xa2   : > { %1021 = vmatpush.bf16.msra.mxu3 %v1517_v3  ;;  %v1596_v35 = vld [vmem:[%s2089_s1 + $0xf4] sm:$0xf]  ;;  %v1422_v36 = vld [vmem:[%s2089_s1 + $0xf8] sm:$0xf0]  ;;  %v1578_v44 = vld [vmem:[%s2089_s1 + $0x64] sm:$0xf]  ;;  %v1493_v48 = vor.u32 %v1615_v32, %v1492_v30  ;;  %v1361_v49 = vor.u32 %v1580_v33, %v1358_v34 }
  0xa3   : > { %980 = vmatpush.bf16.msra.mxu0 %v1317_v9  ;;  %v1612_v37 = vld [vmem:[%s2089_s1 + $0x174] sm:$0xf]  ;;  %v1486_v39 = vld [vmem:[%s2089_s1 + $0x178] sm:$0xf0]  ;;  %v1350_v45 = vld [vmem:[%s2089_s1 + $0x68] sm:$0xf0]  ;;  %v1425_v54 = vor.u32 %v1596_v35, %v1422_v36 }
  0xa4   : > { %994 = vmatpush.bf16.msra.mxu1 %v1381_v10  ;;  %v1628_v40 = vld [vmem:[%s2089_s1 + $0x1f4] sm:$0xf]  ;;  %v1550_v41 = vld [vmem:[%s2089_s1 + $0x1f8] sm:$0xf0]  ;;  %v1292_v46 = vld [vmem:[%s2087_s6 + $0x8] sm:$0xf]  ;;  %v1489_v55 = vor.u32 %v1612_v37, %v1486_v39  ;;  %v1353_v4 = vor.u32 %v1578_v44, %v1350_v45 }
  0xa5   : > { %1008 = vmatpush.bf16.msra.mxu2 %v1445_v11  ;;  %v1565_v47 = vld [vmem:[%s2087_s6 + $0x14] sm:$0xf0]  ;;  %v1594_v50 = vld [vmem:[%s2089_s1 + $0xe4] sm:$0xf]  ;;  %v1414_v51 = vld [vmem:[%s2089_s1 + $0xe8] sm:$0xf0]  ;;  %v1553_v59 = vor.u32 %v1628_v40, %v1550_v41 }
  0xa6   : > { %1022 = vmatpush.bf16.msra.mxu3 %v1509_v15  ;;  %v1610_v52 = vld [vmem:[%s2089_s1 + $0x164] sm:$0xf]  ;;  %v1478_v53 = vld [vmem:[%s2089_s1 + $0x168] sm:$0xf0]  ;;  %v1294_v57 = vld [vmem:[%s2087_s6 + $0x18] sm:$0xf0]  ;;  %v2177_v60 = vor.u32 %v1565_v47, %v1292_v46  ;;  %v1417_v6 = vor.u32 %v1594_v50, %v1414_v51 }
  0xa7   : > { %981 = vmatpush.bf16.msra.mxu0 %v1309_v22  ;;  %v1563_v56 = vld [vmem:[%s2087_s6 + $0xc] sm:$0xf]  ;;  %v1284_v58 = vld [vmem:[%s2087_s6] sm:$0xf]  ;;  %v1564_v61 = vld [vmem:[%s2087_s6 + $0xc] sm:$0xf0]  ;;  %v1481_v7 = vor.u32 %v1610_v52, %v1478_v53 }
  0xa8   : > { %995 = vmatpush.bf16.msra.mxu1 %v1373_v26  ;;  %v1562_v62 = vld [vmem:[%s2087_s6 + $0x4] sm:$0xf]  ;;  %v1286_v63 = vld [vmem:[%s2087_s6 + $0x10] sm:$0xf0]  ;;  %v1542_v1 = vld [vmem:[%s2089_s1 + $0x1e8] sm:$0xf0]  ;;  %v2184_v2 = vor.u32 %v1563_v56, %v1294_v57  ;;  %v2186_v3 = vor.u32 %v1564_v61, %v1284_v58 }
  0xa9   : > { %1009 = vmatpush.bf16.msra.mxu2 %v1437_v27  ;;  %v1626_v0 = vld [vmem:[%s2089_s1 + $0x1e4] sm:$0xf]  ;;  %v2188_v5 = vor.u32 %v1562_v62, %v1286_v63  ;;  %v1576_v8 = vld [vmem:[%s2089_s1 + $0x54] sm:$0xf]  ;;  %v1342_v9 = vld [vmem:[%s2089_s1 + $0x58] sm:$0xf0] }
  0xaa   : > { %1023 = vmatpush.bf16.msra.mxu3 %v1501_v31  ;;  %v1592_v10 = vld [vmem:[%s2089_s1 + $0xd4] sm:$0xf]  ;;  %v1545_v11 = vor.u32 %v1626_v0, %v1542_v1  ;;  %v1406_v12 = vld [vmem:[%s2089_s1 + $0xd8] sm:$0xf0]  ;;  %v1345_v17 = vor.u32 %v1576_v8, %v1342_v9  ;;  %v1574_v20 = vld [vmem:[%s2089_s1 + $0x44] sm:$0xf] }
  0xab   : > { %982 = vmatpush.bf16.msra.mxu0 %v1301_v38  ;;  %v1608_v13 = vld [vmem:[%s2089_s1 + $0x154] sm:$0xf]  ;;  %v1470_v14 = vld [vmem:[%s2089_s1 + $0x158] sm:$0xf0]  ;;  %v1409_v18 = vor.u32 %v1592_v10, %v1406_v12  ;;  %v1334_v21 = vld [vmem:[%s2089_s1 + $0x48] sm:$0xf0] }
  0xac   : > { %996 = vmatpush.bf16.msra.mxu1 %v1365_v42  ;;  %v1624_v15 = vld [vmem:[%s2089_s1 + $0x1d4] sm:$0xf]  ;;  %v1534_v16 = vld [vmem:[%s2089_s1 + $0x1d8] sm:$0xf0]  ;;  %v1473_v19 = vor.u32 %v1608_v13, %v1470_v14  ;;  %v1590_v22 = vld [vmem:[%s2089_s1 + $0xc4] sm:$0xf]  ;;  %v1337_v29 = vor.u32 %v1574_v20, %v1334_v21 }
  0xad   : > { %1010 = vmatpush.bf16.msra.mxu2 %v1429_v43  ;;  %v1537_v23 = vor.u32 %v1624_v15, %v1534_v16  ;;  %v1398_v24 = vld [vmem:[%s2089_s1 + $0xc8] sm:$0xf0]  ;;  %v1606_v25 = vld [vmem:[%s2089_s1 + $0x144] sm:$0xf]  ;;  %v1572_v32 = vld [vmem:[%s2089_s1 + $0x34] sm:$0xf] }
  0xae   : > { %1024 = vmatpush.bf16.msra.mxu3 %v1493_v48  ;;  %983 = vmatmul.bf16.vlgmr.msra.gmra.mxu0 %v2186_v3  ;;  %v1462_v26 = vld [vmem:[%s2089_s1 + $0x148] sm:$0xf0]  ;;  %v1622_v27 = vld [vmem:[%s2089_s1 + $0x1c4] sm:$0xf]  ;;  %v1401_v30 = vor.u32 %v1590_v22, %v1398_v24  ;;  %v1326_v33 = vld [vmem:[%s2089_s1 + $0x38] sm:$0xf0] }
  0xaf   : > { %1031 = vmatpush.bf16.msrb.mxu0 %v1361_v49  ;;  %997 = vmatmul.bf16.vlgmr.msra.gmra.mxu1 %v2188_v5  ;;  %v1526_v28 = vld [vmem:[%s2089_s1 + $0x1c8] sm:$0xf0]  ;;  %v1465_v31 = vor.u32 %v1606_v25, %v1462_v26  ;;  %v1588_v34 = vld [vmem:[%s2089_s1 + $0xb4] sm:$0xf]  ;;  %v1390_v36 = vld [vmem:[%s2089_s1 + $0xb8] sm:$0xf0]  ;;  %v1329_v41 = vor.u32 %v1572_v32, %v1326_v33 }
  0xb0   : > { %1045 = vmatpush.bf16.msrb.mxu1 %v1425_v54  ;;  %1011 = vmatmul.bf16.vlgmr.msra.gmra.mxu2 %v2177_v60  ;;  %v1529_v35 = vor.u32 %v1622_v27, %v1526_v28  ;;  %v1604_v37 = vld [vmem:[%s2089_s1 + $0x134] sm:$0xf]  ;;  %v1454_v38 = vld [vmem:[%s2089_s1 + $0x138] sm:$0xf0]  ;;  %v1393_v42 = vor.u32 %v1588_v34, %v1390_v36  ;;  %v1570_v44 = vld [vmem:[%s2089_s1 + $0x24] sm:$0xf] }
  0xb1   : > { %1059 = vmatpush.bf16.msrb.mxu2 %v1489_v55  ;;  %1025 = vmatmul.bf16.vlgmr.msra.gmra.mxu3 %v2184_v2  ;;  %v1620_v39 = vld [vmem:[%s2089_s1 + $0x1b4] sm:$0xf]  ;;  %v1518_v40 = vld [vmem:[%s2089_s1 + $0x1b8] sm:$0xf0]  ;;  %v1457_v43 = vor.u32 %v1604_v37, %v1454_v38  ;;  %v1318_v45 = vld [vmem:[%s2089_s1 + $0x28] sm:$0xf0] }
  0xb2   : > { %1073 = vmatpush.bf16.msrb.mxu3 %v1553_v59  ;;  %v1586_v46 = vld [vmem:[%s2089_s1 + $0xa4] sm:$0xf]  ;;  %v1521_v47 = vor.u32 %v1620_v39, %v1518_v40  ;;  %v1382_v48 = vld [vmem:[%s2089_s1 + $0xa8] sm:$0xf0]  ;;  %v1321_v53 = vor.u32 %v1570_v44, %v1318_v45  ;;  %v1568_v56 = vld [vmem:[%s2089_s1 + $0x14] sm:$0xf] }
  0xb3   : > { %1032 = vmatpush.bf16.msrb.mxu0 %v1353_v4  ;;  %v1602_v49 = vld [vmem:[%s2089_s1 + $0x124] sm:$0xf]  ;;  %v1446_v50 = vld [vmem:[%s2089_s1 + $0x128] sm:$0xf0]  ;;  %v1385_v54 = vor.u32 %v1586_v46, %v1382_v48  ;;  %v1310_v57 = vld [vmem:[%s2089_s1 + $0x18] sm:$0xf0] }
  0xb4   : > { %1046 = vmatpush.bf16.msrb.mxu1 %v1417_v6  ;;  %v1618_v51 = vld [vmem:[%s2089_s1 + $0x1a4] sm:$0xf]  ;;  %v1510_v52 = vld [vmem:[%s2089_s1 + $0x1a8] sm:$0xf0]  ;;  %v1449_v55 = vor.u32 %v1602_v49, %v1446_v50  ;;  %v1584_v58 = vld [vmem:[%s2089_s1 + $0x94] sm:$0xf]  ;;  %v1313_v4 = vor.u32 %v1568_v56, %v1310_v57 }
  0xb5   : > { %1060 = vmatpush.bf16.msrb.mxu2 %v1481_v7  ;;  %v1513_v59 = vor.u32 %v1618_v51, %v1510_v52  ;;  %v1374_v61 = vld [vmem:[%s2089_s1 + $0x98] sm:$0xf0]  ;;  %v1600_v62 = vld [vmem:[%s2089_s1 + $0x114] sm:$0xf]  ;;  %v1566_v8 = vld [vmem:[%s2089_s1 + $0x4] sm:$0xf] }
  0xb6   : > { %1074 = vmatpush.bf16.msrb.mxu3 %v1545_v11  ;;  %v1438_v63 = vld [vmem:[%s2089_s1 + $0x118] sm:$0xf0]  ;;  %v1616_v0 = vld [vmem:[%s2089_s1 + $0x194] sm:$0xf]  ;;  %v1377_v6 = vor.u32 %v1584_v58, %v1374_v61  ;;  %v1302_v9 = vld [vmem:[%s2089_s1 + $0x8] sm:$0xf0] }
  0xb7   : > { %1033 = vmatpush.bf16.msrb.mxu0 %v1345_v17  ;;  %v1502_v1 = vld [vmem:[%s2089_s1 + $0x198] sm:$0xf0]  ;;  %v1441_v7 = vor.u32 %v1600_v62, %v1438_v63  ;;  %v1582_v10 = vld [vmem:[%s2089_s1 + $0x84] sm:$0xf]  ;;  %v1366_v12 = vld [vmem:[%s2089_s1 + $0x88] sm:$0xf0]  ;;  %v1305_v17 = vor.u32 %v1566_v8, %v1302_v9 }
  0xb8   : > { %1047 = vmatpush.bf16.msrb.mxu1 %v1409_v18  ;;  %v1505_v11 = vor.u32 %v1616_v0, %v1502_v1  ;;  %v1598_v13 = vld [vmem:[%s2089_s1 + $0x104] sm:$0xf]  ;;  %v1430_v14 = vld [vmem:[%s2089_s1 + $0x108] sm:$0xf0]  ;;  %v1369_v18 = vor.u32 %v1582_v10, %v1366_v12  ;;  %v563_v27 = vld [vmem:[#allocation2 + $0x10] sm:$0xff]  ;;  %p1554_p5 = scmp.ne.s32.totalorder %s1790_s18, 8 }
  0xb9   : > { %1061 = vmatpush.bf16.msrb.mxu2 %v1473_v19  ;;  %v1614_v15 = vld [vmem:[%s2089_s1 + $0x184] sm:$0xf]  ;;  %v1494_v16 = vld [vmem:[%s2089_s1 + $0x188] sm:$0xf0]  ;;  %v1433_v19 = vor.u32 %v1598_v13, %v1430_v14  ;;  %v565_v34 = vld [vmem:[#allocation2 + $0x18] sm:$0xff] }
  0xba   : > { %1075 = vmatpush.bf16.msrb.mxu3 %v1537_v23  ;;  %v1497_v20 = vor.u32 %v1614_v15, %v1494_v16  ;;  %v566_v49 = vld [vmem:[#allocation2 + $0x8] sm:$0xff] }
  0xbb   : > { %1034 = vmatpush.bf16.msrb.mxu0 %v1337_v29 }
  0xbc   : > { %1048 = vmatpush.bf16.msrb.mxu1 %v1401_v30 }
  0xbd   : > { %1062 = vmatpush.bf16.msrb.mxu2 %v1465_v31 }
  0xbe   : > { %1076 = vmatpush.bf16.msrb.mxu3 %v1529_v35 }
  0xbf   : > { %1035 = vmatpush.bf16.msrb.mxu0 %v1329_v41  ;;  %v564_v41 = vld [vmem:[#allocation2] sm:$0xff] }
  0xc0   : > { %1049 = vmatpush.bf16.msrb.mxu1 %v1393_v42 }
  0xc1   : > { %1063 = vmatpush.bf16.msrb.mxu2 %v1457_v43 }
  0xc2   : > { %1077 = vmatpush.bf16.msrb.mxu3 %v1521_v47 }
  0xc3   : > { %1036 = vmatpush.bf16.msrb.mxu0 %v1321_v53 }
  0xc4   : > { %1050 = vmatpush.bf16.msrb.mxu1 %v1385_v54 }
  0xc5   : > { %1064 = vmatpush.bf16.msrb.mxu2 %v1449_v55 }
  0xc6   : > { %1078 = vmatpush.bf16.msrb.mxu3 %v1513_v59 }
  0xc7   : > { %1037 = vmatpush.bf16.msrb.mxu0 %v1313_v4 }
  0xc8   : > { %1051 = vmatpush.bf16.msrb.mxu1 %v1377_v6 }
  0xc9   : > { %1065 = vmatpush.bf16.msrb.mxu2 %v1441_v7 }
  0xca   : > { %1079 = vmatpush.bf16.msrb.mxu3 %v1505_v11 }
  0xcb   : > { %1038 = vmatpush.bf16.msrb.mxu0 %v1305_v17 }
  0xcc   : > { %1052 = vmatpush.bf16.msrb.mxu1 %v1369_v18 }
  0xcd   : > { %1066 = vmatpush.bf16.msrb.mxu2 %v1433_v19 }
  0xce   : > { %1080 = vmatpush.bf16.msrb.mxu3 %v1497_v20  ;;  %1039 = vmatmul.bf16.vlgmr.msrb.gmra.mxu0 %v2186_v3 }
  0xcf   : > { %1053 = vmatmul.bf16.vlgmr.msrb.gmra.mxu1 %v2188_v5 }
  0xd0   : > { %1067 = vmatmul.bf16.vlgmr.msrb.gmra.mxu2 %v2177_v60 }
  0xd1   : > { %1081 = vmatmul.bf16.vlgmr.msrb.gmra.mxu3 %v2184_v2 }
 0x12b   : > { %v984_v21 = vpop.f32.mrf.mxu0 }
 0x12c   : > { %v998_v22 = vpop.f32.mrf.mxu1 }
 0x12d   : > { %v999_v23 = vadd.f32 %v998_v22, %v984_v21 }
 0x133   : > { %v1012_v24 = vpop.f32.mrf.mxu2  ;;  %v986_v29 = vpop.f32.mrf.mxu0 }
 0x134   : > { %v1013_v25 = vadd.f32 %v1012_v24, %v999_v23  ;;  %v1026_v26 = vpop.f32.mrf.mxu3  ;;  %v1000_v30 = vpop.f32.mrf.mxu1 }
 0x135   : > { %v1001_v32 = vadd.f32 %v1000_v30, %v986_v29 }
 0x136   : > { %v1027_v28 = vadd.f32 %v1026_v26, %v1013_v25 }
 0x138   : > { %v1087_v31 = vadd.f32 %v1027_v28, %v563_v27 }
 0x13a   : > { %1091 = vst [vmem:[#allocation2 + $0x10] sm:$0xff] %v1087_v31 }
 0x13b   : > { %v1014_v3 = vpop.f32.mrf.mxu2 }
 0x13c   : > { %v1015_v33 = vadd.f32 %v1014_v3, %v1001_v32  ;;  %v1028_v5 = vpop.f32.mrf.mxu3 }
 0x13e   : > { %v1029_v60 = vadd.f32 %v1028_v5, %v1015_v33 }
 0x140   : > { %v1089_v35 = vadd.f32 %v1029_v60, %v565_v34 }
 0x142   : > { %1093 = vst [vmem:[#allocation2 + $0x18] sm:$0xff] %v1089_v35 }
 0x14b   : > { %v1040_v2 = vpop.f32.mrf.mxu0 }
 0x14c   : > { %v1054_v36 = vpop.f32.mrf.mxu1 }
 0x14d   : > { %v1055_v37 = vadd.f32 %v1054_v36, %v1040_v2 }
 0x153   : > { %v1068_v38 = vpop.f32.mrf.mxu2  ;;  %v1042_v43 = vpop.f32.mrf.mxu0 }
 0x154   : > { %v1069_v39 = vadd.f32 %v1068_v38, %v1055_v37  ;;  %v1082_v40 = vpop.f32.mrf.mxu3  ;;  %v1056_v44 = vpop.f32.mrf.mxu1 }
 0x155   : > { %v1057_v46 = vadd.f32 %v1056_v44, %v1042_v43 }
 0x156   : > { %v1083_v42 = vadd.f32 %v1082_v40, %v1069_v39 }
 0x158   : > { %v1088_v45 = vadd.f32 %v1083_v42, %v564_v41 }
 0x15a   : > { %1092 = vst [vmem:[#allocation2] sm:$0xff] %v1088_v45 }
 0x15b   : > { %v1070_v47 = vpop.f32.mrf.mxu2 }
 0x15c   : > { %v1071_v48 = vadd.f32 %v1070_v47, %v1057_v46  ;;  %v1084_v50 = vpop.f32.mrf.mxu3 }
 0x15e   : > { %v1085_v51 = vadd.f32 %v1084_v50, %v1071_v48  ;;  %1098 = sbr.rel (%p1554_p5) target bundleno = 367 (0x16f), region = 101 }
 0x160   : > { %v1090_v52 = vadd.f32 %v1085_v51, %v566_v49 }
 0x162   : > { %1094 = vst [vmem:[#allocation2 + $0x8] sm:$0xff] %v1090_v52 }
 0x163   : > { %v1099_v53 = vld [vmem:[#allocation2 + $0x10] sm:$0xff]  ;;  %v1103_v54 = vld [vmem:[%s551_s5] sm:$0x3]  ;;  %v1101_v58 = vld [vmem:[#allocation2 + $0x18] sm:$0xff] }
 0x164   : > { %v1100_v55 = vld [vmem:[#allocation2] sm:$0xff]  ;;  %v1105_v56 = vperm.slane %v1103_v54, 0  ;;  %v1106_v57 = vperm.slane %v1103_v54, 1 }
 0x166   : > { %v1109_v61 = vadd.f32 %v1105_v56, %v1099_v53  ;;  %v1110_v62 = vadd.f32 %v1106_v57, %v1100_v55  ;;  %v1111_v63 = vadd.f32 %v1105_v56, %v1101_v58 }
 0x168   : > { %v1113_v1 = vmax.f32 %v1109_v61, 0.0  ;;  %v1114_v4 = vmax.f32 %v1110_v62, 0.0  ;;  %v1115_v6 = vmax.f32 %v1111_v63, 0.0 }
 0x169   : > { %v1102_v59 = vld [vmem:[#allocation2 + $0x8] sm:$0xff] }
 0x16a   : > { %v1112_v0 = vadd.f32 %v1106_v57, %v1102_v59  ;;  %1117 = vst [vmem:[%s2091_s25] sm:$0xff] %v1113_v1 }
 0x16b   : > { %1118 = vst [vmem:[%s2091_s25 + $0x8] sm:$0xff] %v1114_v4 }
 0x16c   : > { %v1116_v7 = vmax.f32 %v1112_v0, 0.0  ;;  %1119 = vst [vmem:[%s2091_s25 + $0x10] sm:$0xff] %v1115_v6 }
 0x16e   : > { %1120 = vst [vmem:[%s2091_s25 + $0x18] sm:$0xff] %v1116_v7 }
 0x16f PF: > { %1127 = sbr.rel (!%p1923_p12) target bundleno = 375 (0x177), region = 105  ;;  %s1630_s14 = sshll.u32 (%p1923_p12), %s1794_s19, 4 }
 0x170   : > { %s1133_s0 = scalar_lea.vmem (%p1923_p12), %s2302_s3, %s1630_s14 }
 0x171   : > { %v1146_v8 = vld [vmem:[%s2091_s25] sm:$0xff] (%p1923_p12) }
 0x172   : > { %v1148_v9 = vld [vmem:[%s2091_s25 + $0x8] sm:$0xff] (%p1923_p12)  ;;  %1147 = vst [vmem:[%s1133_s0] sm:$0xff] (%p1923_p12), %v1146_v8 }
 0x173   : > { %v1150_v10 = vld [vmem:[%s2091_s25 + $0x10] sm:$0xff] (%p1923_p12)  ;;  %1149 = vst [vmem:[%s1133_s0 + $0x8] sm:$0xff] (%p1923_p12), %v1148_v9 }
 0x174   : > { %1151 = vst [vmem:[%s1133_s0 + $0x20] sm:$0xff] %v1150_v10 }
 0x175   : > { %v1152_v11 = vld [vmem:[%s2091_s25 + $0x18] sm:$0xff] }
 0x176   : > { %1153 = vst [vmem:[%s1133_s0 + $0x28] sm:$0xff] %v1152_v11 }
 0x177 PF: > { %s13_s22 = sadd.s32 1, %s1806_s22   ;;  %s2312_s10 = sld [smem:[#allocation6_spill]] }
 0x178   : > { %p10_p6 = scmp.ge.s32.totalorder %s13_s22, 20   ;;  %s2313_s12 = smov %s1770_s13 }
 0x179   : > { %s2314_s13 = smov %s1921_s9  ;;  %s2315_s14 = smov %s1778_s15 }
 0x17a   : > { %s2316_s15 = smov %s1918_s8  ;;  %s2317_s16 = smov %s1786_s17 }
 0x17b   : > { %s2318_s17 = smov %s1904_s30  ;;  %s2319_s18 = smov %s1798_s20 }
 0x17c   : > { %s2320_s19 = smov %s1802_s21  ;;  %s2321_s20 = smov %s2324_s24 }
 0x17d   : > { %s2322_s21 = smov %s2312_s10  ;;  %12 = sbr.rel (!%p10_p6) target bundleno = 9 (0x9), region = 170 }

// kernel: _lambda_.61
= control target key start
LH: loop header
LB: loop body
LE: loop exit
PB: predicated region body
PF: predicated region fallthrough
CT: control target
= control target key end

     0   :  { %s441_s1 = inlined_call_operand.vmem [shape: f32[512,128], index: 1, kind: input, shape index: {}]   ;;  %s442_s2 = inlined_call_operand.vmem [shape: f32[1,128], index: 2, kind: input, shape index: {}]   ;;  %s443_s0 = inlined_call_operand.vmem [shape: f32[8,512], index: 0, kind: input, shape index: {}]   ;;  %s444_s3 = inlined_call_operand.vmem [shape: f32[8,128], index: 3, kind: output, shape index: {0}]   ;;  %s445_s4 = inlined_call_operand.vmem [shape: f32[8,128], index: 4, kind: output, shape index: {1}]  }
   0x1   :  { %v67_v0 = vld [vmem:[%s441_s1 + $0x178] sm:$0xff]  ;;  %v66_v2 = vld [vmem:[%s441_s1 + $0x170] sm:$0xff]  ;;  %v65_v6 = vld [vmem:[%s441_s1 + $0x168] sm:$0xff] }
   0x2   :  { %v35_v1 = vld [vmem:[%s441_s1 + $0x78] sm:$0xff]  ;;  %128 = vmatpush.msra.mxu2 %v67_v0  ;;  %v34_v4 = vld [vmem:[%s441_s1 + $0x70] sm:$0xff]  ;;  %v33_v8 = vld [vmem:[%s441_s1 + $0x68] sm:$0xff] }
   0x3   :  { %88 = vmatpush.msra.mxu0 %v35_v1  ;;  %v83_v3 = vld [vmem:[%s441_s1 + $0x1f8] sm:$0xff]  ;;  %v82_v7 = vld [vmem:[%s441_s1 + $0x1f0] sm:$0xff]  ;;  %v81_v10 = vld [vmem:[%s441_s1 + $0x1e8] sm:$0xff] }
   0x4   :  { %v51_v5 = vld [vmem:[%s441_s1 + $0xf8] sm:$0xff]  ;;  %148 = vmatpush.msra.mxu3 %v83_v3  ;;  %129 = vmatpush.msra.mxu2 %v66_v2  ;;  %v50_v9 = vld [vmem:[%s441_s1 + $0xf0] sm:$0xff]  ;;  %v64_v11 = vld [vmem:[%s441_s1 + $0x160] sm:$0xff] }
   0x5   :  { %108 = vmatpush.msra.mxu1 %v51_v5  ;;  %89 = vmatpush.msra.mxu0 %v34_v4  ;;  %v32_v12 = vld [vmem:[%s441_s1 + $0x60] sm:$0xff]  ;;  %v49_v13 = vld [vmem:[%s441_s1 + $0xe8] sm:$0xff]  ;;  %v63_v16 = vld [vmem:[%s441_s1 + $0x158] sm:$0xff] }
   0x6   :  { %149 = vmatpush.msra.mxu3 %v82_v7  ;;  %130 = vmatpush.msra.mxu2 %v65_v6  ;;  %v80_v14 = vld [vmem:[%s441_s1 + $0x1e0] sm:$0xff]  ;;  %v31_v17 = vld [vmem:[%s441_s1 + $0x58] sm:$0xff]  ;;  %v62_v20 = vld [vmem:[%s441_s1 + $0x150] sm:$0xff] }
   0x7   :  { %109 = vmatpush.msra.mxu1 %v50_v9  ;;  %90 = vmatpush.msra.mxu0 %v33_v8  ;;  %v48_v15 = vld [vmem:[%s441_s1 + $0xe0] sm:$0xff]  ;;  %v79_v18 = vld [vmem:[%s441_s1 + $0x1d8] sm:$0xff]  ;;  %v30_v21 = vld [vmem:[%s441_s1 + $0x50] sm:$0xff] }
   0x8   :  { %150 = vmatpush.msra.mxu3 %v81_v10  ;;  %131 = vmatpush.msra.mxu2 %v64_v11  ;;  %v47_v19 = vld [vmem:[%s441_s1 + $0xd8] sm:$0xff]  ;;  %v78_v22 = vld [vmem:[%s441_s1 + $0x1d0] sm:$0xff]  ;;  %v61_v24 = vld [vmem:[%s441_s1 + $0x148] sm:$0xff] }
   0x9   :  { %110 = vmatpush.msra.mxu1 %v49_v13  ;;  %91 = vmatpush.msra.mxu0 %v32_v12  ;;  %v46_v23 = vld [vmem:[%s441_s1 + $0xd0] sm:$0xff]  ;;  %v29_v25 = vld [vmem:[%s441_s1 + $0x48] sm:$0xff]  ;;  %v60_v28 = vld [vmem:[%s441_s1 + $0x140] sm:$0xff] }
   0xa   :  { %151 = vmatpush.msra.mxu3 %v80_v14  ;;  %132 = vmatpush.msra.mxu2 %v63_v16  ;;  %v77_v26 = vld [vmem:[%s441_s1 + $0x1c8] sm:$0xff]  ;;  %v28_v29 = vld [vmem:[%s441_s1 + $0x40] sm:$0xff]  ;;  %v59_v32 = vld [vmem:[%s441_s1 + $0x138] sm:$0xff] }
   0xb   :  { %111 = vmatpush.msra.mxu1 %v48_v15  ;;  %92 = vmatpush.msra.mxu0 %v31_v17  ;;  %v45_v27 = vld [vmem:[%s441_s1 + $0xc8] sm:$0xff]  ;;  %v76_v30 = vld [vmem:[%s441_s1 + $0x1c0] sm:$0xff]  ;;  %v27_v33 = vld [vmem:[%s441_s1 + $0x38] sm:$0xff] }
   0xc   :  { %152 = vmatpush.msra.mxu3 %v79_v18  ;;  %133 = vmatpush.msra.mxu2 %v62_v20  ;;  %v44_v31 = vld [vmem:[%s441_s1 + $0xc0] sm:$0xff]  ;;  %v75_v34 = vld [vmem:[%s441_s1 + $0x1b8] sm:$0xff]  ;;  %v58_v36 = vld [vmem:[%s441_s1 + $0x130] sm:$0xff] }
   0xd   :  { %112 = vmatpush.msra.mxu1 %v47_v19  ;;  %93 = vmatpush.msra.mxu0 %v30_v21  ;;  %v43_v35 = vld [vmem:[%s441_s1 + $0xb8] sm:$0xff]  ;;  %v26_v37 = vld [vmem:[%s441_s1 + $0x30] sm:$0xff]  ;;  %v57_v40 = vld [vmem:[%s441_s1 + $0x128] sm:$0xff] }
   0xe   :  { %153 = vmatpush.msra.mxu3 %v78_v22  ;;  %134 = vmatpush.msra.mxu2 %v61_v24  ;;  %v74_v38 = vld [vmem:[%s441_s1 + $0x1b0] sm:$0xff]  ;;  %v25_v41 = vld [vmem:[%s441_s1 + $0x28] sm:$0xff]  ;;  %v56_v44 = vld [vmem:[%s441_s1 + $0x120] sm:$0xff] }
   0xf   :  { %113 = vmatpush.msra.mxu1 %v46_v23  ;;  %94 = vmatpush.msra.mxu0 %v29_v25  ;;  %v42_v39 = vld [vmem:[%s441_s1 + $0xb0] sm:$0xff]  ;;  %v73_v42 = vld [vmem:[%s441_s1 + $0x1a8] sm:$0xff]  ;;  %v24_v45 = vld [vmem:[%s441_s1 + $0x20] sm:$0xff] }
  0x10   :  { %154 = vmatpush.msra.mxu3 %v77_v26  ;;  %135 = vmatpush.msra.mxu2 %v60_v28  ;;  %v41_v43 = vld [vmem:[%s441_s1 + $0xa8] sm:$0xff]  ;;  %v72_v46 = vld [vmem:[%s441_s1 + $0x1a0] sm:$0xff]  ;;  %v55_v48 = vld [vmem:[%s441_s1 + $0x118] sm:$0xff] }
  0x11   :  { %114 = vmatpush.msra.mxu1 %v45_v27  ;;  %95 = vmatpush.msra.mxu0 %v28_v29  ;;  %v40_v47 = vld [vmem:[%s441_s1 + $0xa0] sm:$0xff]  ;;  %v23_v49 = vld [vmem:[%s441_s1 + $0x18] sm:$0xff]  ;;  %v54_v52 = vld [vmem:[%s441_s1 + $0x110] sm:$0xff] }
  0x12   :  { %155 = vmatpush.msra.mxu3 %v76_v30  ;;  %136 = vmatpush.msra.mxu2 %v59_v32  ;;  %v71_v50 = vld [vmem:[%s441_s1 + $0x198] sm:$0xff]  ;;  %v22_v53 = vld [vmem:[%s441_s1 + $0x10] sm:$0xff]  ;;  %v53_v56 = vld [vmem:[%s441_s1 + $0x108] sm:$0xff] }
  0x13   :  { %115 = vmatpush.msra.mxu1 %v44_v31  ;;  %96 = vmatpush.msra.mxu0 %v27_v33  ;;  %v39_v51 = vld [vmem:[%s441_s1 + $0x98] sm:$0xff]  ;;  %v70_v54 = vld [vmem:[%s441_s1 + $0x190] sm:$0xff]  ;;  %v21_v57 = vld [vmem:[%s441_s1 + $0x8] sm:$0xff] }
  0x14   :  { %156 = vmatpush.msra.mxu3 %v75_v34  ;;  %137 = vmatpush.msra.mxu2 %v58_v36  ;;  %v38_v55 = vld [vmem:[%s441_s1 + $0x90] sm:$0xff]  ;;  %v69_v58 = vld [vmem:[%s441_s1 + $0x188] sm:$0xff]  ;;  %v52_v60 = vld [vmem:[%s441_s1 + $0x100] sm:$0xff] }
  0x15   :  { %116 = vmatpush.msra.mxu1 %v43_v35  ;;  %97 = vmatpush.msra.mxu0 %v26_v37  ;;  %v37_v59 = vld [vmem:[%s441_s1 + $0x88] sm:$0xff]  ;;  %v20_v61 = vld [vmem:[%s441_s1] sm:$0xff]  ;;  %v18_v62 = vld [vmem:[%s443_s0 + $0x10] sm:$0xff] }
  0x16   :  { %157 = vmatpush.msra.mxu3 %v74_v38  ;;  %138 = vmatpush.msra.mxu2 %v57_v40  ;;  %v68_v63 = vld [vmem:[%s441_s1 + $0x180] sm:$0xff]  ;;  %v19_v1 = vld [vmem:[%s443_s0 + $0x18] sm:$0xff]  ;;  %v17_v3 = vld [vmem:[%s443_s0 + $0x8] sm:$0xff] }
  0x17   :  { %117 = vmatpush.msra.mxu1 %v42_v39  ;;  %98 = vmatpush.msra.mxu0 %v25_v41  ;;  %v16_v0 = vld [vmem:[%s443_s0] sm:$0xff] }
  0x18   :  { %158 = vmatpush.msra.mxu3 %v73_v42  ;;  %139 = vmatpush.msra.mxu2 %v56_v44  ;;  %v36_v2 = vld [vmem:[%s441_s1 + $0x80] sm:$0xff] }
  0x19   :  { %118 = vmatpush.msra.mxu1 %v41_v43  ;;  %99 = vmatpush.msra.mxu0 %v24_v45  ;;  %v198_v4 = vld [vmem:[%s442_s2] ss:$0 sm:$0xff] }
  0x1a   :  { %159 = vmatpush.msra.mxu3 %v72_v46  ;;  %140 = vmatpush.msra.mxu2 %v55_v48 }
  0x1b   :  { %119 = vmatpush.msra.mxu1 %v40_v47  ;;  %100 = vmatpush.msra.mxu0 %v23_v49 }
  0x1c   :  { %160 = vmatpush.msra.mxu3 %v71_v50  ;;  %141 = vmatpush.msra.mxu2 %v54_v52 }
  0x1d   :  { %120 = vmatpush.msra.mxu1 %v39_v51  ;;  %101 = vmatpush.msra.mxu0 %v22_v53 }
  0x1e   :  { %161 = vmatpush.msra.mxu3 %v70_v54  ;;  %142 = vmatpush.msra.mxu2 %v53_v56 }
  0x1f   :  { %121 = vmatpush.msra.mxu1 %v38_v55  ;;  %102 = vmatpush.msra.mxu0 %v21_v57 }
  0x20   :  { %162 = vmatpush.msra.mxu3 %v69_v58  ;;  %143 = vmatpush.msra.mxu2 %v52_v60 }
  0x21   :  { %122 = vmatpush.msra.mxu1 %v37_v59  ;;  %103 = vmatpush.msra.mxu0 %v20_v61 }
  0x22   :  { %144 = vmatmul.f32.vlgmr.msra.gmra.mxu2 %v18_v62  ;;  %163 = vmatpush.msra.mxu3 %v68_v63 }
  0x23   :  { %104 = vmatmul.f32.vlgmr.msra.gmra.mxu0 %v16_v0  ;;  %164 = vmatmul.f32.vlgmr.msra.gmra.mxu3 %v19_v1 }
  0x24   :  { %123 = vmatpush.msra.mxu1 %v36_v2 }
  0x25   :  { %124 = vmatmul.f32.vlgmr.msra.gmra.mxu1 %v17_v3 }
  0xa0   :  { %v105_v5 = vpop.f32.mrf.mxu0 }
  0xa1   :  { %v106_v6 = vadd.f32 %v198_v4, %v105_v5 }
  0xa2   :  { %v125_v7 = vpop.f32.mrf.mxu1 }
  0xa3   :  { %v126_v8 = vadd.f32 %v125_v7, %v106_v6 }
  0xa5   :  { %v145_v9 = vpop.f32.mrf.mxu2 }
  0xa6   :  { %v146_v10 = vadd.f32 %v145_v9, %v126_v8  ;;  %v165_v11 = vpop.f32.mrf.mxu3 }
  0xa8   :  { %v166_v12 = vadd.f32 %v165_v11, %v146_v10 }
  0xaa   :  { %168 = vst [vmem:[%s444_s3] sm:$0xff] %v166_v12  ;;  %v197_v13 = vmul.f32 -1.442695, %v166_v12 }
  0xac   :  { %199 = vpow2.f32 %v197_v13 }
  0xb2   :  { %v200_v14 = vpop.eup %199 }
  0xb3   :  { %v172_v15 = vadd.f32 1.0, %v200_v14 }
  0xb5   :  { %201 = vrcp.f32 %v172_v15  ;;  %v184_v19 = vand.u32 2147483648, %v172_v15  ;;  %v182_v21 = vand.u32 2147483647, %v172_v15  ;;  %vm178_vm1 = vweird.f32 %v172_v15 }
  0xb7   :  { %v185_v23 = vor.u32 1.1754944e-38, %v184_v19  ;;  %vm183_vm3 = vcmp.eq.f32.partialorder %v182_v21, 8.507059e+37 }
  0xbb   :  { %v202_v16 = vpop.eup %201 }
  0xbc   :  { %v174_v17 = vmul.f32 %v202_v16, %v172_v15  ;;  %vm179_vm0 = vweird.f32 %v202_v16 }
  0xbd   :  { %vm180_vm2 = vmor %vm178_vm1, %vm179_vm0 }
  0xbe   :  { %v175_v18 = vsub.f32 1.0, %v174_v17 }
  0xc0   :  { %v176_v20 = vmul.f32 %v202_v16, %v175_v18 }
  0xc2   :  { %v177_v22 = vadd.f32 %v202_v16, %v176_v20 }
  0xc4   :  { %v181_v24 = vsel %vm180_vm2, %v202_v16, %v177_v22 }
  0xc5   :  { %v186_v25 = vsel %vm183_vm3, %v185_v23, %v181_v24 }
  0xc6   :  { %188 = vst [vmem:[%s445_s4] sm:$0xff] %v186_v25 }

</bundles_post_ra>
